<compile_context>
chip_gen: v6e
topology: v6e:2x2x1
jax: 0.10.0
libtpu: 0.0.40
codegen_flags: <defaults>
</compile_context>

<pallas_src>
import jax
import jax.numpy as jnp
from jax.experimental import pallas as pl
from jax.experimental.pallas import tpu as pltpu

VMEM_LIMIT = 32 * 1024 * 1024  # safe scoped-VMEM budget on v5e/v6e/v7x
LANE = 128


def _pick_tile(m, max_tile=512):
    """Largest power-of-two tile (>=8) that divides m; fall back to full m."""
    t = max_tile
    while t >= 8:
        if t <= m and m % t == 0:
            return t
        t //= 2
    return m


# ---------------------------------------------------------------------------
# Pallas kernels
# ---------------------------------------------------------------------------
def _conv_relu_pool_kernel(a_ref, b_ref, c_ref, d_ref, w_ref, o_ref):
    """Fused conv-as-matmul + ReLU + 2x2 maxpool.

    a/b/c/d are the im2col patch matrices of the four pool-window positions;
    the 4-way max over the four (TM, Cout_pad) products is the 2x2 maxpool
    (ReLU commutes with max). Output is lane-dense (Cout padded to 128).
    """
    w = w_ref[...]
    acc = jnp.dot(a_ref[...], w, preferred_element_type=jnp.float32)
    acc = jnp.maximum(acc, jnp.dot(b_ref[...], w, preferred_element_type=jnp.float32))
    acc = jnp.maximum(acc, jnp.dot(c_ref[...], w, preferred_element_type=jnp.float32))
    acc = jnp.maximum(acc, jnp.dot(d_ref[...], w, preferred_element_type=jnp.float32))
    o_ref[...] = jnp.maximum(acc, 0.0).astype(o_ref.dtype)


def conv_relu_pool(patches4, w):
    """patches4: 4x (M, K) bf16; w: (K, Cout_pad) bf16 -> (M, Cout_pad) bf16."""
    M, K = patches4[0].shape
    Kw, Cp = w.shape
    assert K == Kw
    TM = _pick_tile(M, 512)
    return pl.pallas_call(
        _conv_relu_pool_kernel,
        out_shape=jax.ShapeDtypeStruct((M, Cp), jnp.bfloat16),
        grid=(M // TM,),
        in_specs=[pl.BlockSpec((TM, K), lambda i: (i, 0))] * 4
        + [pl.BlockSpec((K, Cp), lambda i: (0, 0))],
        out_specs=pl.BlockSpec((TM, Cp), lambda i: (i, 0)),
        compiler_params=pltpu.CompilerParams(
            dimension_semantics=("parallel",),
            vmem_limit_bytes=VMEM_LIMIT,
        ),
    )(*patches4, w)


def _mlp_kernel(x_ref, w1_ref, w2_ref, z_ref, y_ref):
    """Fused linear_1 + ReLU + classifier (classifier output padded to 128)."""
    z = jnp.dot(x_ref[...], w1_ref[...], preferred_element_type=jnp.float32)
    z = jnp.maximum(z, 0.0)
    z_ref[...] = z
    y_ref[...] = jnp.dot(
        z.astype(w2_ref.dtype), w2_ref[...], preferred_element_type=jnp.float32
    )


def mlp(x, w1, w2):
    """x: (N, 4096) bf16, w1: (4096, 512) bf16, w2: (512, 128) bf16."""
    M, K = x.shape
    _, H = w1.shape
    _, Cp = w2.shape
    TM = _pick_tile(M, 256)
    return pl.pallas_call(
        _mlp_kernel,
        out_shape=(
            jax.ShapeDtypeStruct((M, H), jnp.float32),
            jax.ShapeDtypeStruct((M, Cp), jnp.float32),
        ),
        grid=(M // TM,),
        in_specs=[
            pl.BlockSpec((TM, K), lambda i: (i, 0)),
            pl.BlockSpec((K, H), lambda i: (0, 0)),
            pl.BlockSpec((H, Cp), lambda i: (0, 0)),
        ],
        out_specs=(
            pl.BlockSpec((TM, H), lambda i: (i, 0)),
            pl.BlockSpec((TM, Cp), lambda i: (i, 0)),
        ),
        compiler_params=pltpu.CompilerParams(
            dimension_semantics=("parallel",),
            vmem_limit_bytes=VMEM_LIMIT,
        ),
    )(x, w1, w2)


# ---------------------------------------------------------------------------
# Glue: im2col (bf16), parameter prep, forward
# ---------------------------------------------------------------------------
def im2col_pooled(x_nhwc, ksize, pad, k_pad=None):
    """Build the 4 pool-window patch matrices, each (N*H/2*W/2, K[_pad]).

    Patch column order is (kh, kw, cin) to match the prepped conv weights.
    """
    N, H, W, C = x_nhwc.shape
    xp = jnp.pad(x_nhwc, ((0, 0), (pad, pad), (pad, pad), (0, 0)))
    taps = [xp[:, kh:kh + H, kw:kw + W, :]
            for kh in range(ksize) for kw in range(ksize)]
    patches = jnp.concatenate(taps, axis=-1)          # (N, H, W, k*k*C) bf16
    K = ksize * ksize * C
    if k_pad is not None and k_pad > K:
        patches = jnp.pad(patches, ((0, 0), (0, 0), (0, 0), (0, k_pad - K)))
    Kp = patches.shape[-1]
    Ho, Wo = H // 2, W // 2
    return [patches[:, dh::2, dw::2, :].reshape(N * Ho * Wo, Kp)
            for dh in range(2) for dw in range(2)]


def init_params(num_classes=10):
    """Deterministic synthetic parameters with PyTorch layouts."""
    key = jax.random.PRNGKey(0)
    k1, k2, k3, k4 = jax.random.split(key, 4)
    conv1_w = 0.05 * jax.random.normal(k1, (32, 3, 5, 5), jnp.float32)   # (Cout,Cin,KH,KW)
    conv2_w = 0.05 * jax.random.normal(k2, (64, 32, 5, 5), jnp.float32)
    lin1_w = 0.02 * jax.random.normal(k3, (512, 4096), jnp.float32)      # (out, in)
    cls_w = 0.02 * jax.random.normal(k4, (num_classes, 512), jnp.float32)
    return conv1_w, conv2_w, lin1_w, cls_w


def prepare_params(params, num_classes=10):
    """One-time weight re-layout: transposed, K/Cout padded, bf16, flatten fold."""
    conv1_w, conv2_w, lin1_w, cls_w = params
    # conv1: (32,3,5,5) -> (75,32) in (kh,kw,cin) row order; pad K 75->128, Cout 32->128
    w1 = jnp.transpose(conv1_w, (2, 3, 1, 0)).reshape(75, 32)
    w1 = jnp.pad(w1, ((0, LANE - 75), (0, LANE - 32))).astype(jnp.bfloat16)
    # conv2: (64,32,5,5) -> (800,64); pad Cout 64->128
    w2 = jnp.transpose(conv2_w, (2, 3, 1, 0)).reshape(800, 64)
    w2 = jnp.pad(w2, ((0, 0), (0, LANE - 64))).astype(jnp.bfloat16)
    # linear_1: (512,4096) with cols in NCHW (c,h,w) order -> rows in NHWC (h,w,c) order
    wl = jnp.transpose(lin1_w.reshape(512, 64, 8, 8), (2, 3, 1, 0))
    wl = wl.reshape(4096, 512).astype(jnp.bfloat16)
    # classifier: (10,512) -> (512,10) -> pad out dim to 128 lanes
    wc = jnp.pad(cls_w.T, ((0, 0), (0, LANE - num_classes))).astype(jnp.bfloat16)
    return w1, w2, wl, wc


def fedavgnet_cifar_forward(x_nchw, prepped, num_classes=10, get_features=False):
    w1, w2, wl, wc = prepped
    N = x_nchw.shape[0]

    x = jnp.transpose(x_nchw, (0, 2, 3, 1)).astype(jnp.bfloat16)     # NCHW -> NHWC bf16

    # conv2d_1 (3->32, k=5, pad=2, no bias) + relu1 + max_pooling (fused)
    p1 = im2col_pooled(x, 5, 2, k_pad=LANE)                          # 4x (N*256, 128)
    h1 = conv_relu_pool(p1, w1)                                      # (N*256, 128)
    h1 = h1[:, :32].reshape(N, 16, 16, 32)                           # drop Cout padding

    # conv2d_2 (32->64, k=5, pad=2, no bias) + relu2 + max_pooling (fused)
    p2 = im2col_pooled(h1, 5, 2)                                     # 4x (N*64, 800)
    h2 = conv_relu_pool(p2, w2)                                      # (N*64, 128)

    # flatten: NHWC flatten; the NCHW permutation is folded into wl's row order
    flat = h2[:, :64].reshape(N, 64 * 8 * 8)                         # (N, 4096) bf16

    # linear_1 (no bias) + relu3 + classifier (no bias), fused
    z, y_pad = mlp(flat, wl, wc)                                     # (N,512), (N,128)
    y = y_pad[:, :num_classes]
    # Note: relu4(y) is computed in the reference but never returned when
    # get_features=False, so it is dead code and omitted (y is the logits).
    if get_features:
        return y, z
    return y


# ---------------------------------------------------------------------------
# Pure-JAX reference (for correctness check)
# ---------------------------------------------------------------------------
def reference_forward(x_nchw, params):
    conv1_w, conv2_w, lin1_w, cls_w = params

    def conv(x, w):
        return jax.lax.conv_general_dilated(
            x, w, window_strides=(1, 1), padding=((2, 2), (2, 2)),
            dimension_numbers=("NCHW", "OIHW", "NCHW"))

    def pool(x):
        return jax.lax.reduce_window(
            x, -jnp.inf, jax.lax.max, (1, 1, 2, 2), (1, 1, 2, 2), "VALID")

    x = pool(jnp.maximum(conv(x_nchw, conv1_w), 0.0))
    x = pool(jnp.maximum(conv(x, conv2_w), 0.0))
    flat = x.reshape(x.shape[0], -1)
    z = jnp.maximum(flat @ lin1_w.T, 0.0)
    y = z @ cls_w.T
    return y, z


if __name__ == "__main__":
    # CIFAR-shaped input (32x32 is required by linear_1's in_features=4096).
    batch = 2
    num_classes = 10
    x = jax.random.normal(jax.random.PRNGKey(0), (batch, 3, 32, 32), jnp.float32)
    params = init_params(num_classes)
    prepped = prepare_params(params, num_classes)

    fwd = jax.jit(lambda xx, pp: fedavgnet_cifar_forward(xx, pp, num_classes))
    y = jax.block_until_ready(fwd(x, prepped))
    assert y.shape == (batch, num_classes) and y.dtype == jnp.float32

    y2, z2 = fedavgnet_cifar_forward(x, prepped, num_classes, get_features=True)
    y2, z2 = jax.block_until_ready((y2, z2))
    assert y2.shape == (batch, num_classes) and z2.shape == (batch, 512)

    # Correctness check against the pure-JAX f32 reference (bf16 tolerance).
    y_ref, z_ref = jax.block_until_ready(reference_forward(x, params))
    assert jnp.allclose(y2, y_ref, atol=3e-2, rtol=3e-2), (
        float(jnp.max(jnp.abs(y2 - y_ref))))
    assert jnp.allclose(z2, z_ref, atol=3e-2, rtol=3e-2), (
        float(jnp.max(jnp.abs(z2 - z_ref))))

    print("KERNEL_OK")
</pallas_src>

<mosaic_0001>
module attributes {stable_mosaic.version = 11 : i64} {
  func.func @_conv_relu_pool_kernel(%arg0: i32, %arg1: memref<512x128xbf16, #tpu.memory_space<vmem>>, %arg2: memref<512x128xbf16, #tpu.memory_space<vmem>>, %arg3: memref<512x128xbf16, #tpu.memory_space<vmem>>, %arg4: memref<512x128xbf16, #tpu.memory_space<vmem>>, %arg5: memref<128x128xbf16, #tpu.memory_space<vmem>>, %arg6: memref<512x128xbf16, #tpu.memory_space<vmem>>) attributes {dimension_semantics = [#tpu.dimension_semantics<parallel>], iteration_bounds = array<i64: 1>, scalar_prefetch = 0 : i64, scratch_operands = 0 : i64, tpu.core_type = #tpu.core_type<tc>, window_params = [{transform_indices = @transform_0, window_bounds = array<i64: 512, 128>}, {transform_indices = @transform_1, window_bounds = array<i64: 512, 128>}, {transform_indices = @transform_2, window_bounds = array<i64: 512, 128>}, {transform_indices = @transform_3, window_bounds = array<i64: 512, 128>}, {pipeline_mode = #tpu.pipeline_mode<synchronous>, transform_indices = @transform_4, window_bounds = array<i64: 128, 128>}, {transform_indices = @transform_5, window_bounds = array<i64: 512, 128>}]} {
    %c0 = arith.constant 0 : index
    %c0_0 = arith.constant 0 : index
    %0 = vector.load %arg5[%c0, %c0_0] : memref<128x128xbf16, #tpu.memory_space<vmem>>, vector<128x128xbf16>
    %c0_1 = arith.constant 0 : index
    %c0_2 = arith.constant 0 : index
    %1 = vector.load %arg1[%c0_1, %c0_2] : memref<512x128xbf16, #tpu.memory_space<vmem>>, vector<512x128xbf16>
    %cst = arith.constant dense<0.000000e+00> : vector<512x128xf32>
    %2 = tpu.matmul %1, %0, %cst {dimension_numbers = #tpu.dot_dimension_numbers<[1], [0], [0], [1], [0, 0, 1, 1], [], []>} : vector<512x128xbf16>, vector<128x128xbf16>, vector<512x128xf32> -> vector<512x128xf32>
    %c0_3 = arith.constant 0 : index
    %c0_4 = arith.constant 0 : index
    %3 = vector.load %arg2[%c0_3, %c0_4] : memref<512x128xbf16, #tpu.memory_space<vmem>>, vector<512x128xbf16>
    %cst_5 = arith.constant dense<0.000000e+00> : vector<512x128xf32>
    %4 = tpu.matmul %3, %0, %cst_5 {dimension_numbers = #tpu.dot_dimension_numbers<[1], [0], [0], [1], [0, 0, 1, 1], [], []>} : vector<512x128xbf16>, vector<128x128xbf16>, vector<512x128xf32> -> vector<512x128xf32>
    %5 = arith.maximumf %2, %4 : vector<512x128xf32>
    %c0_6 = arith.constant 0 : index
    %c0_7 = arith.constant 0 : index
    %6 = vector.load %arg3[%c0_6, %c0_7] : memref<512x128xbf16, #tpu.memory_space<vmem>>, vector<512x128xbf16>
    %cst_8 = arith.constant dense<0.000000e+00> : vector<512x128xf32>
    %7 = tpu.matmul %6, %0, %cst_8 {dimension_numbers = #tpu.dot_dimension_numbers<[1], [0], [0], [1], [0, 0, 1, 1], [], []>} : vector<512x128xbf16>, vector<128x128xbf16>, vector<512x128xf32> -> vector<512x128xf32>
    %8 = arith.maximumf %5, %7 : vector<512x128xf32>
    %c0_9 = arith.constant 0 : index
    %c0_10 = arith.constant 0 : index
    %9 = vector.load %arg4[%c0_9, %c0_10] : memref<512x128xbf16, #tpu.memory_space<vmem>>, vector<512x128xbf16>
    %cst_11 = arith.constant dense<0.000000e+00> : vector<512x128xf32>
    %10 = tpu.matmul %9, %0, %cst_11 {dimension_numbers = #tpu.dot_dimension_numbers<[1], [0], [0], [1], [0, 0, 1, 1], [], []>} : vector<512x128xbf16>, vector<128x128xbf16>, vector<512x128xf32> -> vector<512x128xf32>
    %11 = arith.maximumf %8, %10 : vector<512x128xf32>
    %cst_12 = arith.constant 0.000000e+00 : f32
    %12 = vector.broadcast %cst_12 : f32 to vector<512x128xf32>
    %13 = arith.maximumf %11, %12 : vector<512x128xf32>
    %14 = arith.truncf %13 : vector<512x128xf32> to vector<512x128xbf16>
    %c0_13 = arith.constant 0 : index
    %c0_14 = arith.constant 0 : index
    %15 = vector.load %arg6[%c0_13, %c0_14] : memref<512x128xbf16, #tpu.memory_space<vmem>>, vector<512x128xbf16>
    tpu.vector_store %arg6[%c0_13, %c0_14], %14 {strides = array<i32>} : memref<512x128xbf16, #tpu.memory_space<vmem>>, vector<512x128xbf16>,
    return
  }
  func.func @transform_0(%arg0: i32) -> (i32, i32) {
    %c0_i32 = arith.constant 0 : i32
    %c0_i32_0 = arith.constant 0 : i32
    return %arg0, %c0_i32 : i32, i32
  }
  func.func @transform_1(%arg0: i32) -> (i32, i32) {
    %c0_i32 = arith.constant 0 : i32
    %c0_i32_0 = arith.constant 0 : i32
    return %arg0, %c0_i32 : i32, i32
  }
  func.func @transform_2(%arg0: i32) -> (i32, i32) {
    %c0_i32 = arith.constant 0 : i32
    %c0_i32_0 = arith.constant 0 : i32
    return %arg0, %c0_i32 : i32, i32
  }
  func.func @transform_3(%arg0: i32) -> (i32, i32) {
    %c0_i32 = arith.constant 0 : i32
    %c0_i32_0 = arith.constant 0 : i32
    return %arg0, %c0_i32 : i32, i32
  }
  func.func @transform_4(%arg0: i32) -> (i32, i32) {
    %c0_i32 = arith.constant 0 : i32
    %c0_i32_0 = arith.constant 0 : i32
    %c0_i32_1 = arith.constant 0 : i32
    return %c0_i32, %c0_i32_0 : i32, i32
  }
  func.func @transform_5(%arg0: i32) -> (i32, i32) {
    %c0_i32 = arith.constant 0 : i32
    %c0_i32_0 = arith.constant 0 : i32
    return %arg0, %c0_i32 : i32, i32
  }
}

module attributes {stable_mosaic.version = 11 : i64} {
  func.func @_conv_relu_pool_kernel(%arg0: i32, %arg1: memref<128x800xbf16, #tpu.memory_space<vmem>>, %arg2: memref<128x800xbf16, #tpu.memory_space<vmem>>, %arg3: memref<128x800xbf16, #tpu.memory_space<vmem>>, %arg4: memref<128x800xbf16, #tpu.memory_space<vmem>>, %arg5: memref<800x128xbf16, #tpu.memory_space<vmem>>, %arg6: memref<128x128xbf16, #tpu.memory_space<vmem>>) attributes {dimension_semantics = [#tpu.dimension_semantics<parallel>], iteration_bounds = array<i64: 1>, scalar_prefetch = 0 : i64, scratch_operands = 0 : i64, tpu.core_type = #tpu.core_type<tc>, window_params = [{transform_indices = @transform_0, window_bounds = array<i64: 128, 800>}, {transform_indices = @transform_1, window_bounds = array<i64: 128, 800>}, {transform_indices = @transform_2, window_bounds = array<i64: 128, 800>}, {transform_indices = @transform_3, window_bounds = array<i64: 128, 800>}, {pipeline_mode = #tpu.pipeline_mode<synchronous>, transform_indices = @transform_4, window_bounds = array<i64: 800, 128>}, {transform_indices = @transform_5, window_bounds = array<i64: 128, 128>}]} {
    %c0 = arith.constant 0 : index
    %c0_0 = arith.constant 0 : index
    %0 = vector.load %arg5[%c0, %c0_0] : memref<800x128xbf16, #tpu.memory_space<vmem>>, vector<800x128xbf16>
    %c0_1 = arith.constant 0 : index
    %c0_2 = arith.constant 0 : index
    %1 = vector.load %arg1[%c0_1, %c0_2] : memref<128x800xbf16, #tpu.memory_space<vmem>>, vector<128x800xbf16>
    %cst = arith.constant dense<0.000000e+00> : vector<128x128xf32>
    %2 = tpu.matmul %1, %0, %cst {dimension_numbers = #tpu.dot_dimension_numbers<[1], [0], [0], [1], [0, 0, 1, 1], [], []>} : vector<128x800xbf16>, vector<800x128xbf16>, vector<128x128xf32> -> vector<128x128xf32>
    %c0_3 = arith.constant 0 : index
    %c0_4 = arith.constant 0 : index
    %3 = vector.load %arg2[%c0_3, %c0_4] : memref<128x800xbf16, #tpu.memory_space<vmem>>, vector<128x800xbf16>
    %cst_5 = arith.constant dense<0.000000e+00> : vector<128x128xf32>
    %4 = tpu.matmul %3, %0, %cst_5 {dimension_numbers = #tpu.dot_dimension_numbers<[1], [0], [0], [1], [0, 0, 1, 1], [], []>} : vector<128x800xbf16>, vector<800x128xbf16>, vector<128x128xf32> -> vector<128x128xf32>
    %5 = arith.maximumf %2, %4 : vector<128x128xf32>
    %c0_6 = arith.constant 0 : index
    %c0_7 = arith.constant 0 : index
    %6 = vector.load %arg3[%c0_6, %c0_7] : memref<128x800xbf16, #tpu.memory_space<vmem>>, vector<128x800xbf16>
    %cst_8 = arith.constant dense<0.000000e+00> : vector<128x128xf32>
    %7 = tpu.matmul %6, %0, %cst_8 {dimension_numbers = #tpu.dot_dimension_numbers<[1], [0], [0], [1], [0, 0, 1, 1], [], []>} : vector<128x800xbf16>, vector<800x128xbf16>, vector<128x128xf32> -> vector<128x128xf32>
    %8 = arith.maximumf %5, %7 : vector<128x128xf32>
    %c0_9 = arith.constant 0 : index
    %c0_10 = arith.constant 0 : index
    %9 = vector.load %arg4[%c0_9, %c0_10] : memref<128x800xbf16, #tpu.memory_space<vmem>>, vector<128x800xbf16>
    %cst_11 = arith.constant dense<0.000000e+00> : vector<128x128xf32>
    %10 = tpu.matmul %9, %0, %cst_11 {dimension_numbers = #tpu.dot_dimension_numbers<[1], [0], [0], [1], [0, 0, 1, 1], [], []>} : vector<128x800xbf16>, vector<800x128xbf16>, vector<128x128xf32> -> vector<128x128xf32>
    %11 = arith.maximumf %8, %10 : vector<128x128xf32>
    %cst_12 = arith.constant 0.000000e+00 : f32
    %12 = vector.broadcast %cst_12 : f32 to vector<128x128xf32>
    %13 = arith.maximumf %11, %12 : vector<128x128xf32>
    %14 = arith.truncf %13 : vector<128x128xf32> to vector<128x128xbf16>
    %c0_13 = arith.constant 0 : index
    %c0_14 = arith.constant 0 : index
    %15 = vector.load %arg6[%c0_13, %c0_14] : memref<128x128xbf16, #tpu.memory_space<vmem>>, vector<128x128xbf16>
    tpu.vector_store %arg6[%c0_13, %c0_14], %14 {strides = array<i32>} : memref<128x128xbf16, #tpu.memory_space<vmem>>, vector<128x128xbf16>,
    return
  }
  func.func @transform_0(%arg0: i32) -> (i32, i32) {
    %c0_i32 = arith.constant 0 : i32
    %c0_i32_0 = arith.constant 0 : i32
    return %arg0, %c0_i32 : i32, i32
  }
  func.func @transform_1(%arg0: i32) -> (i32, i32) {
    %c0_i32 = arith.constant 0 : i32
    %c0_i32_0 = arith.constant 0 : i32
    return %arg0, %c0_i32 : i32, i32
  }
  func.func @transform_2(%arg0: i32) -> (i32, i32) {
    %c0_i32 = arith.constant 0 : i32
    %c0_i32_0 = arith.constant 0 : i32
    return %arg0, %c0_i32 : i32, i32
  }
  func.func @transform_3(%arg0: i32) -> (i32, i32) {
    %c0_i32 = arith.constant 0 : i32
    %c0_i32_0 = arith.constant 0 : i32
    return %arg0, %c0_i32 : i32, i32
  }
  func.func @transform_4(%arg0: i32) -> (i32, i32) {
    %c0_i32 = arith.constant 0 : i32
    %c0_i32_0 = arith.constant 0 : i32
    %c0_i32_1 = arith.constant 0 : i32
    return %c0_i32, %c0_i32_0 : i32, i32
  }
  func.func @transform_5(%arg0: i32) -> (i32, i32) {
    %c0_i32 = arith.constant 0 : i32
    %c0_i32_0 = arith.constant 0 : i32
    return %arg0, %c0_i32 : i32, i32
  }
}

module attributes {stable_mosaic.version = 11 : i64} {
  func.func @_mlp_kernel(%arg0: i32, %arg1: memref<2x4096xbf16, #tpu.memory_space<vmem>>, %arg2: memref<4096x512xbf16, #tpu.memory_space<vmem>>, %arg3: memref<512x128xbf16, #tpu.memory_space<vmem>>, %arg4: memref<2x512xf32, #tpu.memory_space<vmem>>, %arg5: memref<2x128xf32, #tpu.memory_space<vmem>>) attributes {dimension_semantics = [#tpu.dimension_semantics<parallel>], iteration_bounds = array<i64: 1>, scalar_prefetch = 0 : i64, scratch_operands = 0 : i64, tpu.core_type = #tpu.core_type<tc>, window_params = [{transform_indices = @transform_0, window_bounds = array<i64: 2, 4096>}, {pipeline_mode = #tpu.pipeline_mode<synchronous>, transform_indices = @transform_1, window_bounds = array<i64: 4096, 512>}, {pipeline_mode = #tpu.pipeline_mode<synchronous>, transform_indices = @transform_2, window_bounds = array<i64: 512, 128>}, {transform_indices = @transform_3, window_bounds = array<i64: 2, 512>}, {transform_indices = @transform_4, window_bounds = array<i64: 2, 128>}]} {
    %c0 = arith.constant 0 : index
    %c0_0 = arith.constant 0 : index
    %0 = vector.load %arg1[%c0, %c0_0] : memref<2x4096xbf16, #tpu.memory_space<vmem>>, vector<2x4096xbf16>
    %c0_1 = arith.constant 0 : index
    %c0_2 = arith.constant 0 : index
    %1 = vector.load %arg2[%c0_1, %c0_2] : memref<4096x512xbf16, #tpu.memory_space<vmem>>, vector<4096x512xbf16>
    %cst = arith.constant dense<0.000000e+00> : vector<2x512xf32>
    %2 = tpu.matmul %0, %1, %cst {dimension_numbers = #tpu.dot_dimension_numbers<[1], [0], [0], [1], [0, 0, 1, 1], [], []>} : vector<2x4096xbf16>, vector<4096x512xbf16>, vector<2x512xf32> -> vector<2x512xf32>
    %cst_3 = arith.constant 0.000000e+00 : f32
    %3 = vector.broadcast %cst_3 : f32 to vector<2x512xf32>
    %4 = arith.maximumf %2, %3 : vector<2x512xf32>
    %c0_4 = arith.constant 0 : index
    %c0_5 = arith.constant 0 : index
    %5 = vector.load %arg4[%c0_4, %c0_5] : memref<2x512xf32, #tpu.memory_space<vmem>>, vector<2x512xf32>
    tpu.vector_store %arg4[%c0_4, %c0_5], %4 {strides = array<i32>} : memref<2x512xf32, #tpu.memory_space<vmem>>, vector<2x512xf32>,
    %6 = arith.truncf %4 : vector<2x512xf32> to vector<2x512xbf16>
    %c0_6 = arith.constant 0 : index
    %c0_7 = arith.constant 0 : index
    %7 = vector.load %arg3[%c0_6, %c0_7] : memref<512x128xbf16, #tpu.memory_space<vmem>>, vector<512x128xbf16>
    %cst_8 = arith.constant dense<0.000000e+00> : vector<2x128xf32>
    %8 = tpu.matmul %6, %7, %cst_8 {dimension_numbers = #tpu.dot_dimension_numbers<[1], [0], [0], [1], [0, 0, 1, 1], [], []>} : vector<2x512xbf16>, vector<512x128xbf16>, vector<2x128xf32> -> vector<2x128xf32>
    %c0_9 = arith.constant 0 : index
    %c0_10 = arith.constant 0 : index
    %9 = vector.load %arg5[%c0_9, %c0_10] : memref<2x128xf32, #tpu.memory_space<vmem>>, vector<2x128xf32>
    tpu.vector_store %arg5[%c0_9, %c0_10], %8 {strides = array<i32>} : memref<2x128xf32, #tpu.memory_space<vmem>>, vector<2x128xf32>,
    return
  }
  func.func @transform_0(%arg0: i32) -> (i32, i32) {
    %c0_i32 = arith.constant 0 : i32
    %c0_i32_0 = arith.constant 0 : i32
    return %arg0, %c0_i32 : i32, i32
  }
  func.func @transform_1(%arg0: i32) -> (i32, i32) {
    %c0_i32 = arith.constant 0 : i32
    %c0_i32_0 = arith.constant 0 : i32
    %c0_i32_1 = arith.constant 0 : i32
    return %c0_i32, %c0_i32_0 : i32, i32
  }
  func.func @transform_2(%arg0: i32) -> (i32, i32) {
    %c0_i32 = arith.constant 0 : i32
    %c0_i32_0 = arith.constant 0 : i32
    %c0_i32_1 = arith.constant 0 : i32
    return %c0_i32, %c0_i32_0 : i32, i32
  }
  func.func @transform_3(%arg0: i32) -> (i32, i32) {
    %c0_i32 = arith.constant 0 : i32
    %c0_i32_0 = arith.constant 0 : i32
    return %arg0, %c0_i32 : i32, i32
  }
  func.func @transform_4(%arg0: i32) -> (i32, i32) {
    %c0_i32 = arith.constant 0 : i32
    %c0_i32_0 = arith.constant 0 : i32
    return %arg0, %c0_i32 : i32, i32
  }
}

</mosaic_0001>

<bundles_post_ra>
// kernel: _lambda_.3
= control target key start
LH: loop header
LB: loop body
LE: loop exit
PB: predicated region body
PF: predicated region fallthrough
CT: control target
= control target key end

     0   :  { %s5096_s4 = inlined_call_operand.vmem [shape: bf16[128,128], index: 4, kind: input, shape index: {}]   ;;  %s5097_s0 = inlined_call_operand.vmem [shape: bf16[512,128], index: 0, kind: input, shape index: {}]   ;;  %s5098_s1 = inlined_call_operand.vmem [shape: bf16[512,128], index: 1, kind: input, shape index: {}]   ;;  %s5099_s2 = inlined_call_operand.vmem [shape: bf16[512,128], index: 2, kind: input, shape index: {}]   ;;  %s5100_s3 = inlined_call_operand.vmem [shape: bf16[512,128], index: 3, kind: input, shape index: {}]   ;;  %s5101_s5 = inlined_call_operand.vmem [shape: bf16[512,128], index: 5, kind: output, shape index: {}]  }
   0x1   :  { %v3780_v0 = vld [vmem:[%s5096_s4 + $0x38] sm:$0xff]   ;;  %v3952_v1 = vld [vmem:[%s5096_s4 + $0x30] sm:$0xff]   ;;  %v3959_v2 = vld [vmem:[%s5096_s4 + $0x28] sm:$0xff]  }
   0x2   :  { %3460 = vmatprep.subr.bf16.mxu0 %v3780_v0  ;;  %3540 = vmatprep.subr.bf16.mxu1 %v3780_v0  ;;  %v3966_v3 = vld [vmem:[%s5096_s4 + $0x20] sm:$0xff]   ;;  %v3983_v6 = vld [vmem:[%s5096_s4 + $0x18] sm:$0xff]   ;;  %v3992_v7 = vld [vmem:[%s5096_s4 + $0x10] sm:$0xff]  }
   0x3   :  { %3461 = vmatpush3.bf16.msra.mxu0 %v3780_v0  ;;  %3541 = vmatpush3.bf16.msra.mxu1 %v3780_v0  ;;  %v3788_v4 = vld [vmem:[%s5097_s0] sm:$0xff]   ;;  %v4001_v8 = vld [vmem:[%s5096_s4 + $0x8] sm:$0xff]   ;;  %v3792_v12 = vld [vmem:[%s5097_s0 + $0x10] sm:$0xff]  }
   0x4   :  { %3462 = vmatprep.subr.bf16.mxu0 %v3952_v1  ;;  %3542 = vmatprep.subr.bf16.mxu1 %v3952_v1  ;;  %v3789_v5 = vld [vmem:[%s5098_s1] sm:$0xff]   ;;  %v3790_v10 = vld [vmem:[%s5097_s0 + $0x8] sm:$0xff]   ;;  %v3793_v13 = vld [vmem:[%s5098_s1 + $0x10] sm:$0xff]  }
   0x5   :  { %3476 = vmatprep.mubr.bf16.mxu0 %v3788_v4  ;;  %3556 = vmatprep.mubr.bf16.mxu1 %v3789_v5  ;;  %v4010_v9 = vld [vmem:[%s5096_s4] sm:$0xff]   ;;  %v3791_v11 = vld [vmem:[%s5098_s1 + $0x8] sm:$0xff]   ;;  %v3794_v14 = vld [vmem:[%s5097_s0 + $0x18] sm:$0xff]  }
   0x6   :  { %v3795_v15 = vld [vmem:[%s5098_s1 + $0x18] sm:$0xff]   ;;  %v3796_v16 = vld [vmem:[%s5097_s0 + $0x20] sm:$0xff]   ;;  %v3798_v18 = vld [vmem:[%s5097_s0 + $0x28] sm:$0xff]  }
   0x7   :  { %3463 = vmatpush3.bf16.msra.mxu0 %v3952_v1  ;;  %3543 = vmatpush3.bf16.msra.mxu1 %v3952_v1  ;;  %v3797_v17 = vld [vmem:[%s5098_s1 + $0x20] sm:$0xff]   ;;  %v3799_v19 = vld [vmem:[%s5098_s1 + $0x28] sm:$0xff]   ;;  %v3800_v20 = vld [vmem:[%s5097_s0 + $0x30] sm:$0xff]  }
   0x8   :  { %3464 = vmatprep.subr.bf16.mxu0 %v3959_v2  ;;  %3544 = vmatprep.subr.bf16.mxu1 %v3959_v2  ;;  %v3801_v21 = vld [vmem:[%s5098_s1 + $0x30] sm:$0xff]   ;;  %v3802_v22 = vld [vmem:[%s5097_s0 + $0x38] sm:$0xff]   ;;  %v3804_v24 = vld [vmem:[%s5097_s0 + $0x40] sm:$0xff]  }
   0x9   :  { %v3803_v23 = vld [vmem:[%s5098_s1 + $0x38] sm:$0xff]   ;;  %v3805_v25 = vld [vmem:[%s5098_s1 + $0x40] sm:$0xff]   ;;  %v3806_v26 = vld [vmem:[%s5097_s0 + $0x48] sm:$0xff]  }
   0xa   :  { %v3807_v27 = vld [vmem:[%s5098_s1 + $0x48] sm:$0xff]   ;;  %v3808_v28 = vld [vmem:[%s5097_s0 + $0x50] sm:$0xff]   ;;  %v3810_v30 = vld [vmem:[%s5097_s0 + $0x58] sm:$0xff]  }
   0xb   :  { %3465 = vmatpush3.bf16.msra.mxu0 %v3959_v2  ;;  %3545 = vmatpush3.bf16.msra.mxu1 %v3959_v2  ;;  %v3809_v29 = vld [vmem:[%s5098_s1 + $0x50] sm:$0xff]   ;;  %v3811_v31 = vld [vmem:[%s5098_s1 + $0x58] sm:$0xff]   ;;  %v3812_v32 = vld [vmem:[%s5097_s0 + $0x60] sm:$0xff]  }
   0xc   :  { %3466 = vmatprep.subr.bf16.mxu0 %v3966_v3  ;;  %3546 = vmatprep.subr.bf16.mxu1 %v3966_v3  ;;  %v3813_v33 = vld [vmem:[%s5098_s1 + $0x60] sm:$0xff]   ;;  %v3814_v34 = vld [vmem:[%s5097_s0 + $0x68] sm:$0xff]   ;;  %v3816_v36 = vld [vmem:[%s5097_s0 + $0x70] sm:$0xff]  }
   0xd   :  { %v3815_v35 = vld [vmem:[%s5098_s1 + $0x68] sm:$0xff]   ;;  %v3817_v37 = vld [vmem:[%s5098_s1 + $0x70] sm:$0xff]   ;;  %v3818_v38 = vld [vmem:[%s5097_s0 + $0x78] sm:$0xff]  }
   0xe   :  { %v3819_v39 = vld [vmem:[%s5098_s1 + $0x78] sm:$0xff]   ;;  %v3820_v40 = vld [vmem:[%s5097_s0 + $0x80] sm:$0xff]   ;;  %v3822_v42 = vld [vmem:[%s5097_s0 + $0x88] sm:$0xff]  }
   0xf   :  { %3467 = vmatpush3.bf16.msra.mxu0 %v3966_v3  ;;  %3547 = vmatpush3.bf16.msra.mxu1 %v3966_v3  ;;  %v3821_v41 = vld [vmem:[%s5098_s1 + $0x80] sm:$0xff]   ;;  %v3823_v43 = vld [vmem:[%s5098_s1 + $0x88] sm:$0xff]   ;;  %v3824_v44 = vld [vmem:[%s5097_s0 + $0x90] sm:$0xff]  }
  0x10   :  { %3468 = vmatprep.subr.bf16.mxu0 %v3983_v6  ;;  %3548 = vmatprep.subr.bf16.mxu1 %v3983_v6  ;;  %v3825_v45 = vld [vmem:[%s5098_s1 + $0x90] sm:$0xff]   ;;  %v3826_v46 = vld [vmem:[%s5097_s0 + $0x98] sm:$0xff]   ;;  %v3828_v48 = vld [vmem:[%s5097_s0 + $0xa0] sm:$0xff]  }
  0x11   :  { %v3827_v47 = vld [vmem:[%s5098_s1 + $0x98] sm:$0xff]   ;;  %v3829_v49 = vld [vmem:[%s5098_s1 + $0xa0] sm:$0xff]   ;;  %v3830_v50 = vld [vmem:[%s5097_s0 + $0xa8] sm:$0xff]  }
  0x12   :  { %v3831_v51 = vld [vmem:[%s5098_s1 + $0xa8] sm:$0xff]   ;;  %v3832_v52 = vld [vmem:[%s5097_s0 + $0xb0] sm:$0xff]   ;;  %v3834_v54 = vld [vmem:[%s5097_s0 + $0xb8] sm:$0xff]  }
  0x13   :  { %3469 = vmatpush3.bf16.msra.mxu0 %v3983_v6  ;;  %3549 = vmatpush3.bf16.msra.mxu1 %v3983_v6  ;;  %v3833_v53 = vld [vmem:[%s5098_s1 + $0xb0] sm:$0xff]   ;;  %v3835_v55 = vld [vmem:[%s5098_s1 + $0xb8] sm:$0xff]   ;;  %v3836_v56 = vld [vmem:[%s5097_s0 + $0xc0] sm:$0xff]  }
  0x14   :  { %3470 = vmatprep.subr.bf16.mxu0 %v3992_v7  ;;  %3550 = vmatprep.subr.bf16.mxu1 %v3992_v7  ;;  %v3837_v57 = vld [vmem:[%s5098_s1 + $0xc0] sm:$0xff]   ;;  %v3838_v58 = vld [vmem:[%s5097_s0 + $0xc8] sm:$0xff]   ;;  %v3840_v60 = vld [vmem:[%s5097_s0 + $0xd0] sm:$0xff]  }
  0x15   :  { %v3839_v59 = vld [vmem:[%s5098_s1 + $0xc8] sm:$0xff]   ;;  %v3841_v61 = vld [vmem:[%s5098_s1 + $0xd0] sm:$0xff]   ;;  %v3842_v62 = vld [vmem:[%s5097_s0 + $0xd8] sm:$0xff]  }
  0x16   :  { %v3843_v63 = vld [vmem:[%s5098_s1 + $0xd8] sm:$0xff]   ;;  %v3848_v4 = vld [vmem:[%s5097_s0 + $0xf0] sm:$0xff]  }
  0x17   :  { %3471 = vmatpush3.bf16.msra.mxu0 %v3992_v7  ;;  %3551 = vmatpush3.bf16.msra.mxu1 %v3992_v7  ;;  %v3849_v5 = vld [vmem:[%s5098_s1 + $0xf0] sm:$0xff]  }
  0x18   :  { %3472 = vmatprep.subr.bf16.mxu0 %v4001_v8  ;;  %3552 = vmatprep.subr.bf16.mxu1 %v4001_v8 }
  0x1b   :  { %3473 = vmatpush3.bf16.msra.mxu0 %v4001_v8  ;;  %3553 = vmatpush3.bf16.msra.mxu1 %v4001_v8 }
  0x1c   :  { %3474 = vmatprep.subr.bf16.mxu0 %v4010_v9  ;;  %3554 = vmatprep.subr.bf16.mxu1 %v4010_v9 }
  0x1f   :  { %3475 = vmatpush3.bf16.msra.mxu0 %v4010_v9  ;;  %3555 = vmatpush3.bf16.msra.mxu1 %v4010_v9 }
  0x20   :  { %3620 = vmatprep.subr.bf16.mxu0 %v3780_v0  ;;  %3700 = vmatprep.subr.bf16.mxu1 %v3780_v0 }
  0x22   :  { %3477 = vmatmul.mubr.bf16.vlgmr.msra.gmra.mxu0 %v3790_v10  ;;  %3557 = vmatmul.mubr.bf16.vlgmr.msra.gmra.mxu1 %v3791_v11  ;;  %v3854_v10 = vld [vmem:[%s5099_s2 + $0x8] sm:$0xff]  }
  0x23   :  { %3621 = vmatpush3.bf16.msra.mxu0 %v3780_v0  ;;  %3701 = vmatpush3.bf16.msra.mxu1 %v3780_v0  ;;  %v3844_v0 = vld [vmem:[%s5097_s0 + $0xe0] sm:$0xff]   ;;  %v3855_v11 = vld [vmem:[%s5100_s3 + $0x8] sm:$0xff]  }
  0x24   :  { %3480 = vmatprep.mubr.bf16.mxu0 %v3792_v12  ;;  %3560 = vmatprep.mubr.bf16.mxu1 %v3793_v13  ;;  %v3856_v12 = vld [vmem:[%s5099_s2 + $0x10] sm:$0xff]  }
  0x25   :  { %3622 = vmatprep.subr.bf16.mxu0 %v3952_v1  ;;  %3702 = vmatprep.subr.bf16.mxu1 %v3952_v1  ;;  %v3857_v13 = vld [vmem:[%s5100_s3 + $0x10] sm:$0xff]  }
  0x27   :  { %3623 = vmatpush3.bf16.msra.mxu0 %v3952_v1  ;;  %3703 = vmatpush3.bf16.msra.mxu1 %v3952_v1  ;;  %v3845_v1 = vld [vmem:[%s5098_s1 + $0xe0] sm:$0xff]  }
  0x28   :  { %3624 = vmatprep.subr.bf16.mxu0 %v3959_v2  ;;  %3704 = vmatprep.subr.bf16.mxu1 %v3959_v2 }
  0x2a   :  { %3481 = vmatmul.mubr.bf16.gmra.mxu0 %v3794_v14  ;;  %3561 = vmatmul.mubr.bf16.gmra.mxu1 %v3795_v15  ;;  %v3858_v14 = vld [vmem:[%s5099_s2 + $0x18] sm:$0xff]  }
  0x2b   :  { %3484 = vmatprep.mubr.bf16.mxu0 %v3796_v16  ;;  %3564 = vmatprep.mubr.bf16.mxu1 %v3797_v17  ;;  %v3859_v15 = vld [vmem:[%s5100_s3 + $0x18] sm:$0xff]   ;;  %v3860_v16 = vld [vmem:[%s5099_s2 + $0x20] sm:$0xff]  }
  0x2c   :  { %3625 = vmatpush3.bf16.msra.mxu0 %v3959_v2  ;;  %3705 = vmatpush3.bf16.msra.mxu1 %v3959_v2  ;;  %v3846_v2 = vld [vmem:[%s5097_s0 + $0xe8] sm:$0xff]   ;;  %v3861_v17 = vld [vmem:[%s5100_s3 + $0x20] sm:$0xff]  }
  0x2d   :  { %3626 = vmatprep.subr.bf16.mxu0 %v3966_v3  ;;  %3706 = vmatprep.subr.bf16.mxu1 %v3966_v3 }
  0x30   :  { %3627 = vmatpush3.bf16.msra.mxu0 %v3966_v3  ;;  %3707 = vmatpush3.bf16.msra.mxu1 %v3966_v3  ;;  %v3847_v3 = vld [vmem:[%s5098_s1 + $0xe8] sm:$0xff]  }
  0x31   :  { %3628 = vmatprep.subr.bf16.mxu0 %v3983_v6  ;;  %3708 = vmatprep.subr.bf16.mxu1 %v3983_v6 }
  0x32   :  { %3485 = vmatmul.mubr.bf16.gmra.mxu0 %v3798_v18  ;;  %3565 = vmatmul.mubr.bf16.gmra.mxu1 %v3799_v19  ;;  %v3862_v18 = vld [vmem:[%s5099_s2 + $0x28] sm:$0xff]  }
  0x33   :  { %3488 = vmatprep.mubr.bf16.mxu0 %v3800_v20  ;;  %3568 = vmatprep.mubr.bf16.mxu1 %v3801_v21  ;;  %v3863_v19 = vld [vmem:[%s5100_s3 + $0x28] sm:$0xff]   ;;  %v3864_v20 = vld [vmem:[%s5099_s2 + $0x30] sm:$0xff]  }
  0x34   :  { %3629 = vmatpush3.bf16.msra.mxu0 %v3983_v6  ;;  %3709 = vmatpush3.bf16.msra.mxu1 %v3983_v6  ;;  %v3850_v6 = vld [vmem:[%s5097_s0 + $0xf8] sm:$0xff]   ;;  %v3865_v21 = vld [vmem:[%s5100_s3 + $0x30] sm:$0xff]  }
  0x35   :  { %3630 = vmatprep.subr.bf16.mxu0 %v3992_v7  ;;  %3710 = vmatprep.subr.bf16.mxu1 %v3992_v7 }
  0x38   :  { %3631 = vmatpush3.bf16.msra.mxu0 %v3992_v7  ;;  %3711 = vmatpush3.bf16.msra.mxu1 %v3992_v7  ;;  %v3851_v7 = vld [vmem:[%s5098_s1 + $0xf8] sm:$0xff]  }
  0x39   :  { %3632 = vmatprep.subr.bf16.mxu0 %v4001_v8  ;;  %3712 = vmatprep.subr.bf16.mxu1 %v4001_v8 }
  0x3a   :  { %3489 = vmatmul.mubr.bf16.gmra.mxu0 %v3802_v22  ;;  %3569 = vmatmul.mubr.bf16.gmra.mxu1 %v3803_v23  ;;  %v3866_v22 = vld [vmem:[%s5099_s2 + $0x38] sm:$0xff]  }
  0x3b   :  { %3492 = vmatprep.mubr.bf16.mxu0 %v3804_v24  ;;  %3572 = vmatprep.mubr.bf16.mxu1 %v3805_v25  ;;  %v3867_v23 = vld [vmem:[%s5100_s3 + $0x38] sm:$0xff]   ;;  %v3868_v24 = vld [vmem:[%s5099_s2 + $0x40] sm:$0xff]  }
  0x3c   :  { %3633 = vmatpush3.bf16.msra.mxu0 %v4001_v8  ;;  %3713 = vmatpush3.bf16.msra.mxu1 %v4001_v8  ;;  %v3852_v8 = vld [vmem:[%s5099_s2] sm:$0xff]  }
  0x3d   :  { %3634 = vmatprep.subr.bf16.mxu0 %v4010_v9  ;;  %3714 = vmatprep.subr.bf16.mxu1 %v4010_v9  ;;  %v3869_v25 = vld [vmem:[%s5100_s3 + $0x40] sm:$0xff]  }
  0x40   :  { %3635 = vmatpush3.bf16.msra.mxu0 %v4010_v9  ;;  %3715 = vmatpush3.bf16.msra.mxu1 %v4010_v9  ;;  %v3853_v9 = vld [vmem:[%s5100_s3] sm:$0xff]  }
  0x42   :  { %3493 = vmatmul.mubr.bf16.gmra.mxu0 %v3806_v26  ;;  %3573 = vmatmul.mubr.bf16.gmra.mxu1 %v3807_v27  ;;  %v3870_v26 = vld [vmem:[%s5099_s2 + $0x48] sm:$0xff]  }
  0x43   :  { %3496 = vmatprep.mubr.bf16.mxu0 %v3808_v28  ;;  %3576 = vmatprep.mubr.bf16.mxu1 %v3809_v29  ;;  %v3871_v27 = vld [vmem:[%s5100_s3 + $0x48] sm:$0xff]   ;;  %v3872_v28 = vld [vmem:[%s5099_s2 + $0x50] sm:$0xff]  }
  0x44   :  { %v3873_v29 = vld [vmem:[%s5100_s3 + $0x50] sm:$0xff]  }
  0x4a   :  { %3497 = vmatmul.mubr.bf16.gmra.mxu0 %v3810_v30  ;;  %3577 = vmatmul.mubr.bf16.gmra.mxu1 %v3811_v31  ;;  %v3874_v30 = vld [vmem:[%s5099_s2 + $0x58] sm:$0xff]  }
  0x4b   :  { %3500 = vmatprep.mubr.bf16.mxu0 %v3812_v32  ;;  %3580 = vmatprep.mubr.bf16.mxu1 %v3813_v33  ;;  %v3875_v31 = vld [vmem:[%s5100_s3 + $0x58] sm:$0xff]   ;;  %v3876_v32 = vld [vmem:[%s5099_s2 + $0x60] sm:$0xff]  }
  0x4c   :  { %v3877_v33 = vld [vmem:[%s5100_s3 + $0x60] sm:$0xff]  }
  0x52   :  { %3501 = vmatmul.mubr.bf16.gmra.mxu0 %v3814_v34  ;;  %3581 = vmatmul.mubr.bf16.gmra.mxu1 %v3815_v35  ;;  %v3878_v34 = vld [vmem:[%s5099_s2 + $0x68] sm:$0xff]  }
  0x53   :  { %3504 = vmatprep.mubr.bf16.mxu0 %v3816_v36  ;;  %3584 = vmatprep.mubr.bf16.mxu1 %v3817_v37  ;;  %v3879_v35 = vld [vmem:[%s5100_s3 + $0x68] sm:$0xff]   ;;  %v3880_v36 = vld [vmem:[%s5099_s2 + $0x70] sm:$0xff]  }
  0x54   :  { %v3881_v37 = vld [vmem:[%s5100_s3 + $0x70] sm:$0xff]  }
  0x5a   :  { %3505 = vmatmul.mubr.bf16.gmra.mxu0 %v3818_v38  ;;  %3585 = vmatmul.mubr.bf16.gmra.mxu1 %v3819_v39  ;;  %v3882_v38 = vld [vmem:[%s5099_s2 + $0x78] sm:$0xff]  }
  0x5b   :  { %3508 = vmatprep.mubr.bf16.mxu0 %v3820_v40  ;;  %3588 = vmatprep.mubr.bf16.mxu1 %v3821_v41  ;;  %v3883_v39 = vld [vmem:[%s5100_s3 + $0x78] sm:$0xff]   ;;  %v3884_v40 = vld [vmem:[%s5099_s2 + $0x80] sm:$0xff]  }
  0x5c   :  { %v3885_v41 = vld [vmem:[%s5100_s3 + $0x80] sm:$0xff]  }
  0x62   :  { %3509 = vmatmul.mubr.bf16.gmra.mxu0 %v3822_v42  ;;  %3589 = vmatmul.mubr.bf16.gmra.mxu1 %v3823_v43  ;;  %v3886_v42 = vld [vmem:[%s5099_s2 + $0x88] sm:$0xff]  }
  0x63   :  { %3512 = vmatprep.mubr.bf16.mxu0 %v3824_v44  ;;  %3592 = vmatprep.mubr.bf16.mxu1 %v3825_v45  ;;  %v3887_v43 = vld [vmem:[%s5100_s3 + $0x88] sm:$0xff]   ;;  %v3888_v44 = vld [vmem:[%s5099_s2 + $0x90] sm:$0xff]  }
  0x64   :  { %v3889_v45 = vld [vmem:[%s5100_s3 + $0x90] sm:$0xff]  }
  0x6a   :  { %3513 = vmatmul.mubr.bf16.gmra.mxu0 %v3826_v46  ;;  %3593 = vmatmul.mubr.bf16.gmra.mxu1 %v3827_v47 }
  0x6b   :  { %3516 = vmatprep.mubr.bf16.mxu0 %v3828_v48  ;;  %3596 = vmatprep.mubr.bf16.mxu1 %v3829_v49 }
  0x72   :  { %3517 = vmatmul.mubr.bf16.gmra.mxu0 %v3830_v50  ;;  %3597 = vmatmul.mubr.bf16.gmra.mxu1 %v3831_v51 }
  0x73   :  { %3520 = vmatprep.mubr.bf16.mxu0 %v3832_v52  ;;  %3600 = vmatprep.mubr.bf16.mxu1 %v3833_v53 }
  0x7a   :  { %3521 = vmatmul.mubr.bf16.gmra.mxu0 %v3834_v54  ;;  %3601 = vmatmul.mubr.bf16.gmra.mxu1 %v3835_v55  ;;  %v3890_v54 = vld [vmem:[%s5099_s2 + $0x98] sm:$0xff]  }
  0x7b   :  { %3524 = vmatprep.mubr.bf16.mxu0 %v3836_v56  ;;  %3604 = vmatprep.mubr.bf16.mxu1 %v3837_v57  ;;  %v3891_v55 = vld [vmem:[%s5100_s3 + $0x98] sm:$0xff]   ;;  %v3892_v57 = vld [vmem:[%s5099_s2 + $0xa0] sm:$0xff]  }
  0x82   :  { %3525 = vmatmul.mubr.bf16.gmra.mxu0 %v3838_v58  ;;  %3605 = vmatmul.mubr.bf16.gmra.mxu1 %v3839_v59  ;;  %v3893_v58 = vld [vmem:[%s5100_s3 + $0xa0] sm:$0xff]  }
  0x83   :  { %3528 = vmatprep.mubr.bf16.mxu0 %v3840_v60  ;;  %3608 = vmatprep.mubr.bf16.mxu1 %v3841_v61 }
  0x8a   :  { %3529 = vmatmul.mubr.bf16.gmra.mxu0 %v3842_v62  ;;  %3609 = vmatmul.mubr.bf16.gmra.mxu1 %v3843_v63 }
  0x8b   :  { %3532 = vmatprep.mubr.bf16.mxu0 %v3844_v0  ;;  %3612 = vmatprep.mubr.bf16.mxu1 %v3845_v1 }
  0x92   :  { %3533 = vmatmul.mubr.bf16.gmra.mxu0 %v3846_v2  ;;  %3613 = vmatmul.mubr.bf16.gmra.mxu1 %v3847_v3 }
  0x93   :  { %3536 = vmatprep.mubr.bf16.mxu0 %v3848_v4  ;;  %3616 = vmatprep.mubr.bf16.mxu1 %v3849_v5 }
  0x9a   :  { %3537 = vmatmul.mubr.bf16.gmra.mxu0 %v3850_v6  ;;  %3617 = vmatmul.mubr.bf16.gmra.mxu1 %v3851_v7  ;;  %v3894_v6 = vld [vmem:[%s5099_s2 + $0xa8] sm:$0xff]  }
  0x9b   :  { %3636 = vmatprep.mubr.bf16.mxu0 %v3852_v8  ;;  %3716 = vmatprep.mubr.bf16.mxu1 %v3853_v9  ;;  %v3895_v7 = vld [vmem:[%s5100_s3 + $0xa8] sm:$0xff]   ;;  %v3896_v9 = vld [vmem:[%s5099_s2 + $0xb0] sm:$0xff]  }
  0xa2   :  { %3637 = vmatmul.mubr.bf16.vlgmr.msra.gmra.mxu0 %v3854_v10  ;;  %3717 = vmatmul.mubr.bf16.vlgmr.msra.gmra.mxu1 %v3855_v11  ;;  %v3897_v10 = vld [vmem:[%s5100_s3 + $0xb0] sm:$0xff]  }
  0xa3   :  { %3640 = vmatprep.mubr.bf16.mxu0 %v3856_v12  ;;  %3720 = vmatprep.mubr.bf16.mxu1 %v3857_v13 }
  0xaa   :  { %3641 = vmatmul.mubr.bf16.gmra.mxu0 %v3858_v14  ;;  %3721 = vmatmul.mubr.bf16.gmra.mxu1 %v3859_v15 }
  0xab   :  { %3644 = vmatprep.mubr.bf16.mxu0 %v3860_v16  ;;  %3724 = vmatprep.mubr.bf16.mxu1 %v3861_v17 }
  0xb2   :  { %3645 = vmatmul.mubr.bf16.gmra.mxu0 %v3862_v18  ;;  %3725 = vmatmul.mubr.bf16.gmra.mxu1 %v3863_v19 }
  0xb3   :  { %3648 = vmatprep.mubr.bf16.mxu0 %v3864_v20  ;;  %3728 = vmatprep.mubr.bf16.mxu1 %v3865_v21 }
  0xba   :  { %3649 = vmatmul.mubr.bf16.gmra.mxu0 %v3866_v22  ;;  %3729 = vmatmul.mubr.bf16.gmra.mxu1 %v3867_v23  ;;  %v3898_v22 = vld [vmem:[%s5099_s2 + $0xb8] sm:$0xff]  }
  0xbb   :  { %3652 = vmatprep.mubr.bf16.mxu0 %v3868_v24  ;;  %3732 = vmatprep.mubr.bf16.mxu1 %v3869_v25  ;;  %v3899_v23 = vld [vmem:[%s5100_s3 + $0xb8] sm:$0xff]   ;;  %v3900_v25 = vld [vmem:[%s5099_s2 + $0xc0] sm:$0xff]  }
  0xc2   :  { %3653 = vmatmul.mubr.bf16.gmra.mxu0 %v3870_v26  ;;  %3733 = vmatmul.mubr.bf16.gmra.mxu1 %v3871_v27  ;;  %v3901_v26 = vld [vmem:[%s5100_s3 + $0xc0] sm:$0xff]  }
  0xc3   :  { %3656 = vmatprep.mubr.bf16.mxu0 %v3872_v28  ;;  %3736 = vmatprep.mubr.bf16.mxu1 %v3873_v29 }
  0xca   :  { %3657 = vmatmul.mubr.bf16.gmra.mxu0 %v3874_v30  ;;  %3737 = vmatmul.mubr.bf16.gmra.mxu1 %v3875_v31 }
  0xcb   :  { %3660 = vmatprep.mubr.bf16.mxu0 %v3876_v32  ;;  %3740 = vmatprep.mubr.bf16.mxu1 %v3877_v33 }
  0xd2   :  { %3661 = vmatmul.mubr.bf16.gmra.mxu0 %v3878_v34  ;;  %3741 = vmatmul.mubr.bf16.gmra.mxu1 %v3879_v35  ;;  %v3913_v35 = vld [vmem:[%s5100_s3 + $0xf0] sm:$0xff]  }
  0xd3   :  { %3664 = vmatprep.mubr.bf16.mxu0 %v3880_v36  ;;  %3744 = vmatprep.mubr.bf16.mxu1 %v3881_v37 }
  0xda   :  { %3665 = vmatmul.mubr.bf16.gmra.mxu0 %v3882_v38  ;;  %3745 = vmatmul.mubr.bf16.gmra.mxu1 %v3883_v39  ;;  %v3902_v38 = vld [vmem:[%s5099_s2 + $0xc8] sm:$0xff]  }
  0xdb   :  { %3668 = vmatprep.mubr.bf16.mxu0 %v3884_v40  ;;  %3748 = vmatprep.mubr.bf16.mxu1 %v3885_v41  ;;  %v3903_v39 = vld [vmem:[%s5100_s3 + $0xc8] sm:$0xff]   ;;  %v3904_v41 = vld [vmem:[%s5099_s2 + $0xd0] sm:$0xff]  }
  0xe2   :  { %v4346_v46 = vpop.f32.mrf.mxu0  ;;  %v4348_v47 = vpop.f32.mrf.mxu1  ;;  %3669 = vmatmul.mubr.bf16.gmra.mxu0 %v3886_v42  ;;  %3749 = vmatmul.mubr.bf16.gmra.mxu1 %v3887_v43  ;;  %v3905_v42 = vld [vmem:[%s5100_s3 + $0xd0] sm:$0xff]  }
  0xe3   :  { %3672 = vmatprep.mubr.bf16.mxu0 %v3888_v44  ;;  %3752 = vmatprep.mubr.bf16.mxu1 %v3889_v45 }
  0xe4   :  { %v4352_v49 = vpop.f32.mrf.mxu0  ;;  %v4354_v50 = vpop.f32.mrf.mxu1 }
  0xe6   :  { %v4358_v52 = vpop.f32.mrf.mxu0  ;;  %v4360_v53 = vpop.f32.mrf.mxu1 }
  0xe8   :  { %v4376_v59 = vpop.f32.mrf.mxu0  ;;  %v4378_v60 = vpop.f32.mrf.mxu1 }
  0xea   :  { %v4382_v62 = vpop.f32.mrf.mxu0  ;;  %v4384_v63 = vpop.f32.mrf.mxu1  ;;  %3673 = vmatmul.mubr.bf16.gmra.mxu0 %v3890_v54  ;;  %3753 = vmatmul.mubr.bf16.gmra.mxu1 %v3891_v55 }
  0xeb   :  { %3676 = vmatprep.mubr.bf16.mxu0 %v3892_v57  ;;  %3756 = vmatprep.mubr.bf16.mxu1 %v3893_v58 }
  0xec   :  { %v4388_v1 = vpop.f32.mrf.mxu0  ;;  %v4390_v2 = vpop.f32.mrf.mxu1 }
  0xee   :  { %v4394_v4 = vpop.f32.mrf.mxu0  ;;  %v4396_v5 = vpop.f32.mrf.mxu1 }
  0xf0   :  { %v4412_v11 = vpop.f32.mrf.mxu0  ;;  %v4414_v12 = vpop.f32.mrf.mxu1 }
  0xf2   :  { %v4418_v14 = vpop.f32.mrf.mxu0  ;;  %v4420_v15 = vpop.f32.mrf.mxu1  ;;  %3677 = vmatmul.mubr.bf16.gmra.mxu0 %v3894_v6  ;;  %3757 = vmatmul.mubr.bf16.gmra.mxu1 %v3895_v7 }
  0xf3   :  { %3680 = vmatprep.mubr.bf16.mxu0 %v3896_v9  ;;  %3760 = vmatprep.mubr.bf16.mxu1 %v3897_v10 }
  0xf4   :  { %v4424_v17 = vpop.f32.mrf.mxu0  ;;  %v4426_v18 = vpop.f32.mrf.mxu1 }
  0xf6   :  { %v4430_v20 = vpop.f32.mrf.mxu0  ;;  %v4432_v21 = vpop.f32.mrf.mxu1 }
  0xf8   :  { %v4448_v27 = vpop.f32.mrf.mxu0  ;;  %v4450_v28 = vpop.f32.mrf.mxu1 }
  0xfa   :  { %v4454_v30 = vpop.f32.mrf.mxu0  ;;  %v4456_v31 = vpop.f32.mrf.mxu1  ;;  %3681 = vmatmul.mubr.bf16.gmra.mxu0 %v3898_v22  ;;  %3761 = vmatmul.mubr.bf16.gmra.mxu1 %v3899_v23  ;;  %v3906_v22 = vld [vmem:[%s5099_s2 + $0xd8] sm:$0xff]  }
  0xfb   :  { %3684 = vmatprep.mubr.bf16.mxu0 %v3900_v25  ;;  %3764 = vmatprep.mubr.bf16.mxu1 %v3901_v26  ;;  %v3907_v23 = vld [vmem:[%s5100_s3 + $0xd8] sm:$0xff]   ;;  %v3908_v26 = vld [vmem:[%s5099_s2 + $0xe0] sm:$0xff]  }
  0xfc   :  { %v4460_v33 = vpop.f32.mrf.mxu0  ;;  %v4462_v34 = vpop.f32.mrf.mxu1 }
  0xfe   :  { %v4466_v36 = vpop.f32.mrf.mxu0  ;;  %v4468_v37 = vpop.f32.mrf.mxu1 }
 0x100   :  { %v4484_v43 = vpop.f32.mrf.mxu0  ;;  %v4486_v44 = vpop.f32.mrf.mxu1 }
 0x102   :  { %v4490_v54 = vpop.f32.mrf.mxu0  ;;  %v4492_v55 = vpop.f32.mrf.mxu1  ;;  %3685 = vmatmul.mubr.bf16.gmra.mxu0 %v3902_v38  ;;  %3765 = vmatmul.mubr.bf16.gmra.mxu1 %v3903_v39  ;;  %v3909_v38 = vld [vmem:[%s5100_s3 + $0xe0] sm:$0xff]  }
 0x103   :  { %3688 = vmatprep.mubr.bf16.mxu0 %v3904_v41  ;;  %3768 = vmatprep.mubr.bf16.mxu1 %v3905_v42 }
 0x104   :  { %v4496_v58 = vpop.f32.mrf.mxu0  ;;  %v4498_v6 = vpop.f32.mrf.mxu1 }
 0x106   :  { %v4502_v9 = vpop.f32.mrf.mxu0  ;;  %v4504_v10 = vpop.f32.mrf.mxu1 }
 0x108   :  { %v4520_v39 = vpop.f32.mrf.mxu0  ;;  %v4522_v41 = vpop.f32.mrf.mxu1 }
 0x10a   :  { %v4526_v7 = vpop.f32.mrf.mxu0  ;;  %v4528_v57 = vpop.f32.mrf.mxu1  ;;  %3689 = vmatmul.mubr.bf16.gmra.mxu0 %v3906_v22  ;;  %3769 = vmatmul.mubr.bf16.gmra.mxu1 %v3907_v23  ;;  %v3910_v22 = vld [vmem:[%s5099_s2 + $0xe8] sm:$0xff]  }
 0x10b   :  { %3692 = vmatprep.mubr.bf16.mxu0 %v3908_v26  ;;  %3772 = vmatprep.mubr.bf16.mxu1 %v3909_v38  ;;  %v3911_v23 = vld [vmem:[%s5100_s3 + $0xe8] sm:$0xff]   ;;  %v3912_v38 = vld [vmem:[%s5099_s2 + $0xf0] sm:$0xff]  }
 0x10c   :  { %v4532_v45 = vpop.f32.mrf.mxu0  ;;  %v4534_v40 = vpop.f32.mrf.mxu1 }
 0x10e   :  { %v4538_v32 = vpop.f32.mrf.mxu0  ;;  %v4540_v42 = vpop.f32.mrf.mxu1 }
 0x110   :  { %v4556_v25 = vpop.f32.mrf.mxu0  ;;  %v4558_v29 = vpop.f32.mrf.mxu1 }
 0x111   :  { %5184 = vst [vmem:[#allocation2_spill] sm:$0xff] %v4556_v25  ;;  %5185 = vst [vmem:[#allocation3_spill] sm:$0xff] %v4558_v29 }
 0x112   :  { %v4562_v19 = vpop.f32.mrf.mxu0  ;;  %v4564_v16 = vpop.f32.mrf.mxu1  ;;  %3693 = vmatmul.mubr.bf16.gmra.mxu0 %v3910_v22  ;;  %3773 = vmatmul.mubr.bf16.gmra.mxu1 %v3911_v23  ;;  %v3914_v22 = vld [vmem:[%s5099_s2 + $0xf8] sm:$0xff]  }
 0x113   :  { %5186 = vst [vmem:[#allocation4_spill] sm:$0xff] %v4562_v19  ;;  %5187 = vst [vmem:[#allocation5_spill] sm:$0xff] %v4564_v16  ;;  %3696 = vmatprep.mubr.bf16.mxu0 %v3912_v38  ;;  %3776 = vmatprep.mubr.bf16.mxu1 %v3913_v35  ;;  %v3915_v23 = vld [vmem:[%s5100_s3 + $0xf8] sm:$0xff]   ;;  %v5268_v16 = vmax.f32 %v4358_v52, %v4360_v53 }
 0x114   :  { %v4568_v13 = vpop.f32.mrf.mxu0  ;;  %v4570_v8 = vpop.f32.mrf.mxu1 }
 0x115   :  { %5188 = vst [vmem:[#allocation6_spill] sm:$0xff] %v4568_v13  ;;  %5189 = vst [vmem:[#allocation7_spill] sm:$0xff] %v4570_v8 }
 0x116   :  { %v4574_v0 = vpop.f32.mrf.mxu0  ;;  %v4576_v24 = vpop.f32.mrf.mxu1 }
 0x117   :  { %5190 = vst [vmem:[#allocation8_spill] sm:$0xff] %v4574_v0  ;;  %5191 = vst [vmem:[#allocation9_spill] sm:$0xff] %v4576_v24 }
 0x118   :  { %v4586_v38 = vpop.f32.mrf.mxu0  ;;  %v4588_v26 = vpop.f32.mrf.mxu1 }
 0x119   :  { %5192 = vst [vmem:[#allocation10_spill] sm:$0xff] %v4586_v38  ;;  %5193 = vst [vmem:[#allocation11_spill] sm:$0xff] %v4588_v26  ;;  %v5267_v38 = vmax.f32 %v4352_v49, %v4354_v50 }
 0x11a   :  { %v4592_v61 = vpop.f32.mrf.mxu0  ;;  %v4594_v56 = vpop.f32.mrf.mxu1  ;;  %3697 = vmatmul.mubr.bf16.gmra.mxu0 %v3914_v22  ;;  %3777 = vmatmul.mubr.bf16.gmra.mxu1 %v3915_v23 }
 0x11b   :  { %5194 = vst [vmem:[#allocation12_spill] sm:$0xff] %v4592_v61  ;;  %5195 = vst [vmem:[#allocation13_spill] sm:$0xff] %v4594_v56  ;;  %v5266_v61 = vmax.f32 %v4346_v46, %v4348_v47  ;;  %v5269_v46 = vmax.f32 %v4376_v59, %v4378_v60 }
 0x11c   :  { %v4598_v48 = vpop.f32.mrf.mxu0  ;;  %v4600_v8 = vpop.f32.mrf.mxu1 }
 0x11d   :  { %5196 = vst [vmem:[#allocation14_spill] sm:$0xff] %v4598_v48  ;;  %5197 = vst [vmem:[#allocation15_spill] sm:$0xff] %v4600_v8 }
 0x11e   :  { %v4604_v24 = vpop.f32.mrf.mxu0  ;;  %v4606_v0 = vpop.f32.mrf.mxu1 }
 0x11f   :  { %5198 = vst [vmem:[#allocation16_spill] sm:$0xff] %v4604_v24  ;;  %5199 = vst [vmem:[#allocation17_spill] sm:$0xff] %v4606_v0 }
 0x120   :  { %v4610_v26 = vpop.f32.mrf.mxu0  ;;  %v4612_v22 = vpop.f32.mrf.mxu1 }
 0x121   :  { %5200 = vst [vmem:[#allocation18_spill] sm:$0xff] %v4610_v26  ;;  %5201 = vst [vmem:[#allocation19_spill] sm:$0xff] %v4612_v22 }
 0x122   :  { %v4616_v51 = vpop.f32.mrf.mxu0  ;;  %v4618_v56 = vpop.f32.mrf.mxu1 }
 0x123   :  { %5202 = vst [vmem:[#allocation20_spill] sm:$0xff] %v4616_v51  ;;  %5203 = vst [vmem:[#allocation21_spill] sm:$0xff] %v4618_v56 }
 0x124   :  { %v4622_v8 = vpop.f32.mrf.mxu0  ;;  %v4624_v48 = vpop.f32.mrf.mxu1 }
 0x125   :  { %5204 = vst [vmem:[#allocation22_spill] sm:$0xff] %v4622_v8  ;;  %5205 = vst [vmem:[#allocation23_spill] sm:$0xff] %v4624_v48 }
 0x126   :  { %v4628_v0 = vpop.f32.mrf.mxu0  ;;  %v4630_v24 = vpop.f32.mrf.mxu1 }
 0x127   :  { %5206 = vst [vmem:[#allocation24_spill] sm:$0xff] %v4628_v0  ;;  %5207 = vst [vmem:[#allocation25_spill] sm:$0xff] %v4630_v24 }
 0x128   :  { %v4634_v22 = vpop.f32.mrf.mxu0  ;;  %v4636_v26 = vpop.f32.mrf.mxu1 }
 0x129   :  { %5208 = vst [vmem:[#allocation26_spill] sm:$0xff] %v4634_v22  ;;  %5209 = vst [vmem:[#allocation27_spill] sm:$0xff] %v4636_v26 }
 0x12a   :  { %v4640_v56 = vpop.f32.mrf.mxu0  ;;  %v4642_v51 = vpop.f32.mrf.mxu1 }
 0x12b   :  { %5210 = vst [vmem:[#allocation28_spill] sm:$0xff] %v4640_v56  ;;  %5211 = vst [vmem:[#allocation29_spill] sm:$0xff] %v4642_v51 }
 0x12c   :  { %v4646_v48 = vpop.f32.mrf.mxu0  ;;  %v4648_v8 = vpop.f32.mrf.mxu1 }
 0x12d   :  { %5212 = vst [vmem:[#allocation30_spill] sm:$0xff] %v4646_v48  ;;  %5213 = vst [vmem:[#allocation31_spill] sm:$0xff] %v4648_v8 }
 0x12e   :  { %v4652_v24 = vpop.f32.mrf.mxu0  ;;  %v4654_v0 = vpop.f32.mrf.mxu1 }
 0x12f   :  { %5214 = vst [vmem:[#allocation32_spill] sm:$0xff] %v4652_v24  ;;  %5215 = vst [vmem:[#allocation33_spill] sm:$0xff] %v4654_v0 }
 0x130   :  { %v4658_v26 = vpop.f32.mrf.mxu0  ;;  %v4660_v22 = vpop.f32.mrf.mxu1 }
 0x131   :  { %5216 = vst [vmem:[#allocation34_spill] sm:$0xff] %v4658_v26  ;;  %5217 = vst [vmem:[#allocation35_spill] sm:$0xff] %v4660_v22 }
 0x132   :  { %v4664_v51 = vpop.f32.mrf.mxu0  ;;  %v4666_v56 = vpop.f32.mrf.mxu1 }
 0x133   :  { %5218 = vst [vmem:[#allocation36_spill] sm:$0xff] %v4664_v51  ;;  %5219 = vst [vmem:[#allocation37_spill] sm:$0xff] %v4666_v56 }
 0x134   :  { %v4670_v8 = vpop.f32.mrf.mxu0  ;;  %v4672_v48 = vpop.f32.mrf.mxu1 }
 0x135   :  { %5220 = vst [vmem:[#allocation38_spill] sm:$0xff] %v4670_v8  ;;  %5221 = vst [vmem:[#allocation39_spill] sm:$0xff] %v4672_v48 }
 0x136   :  { %v4676_v0 = vpop.f32.mrf.mxu0  ;;  %v4678_v24 = vpop.f32.mrf.mxu1 }
 0x137   :  { %5222 = vst [vmem:[#allocation40_spill] sm:$0xff] %v4676_v0  ;;  %5223 = vst [vmem:[#allocation41_spill] sm:$0xff] %v4678_v24 }
 0x138   :  { %v4682_v22 = vpop.f32.mrf.mxu0  ;;  %v4684_v26 = vpop.f32.mrf.mxu1 }
 0x139   :  { %5224 = vst [vmem:[#allocation42_spill] sm:$0xff] %v4682_v22  ;;  %5225 = vst [vmem:[#allocation43_spill] sm:$0xff] %v4684_v26 }
 0x13a   :  { %v4688_v56 = vpop.f32.mrf.mxu0  ;;  %v4690_v51 = vpop.f32.mrf.mxu1 }
 0x13b   :  { %5226 = vst [vmem:[#allocation44_spill] sm:$0xff] %v4688_v56  ;;  %5227 = vst [vmem:[#allocation45_spill] sm:$0xff] %v4690_v51 }
 0x13c   :  { %v4694_v48 = vpop.f32.mrf.mxu0  ;;  %v4696_v8 = vpop.f32.mrf.mxu1 }
 0x13d   :  { %5228 = vst [vmem:[#allocation46_spill] sm:$0xff] %v4694_v48  ;;  %5229 = vst [vmem:[#allocation47_spill] sm:$0xff] %v4696_v8 }
 0x13e   :  { %v4700_v24 = vpop.f32.mrf.mxu0  ;;  %v4702_v0 = vpop.f32.mrf.mxu1 }
 0x13f   :  { %5230 = vst [vmem:[#allocation48_spill] sm:$0xff] %v4700_v24  ;;  %5231 = vst [vmem:[#allocation49_spill] sm:$0xff] %v4702_v0 }
 0x140   :  { %v4706_v26 = vpop.f32.mrf.mxu0  ;;  %v4708_v22 = vpop.f32.mrf.mxu1 }
 0x141   :  { %5232 = vst [vmem:[#allocation50_spill] sm:$0xff] %v4706_v26  ;;  %5233 = vst [vmem:[#allocation51_spill] sm:$0xff] %v4708_v22 }
 0x142   :  { %v4712_v51 = vpop.f32.mrf.mxu0  ;;  %v4714_v56 = vpop.f32.mrf.mxu1 }
 0x143   :  { %5234 = vst [vmem:[#allocation52_spill] sm:$0xff] %v4712_v51  ;;  %5235 = vst [vmem:[#allocation53_spill] sm:$0xff] %v4714_v56 }
 0x144   :  { %v4718_v8 = vpop.f32.mrf.mxu0  ;;  %v4720_v48 = vpop.f32.mrf.mxu1 }
 0x145   :  { %5236 = vst [vmem:[#allocation54_spill] sm:$0xff] %v4718_v8  ;;  %5237 = vst [vmem:[#allocation55_spill] sm:$0xff] %v4720_v48 }
 0x146   :  { %v4724_v0 = vpop.f32.mrf.mxu0  ;;  %v4726_v24 = vpop.f32.mrf.mxu1 }
 0x147   :  { %5238 = vst [vmem:[#allocation56_spill] sm:$0xff] %v4724_v0  ;;  %5239 = vst [vmem:[#allocation57_spill] sm:$0xff] %v4726_v24 }
 0x148   :  { %v4730_v22 = vpop.f32.mrf.mxu0  ;;  %v4732_v26 = vpop.f32.mrf.mxu1 }
 0x149   :  { %5240 = vst [vmem:[#allocation58_spill] sm:$0xff] %v4730_v22  ;;  %5241 = vst [vmem:[#allocation59_spill] sm:$0xff] %v4732_v26 }
 0x14a   :  { %v4736_v56 = vpop.f32.mrf.mxu0  ;;  %v4738_v51 = vpop.f32.mrf.mxu1 }
 0x14b   :  { %5242 = vst [vmem:[#allocation60_spill] sm:$0xff] %v4736_v56  ;;  %5243 = vst [vmem:[#allocation61_spill] sm:$0xff] %v4738_v51 }
 0x14c   :  { %v4742_v48 = vpop.f32.mrf.mxu0  ;;  %v4744_v8 = vpop.f32.mrf.mxu1 }
 0x14d   :  { %5244 = vst [vmem:[#allocation62_spill] sm:$0xff] %v4742_v48  ;;  %5245 = vst [vmem:[#allocation63_spill] sm:$0xff] %v4744_v8 }
 0x14e   :  { %v4748_v24 = vpop.f32.mrf.mxu0  ;;  %v4750_v0 = vpop.f32.mrf.mxu1 }
 0x14f   :  { %5246 = vst [vmem:[#allocation64_spill] sm:$0xff] %v4748_v24  ;;  %5247 = vst [vmem:[#allocation65_spill] sm:$0xff] %v4750_v0 }
 0x150   :  { %v4754_v26 = vpop.f32.mrf.mxu0  ;;  %v4756_v22 = vpop.f32.mrf.mxu1 }
 0x151   :  { %5248 = vst [vmem:[#allocation66_spill] sm:$0xff] %v4754_v26  ;;  %5249 = vst [vmem:[#allocation67_spill] sm:$0xff] %v4756_v22 }
 0x152   :  { %v4760_v51 = vpop.f32.mrf.mxu0  ;;  %v4762_v56 = vpop.f32.mrf.mxu1 }
 0x153   :  { %5250 = vst [vmem:[#allocation68_spill] sm:$0xff] %v4760_v51  ;;  %5251 = vst [vmem:[#allocation69_spill] sm:$0xff] %v4762_v56 }
 0x154   :  { %v4766_v8 = vpop.f32.mrf.mxu0  ;;  %v4768_v48 = vpop.f32.mrf.mxu1 }
 0x155   :  { %5252 = vst [vmem:[#allocation70_spill] sm:$0xff] %v4766_v8  ;;  %5253 = vst [vmem:[#allocation71_spill] sm:$0xff] %v4768_v48 }
 0x156   :  { %v4772_v0 = vpop.f32.mrf.mxu0  ;;  %v4774_v24 = vpop.f32.mrf.mxu1 }
 0x157   :  { %5254 = vst [vmem:[#allocation72_spill] sm:$0xff] %v4772_v0  ;;  %5255 = vst [vmem:[#allocation73_spill] sm:$0xff] %v4774_v24 }
 0x158   :  { %v4778_v22 = vpop.f32.mrf.mxu0  ;;  %v4780_v26 = vpop.f32.mrf.mxu1 }
 0x159   :  { %5256 = vst [vmem:[#allocation74_spill] sm:$0xff] %v4778_v22  ;;  %5257 = vst [vmem:[#allocation75_spill] sm:$0xff] %v4780_v26 }
 0x15a   :  { %v4784_v56 = vpop.f32.mrf.mxu0  ;;  %v4786_v51 = vpop.f32.mrf.mxu1 }
 0x15b   :  { %5258 = vst [vmem:[#allocation76_spill] sm:$0xff] %v4784_v56  ;;  %5259 = vst [vmem:[#allocation77_spill] sm:$0xff] %v4786_v51 }
 0x15c   :  { %v4790_v48 = vpop.f32.mrf.mxu0  ;;  %v4792_v8 = vpop.f32.mrf.mxu1 }
 0x15d   :  { %5260 = vst [vmem:[#allocation78_spill] sm:$0xff] %v4790_v48  ;;  %5261 = vst [vmem:[#allocation79_spill] sm:$0xff] %v4792_v8 }
 0x15e   :  { %v4796_v24 = vpop.f32.mrf.mxu0  ;;  %v4798_v0 = vpop.f32.mrf.mxu1 }
 0x15f   :  { %5262 = vst [vmem:[#allocation80_spill] sm:$0xff] %v4796_v24  ;;  %5263 = vst [vmem:[#allocation81_spill] sm:$0xff] %v4798_v0 }
 0x160   :  { %v4802_v26 = vpop.f32.mrf.mxu0  ;;  %v4804_v22 = vpop.f32.mrf.mxu1 }
 0x161   :  { %5264 = vst [vmem:[#allocation82_spill] sm:$0xff] %v4802_v26  ;;  %5265 = vst [vmem:[#allocation83_spill] sm:$0xff] %v4804_v22 }
 0x162   :  { %v3638_v51 = vpop.f32.mrf.mxu0  ;;  %v3718_v56 = vpop.f32.mrf.mxu1 }
 0x163   :  { %v1786_v23 = vmax.f32 %v5266_v61, %v3638_v51 }
 0x164   :  { %v1529_v8 = vpop.f32.mrf.mxu0  ;;  %v2138_v48 = vpop.f32.mrf.mxu1 }
 0x165   :  { %v1784_v13 = vmax.f32 %v5267_v38, %v1529_v8  ;;  %v2395_v24 = vmax.f32 %v1786_v23, %v3718_v56  ;;  %v5270_v56 = vmax.f32 %v4382_v62, %v4384_v63  ;;  %v5272_v62 = vmax.f32 %v4394_v4, %v4396_v5 }
 0x166   :  { %v3639_v35 = vpop.f32.mrf.mxu0  ;;  %v3719_v0 = vpop.f32.mrf.mxu1  ;;  %v5274_v4 = vmax.f32 %v4418_v14, %v4420_v15  ;;  %v5276_v14 = vmax.f32 %v4430_v20, %v4432_v21  ;;  %v5278_v20 = vmax.f32 %v4454_v30, %v4456_v31  ;;  %v5280_v30 = vmax.f32 %v4466_v36, %v4468_v37 }
 0x167   :  { %v1787_v19 = vmax.f32 %v5268_v16, %v3639_v35  ;;  %v2393_v26 = vmax.f32 %v1784_v13, %v2138_v48  ;;  %v2459_v25 = vmax.f32 %v2395_v24, 0.0  ;;  %v5271_v48 = vmax.f32 %v4388_v1, %v4390_v2 }
 0x168   :  { %v1532_v3 = vpop.f32.mrf.mxu0  ;;  %v2141_v22 = vpop.f32.mrf.mxu1  ;;  %v5282_v36 = vmax.f32 %v4490_v54, %v4492_v55  ;;  %v5284_v54 = vmax.f32 %v4502_v9, %v4504_v10  ;;  %v5286_v9 = vmax.f32 %v4526_v7, %v4528_v57  ;;  %v5288_v57 = vmax.f32 %v4538_v32, %v4540_v42  ;;  %v5293_v32 = vld [vmem:[#allocation5_spill] sm:$0xff] }
 0x169   :  { %v2396_v29 = vmax.f32 %v1787_v19, %v3719_v0  ;;  %v1785_v47 = vmax.f32 %v5269_v46, %v1532_v3  ;;  %v2457_v53 = vmax.f32 %v2393_v26, 0.0 }
 0x16a   :  { %v3642_v51 = vpop.f32.mrf.mxu0  ;;  %v3722_v61 = vpop.f32.mrf.mxu1 }
 0x16b   :  { %v2460_v49 = vmax.f32 %v2396_v29, 0.0  ;;  %v2394_v50 = vmax.f32 %v1785_v47, %v2141_v22  ;;  %v1790_v8 = vmax.f32 %v5270_v56, %v3642_v51  ;;  %v5273_v29 = vmax.f32 %v4412_v11, %v4414_v12 }
 0x16c   :  { %v1545_v38 = vpop.f32.mrf.mxu0  ;;  %v2154_v52 = vpop.f32.mrf.mxu1 }
 0x16d   :  { %v3117_v16 = vpack.c.bf16 %v2460_v49, %v2459_v25  ;;  %v2458_v35 = vmax.f32 %v2394_v50, 0.0  ;;  %v1788_v0 = vmax.f32 %v5271_v48, %v1545_v38  ;;  %v2399_v13 = vmax.f32 %v1790_v8, %v3722_v61 }
 0x16e   :  { %v3643_v59 = vpop.f32.mrf.mxu0  ;;  %v3723_v60 = vpop.f32.mrf.mxu1  ;;  %v5275_v8 = vmax.f32 %v4424_v17, %v4426_v18  ;;  %v5277_v48 = vmax.f32 %v4448_v27, %v4450_v28 }
 0x16f   :  { %3269 = vst [vmem:[%s5101_s5 + $0x8] sm:$0xff] %v3117_v16   ;;  %v3112_v3 = vpack.c.bf16 %v2458_v35, %v2457_v53  ;;  %v1791_v63 = vmax.f32 %v5272_v62, %v3643_v59  ;;  %v2397_v1 = vmax.f32 %v1788_v0, %v2154_v52  ;;  %v2463_v23 = vmax.f32 %v2399_v13, 0.0 }
 0x170   :  { %v1548_v19 = vpop.f32.mrf.mxu0  ;;  %v2157_v24 = vpop.f32.mrf.mxu1 }
 0x171   :  { %3113 = vst [vmem:[%s5101_s5] sm:$0xff] %v3112_v3   ;;  %v2400_v2 = vmax.f32 %v1791_v63, %v3723_v60  ;;  %v1789_v25 = vmax.f32 %v5273_v29, %v1548_v19  ;;  %v2461_v49 = vmax.f32 %v2397_v1, 0.0  ;;  %v5279_v29 = vmax.f32 %v4460_v33, %v4462_v34 }
 0x172   :  { %v3646_v26 = vpop.f32.mrf.mxu0  ;;  %v3726_v22 = vpop.f32.mrf.mxu1 }
 0x173   :  { %v2464_v46 = vmax.f32 %v2400_v2, 0.0  ;;  %v2398_v47 = vmax.f32 %v1789_v25, %v2157_v24  ;;  %v1794_v5 = vmax.f32 %v5274_v4, %v3646_v26 }
 0x174   :  { %v1561_v51 = vpop.f32.mrf.mxu0  ;;  %v2170_v61 = vpop.f32.mrf.mxu1 }
 0x175   :  { %v3127_v50 = vpack.c.bf16 %v2464_v46, %v2463_v23  ;;  %v2462_v56 = vmax.f32 %v2398_v47, 0.0  ;;  %v1792_v38 = vmax.f32 %v5275_v8, %v1561_v51  ;;  %v2403_v53 = vmax.f32 %v1794_v5, %v3726_v22 }
 0x176   :  { %v3647_v11 = vpop.f32.mrf.mxu0  ;;  %v3727_v12 = vpop.f32.mrf.mxu1  ;;  %v5281_v47 = vmax.f32 %v4484_v43, %v4486_v44 }
 0x177   :  { %3271 = vst [vmem:[%s5101_s5 + $0x18] sm:$0xff] %v3127_v50   ;;  %v3122_v52 = vpack.c.bf16 %v2462_v56, %v2461_v49  ;;  %v1795_v15 = vmax.f32 %v5276_v14, %v3647_v11  ;;  %v2401_v17 = vmax.f32 %v1792_v38, %v2170_v61  ;;  %v2467_v3 = vmax.f32 %v2403_v53, 0.0 }
 0x178   :  { %v1564_v16 = vpop.f32.mrf.mxu0  ;;  %v2173_v35 = vpop.f32.mrf.mxu1 }
 0x179   :  { %3270 = vst [vmem:[%s5101_s5 + $0x10] sm:$0xff] %v3122_v52   ;;  %v2404_v18 = vmax.f32 %v1795_v15, %v3727_v12  ;;  %v1793_v0 = vmax.f32 %v5277_v48, %v1564_v16  ;;  %v2465_v24 = vmax.f32 %v2401_v17, 0.0  ;;  %v5283_v52 = vmax.f32 %v4496_v58, %v4498_v6 }
 0x17a   :  { %v3650_v59 = vpop.f32.mrf.mxu0  ;;  %v3730_v60 = vpop.f32.mrf.mxu1  ;;  %v5285_v17 = vmax.f32 %v4520_v39, %v4522_v41 }
 0x17b   :  { %v2468_v13 = vmax.f32 %v2404_v18, 0.0  ;;  %v2402_v62 = vmax.f32 %v1793_v0, %v2173_v35  ;;  %v1798_v21 = vmax.f32 %v5278_v20, %v3650_v59 }
 0x17c   :  { %v1577_v63 = vpop.f32.mrf.mxu0  ;;  %v2186_v19 = vpop.f32.mrf.mxu1 }
 0x17d   :  { %v3137_v1 = vpack.c.bf16 %v2468_v13, %v2467_v3  ;;  %v2466_v2 = vmax.f32 %v2402_v62, 0.0  ;;  %v1796_v25 = vmax.f32 %v5279_v29, %v1577_v63  ;;  %v2407_v22 = vmax.f32 %v1798_v21, %v3730_v60 }
 0x17e   :  { %v3651_v27 = vpop.f32.mrf.mxu0  ;;  %v3731_v28 = vpop.f32.mrf.mxu1 }
 0x17f   :  { %3273 = vst [vmem:[%s5101_s5 + $0x28] sm:$0xff] %v3137_v1   ;;  %v3132_v26 = vpack.c.bf16 %v2466_v2, %v2465_v24  ;;  %v1799_v31 = vmax.f32 %v5280_v30, %v3651_v27  ;;  %v2405_v33 = vmax.f32 %v1796_v25, %v2186_v19  ;;  %v2471_v61 = vmax.f32 %v2407_v22, 0.0  ;;  %v5289_v27 = vld [vmem:[#allocation2_spill] sm:$0xff] }
 0x180   :  { %v1580_v23 = vpop.f32.mrf.mxu0  ;;  %v2189_v46 = vpop.f32.mrf.mxu1  ;;  %v5287_v19 = vmax.f32 %v4532_v45, %v4534_v40 }
 0x181   :  { %3272 = vst [vmem:[%s5101_s5 + $0x20] sm:$0xff] %v3132_v26   ;;  %v2408_v34 = vmax.f32 %v1799_v31, %v3731_v28  ;;  %v1797_v4 = vmax.f32 %v5281_v47, %v1580_v23  ;;  %v2469_v38 = vmax.f32 %v2405_v33, 0.0  ;;  %v5290_v28 = vld [vmem:[#allocation3_spill] sm:$0xff] }
 0x182   :  { %v3654_v5 = vpop.f32.mrf.mxu0  ;;  %v3734_v51 = vpop.f32.mrf.mxu1  ;;  %v5291_v26 = vmax.f32 %v5289_v27, %v5290_v28 }
 0x183   :  { %v2472_v49 = vmax.f32 %v2408_v34, 0.0  ;;  %v2406_v50 = vmax.f32 %v1797_v4, %v2189_v46  ;;  %v1802_v37 = vmax.f32 %v5282_v36, %v3654_v5  ;;  %v5292_v34 = vld [vmem:[#allocation4_spill] sm:$0xff]  ;;  %v5296_v36 = vld [vmem:[#allocation7_spill] sm:$0xff] }
 0x184   :  { %v1593_v56 = vpop.f32.mrf.mxu0  ;;  %v2202_v8 = vpop.f32.mrf.mxu1  ;;  %v5294_v42 = vmax.f32 %v5292_v34, %v5293_v32 }
 0x185   :  { %v3147_v11 = vpack.c.bf16 %v2472_v49, %v2471_v61  ;;  %v2470_v12 = vmax.f32 %v2406_v50, 0.0  ;;  %v1800_v53 = vmax.f32 %v5283_v52, %v1593_v56  ;;  %v2411_v15 = vmax.f32 %v1802_v37, %v3734_v51  ;;  %v5295_v50 = vld [vmem:[#allocation6_spill] sm:$0xff]  ;;  %v5298_v52 = vld [vmem:[#allocation8_spill] sm:$0xff] }
 0x186   :  { %v3655_v43 = vpop.f32.mrf.mxu0  ;;  %v3735_v44 = vpop.f32.mrf.mxu1  ;;  %v5297_v37 = vmax.f32 %v5295_v50, %v5296_v36 }
 0x187   :  { %3275 = vst [vmem:[%s5101_s5 + $0x38] sm:$0xff] %v3147_v11   ;;  %v3142_v14 = vpack.c.bf16 %v2470_v12, %v2469_v38  ;;  %v1803_v55 = vmax.f32 %v5284_v54, %v3655_v43  ;;  %v2409_v58 = vmax.f32 %v1800_v53, %v2202_v8  ;;  %v2475_v59 = vmax.f32 %v2411_v15, 0.0  ;;  %v5299_v53 = vld [vmem:[#allocation9_spill] sm:$0xff] }
 0x188   :  { %v1596_v16 = vpop.f32.mrf.mxu0  ;;  %v2205_v35 = vpop.f32.mrf.mxu1  ;;  %v5300_v43 = vmax.f32 %v5298_v52, %v5299_v53 }
 0x189   :  { %3274 = vst [vmem:[%s5101_s5 + $0x30] sm:$0xff] %v3142_v14   ;;  %v2412_v6 = vmax.f32 %v1803_v55, %v3735_v44  ;;  %v1801_v18 = vmax.f32 %v5285_v17, %v1596_v16  ;;  %v2473_v20 = vmax.f32 %v2409_v58, 0.0  ;;  %v5301_v16 = vld [vmem:[#allocation10_spill] sm:$0xff] }
 0x18a   :  { %v3658_v48 = vpop.f32.mrf.mxu0  ;;  %v3738_v0 = vpop.f32.mrf.mxu1 }
 0x18b   :  { %v2476_v60 = vmax.f32 %v2412_v6, 0.0  ;;  %v2410_v3 = vmax.f32 %v1801_v18, %v2205_v35  ;;  %v1806_v10 = vmax.f32 %v5286_v9, %v3658_v48  ;;  %v5302_v35 = vld [vmem:[#allocation11_spill] sm:$0xff] }
 0x18c   :  { %v1609_v13 = vpop.f32.mrf.mxu0  ;;  %v2218_v62 = vpop.f32.mrf.mxu1  ;;  %v5303_v58 = vmax.f32 %v5301_v16, %v5302_v35 }
 0x18d   :  { %v3157_v21 = vpack.c.bf16 %v2476_v60, %v2475_v59  ;;  %v2474_v63 = vmax.f32 %v2410_v3, 0.0  ;;  %v1804_v24 = vmax.f32 %v5287_v19, %v1609_v13  ;;  %v2415_v2 = vmax.f32 %v1806_v10, %v3738_v0  ;;  %v5304_v60 = vld [vmem:[#allocation12_spill] sm:$0xff]  ;;  %v5305_v3 = vld [vmem:[#allocation13_spill] sm:$0xff]  ;;  %v5307_v19 = vld [vmem:[#allocation14_spill] sm:$0xff] }
 0x18e   :  { %v3659_v39 = vpop.f32.mrf.mxu0  ;;  %v3739_v41 = vpop.f32.mrf.mxu1  ;;  %v5306_v9 = vmax.f32 %v5304_v60, %v5305_v3 }
 0x18f   :  { %3277 = vst [vmem:[%s5101_s5 + $0x48] sm:$0xff] %v3157_v21   ;;  %v3152_v1 = vpack.c.bf16 %v2474_v63, %v2473_v20  ;;  %v1807_v7 = vmax.f32 %v5288_v57, %v3659_v39  ;;  %v2413_v40 = vmax.f32 %v1804_v24, %v2218_v62  ;;  %v2479_v23 = vmax.f32 %v2415_v2, 0.0  ;;  %v5308_v24 = vld [vmem:[#allocation15_spill] sm:$0xff] }
 0x190   :  { %v1612_v29 = vpop.f32.mrf.mxu0  ;;  %v2221_v25 = vpop.f32.mrf.mxu1  ;;  %v5309_v39 = vmax.f32 %v5307_v19, %v5308_v24 }
 0x191   :  { %3276 = vst [vmem:[%s5101_s5 + $0x40] sm:$0xff] %v3152_v1   ;;  %v2416_v45 = vmax.f32 %v1807_v7, %v3739_v41  ;;  %v1805_v22 = vmax.f32 %v5291_v26, %v1612_v29  ;;  %v2477_v51 = vmax.f32 %v2413_v40, 0.0  ;;  %v5310_v29 = vld [vmem:[#allocation16_spill] sm:$0xff] }
 0x192   :  { %v3662_v30 = vpop.f32.mrf.mxu0  ;;  %v3742_v31 = vpop.f32.mrf.mxu1 }
 0x193   :  { %v2480_v46 = vmax.f32 %v2416_v45, 0.0  ;;  %v2414_v33 = vmax.f32 %v1805_v22, %v2221_v25  ;;  %v1810_v47 = vmax.f32 %v5294_v42, %v3662_v30  ;;  %v5311_v25 = vld [vmem:[#allocation17_spill] sm:$0xff]  ;;  %v5313_v30 = vld [vmem:[#allocation18_spill] sm:$0xff] }
 0x194   :  { %v1625_v4 = vpop.f32.mrf.mxu0  ;;  %v2234_v5 = vpop.f32.mrf.mxu1  ;;  %v5312_v40 = vmax.f32 %v5310_v29, %v5311_v25 }
 0x195   :  { %v3167_v61 = vpack.c.bf16 %v2480_v46, %v2479_v23  ;;  %v2478_v49 = vmax.f32 %v2414_v33, 0.0  ;;  %v1808_v56 = vmax.f32 %v5297_v37, %v1625_v4  ;;  %v2419_v12 = vmax.f32 %v1810_v47, %v3742_v31  ;;  %v5314_v31 = vld [vmem:[#allocation19_spill] sm:$0xff]  ;;  %v5316_v4 = vld [vmem:[#allocation20_spill] sm:$0xff] }
 0x196   :  { %v3663_v8 = vpop.f32.mrf.mxu0  ;;  %v3743_v38 = vpop.f32.mrf.mxu1  ;;  %v5315_v23 = vmax.f32 %v5313_v30, %v5314_v31 }
 0x197   :  { %3279 = vst [vmem:[%s5101_s5 + $0x58] sm:$0xff] %v3167_v61   ;;  %v3162_v11 = vpack.c.bf16 %v2478_v49, %v2477_v51  ;;  %v1811_v44 = vmax.f32 %v5300_v43, %v3663_v8  ;;  %v2417_v54 = vmax.f32 %v1808_v56, %v2234_v5  ;;  %v2483_v48 = vmax.f32 %v2419_v12, 0.0  ;;  %v5317_v5 = vld [vmem:[#allocation21_spill] sm:$0xff]  ;;  %v5319_v8 = vld [vmem:[#allocation22_spill] sm:$0xff] }
 0x198   :  { %v1628_v14 = vpop.f32.mrf.mxu0  ;;  %v2237_v15 = vpop.f32.mrf.mxu1  ;;  %v5318_v51 = vmax.f32 %v5316_v4, %v5317_v5 }
 0x199   :  { %3278 = vst [vmem:[%s5101_s5 + $0x50] sm:$0xff] %v3162_v11   ;;  %v2420_v55 = vmax.f32 %v1811_v44, %v3743_v38  ;;  %v1809_v6 = vmax.f32 %v5303_v58, %v1628_v14  ;;  %v2481_v20 = vmax.f32 %v2417_v54, 0.0  ;;  %v5320_v38 = vld [vmem:[#allocation23_spill] sm:$0xff]  ;;  %v5322_v14 = vld [vmem:[#allocation24_spill] sm:$0xff] }
 0x19a   :  { %v3666_v17 = vpop.f32.mrf.mxu0  ;;  %v3746_v18 = vpop.f32.mrf.mxu1  ;;  %v5321_v11 = vmax.f32 %v5319_v8, %v5320_v38 }
 0x19b   :  { %v2484_v0 = vmax.f32 %v2420_v55, 0.0  ;;  %v2418_v59 = vmax.f32 %v1809_v6, %v2237_v15  ;;  %v1814_v10 = vmax.f32 %v5306_v9, %v3666_v17  ;;  %v5323_v15 = vld [vmem:[#allocation25_spill] sm:$0xff]  ;;  %v5325_v17 = vld [vmem:[#allocation26_spill] sm:$0xff] }
 0x19c   :  { %v1641_v13 = vpop.f32.mrf.mxu0  ;;  %v2250_v62 = vpop.f32.mrf.mxu1  ;;  %v5324_v54 = vmax.f32 %v5322_v14, %v5323_v15 }
 0x19d   :  { %v3177_v21 = vpack.c.bf16 %v2484_v0, %v2483_v48  ;;  %v2482_v63 = vmax.f32 %v2418_v59, 0.0  ;;  %v1812_v41 = vmax.f32 %v5309_v39, %v1641_v13  ;;  %v2423_v7 = vmax.f32 %v1814_v10, %v3746_v18  ;;  %v5326_v18 = vld [vmem:[#allocation27_spill] sm:$0xff]  ;;  %v5328_v13 = vld [vmem:[#allocation28_spill] sm:$0xff] }
 0x19e   :  { %v3667_v1 = vpop.f32.mrf.mxu0  ;;  %v3747_v2 = vpop.f32.mrf.mxu1  ;;  %v5327_v48 = vmax.f32 %v5325_v17, %v5326_v18 }
 0x19f   :  { %3281 = vst [vmem:[%s5101_s5 + $0x68] sm:$0xff] %v3177_v21   ;;  %v3172_v57 = vpack.c.bf16 %v2482_v63, %v2481_v20  ;;  %v1815_v45 = vmax.f32 %v5312_v40, %v3667_v1  ;;  %v2421_v26 = vmax.f32 %v1812_v41, %v2250_v62  ;;  %v2487_v32 = vmax.f32 %v2423_v7, 0.0  ;;  %v5329_v62 = vld [vmem:[#allocation29_spill] sm:$0xff]  ;;  %v5331_v1 = vld [vmem:[#allocation30_spill] sm:$0xff] }
 0x1a0   :  { %v1644_v27 = vpop.f32.mrf.mxu0  ;;  %v2253_v28 = vpop.f32.mrf.mxu1  ;;  %v5330_v20 = vmax.f32 %v5328_v13, %v5329_v62 }
 0x1a1   :  { %3280 = vst [vmem:[%s5101_s5 + $0x60] sm:$0xff] %v3172_v57   ;;  %v2424_v22 = vmax.f32 %v1815_v45, %v3747_v2  ;;  %v1813_v46 = vmax.f32 %v5315_v23, %v1644_v27  ;;  %v2485_v36 = vmax.f32 %v2421_v26, 0.0  ;;  %v5332_v2 = vld [vmem:[#allocation31_spill] sm:$0xff]  ;;  %v5334_v27 = vld [vmem:[#allocation32_spill] sm:$0xff] }
 0x1a2   :  { %v3670_v33 = vpop.f32.mrf.mxu0  ;;  %v3750_v34 = vpop.f32.mrf.mxu1  ;;  %v5333_v57 = vmax.f32 %v5331_v1, %v5332_v2 }
 0x1a3   :  { %v2488_v42 = vmax.f32 %v2424_v22, 0.0  ;;  %v2422_v47 = vmax.f32 %v1813_v46, %v2253_v28  ;;  %v1818_v61 = vmax.f32 %v5318_v51, %v3670_v33  ;;  %v5335_v28 = vld [vmem:[#allocation33_spill] sm:$0xff]  ;;  %v5337_v33 = vld [vmem:[#allocation34_spill] sm:$0xff] }
 0x1a4   :  { %v1657_v49 = vpop.f32.mrf.mxu0  ;;  %v2266_v50 = vpop.f32.mrf.mxu1  ;;  %v5336_v26 = vmax.f32 %v5334_v27, %v5335_v28 }
 0x1a5   :  { %v3187_v37 = vpack.c.bf16 %v2488_v42, %v2487_v32  ;;  %v2486_v56 = vmax.f32 %v2422_v47, 0.0  ;;  %v1816_v12 = vmax.f32 %v5321_v11, %v1657_v49  ;;  %v2427_v44 = vmax.f32 %v1818_v61, %v3750_v34  ;;  %v5338_v34 = vld [vmem:[#allocation35_spill] sm:$0xff]  ;;  %v5340_v49 = vld [vmem:[#allocation36_spill] sm:$0xff] }
 0x1a6   :  { %v3671_v52 = vpop.f32.mrf.mxu0  ;;  %v3751_v53 = vpop.f32.mrf.mxu1  ;;  %v5339_v32 = vmax.f32 %v5337_v33, %v5338_v34 }
 0x1a7   :  { %3283 = vst [vmem:[%s5101_s5 + $0x78] sm:$0xff] %v3187_v37   ;;  %v3182_v43 = vpack.c.bf16 %v2486_v56, %v2485_v36  ;;  %v1819_v55 = vmax.f32 %v5324_v54, %v3671_v52  ;;  %v2425_v58 = vmax.f32 %v1816_v12, %v2266_v50  ;;  %v2491_v3 = vmax.f32 %v2427_v44, 0.0  ;;  %v5341_v50 = vld [vmem:[#allocation37_spill] sm:$0xff]  ;;  %v5343_v52 = vld [vmem:[#allocation38_spill] sm:$0xff] }
 0x1a8   :  { %v1660_v16 = vpop.f32.mrf.mxu0  ;;  %v2269_v35 = vpop.f32.mrf.mxu1  ;;  %v5342_v36 = vmax.f32 %v5340_v49, %v5341_v50 }
 0x1a9   :  { %3282 = vst [vmem:[%s5101_s5 + $0x70] sm:$0xff] %v3182_v43   ;;  %v2428_v6 = vmax.f32 %v1819_v55, %v3751_v53  ;;  %v1817_v0 = vmax.f32 %v5327_v48, %v1660_v16  ;;  %v2489_v24 = vmax.f32 %v2425_v58, 0.0  ;;  %v5344_v53 = vld [vmem:[#allocation39_spill] sm:$0xff]  ;;  %v5346_v16 = vld [vmem:[#allocation40_spill] sm:$0xff] }
 0x1aa   :  { %v3674_v59 = vpop.f32.mrf.mxu0  ;;  %v3754_v60 = vpop.f32.mrf.mxu1  ;;  %v5345_v43 = vmax.f32 %v5343_v52, %v5344_v53 }
 0x1ab   :  { %v2492_v9 = vmax.f32 %v2428_v6, 0.0  ;;  %v2426_v10 = vmax.f32 %v1817_v0, %v2269_v35  ;;  %v1822_v21 = vmax.f32 %v5330_v20, %v3674_v59  ;;  %v5347_v35 = vld [vmem:[#allocation41_spill] sm:$0xff]  ;;  %v5349_v59 = vld [vmem:[#allocation42_spill] sm:$0xff] }
 0x1ac   :  { %v1673_v63 = vpop.f32.mrf.mxu0  ;;  %v2282_v19 = vpop.f32.mrf.mxu1  ;;  %v5348_v58 = vmax.f32 %v5346_v16, %v5347_v35 }
 0x1ad   :  { %v3197_v39 = vpack.c.bf16 %v2492_v9, %v2491_v3  ;;  %v2490_v41 = vmax.f32 %v2426_v10, 0.0  ;;  %v1820_v7 = vmax.f32 %v5333_v57, %v1673_v63  ;;  %v2431_v45 = vmax.f32 %v1822_v21, %v3754_v60  ;;  %v5350_v60 = vld [vmem:[#allocation43_spill] sm:$0xff]  ;;  %v5352_v63 = vld [vmem:[#allocation44_spill] sm:$0xff] }
 0x1ae   :  { %v3675_v29 = vpop.f32.mrf.mxu0  ;;  %v3755_v25 = vpop.f32.mrf.mxu1  ;;  %v5351_v3 = vmax.f32 %v5349_v59, %v5350_v60 }
 0x1af   :  { %3285 = vst [vmem:[%s5101_s5 + $0x88] sm:$0xff] %v3197_v39   ;;  %v3192_v40 = vpack.c.bf16 %v2490_v41, %v2489_v24  ;;  %v1823_v22 = vmax.f32 %v5336_v26, %v3675_v29  ;;  %v2429_v23 = vmax.f32 %v1820_v7, %v2282_v19  ;;  %v2495_v5 = vmax.f32 %v2431_v45, 0.0  ;;  %v5353_v19 = vld [vmem:[#allocation45_spill] sm:$0xff]  ;;  %v5355_v29 = vld [vmem:[#allocation46_spill] sm:$0xff] }
 0x1b0   :  { %v1676_v30 = vpop.f32.mrf.mxu0  ;;  %v2285_v31 = vpop.f32.mrf.mxu1  ;;  %v5354_v24 = vmax.f32 %v5352_v63, %v5353_v19 }
 0x1b1   :  { %3284 = vst [vmem:[%s5101_s5 + $0x80] sm:$0xff] %v3192_v40   ;;  %v2432_v46 = vmax.f32 %v1823_v22, %v3755_v25  ;;  %v1821_v42 = vmax.f32 %v5339_v32, %v1676_v30  ;;  %v2493_v38 = vmax.f32 %v2429_v23, 0.0  ;;  %v5356_v25 = vld [vmem:[#allocation47_spill] sm:$0xff]  ;;  %v5358_v30 = vld [vmem:[#allocation48_spill] sm:$0xff] }
 0x1b2   :  { %v3678_v47 = vpop.f32.mrf.mxu0  ;;  %v3758_v4 = vpop.f32.mrf.mxu1  ;;  %v5357_v40 = vmax.f32 %v5355_v29, %v5356_v25 }
 0x1b3   :  { %v2496_v51 = vmax.f32 %v2432_v46, 0.0  ;;  %v2430_v61 = vmax.f32 %v1821_v42, %v2285_v31  ;;  %v1826_v37 = vmax.f32 %v5342_v36, %v3678_v47  ;;  %v5359_v31 = vld [vmem:[#allocation49_spill] sm:$0xff]  ;;  %v5361_v47 = vld [vmem:[#allocation50_spill] sm:$0xff] }
 0x1b4   :  { %v1689_v56 = vpop.f32.mrf.mxu0  ;;  %v2298_v8 = vpop.f32.mrf.mxu1  ;;  %v5360_v23 = vmax.f32 %v5358_v30, %v5359_v31 }
 0x1b5   :  { %v3207_v11 = vpack.c.bf16 %v2496_v51, %v2495_v5  ;;  %v2494_v12 = vmax.f32 %v2430_v61, 0.0  ;;  %v1824_v44 = vmax.f32 %v5345_v43, %v1689_v56  ;;  %v2435_v55 = vmax.f32 %v1826_v37, %v3758_v4  ;;  %v5362_v4 = vld [vmem:[#allocation51_spill] sm:$0xff]  ;;  %v5364_v56 = vld [vmem:[#allocation52_spill] sm:$0xff] }
 0x1b6   :  { %v3679_v14 = vpop.f32.mrf.mxu0  ;;  %v3759_v15 = vpop.f32.mrf.mxu1  ;;  %v5363_v5 = vmax.f32 %v5361_v47, %v5362_v4 }
 0x1b7   :  { %3287 = vst [vmem:[%s5101_s5 + $0x98] sm:$0xff] %v3207_v11   ;;  %v3202_v54 = vpack.c.bf16 %v2494_v12, %v2493_v38  ;;  %v1827_v6 = vmax.f32 %v5348_v58, %v3679_v14  ;;  %v2433_v48 = vmax.f32 %v1824_v44, %v2298_v8  ;;  %v2499_v62 = vmax.f32 %v2435_v55, 0.0  ;;  %v5365_v8 = vld [vmem:[#allocation53_spill] sm:$0xff]  ;;  %v5367_v14 = vld [vmem:[#allocation54_spill] sm:$0xff] }
 0x1b8   :  { %v1692_v17 = vpop.f32.mrf.mxu0  ;;  %v2301_v18 = vpop.f32.mrf.mxu1  ;;  %v5366_v38 = vmax.f32 %v5364_v56, %v5365_v8 }
 0x1b9   :  { %3286 = vst [vmem:[%s5101_s5 + $0x90] sm:$0xff] %v3202_v54   ;;  %v2436_v0 = vmax.f32 %v1827_v6, %v3759_v15  ;;  %v1825_v9 = vmax.f32 %v5351_v3, %v1692_v17  ;;  %v2497_v2 = vmax.f32 %v2433_v48, 0.0  ;;  %v5368_v15 = vld [vmem:[#allocation55_spill] sm:$0xff]  ;;  %v5370_v17 = vld [vmem:[#allocation56_spill] sm:$0xff] }
 0x1ba   :  { %v3682_v10 = vpop.f32.mrf.mxu0  ;;  %v3762_v13 = vpop.f32.mrf.mxu1  ;;  %v5369_v54 = vmax.f32 %v5367_v14, %v5368_v15 }
 0x1bb   :  { %v2500_v20 = vmax.f32 %v2436_v0, 0.0  ;;  %v2434_v21 = vmax.f32 %v1825_v9, %v2301_v18  ;;  %v1830_v39 = vmax.f32 %v5354_v24, %v3682_v10  ;;  %v5371_v18 = vld [vmem:[#allocation57_spill] sm:$0xff]  ;;  %v5373_v10 = vld [vmem:[#allocation58_spill] sm:$0xff] }
 0x1bc   :  { %v1705_v41 = vpop.f32.mrf.mxu0  ;;  %v2314_v1 = vpop.f32.mrf.mxu1  ;;  %v5372_v48 = vmax.f32 %v5370_v17, %v5371_v18 }
 0x1bd   :  { %v3217_v57 = vpack.c.bf16 %v2500_v20, %v2499_v62  ;;  %v2498_v7 = vmax.f32 %v2434_v21, 0.0  ;;  %v1828_v45 = vmax.f32 %v5357_v40, %v1705_v41  ;;  %v2439_v22 = vmax.f32 %v1830_v39, %v3762_v13  ;;  %v5374_v13 = vld [vmem:[#allocation59_spill] sm:$0xff]  ;;  %v5376_v41 = vld [vmem:[#allocation60_spill] sm:$0xff] }
 0x1be   :  { %v3683_v27 = vpop.f32.mrf.mxu0  ;;  %v3763_v28 = vpop.f32.mrf.mxu1  ;;  %v5375_v62 = vmax.f32 %v5373_v10, %v5374_v13 }
 0x1bf   :  { %3289 = vst [vmem:[%s5101_s5 + $0xa8] sm:$0xff] %v3217_v57   ;;  %v3212_v26 = vpack.c.bf16 %v2498_v7, %v2497_v2  ;;  %v1831_v46 = vmax.f32 %v5360_v23, %v3683_v27  ;;  %v2437_v32 = vmax.f32 %v1828_v45, %v2314_v1  ;;  %v2503_v50 = vmax.f32 %v2439_v22, 0.0  ;;  %v5377_v1 = vld [vmem:[#allocation61_spill] sm:$0xff]  ;;  %v5379_v27 = vld [vmem:[#allocation62_spill] sm:$0xff] }
 0x1c0   :  { %v1708_v33 = vpop.f32.mrf.mxu0  ;;  %v2317_v34 = vpop.f32.mrf.mxu1  ;;  %v5378_v2 = vmax.f32 %v5376_v41, %v5377_v1 }
 0x1c1   :  { %3288 = vst [vmem:[%s5101_s5 + $0xa0] sm:$0xff] %v3212_v26   ;;  %v2440_v42 = vmax.f32 %v1831_v46, %v3763_v28  ;;  %v1829_v51 = vmax.f32 %v5363_v5, %v1708_v33  ;;  %v2501_v53 = vmax.f32 %v2437_v32, 0.0  ;;  %v5380_v28 = vld [vmem:[#allocation63_spill] sm:$0xff]  ;;  %v5382_v33 = vld [vmem:[#allocation64_spill] sm:$0xff] }
 0x1c2   :  { %v3686_v61 = vpop.f32.mrf.mxu0  ;;  %v3766_v49 = vpop.f32.mrf.mxu1  ;;  %v5381_v26 = vmax.f32 %v5379_v27, %v5380_v28 }
 0x1c3   :  { %v2504_v36 = vmax.f32 %v2440_v42, 0.0  ;;  %v2438_v37 = vmax.f32 %v1829_v51, %v2317_v34  ;;  %v1834_v11 = vmax.f32 %v5366_v38, %v3686_v61  ;;  %v5383_v34 = vld [vmem:[#allocation65_spill] sm:$0xff]  ;;  %v5385_v61 = vld [vmem:[#allocation66_spill] sm:$0xff] }
 0x1c4   :  { %v1721_v12 = vpop.f32.mrf.mxu0  ;;  %v2330_v52 = vpop.f32.mrf.mxu1  ;;  %v5384_v32 = vmax.f32 %v5382_v33, %v5383_v34 }
 0x1c5   :  { %v3227_v43 = vpack.c.bf16 %v2504_v36, %v2503_v50  ;;  %v2502_v44 = vmax.f32 %v2438_v37, 0.0  ;;  %v1832_v55 = vmax.f32 %v5369_v54, %v1721_v12  ;;  %v2443_v6 = vmax.f32 %v1834_v11, %v3766_v49  ;;  %v5386_v49 = vld [vmem:[#allocation67_spill] sm:$0xff]  ;;  %v5388_v12 = vld [vmem:[#allocation68_spill] sm:$0xff] }
 0x1c6   :  { %v3687_v16 = vpop.f32.mrf.mxu0  ;;  %v3767_v35 = vpop.f32.mrf.mxu1  ;;  %v5387_v50 = vmax.f32 %v5385_v61, %v5386_v49 }
 0x1c7   :  { %3291 = vst [vmem:[%s5101_s5 + $0xb8] sm:$0xff] %v3227_v43   ;;  %v3222_v58 = vpack.c.bf16 %v2502_v44, %v2501_v53  ;;  %v1835_v0 = vmax.f32 %v5372_v48, %v3687_v16  ;;  %v2441_v3 = vmax.f32 %v1832_v55, %v2330_v52  ;;  %v2507_v19 = vmax.f32 %v2443_v6, 0.0  ;;  %v5389_v52 = vld [vmem:[#allocation69_spill] sm:$0xff]  ;;  %v5391_v16 = vld [vmem:[#allocation70_spill] sm:$0xff] }
 0x1c8   :  { %v1724_v59 = vpop.f32.mrf.mxu0  ;;  %v2333_v60 = vpop.f32.mrf.mxu1  ;;  %v5390_v53 = vmax.f32 %v5388_v12, %v5389_v52 }
 0x1c9   :  { %3290 = vst [vmem:[%s5101_s5 + $0xb0] sm:$0xff] %v3222_v58   ;;  %v2444_v9 = vmax.f32 %v1835_v0, %v3767_v35  ;;  %v1833_v20 = vmax.f32 %v5375_v62, %v1724_v59  ;;  %v2505_v25 = vmax.f32 %v2441_v3, 0.0  ;;  %v5392_v35 = vld [vmem:[#allocation71_spill] sm:$0xff]  ;;  %v5394_v59 = vld [vmem:[#allocation72_spill] sm:$0xff] }
 0x1ca   :  { %v3690_v21 = vpop.f32.mrf.mxu0  ;;  %v3770_v63 = vpop.f32.mrf.mxu1  ;;  %v5393_v58 = vmax.f32 %v5391_v16, %v5392_v35 }
 0x1cb   :  { %v2508_v24 = vmax.f32 %v2444_v9, 0.0  ;;  %v2442_v39 = vmax.f32 %v1833_v20, %v2333_v60  ;;  %v1838_v57 = vmax.f32 %v5378_v2, %v3690_v21  ;;  %v5395_v60 = vld [vmem:[#allocation73_spill] sm:$0xff]  ;;  %v5397_v21 = vld [vmem:[#allocation74_spill] sm:$0xff] }
 0x1cc   :  { %v1737_v7 = vpop.f32.mrf.mxu0  ;;  %v2346_v29 = vpop.f32.mrf.mxu1  ;;  %v5396_v3 = vmax.f32 %v5394_v59, %v5395_v60 }
 0x1cd   :  { %v3237_v40 = vpack.c.bf16 %v2508_v24, %v2507_v19  ;;  %v2506_v45 = vmax.f32 %v2442_v39, 0.0  ;;  %v1836_v22 = vmax.f32 %v5381_v26, %v1737_v7  ;;  %v2447_v46 = vmax.f32 %v1838_v57, %v3770_v63  ;;  %v5398_v63 = vld [vmem:[#allocation75_spill] sm:$0xff]  ;;  %v5400_v7 = vld [vmem:[#allocation76_spill] sm:$0xff] }
 0x1ce   :  { %v3691_v30 = vpop.f32.mrf.mxu0  ;;  %v3771_v31 = vpop.f32.mrf.mxu1  ;;  %v5399_v19 = vmax.f32 %v5397_v21, %v5398_v63 }
 0x1cf   :  { %3293 = vst [vmem:[%s5101_s5 + $0xc8] sm:$0xff] %v3237_v40   ;;  %v3232_v23 = vpack.c.bf16 %v2506_v45, %v2505_v25  ;;  %v1839_v42 = vmax.f32 %v5384_v32, %v3691_v30  ;;  %v2445_v5 = vmax.f32 %v1836_v22, %v2346_v29  ;;  %v2511_v8 = vmax.f32 %v2447_v46, 0.0  ;;  %v5401_v29 = vld [vmem:[#allocation77_spill] sm:$0xff]  ;;  %v5403_v30 = vld [vmem:[#allocation78_spill] sm:$0xff] }
 0x1d0   :  { %v1740_v47 = vpop.f32.mrf.mxu0  ;;  %v2349_v4 = vpop.f32.mrf.mxu1  ;;  %v5402_v25 = vmax.f32 %v5400_v7, %v5401_v29 }
 0x1d1   :  { %3292 = vst [vmem:[%s5101_s5 + $0xc0] sm:$0xff] %v3232_v23   ;;  %v2448_v51 = vmax.f32 %v1839_v42, %v3771_v31  ;;  %v1837_v36 = vmax.f32 %v5387_v50, %v1740_v47  ;;  %v2509_v15 = vmax.f32 %v2445_v5, 0.0  ;;  %v5404_v31 = vld [vmem:[#allocation79_spill] sm:$0xff]  ;;  %v5406_v47 = vld [vmem:[#allocation80_spill] sm:$0xff] }
 0x1d2   :  { %v3694_v37 = vpop.f32.mrf.mxu0  ;;  %v3774_v56 = vpop.f32.mrf.mxu1  ;;  %v5405_v23 = vmax.f32 %v5403_v30, %v5404_v31 }
 0x1d3   :  { %v2512_v38 = vmax.f32 %v2448_v51, 0.0  ;;  %v2446_v11 = vmax.f32 %v1837_v36, %v2349_v4  ;;  %v1842_v43 = vmax.f32 %v5390_v53, %v3694_v37  ;;  %v5407_v4 = vld [vmem:[#allocation81_spill] sm:$0xff]  ;;  %v5409_v36 = vld [vmem:[#allocation82_spill] sm:$0xff]  ;;  %v5410_v37 = vld [vmem:[#allocation83_spill] sm:$0xff] }
 0x1d4   :  { %v1753_v44 = vpop.f32.mrf.mxu0  ;;  %v2362_v14 = vpop.f32.mrf.mxu1  ;;  %v5408_v5 = vmax.f32 %v5406_v47, %v5407_v4 }
 0x1d5   :  { %v3247_v54 = vpack.c.bf16 %v2512_v38, %v2511_v8  ;;  %v2510_v55 = vmax.f32 %v2446_v11, 0.0  ;;  %v1840_v6 = vmax.f32 %v5393_v58, %v1753_v44  ;;  %v2451_v0 = vmax.f32 %v1842_v43, %v3774_v56 }
 0x1d6   :  { %v3695_v17 = vpop.f32.mrf.mxu0  ;;  %v3775_v18 = vpop.f32.mrf.mxu1  ;;  %v5411_v56 = vmax.f32 %v5409_v36, %v5410_v37 }
 0x1d7   :  { %3295 = vst [vmem:[%s5101_s5 + $0xd8] sm:$0xff] %v3247_v54   ;;  %v3242_v48 = vpack.c.bf16 %v2510_v55, %v2509_v15  ;;  %v1843_v9 = vmax.f32 %v5396_v3, %v3695_v17  ;;  %v2449_v62 = vmax.f32 %v1840_v6, %v2362_v14  ;;  %v2515_v1 = vmax.f32 %v2451_v0, 0.0 }
 0x1d8   :  { %v1756_v10 = vpop.f32.mrf.mxu0  ;;  %v2365_v13 = vpop.f32.mrf.mxu1 }
 0x1d9   :  { %3294 = vst [vmem:[%s5101_s5 + $0xd0] sm:$0xff] %v3242_v48   ;;  %v2452_v20 = vmax.f32 %v1843_v9, %v3775_v18  ;;  %v1841_v24 = vmax.f32 %v5399_v19, %v1756_v10  ;;  %v2513_v28 = vmax.f32 %v2449_v62, 0.0 }
 0x1da   :  { %v3698_v39 = vpop.f32.mrf.mxu0  ;;  %v3778_v41 = vpop.f32.mrf.mxu1 }
 0x1db   :  { %v2516_v2 = vmax.f32 %v2452_v20, 0.0  ;;  %v2450_v57 = vmax.f32 %v1841_v24, %v2365_v13  ;;  %v1846_v40 = vmax.f32 %v5402_v25, %v3698_v39 }
 0x1dc   :  { %v1769_v45 = vpop.f32.mrf.mxu0  ;;  %v2378_v27 = vpop.f32.mrf.mxu1 }
 0x1dd   :  { %v3257_v26 = vpack.c.bf16 %v2516_v2, %v2515_v1  ;;  %v2514_v22 = vmax.f32 %v2450_v57, 0.0  ;;  %v1844_v46 = vmax.f32 %v5405_v23, %v1769_v45  ;;  %v2455_v42 = vmax.f32 %v1846_v40, %v3778_v41 }
 0x1de   :  { %v3699_v33 = vpop.f32.mrf.mxu0  ;;  %v3779_v34 = vpop.f32.mrf.mxu1 }
 0x1df   :  { %3297 = vst [vmem:[%s5101_s5 + $0xe8] sm:$0xff] %v3257_v26   ;;  %v3252_v32 = vpack.c.bf16 %v2514_v22, %v2513_v28  ;;  %v1847_v51 = vmax.f32 %v5408_v5, %v3699_v33  ;;  %v2453_v49 = vmax.f32 %v1844_v46, %v2378_v27  ;;  %v2519_v11 = vmax.f32 %v2455_v42, 0.0 }
 0x1e0   :  { %v1772_v61 = vpop.f32.mrf.mxu0  ;;  %v2381_v38 = vpop.f32.mrf.mxu1 }
 0x1e1   :  { %3296 = vst [vmem:[%s5101_s5 + $0xe0] sm:$0xff] %v3252_v32   ;;  %v2456_v50 = vmax.f32 %v1847_v51, %v3779_v34  ;;  %v1845_v8 = vmax.f32 %v5411_v56, %v1772_v61  ;;  %v2517_v53 = vmax.f32 %v2453_v49, 0.0 }
 0x1e3   :  { %v2520_v12 = vmax.f32 %v2456_v50, 0.0  ;;  %v2454_v52 = vmax.f32 %v1845_v8, %v2381_v38 }
 0x1e5   :  { %v3267_v43 = vpack.c.bf16 %v2520_v12, %v2519_v11  ;;  %v2518_v44 = vmax.f32 %v2454_v52, 0.0 }
 0x1e7   :  { %3299 = vst [vmem:[%s5101_s5 + $0xf8] sm:$0xff] %v3267_v43   ;;  %v3262_v14 = vpack.c.bf16 %v2518_v44, %v2517_v53 }
 0x1e9   :  { %3298 = vst [vmem:[%s5101_s5 + $0xf0] sm:$0xff] %v3262_v14  }

// kernel: _lambda_.4
= control target key start
LH: loop header
LB: loop body
LE: loop exit
PB: predicated region body
PF: predicated region fallthrough
CT: control target
= control target key end

     0   :  { %vm765_vm0 = vcmask 261120   ;;  %s7308_s4 = inlined_call_operand.vmem [shape: bf16[800,128], index: 4, kind: input, shape index: {}]   ;;  %s7309_s0 = inlined_call_operand.vmem [shape: bf16[128,800], index: 0, kind: input, shape index: {}]   ;;  %s7310_s1 = inlined_call_operand.vmem [shape: bf16[128,800], index: 1, kind: input, shape index: {}]   ;;  %s7311_s2 = inlined_call_operand.vmem [shape: bf16[128,800], index: 2, kind: input, shape index: {}]   ;;  %s7312_s3 = inlined_call_operand.vmem [shape: bf16[128,800], index: 3, kind: input, shape index: {}]   ;;  %s7313_s5 = inlined_call_operand.vmem [shape: bf16[128,128], index: 5, kind: output, shape index: {}]  }
   0x1   :  { %v5321_v0 = vld [vmem:[%s7308_s4 + $0x78] sm:$0xff]   ;;  %v5344_v4 = vld [vmem:[%s7308_s4 + $0x70] sm:$0xff]   ;;  %v5368_v8 = vld [vmem:[%s7308_s4 + $0x68] sm:$0xff]  }
   0x2   :  { %v5326_v1 = vld [vmem:[%s7308_s4 + $0xf8] sm:$0xff]   ;;  %3979 = vmatprep.subr.bf16.mxu0 %v5321_v0  ;;  %v5350_v5 = vld [vmem:[%s7308_s4 + $0xf0] sm:$0xff]   ;;  %v5374_v9 = vld [vmem:[%s7308_s4 + $0xe8] sm:$0xff]  }
   0x3   :  { %v5332_v2 = vld [vmem:[%s7308_s4 + $0x38] sm:$0xff]   ;;  %4043 = vmatprep.subr.bf16.mxu1 %v5326_v1  ;;  %v5356_v6 = vld [vmem:[%s7308_s4 + $0x30] sm:$0xff]   ;;  %v5380_v10 = vld [vmem:[%s7308_s4 + $0x28] sm:$0xff]  }
   0x4   :  { %v5338_v3 = vld [vmem:[%s7308_s4 + $0xb8] sm:$0xff]   ;;  %3980 = vmatpush3.bf16.msra.mxu0 %v5332_v2  ;;  %v5362_v7 = vld [vmem:[%s7308_s4 + $0xb0] sm:$0xff]   ;;  %v5386_v11 = vld [vmem:[%s7308_s4 + $0xa8] sm:$0xff]  }
   0x5   :  { %4044 = vmatpush3.bf16.msra.mxu1 %v5338_v3  ;;  %3981 = vmatprep.subr.bf16.mxu0 %v5344_v4  ;;  %v5392_v12 = vld [vmem:[%s7308_s4 + $0x60] sm:$0xff]   ;;  %v5416_v16 = vld [vmem:[%s7308_s4 + $0x58] sm:$0xff]   ;;  %v5440_v20 = vld [vmem:[%s7308_s4 + $0x50] sm:$0xff]  }
   0x6   :  { %4045 = vmatprep.subr.bf16.mxu1 %v5350_v5  ;;  %v5398_v13 = vld [vmem:[%s7308_s4 + $0xe0] sm:$0xff]   ;;  %v5422_v17 = vld [vmem:[%s7308_s4 + $0xd8] sm:$0xff]   ;;  %v5446_v21 = vld [vmem:[%s7308_s4 + $0xd0] sm:$0xff]  }
   0x7   :  { %v5404_v14 = vld [vmem:[%s7308_s4 + $0x20] sm:$0xff]   ;;  %v5428_v18 = vld [vmem:[%s7308_s4 + $0x18] sm:$0xff]   ;;  %v5452_v22 = vld [vmem:[%s7308_s4 + $0x10] sm:$0xff]  }
   0x8   :  { %3982 = vmatpush3.bf16.msra.mxu0 %v5356_v6  ;;  %v5410_v15 = vld [vmem:[%s7308_s4 + $0xa0] sm:$0xff]   ;;  %v5434_v19 = vld [vmem:[%s7308_s4 + $0x98] sm:$0xff]   ;;  %v5458_v23 = vld [vmem:[%s7308_s4 + $0x90] sm:$0xff]  }
   0x9   :  { %4046 = vmatpush3.bf16.msra.mxu1 %v5362_v7  ;;  %3983 = vmatprep.subr.bf16.mxu0 %v5368_v8  ;;  %v5464_v24 = vld [vmem:[%s7308_s4 + $0x48] sm:$0xff]   ;;  %v5488_v28 = vld [vmem:[%s7308_s4 + $0x40] sm:$0xff]   ;;  %v5530_v37 = vld [vmem:[%s7308_s4 + $0x178] sm:$0xff]  }
   0xa   :  { %4047 = vmatprep.subr.bf16.mxu1 %v5374_v9  ;;  %v5470_v25 = vld [vmem:[%s7308_s4 + $0xc8] sm:$0xff]   ;;  %v5494_v29 = vld [vmem:[%s7308_s4 + $0xc0] sm:$0xff]   ;;  %v5536_v38 = vld [vmem:[%s7308_s4 + $0x138] sm:$0xff]  }
   0xb   :  { %v5476_v26 = vld [vmem:[%s7308_s4 + $0x8] sm:$0xff]   ;;  %v5500_v30 = vld [vmem:[%s7308_s4] sm:$0xff]   ;;  %v4908_v39 = vld [vmem:[%s7309_s0 + $0x3c] ss:$28 sps:$4 sm:$0xff]  }
   0xc   :  { %3984 = vmatpush3.bf16.msra.mxu0 %v5380_v10  ;;  %v5482_v27 = vld [vmem:[%s7308_s4 + $0x88] sm:$0xff]   ;;  %v5506_v31 = vld [vmem:[%s7308_s4 + $0x80] sm:$0xff]   ;;  %v4912_v41 = vld [vmem:[%s7309_s0 + $0x38] ss:$28 sps:$4 sm:$0xff]  }
   0xd   :  { %4048 = vmatpush3.bf16.msra.mxu1 %v5386_v11  ;;  %3985 = vmatprep.subr.bf16.mxu0 %v5392_v12  ;;  %v4899_v32 = vld [vmem:[%s7309_s0] ss:$28 sps:$4 sm:$0xff]   ;;  %v4902_v34 = vld [vmem:[%s7309_s0 + $0x8] ss:$28 sps:$4 sm:$0xff]   ;;  %v5556_v43 = vld [vmem:[%s7308_s4 + $0x170] sm:$0xff]  }
   0xe   :  { %4049 = vmatprep.subr.bf16.mxu1 %v5398_v13  ;;  %v4901_v33 = vld [vmem:[%s7309_s0 + $0x4] ss:$28 sps:$4 sm:$0xff]   ;;  %v4904_v35 = vld [vmem:[%s7309_s0 + $0xc] ss:$28 sps:$4 sm:$0xff]   ;;  %v5561_v44 = vld [vmem:[%s7308_s4 + $0x130] sm:$0xff]  }
   0xf   :  { %822 = vmatprep.mubr.bf16.mxu0 %v4901_v33  ;;  %v5525_v36 = vld [vmem:[%s7308_s4 + $0x188] sm:$0xff]   ;;  %919 = vmatprep.mubr.bf16.mxu1 %v4904_v35  ;;  %v4910_v40 = vld [vmem:[%s7309_s0 + $0x44] ss:$28 sps:$4 sm:$0xff]   ;;  %v4916_v45 = vld [vmem:[%s7309_s0 + $0x74] ss:$28 sps:$4 sm:$0xff]  }
  0x10   :  { %3986 = vmatpush3.bf16.msra.mxu0 %v5404_v14  ;;  %v4913_v42 = vld [vmem:[%s7309_s0 + $0x40] ss:$28 sps:$4 sm:$0xff]   ;;  %v5574_v47 = vld [vmem:[%s7308_s4 + $0x168] sm:$0xff]   ;;  %v4921_v50 = vld [vmem:[%s7309_s0 + $0x78] ss:$28 sps:$4 sm:$0xff]  }
  0x11   :  { %4050 = vmatpush3.bf16.msra.mxu1 %v5410_v15  ;;  %3987 = vmatprep.subr.bf16.mxu0 %v5416_v16  ;;  %v4918_v46 = vld [vmem:[%s7309_s0 + $0x7c] ss:$28 sps:$4 sm:$0xff]   ;;  %v5579_v48 = vld [vmem:[%s7308_s4 + $0x128] sm:$0xff]   ;;  %v4926_v52 = vld [vmem:[%s7309_s0 + $0xb4] ss:$28 sps:$4 sm:$0xff]  }
  0x12   :  { %4051 = vmatprep.subr.bf16.mxu1 %v5422_v17  ;;  %v4920_v49 = vld [vmem:[%s7309_s0 + $0x70] ss:$28 sps:$4 sm:$0xff]   ;;  %v5598_v53 = vld [vmem:[%s7308_s4 + $0x160] sm:$0xff]   ;;  %v5624_v59 = vld [vmem:[%s7308_s4 + $0x158] sm:$0xff]  }
  0x13   :  { %v4924_v51 = vld [vmem:[%s7309_s0 + $0xac] ss:$28 sps:$4 sm:$0xff]   ;;  %v5603_v54 = vld [vmem:[%s7308_s4 + $0x120] sm:$0xff]   ;;  %v5630_v60 = vld [vmem:[%s7308_s4 + $0x118] sm:$0xff]  }
  0x14   :  { %3988 = vmatpush3.bf16.msra.mxu0 %v5428_v18  ;;  %v4928_v55 = vld [vmem:[%s7309_s0 + $0xa8] ss:$28 sps:$4 sm:$0xff]   ;;  %v4929_v56 = vld [vmem:[%s7309_s0 + $0xb0] ss:$28 sps:$4 sm:$0xff]   ;;  %v4941_v33 = vld [vmem:[%s7309_s0 + $0x11c] ss:$28 sps:$4 sm:$0xff]  }
  0x15   :  { %4052 = vmatpush3.bf16.msra.mxu1 %v5434_v19  ;;  %3989 = vmatprep.subr.bf16.mxu0 %v5440_v20  ;;  %v4932_v57 = vld [vmem:[%s7309_s0 + $0xe4] ss:$28 sps:$4 sm:$0xff]   ;;  %v4934_v61 = vld [vmem:[%s7309_s0 + $0xec] ss:$28 sps:$4 sm:$0xff]   ;;  %v5642_v62 = vld [vmem:[%s7308_s4 + $0x150] sm:$0xff]  }
  0x16   :  { %4053 = vmatprep.subr.bf16.mxu1 %v5446_v21  ;;  %v5619_v58 = vld [vmem:[%s7308_s4 + $0x180] sm:$0xff]   ;;  %v5647_v63 = vld [vmem:[%s7308_s4 + $0x110] sm:$0xff]   ;;  %v5666_v35 = vld [vmem:[%s7308_s4 + $0x148] sm:$0xff]  }
  0x18   :  { %3990 = vmatpush3.bf16.msra.mxu0 %v5452_v22 }
  0x19   :  { %4054 = vmatpush3.bf16.msra.mxu1 %v5458_v23  ;;  %3991 = vmatprep.subr.bf16.mxu0 %v5464_v24 }
  0x1a   :  { %4055 = vmatprep.subr.bf16.mxu1 %v5470_v25 }
  0x1c   :  { %3992 = vmatpush3.bf16.msra.mxu0 %v5476_v26 }
  0x1d   :  { %4056 = vmatpush3.bf16.msra.mxu1 %v5482_v27  ;;  %3993 = vmatprep.subr.bf16.mxu0 %v5488_v28 }
  0x1e   :  { %4057 = vmatprep.subr.bf16.mxu1 %v5494_v29 }
  0x20   :  { %3994 = vmatpush3.bf16.msra.mxu0 %v5500_v30 }
  0x21   :  { %4058 = vmatpush3.bf16.msra.mxu1 %v5506_v31  ;;  %4107 = vmatprep.subr.bf16.mxu0 %v5530_v37 }
  0x22   :  { %4787 = vmatprep.subr.bf16.mxu1 %v5525_v36 }
  0x23   :  { %823 = vmatmul.mubr.bf16.vlgmr.msra.gmra.mxu0 %v4899_v32  ;;  %v4936_v32 = vld [vmem:[%s7309_s0 + $0xe0] ss:$28 sps:$4 sm:$0xff]  }
  0x24   :  { %920 = vmatmul.mubr.bf16.vlgmr.msra.gmra.mxu1 %v4902_v34  ;;  %4108 = vmatpush3.bf16.msra.mxu0 %v5536_v38  ;;  %v4943_v34 = vld [vmem:[%s7309_s0 + $0x124] ss:$28 sps:$4 sm:$0xff]  }
  0x25   :  { %4788 = vmatpush3.bf16.msra.mxu1 %v5525_v36  ;;  %830 = vmatprep.mubr.bf16.mxu0 %v4908_v39  ;;  %v5671_v39 = vld [vmem:[%s7308_s4 + $0x108] sm:$0xff]  }
  0x26   :  { %927 = vmatprep.mubr.bf16.mxu1 %v4910_v40  ;;  %4109 = vmatprep.subr.bf16.mxu0 %v5556_v43  ;;  %v5678_v40 = vld [vmem:[%s7308_s4 + $0x140] sm:$0xff]  }
  0x27   :  { %4789 = vmatprep.subr.bf16.mxu1 %v5619_v58 }
  0x28   :  { %4110 = vmatpush3.bf16.msra.mxu0 %v5561_v44 }
  0x29   :  { %4111 = vmatprep.subr.bf16.mxu0 %v5574_v47  ;;  %4790 = vmatpush3.bf16.msra.mxu1 %v5619_v58 }
  0x2a   :  { %4181 = vmatprep.subr.bf16.mxu1 %v5321_v0  ;;  %v4937_v0 = vld [vmem:[%s7309_s0 + $0xe8] ss:$28 sps:$4 sm:$0xff]  }
  0x2b   :  { %831 = vmatmul.mubr.bf16.gmra.mxu0 %v4912_v41  ;;  %v5683_v41 = vld [vmem:[%s7308_s4 + $0x100] sm:$0xff]  }
  0x2c   :  { %928 = vmatmul.mubr.bf16.gmra.mxu1 %v4913_v42  ;;  %838 = vmatprep.mubr.bf16.mxu0 %v4916_v45  ;;  %v4945_v42 = vld [vmem:[%s7309_s0 + $0x118] ss:$28 sps:$4 sm:$0xff]   ;;  %v4946_v45 = vld [vmem:[%s7309_s0 + $0x120] ss:$28 sps:$4 sm:$0xff]  }
  0x2d   :  { %935 = vmatprep.mubr.bf16.mxu1 %v4918_v46  ;;  %4112 = vmatpush3.bf16.msra.mxu0 %v5579_v48  ;;  %v4949_v46 = vld [vmem:[%s7309_s0 + $0x154] ss:$28 sps:$4 sm:$0xff]  }
  0x2e   :  { %4113 = vmatprep.subr.bf16.mxu0 %v5598_v53 }
  0x31   :  { %4114 = vmatpush3.bf16.msra.mxu0 %v5603_v54 }
  0x32   :  { %4115 = vmatprep.subr.bf16.mxu0 %v5624_v59 }
  0x33   :  { %839 = vmatmul.mubr.bf16.gmra.mxu0 %v4920_v49  ;;  %v4951_v49 = vld [vmem:[%s7309_s0 + $0x15c] ss:$28 sps:$4 sm:$0xff]  }
  0x34   :  { %936 = vmatmul.mubr.bf16.gmra.mxu1 %v4921_v50  ;;  %846 = vmatprep.mubr.bf16.mxu0 %v4924_v51  ;;  %v4953_v50 = vld [vmem:[%s7309_s0 + $0x150] ss:$28 sps:$4 sm:$0xff]   ;;  %v4954_v51 = vld [vmem:[%s7309_s0 + $0x158] ss:$28 sps:$4 sm:$0xff]  }
  0x35   :  { %943 = vmatprep.mubr.bf16.mxu1 %v4926_v52  ;;  %4116 = vmatpush3.bf16.msra.mxu0 %v5630_v60  ;;  %v4957_v52 = vld [vmem:[%s7309_s0 + $0x18c] ss:$28 sps:$4 sm:$0xff]  }
  0x36   :  { %4117 = vmatprep.subr.bf16.mxu0 %v5642_v62 }
  0x39   :  { %4118 = vmatpush3.bf16.msra.mxu0 %v5647_v63 }
  0x3a   :  { %4119 = vmatprep.subr.bf16.mxu0 %v5666_v35 }
  0x3b   :  { %847 = vmatmul.mubr.bf16.gmra.mxu0 %v4928_v55  ;;  %v4961_v55 = vld [vmem:[%s7309_s0 + $0x188] ss:$28 sps:$4 sm:$0xff]  }
  0x3c   :  { %944 = vmatmul.mubr.bf16.gmra.mxu1 %v4929_v56  ;;  %854 = vmatprep.mubr.bf16.mxu0 %v4932_v57  ;;  %v4962_v56 = vld [vmem:[%s7309_s0 + $0x190] ss:$28 sps:$4 sm:$0xff]  }
  0x3d   :  { %951 = vmatprep.mubr.bf16.mxu1 %v4934_v61  ;;  %4120 = vmatpush3.bf16.msra.mxu0 %v5671_v39  ;;  %v4967_v57 = vld [vmem:[%s7309_s0 + $0x14] ss:$28 sps:$4 sm:$0xff]  }
  0x3e   :  { %4121 = vmatprep.subr.bf16.mxu0 %v5678_v40  ;;  %v4968_v61 = vld [vmem:[%s7309_s0 + $0x18] ss:$28 sps:$4 sm:$0xff]  }
  0x41   :  { %4122 = vmatpush3.bf16.msra.mxu0 %v5683_v41 }
  0x42   :  { %4245 = vmatprep.subr.bf16.mxu0 %v5326_v1  ;;  %v4959_v1 = vld [vmem:[%s7309_s0 + $0x194] ss:$28 sps:$4 sm:$0xff]  }
  0x43   :  { %855 = vmatmul.mubr.bf16.gmra.mxu0 %v4936_v32  ;;  %v4965_v32 = vld [vmem:[%s7309_s0 + $0x10] ss:$28 sps:$4 sm:$0xff]  }
  0x44   :  { %952 = vmatmul.mubr.bf16.gmra.mxu1 %v4937_v0  ;;  %862 = vmatprep.mubr.bf16.mxu0 %v4941_v33  ;;  %v4969_v0 = vld [vmem:[%s7309_s0 + $0x50] ss:$28 sps:$4 sm:$0xff]  }
  0x45   :  { %959 = vmatprep.mubr.bf16.mxu1 %v4943_v34  ;;  %v4970_v33 = vld [vmem:[%s7309_s0 + $0x4c] ss:$28 sps:$4 sm:$0xff]  }
  0x46   :  { %v4972_v34 = vld [vmem:[%s7309_s0 + $0x88] ss:$28 sps:$4 sm:$0xff]  }
  0x4b   :  { %863 = vmatmul.mubr.bf16.gmra.mxu0 %v4945_v42  ;;  %v4973_v42 = vld [vmem:[%s7309_s0 + $0x48] ss:$28 sps:$4 sm:$0xff]  }
  0x4c   :  { %960 = vmatmul.mubr.bf16.gmra.mxu1 %v4946_v45  ;;  %870 = vmatprep.mubr.bf16.mxu0 %v4949_v46  ;;  %v4974_v45 = vld [vmem:[%s7309_s0 + $0xc0] ss:$28 sps:$4 sm:$0xff]  }
  0x4d   :  { %967 = vmatprep.mubr.bf16.mxu1 %v4951_v49  ;;  %v5953_v46 = vld [vmem:[%s7308_s4 + $0xb8] sm:$0xff]   ;;  %v5959_v49 = vld [vmem:[%s7308_s4 + $0xf0] sm:$0xff]  }
  0x53   :  { %871 = vmatmul.mubr.bf16.gmra.mxu0 %v4953_v50  ;;  %v5043_v50 = vld [vmem:[%s7310_s1 + $0x120] ss:$28 sps:$4 sm:$0xff]  }
  0x54   :  { %968 = vmatmul.mubr.bf16.gmra.mxu1 %v4954_v51  ;;  %878 = vmatprep.mubr.bf16.mxu0 %v4957_v52  ;;  %v5044_v51 = vld [vmem:[%s7310_s1 + $0x48] ss:$28 sps:$4 sm:$0xff]   ;;  %v5045_v52 = vld [vmem:[%s7310_s1 + $0x15c] ss:$28 sps:$4 sm:$0xff]  }
  0x55   :  { %975 = vmatprep.mubr.bf16.mxu1 %v4959_v1  ;;  %v5974_v1 = vld [vmem:[%s7308_s4 + $0xb0] sm:$0xff]  }
  0x5b   :  { %879 = vmatmul.mubr.bf16.gmra.mxu0 %v4961_v55  ;;  %v5047_v55 = vld [vmem:[%s7310_s1 + $0x84] ss:$28 sps:$4 sm:$0xff]  }
  0x5c   :  { %976 = vmatmul.mubr.bf16.gmra.mxu1 %v4962_v56  ;;  %1016 = vmatprep.mubr.bf16.mxu0 %v4967_v57  ;;  %v5983_v56 = vld [vmem:[%s7308_s4 + $0xe8] sm:$0xff]  }
  0x5d   :  { %4791 = vmatprep.mubr.msk.bf16.mxu1 %vm765_vm0, %v4968_v61  ;;  %v5989_v57 = vld [vmem:[%s7308_s4 + $0xa8] sm:$0xff]   ;;  %v5995_v61 = vld [vmem:[%s7308_s4 + $0xe0] sm:$0xff]  }
  0x63   :  { %1017 = vmatmul.mubr.bf16.vlgmr.msra.gmra.mxu0 %v4965_v32  ;;  %v5049_v32 = vld [vmem:[%s7310_s1 + $0x158] ss:$28 sps:$4 sm:$0xff]  }
  0x64   :  { %4792 = vmatmul.mubr.msk.bf16.vlgmr.msra.gmra.mxu1 %vm765_vm0, %v4969_v0  ;;  %4246 = vmatpush3.bf16.msra.mxu0 %v5338_v3  ;;  %v4977_v3 = vld [vmem:[%s7309_s0 + $0xf8] ss:$28 sps:$4 sm:$0xff]   ;;  %v5050_v0 = vld [vmem:[%s7310_s1 + $0x80] ss:$28 sps:$4 sm:$0xff]  }
  0x65   :  { %4182 = vmatpush3.bf16.msra.mxu1 %v5332_v2  ;;  %1024 = vmatprep.mubr.bf16.mxu0 %v4970_v33  ;;  %v4975_v2 = vld [vmem:[%s7309_s0 + $0x84] ss:$28 sps:$4 sm:$0xff]   ;;  %v5051_v33 = vld [vmem:[%s7310_s1 + $0x194] ss:$28 sps:$4 sm:$0xff]  }
  0x66   :  { %4183 = vmatprep.subr.bf16.mxu1 %v5344_v4  ;;  %4795 = vmatprep.mubr.msk.bf16.mxu1 %vm765_vm0, %v4972_v34  ;;  %v4978_v4 = vld [vmem:[%s7309_s0 + $0x80] ss:$28 sps:$4 sm:$0xff]  }
  0x67   :  { %4247 = vmatprep.subr.bf16.mxu0 %v5350_v5  ;;  %v4979_v5 = vld [vmem:[%s7309_s0 + $0x130] ss:$28 sps:$4 sm:$0xff]   ;;  %v5053_v34 = vld [vmem:[%s7310_s1 + $0xbc] ss:$28 sps:$4 sm:$0xff]  }
  0x68   :  { %4248 = vmatpush3.bf16.msra.mxu0 %v5362_v7  ;;  %v4982_v7 = vld [vmem:[%s7309_s0 + $0x168] ss:$28 sps:$4 sm:$0xff]  }
  0x69   :  { %4184 = vmatpush3.bf16.msra.mxu1 %v5356_v6  ;;  %4249 = vmatprep.subr.bf16.mxu0 %v5374_v9  ;;  %v4980_v6 = vld [vmem:[%s7309_s0 + $0xbc] ss:$28 sps:$4 sm:$0xff]  }
  0x6a   :  { %4185 = vmatprep.subr.bf16.mxu1 %v5368_v8  ;;  %v4983_v8 = vld [vmem:[%s7309_s0 + $0xb8] ss:$28 sps:$4 sm:$0xff]   ;;  %v4984_v9 = vld [vmem:[%s7309_s0 + $0x1a0] ss:$28 sps:$4 sm:$0xff]  }
  0x6b   :  { %1025 = vmatmul.mubr.bf16.gmra.mxu0 %v4973_v42  ;;  %v6013_v42 = vld [vmem:[%s7308_s4 + $0xa0] sm:$0xff]  }
  0x6c   :  { %4796 = vmatmul.mubr.msk.bf16.gmra.mxu1 %vm765_vm0, %v4974_v45  ;;  %1032 = vmatprep.mubr.bf16.mxu0 %v4975_v2  ;;  %v6019_v45 = vld [vmem:[%s7308_s4 + $0xd8] sm:$0xff]  }
  0x6d   :  { %4186 = vmatpush3.bf16.msra.mxu1 %v5380_v10  ;;  %4799 = vmatprep.mubr.msk.bf16.mxu1 %vm765_vm0, %v4977_v3  ;;  %v4985_v10 = vld [vmem:[%s7309_s0 + $0xf4] ss:$28 sps:$4 sm:$0xff]   ;;  %v6025_v2 = vld [vmem:[%s7308_s4 + $0x98] sm:$0xff]  }
  0x6e   :  { %4187 = vmatprep.subr.bf16.mxu1 %v5392_v12  ;;  %4250 = vmatpush3.bf16.msra.mxu0 %v5386_v11  ;;  %v4989_v11 = vld [vmem:[%s7310_s1 + $0x4] ss:$28 sps:$4 sm:$0xff]   ;;  %v6031_v3 = vld [vmem:[%s7308_s4 + $0xd0] sm:$0xff]  }
  0x6f   :  { %4251 = vmatprep.subr.bf16.mxu0 %v5398_v13  ;;  %v4987_v12 = vld [vmem:[%s7310_s1] ss:$28 sps:$4 sm:$0xff]   ;;  %v4990_v13 = vld [vmem:[%s7309_s0 + $0xf0] ss:$28 sps:$4 sm:$0xff]  }
  0x71   :  { %4188 = vmatpush3.bf16.msra.mxu1 %v5404_v14  ;;  %v4991_v14 = vld [vmem:[%s7309_s0 + $0x12c] ss:$28 sps:$4 sm:$0xff]  }
  0x72   :  { %4189 = vmatprep.subr.bf16.mxu1 %v5416_v16  ;;  %4252 = vmatpush3.bf16.msra.mxu0 %v5410_v15  ;;  %v4993_v15 = vld [vmem:[%s7310_s1 + $0x3c] ss:$28 sps:$4 sm:$0xff]   ;;  %v4995_v16 = vld [vmem:[%s7309_s0 + $0x128] ss:$28 sps:$4 sm:$0xff]  }
  0x73   :  { %1033 = vmatmul.mubr.bf16.gmra.mxu0 %v4978_v4  ;;  %4253 = vmatprep.subr.bf16.mxu0 %v5422_v17  ;;  %v4996_v17 = vld [vmem:[%s7310_s1 + $0x38] ss:$28 sps:$4 sm:$0xff]   ;;  %v5055_v4 = vld [vmem:[%s7310_s1 + $0x190] ss:$28 sps:$4 sm:$0xff]  }
  0x74   :  { %4800 = vmatmul.mubr.msk.bf16.gmra.mxu1 %vm765_vm0, %v4979_v5  ;;  %1040 = vmatprep.mubr.bf16.mxu0 %v4980_v6  ;;  %v5056_v5 = vld [vmem:[%s7310_s1 + $0xb8] ss:$28 sps:$4 sm:$0xff]  }
  0x75   :  { %4190 = vmatpush3.bf16.msra.mxu1 %v5428_v18  ;;  %4803 = vmatprep.mubr.msk.bf16.mxu1 %vm765_vm0, %v4982_v7  ;;  %v4997_v18 = vld [vmem:[%s7309_s0 + $0x164] ss:$28 sps:$4 sm:$0xff]   ;;  %v5059_v6 = vld [vmem:[%s7310_s1 + $0x18] ss:$28 sps:$4 sm:$0xff]  }
  0x76   :  { %4191 = vmatprep.subr.bf16.mxu1 %v5440_v20  ;;  %4254 = vmatpush3.bf16.msra.mxu0 %v5434_v19  ;;  %v4999_v19 = vld [vmem:[%s7310_s1 + $0x74] ss:$28 sps:$4 sm:$0xff]   ;;  %v5001_v20 = vld [vmem:[%s7309_s0 + $0x160] ss:$28 sps:$4 sm:$0xff]  }
  0x77   :  { %4255 = vmatprep.subr.bf16.mxu0 %v5446_v21  ;;  %v5002_v21 = vld [vmem:[%s7310_s1 + $0x70] ss:$28 sps:$4 sm:$0xff]  }
  0x78   :  { %v5057_v7 = vld [vmem:[%s7310_s1 + $0xf4] ss:$28 sps:$4 sm:$0xff]  }
  0x79   :  { %4192 = vmatpush3.bf16.msra.mxu1 %v5452_v22  ;;  %v5003_v22 = vld [vmem:[%s7309_s0 + $0x19c] ss:$28 sps:$4 sm:$0xff]  }
  0x7a   :  { %4193 = vmatprep.subr.bf16.mxu1 %v5464_v24  ;;  %4256 = vmatpush3.bf16.msra.mxu0 %v5458_v23  ;;  %v5005_v23 = vld [vmem:[%s7310_s1 + $0xac] ss:$28 sps:$4 sm:$0xff]   ;;  %v5007_v24 = vld [vmem:[%s7309_s0 + $0x198] ss:$28 sps:$4 sm:$0xff]  }
  0x7b   :  { %1041 = vmatmul.mubr.bf16.gmra.mxu0 %v4983_v8  ;;  %4257 = vmatprep.subr.bf16.mxu0 %v5470_v25  ;;  %v5008_v25 = vld [vmem:[%s7310_s1 + $0xa8] ss:$28 sps:$4 sm:$0xff]   ;;  %v6049_v8 = vld [vmem:[%s7308_s4 + $0x90] sm:$0xff]  }
  0x7c   :  { %4804 = vmatmul.mubr.msk.bf16.gmra.mxu1 %vm765_vm0, %v4984_v9  ;;  %1048 = vmatprep.mubr.bf16.mxu0 %v4985_v10  ;;  %v6055_v9 = vld [vmem:[%s7308_s4 + $0xc8] sm:$0xff]  }
  0x7d   :  { %4194 = vmatpush3.bf16.msra.mxu1 %v5476_v26  ;;  %1578 = vmatprep.mubr.bf16.mxu1 %v4989_v11  ;;  %v5013_v26 = vld [vmem:[%s7310_s1 + $0xc] ss:$28 sps:$4 sm:$0xff]   ;;  %v6068_v11 = vld [vmem:[%s7308_s4 + $0xc0] sm:$0xff]  }
  0x7e   :  { %4195 = vmatprep.subr.bf16.mxu1 %v5488_v28  ;;  %4258 = vmatpush3.bf16.msra.mxu0 %v5482_v27  ;;  %v5009_v27 = vld [vmem:[%s7310_s1 + $0xe4] ss:$28 sps:$4 sm:$0xff]   ;;  %v6062_v10 = vld [vmem:[%s7308_s4 + $0x88] sm:$0xff]  }
  0x7f   :  { %4259 = vmatprep.subr.bf16.mxu0 %v5494_v29  ;;  %v5011_v28 = vld [vmem:[%s7310_s1 + $0x8] ss:$28 sps:$4 sm:$0xff]   ;;  %v5014_v29 = vld [vmem:[%s7310_s1 + $0xe0] ss:$28 sps:$4 sm:$0xff]  }
  0x81   :  { %4196 = vmatpush3.bf16.msra.mxu1 %v5500_v30  ;;  %v5015_v30 = vld [vmem:[%s7310_s1 + $0x11c] ss:$28 sps:$4 sm:$0xff]  }
  0x82   :  { %4309 = vmatprep.subr.bf16.mxu1 %v5530_v37  ;;  %4260 = vmatpush3.bf16.msra.mxu0 %v5506_v31  ;;  %v5017_v31 = vld [vmem:[%s7310_s1 + $0x44] ss:$28 sps:$4 sm:$0xff]   ;;  %v5890_v37 = vld [vmem:[%s7308_s4 + $0xf8] sm:$0xff]  }
  0x83   :  { %1049 = vmatmul.mubr.bf16.gmra.mxu0 %v4990_v13  ;;  %4807 = vmatprep.subr.bf16.mxu0 %v5525_v36  ;;  %v5060_v13 = vld [vmem:[%s7310_s1 + $0xf0] ss:$28 sps:$4 sm:$0xff]  }
  0x84   :  { %1579 = vmatmul.mubr.bf16.vlgmr.msra.gmra.mxu1 %v4987_v12  ;;  %1056 = vmatprep.mubr.bf16.mxu0 %v4991_v14  ;;  %v5061_v12 = vld [vmem:[%s7310_s1 + $0x50] ss:$28 sps:$4 sm:$0xff]  }
  0x85   :  { %4310 = vmatpush3.bf16.msra.mxu1 %v5536_v38  ;;  %1586 = vmatprep.mubr.bf16.mxu1 %v4993_v15  ;;  %v5020_v38 = vld [vmem:[%s7310_s1 + $0x40] ss:$28 sps:$4 sm:$0xff]   ;;  %v5062_v14 = vld [vmem:[%s7310_s1 + $0x12c] ss:$28 sps:$4 sm:$0xff]  }
  0x86   :  { %4311 = vmatprep.subr.bf16.mxu1 %v5556_v43  ;;  %v5019_v43 = vld [vmem:[%s7310_s1 + $0x118] ss:$28 sps:$4 sm:$0xff]   ;;  %v6083_v15 = vld [vmem:[%s7308_s4 + $0x80] sm:$0xff]  }
  0x87   :  { %7340 = vst [vmem:[#allocation2_spill] sm:$0xff] %v6083_v15 }
  0x89   :  { %4312 = vmatpush3.bf16.msra.mxu1 %v5561_v44  ;;  %v5023_v44 = vld [vmem:[%s7310_s1 + $0x7c] ss:$28 sps:$4 sm:$0xff]  }
  0x8a   :  { %4313 = vmatprep.subr.bf16.mxu1 %v5574_v47  ;;  %v5911_v47 = vld [vmem:[%s7308_s4 + $0x78] sm:$0xff]  }
  0x8b   :  { %1057 = vmatmul.mubr.bf16.gmra.mxu0 %v4995_v16  ;;  %v5064_v16 = vld [vmem:[%s7310_s1 + $0x88] ss:$28 sps:$4 sm:$0xff]  }
  0x8c   :  { %1587 = vmatmul.mubr.bf16.gmra.mxu1 %v4996_v17  ;;  %1064 = vmatprep.mubr.bf16.mxu0 %v4997_v18  ;;  %v6092_v17 = vld [vmem:[%s7308_s4 + $0x188] sm:$0xff]  }
  0x8d   :  { %1594 = vmatprep.mubr.bf16.mxu1 %v4999_v19  ;;  %4314 = vmatpush3.bf16.msra.mxu1 %v5579_v48  ;;  %v5026_v48 = vld [vmem:[%s7310_s1 + $0x78] ss:$28 sps:$4 sm:$0xff]   ;;  %7341 = vst [vmem:[#allocation3_spill] sm:$0xff] %v6092_v17 }
  0x8e   :  { %4315 = vmatprep.subr.bf16.mxu1 %v5598_v53  ;;  %v5025_v53 = vld [vmem:[%s7310_s1 + $0x150] ss:$28 sps:$4 sm:$0xff]  }
  0x91   :  { %4316 = vmatpush3.bf16.msra.mxu1 %v5603_v54  ;;  %v5029_v54 = vld [vmem:[%s7310_s1 + $0xb4] ss:$28 sps:$4 sm:$0xff]  }
  0x92   :  { %4317 = vmatprep.subr.bf16.mxu1 %v5624_v59  ;;  %v5032_v59 = vld [vmem:[%s7310_s1 + $0xb0] ss:$28 sps:$4 sm:$0xff]  }
  0x93   :  { %1065 = vmatmul.mubr.bf16.gmra.mxu0 %v5001_v20  ;;  %v6099_v20 = vld [vmem:[%s7308_s4 + $0x38] sm:$0xff]  }
  0x94   :  { %1595 = vmatmul.mubr.bf16.gmra.mxu1 %v5002_v21  ;;  %1072 = vmatprep.mubr.bf16.mxu0 %v5003_v22  ;;  %v6105_v22 = vld [vmem:[%s7308_s4 + $0x70] sm:$0xff]  }
  0x95   :  { %1602 = vmatprep.mubr.bf16.mxu1 %v5005_v23  ;;  %4318 = vmatpush3.bf16.msra.mxu1 %v5630_v60  ;;  %v5031_v60 = vld [vmem:[%s7310_s1 + $0x188] ss:$28 sps:$4 sm:$0xff]   ;;  %v5066_v23 = vld [vmem:[%s7310_s1 + $0xc0] ss:$28 sps:$4 sm:$0xff]  }
  0x96   :  { %4319 = vmatprep.subr.bf16.mxu1 %v5642_v62  ;;  %v5033_v62 = vld [vmem:[%s7310_s1 + $0xec] ss:$28 sps:$4 sm:$0xff]  }
  0x99   :  { %4320 = vmatpush3.bf16.msra.mxu1 %v5647_v63  ;;  %v5037_v63 = vld [vmem:[%s7310_s1 + $0x14] ss:$28 sps:$4 sm:$0xff]  }
  0x9a   :  { %4321 = vmatprep.subr.bf16.mxu1 %v5666_v35  ;;  %v5038_v35 = vld [vmem:[%s7310_s1 + $0xe8] ss:$28 sps:$4 sm:$0xff]  }
  0x9b   :  { %1073 = vmatmul.mubr.bf16.gmra.mxu0 %v5007_v24 }
  0x9c   :  { %1603 = vmatmul.mubr.bf16.gmra.mxu1 %v5008_v25  ;;  %1675 = vmatprep.mubr.bf16.mxu0 %v5013_v26  ;;  %v5065_v26 = vld [vmem:[%s7310_s1 + $0x128] ss:$28 sps:$4 sm:$0xff]  }
  0x9d   :  { %1610 = vmatprep.mubr.bf16.mxu1 %v5009_v27  ;;  %4322 = vmatpush3.bf16.msra.mxu1 %v5671_v39  ;;  %v5035_v39 = vld [vmem:[%s7310_s1 + $0x10] ss:$28 sps:$4 sm:$0xff]  }
  0x9e   :  { %4323 = vmatprep.subr.bf16.mxu1 %v5678_v40  ;;  %v5039_v40 = vld [vmem:[%s7310_s1 + $0x124] ss:$28 sps:$4 sm:$0xff]  }
  0xa1   :  { %4324 = vmatpush3.bf16.msra.mxu1 %v5683_v41  ;;  %v5041_v41 = vld [vmem:[%s7310_s1 + $0x4c] ss:$28 sps:$4 sm:$0xff]  }
  0xa2   :  { %4447 = vmatprep.subr.bf16.mxu1 %v5890_v37 }
  0xa3   :  { %1676 = vmatmul.mubr.bf16.vlgmr.msra.gmra.mxu0 %v5011_v28 }
  0xa4   :  { %1611 = vmatmul.mubr.bf16.gmra.mxu1 %v5014_v29  ;;  %4808 = vmatpush3.bf16.msra.mxu0 %v5525_v36  ;;  %v5021_v36 = vld [vmem:[%s7310_s1 + $0x154] ss:$28 sps:$4 sm:$0xff]  }
  0xa5   :  { %1618 = vmatprep.mubr.bf16.mxu1 %v5015_v30  ;;  %1683 = vmatprep.mubr.bf16.mxu0 %v5017_v31  ;;  %v6118_v30 = vld [vmem:[%s7308_s4 + $0x30] sm:$0xff]  }
  0xa6   :  { %4809 = vmatprep.subr.bf16.mxu0 %v5619_v58 }
  0xa8   :  { %4810 = vmatpush3.bf16.msra.mxu0 %v5619_v58  ;;  %v5027_v58 = vld [vmem:[%s7310_s1 + $0x18c] ss:$28 sps:$4 sm:$0xff]  }
  0xa9   :  { %4383 = vmatprep.subr.bf16.mxu0 %v5911_v47 }
  0xab   :  { %1684 = vmatmul.mubr.bf16.gmra.mxu0 %v5020_v38 }
  0xac   :  { %1619 = vmatmul.mubr.bf16.gmra.mxu1 %v5019_v43  ;;  %1691 = vmatprep.mubr.bf16.mxu0 %v5023_v44  ;;  %v6126_v43 = vld [vmem:[%s7308_s4 + $0x68] sm:$0xff]   ;;  %v5067_v44 = vld [vmem:[%s7310_s1 + $0x164] ss:$28 sps:$4 sm:$0xff]  }
  0xad   :  { %1626 = vmatprep.mubr.bf16.mxu1 %v5021_v36 }
  0xb3   :  { %1692 = vmatmul.mubr.bf16.gmra.mxu0 %v5026_v48 }
  0xb4   :  { %1627 = vmatmul.mubr.bf16.gmra.mxu1 %v5025_v53  ;;  %1699 = vmatprep.mubr.bf16.mxu0 %v5029_v54  ;;  %v5069_v53 = vld [vmem:[%s7310_s1 + $0xf8] ss:$28 sps:$4 sm:$0xff]  }
  0xb5   :  { %1634 = vmatprep.mubr.bf16.mxu1 %v5027_v58 }
  0xbb   :  { %1700 = vmatmul.mubr.bf16.gmra.mxu0 %v5032_v59 }
  0xbc   :  { %1635 = vmatmul.mubr.bf16.gmra.mxu1 %v5031_v60  ;;  %1707 = vmatprep.mubr.bf16.mxu0 %v5033_v62  ;;  %v6139_v60 = vld [vmem:[%s7308_s4 + $0x28] sm:$0xff]  }
  0xbd   :  { %1772 = vmatprep.mubr.bf16.mxu1 %v5037_v63 }
  0xc3   :  { %1708 = vmatmul.mubr.bf16.gmra.mxu0 %v5038_v35  ;;  %v6147_v35 = vld [vmem:[%s7308_s4 + $0x60] sm:$0xff]  }
  0xc4   :  { %1773 = vmatmul.mubr.bf16.vlgmr.msra.gmra.mxu1 %v5035_v39  ;;  %1715 = vmatprep.mubr.bf16.mxu0 %v5039_v40  ;;  %v5071_v39 = vld [vmem:[%s7310_s1 + $0x130] ss:$28 sps:$4 sm:$0xff]  }
  0xc5   :  { %4448 = vmatpush3.bf16.msra.mxu1 %v5953_v46  ;;  %1780 = vmatprep.mubr.bf16.mxu1 %v5041_v41 }
  0xc6   :  { %4449 = vmatprep.subr.bf16.mxu1 %v5959_v49 }
  0xc9   :  { %4450 = vmatpush3.bf16.msra.mxu1 %v5974_v1 }
  0xca   :  { %4451 = vmatprep.subr.bf16.mxu1 %v5983_v56 }
  0xcb   :  { %1716 = vmatmul.mubr.bf16.gmra.mxu0 %v5043_v50  ;;  %v5070_v50 = vld [vmem:[%s7310_s1 + $0x160] ss:$28 sps:$4 sm:$0xff]  }
  0xcc   :  { %1781 = vmatmul.mubr.bf16.gmra.mxu1 %v5044_v51  ;;  %1723 = vmatprep.mubr.bf16.mxu0 %v5045_v52 }
  0xcd   :  { %1788 = vmatprep.mubr.bf16.mxu1 %v5047_v55  ;;  %4452 = vmatpush3.bf16.msra.mxu1 %v5989_v57 }
  0xce   :  { %4453 = vmatprep.subr.bf16.mxu1 %v5995_v61 }
  0xd1   :  { %4454 = vmatpush3.bf16.msra.mxu1 %v6013_v42 }
  0xd2   :  { %4455 = vmatprep.subr.bf16.mxu1 %v6019_v45 }
  0xd3   :  { %1724 = vmatmul.mubr.bf16.gmra.mxu0 %v5049_v32  ;;  %v6160_v32 = vld [vmem:[%s7308_s4 + $0x20] sm:$0xff]  }
  0xd4   :  { %1789 = vmatmul.mubr.bf16.gmra.mxu1 %v5050_v0  ;;  %1731 = vmatprep.mubr.bf16.mxu0 %v5051_v33 }
  0xd5   :  { %1796 = vmatprep.mubr.bf16.mxu1 %v5053_v34  ;;  %4456 = vmatpush3.bf16.msra.mxu1 %v6025_v2  ;;  %v6168_v34 = vld [vmem:[%s7308_s4 + $0x58] sm:$0xff]  }
  0xd6   :  { %4457 = vmatprep.subr.bf16.mxu1 %v6031_v3 }
  0xd9   :  { %4458 = vmatpush3.bf16.msra.mxu1 %v6049_v8 }
  0xda   :  { %4459 = vmatprep.subr.bf16.mxu1 %v6055_v9 }
  0xdb   :  { %1732 = vmatmul.mubr.bf16.gmra.mxu0 %v5055_v4  ;;  %v5072_v4 = vld [vmem:[%s7310_s1 + $0x19c] ss:$28 sps:$4 sm:$0xff]  }
  0xdc   :  { %1797 = vmatmul.mubr.bf16.gmra.mxu1 %v5056_v5  ;;  %4811 = vmatprep.mubr.msk.bf16.mxu0 %vm765_vm0, %v5059_v6 }
  0xdd   :  { %1804 = vmatprep.mubr.bf16.mxu1 %v5057_v7  ;;  %4460 = vmatpush3.bf16.msra.mxu1 %v6062_v10  ;;  %v5074_v7 = vld [vmem:[%s7310_s1 + $0x168] ss:$28 sps:$4 sm:$0xff]  }
  0xde   :  { %4461 = vmatprep.subr.bf16.mxu1 %v6068_v11 }
  0xe1   :  { %4462 = vmatpush3.bf16.msra.mxu1 %v6083_v15 }
  0xe2   :  { %4827 = vmatprep.subr.bf16.mxu1 %v6092_v17 }
  0xe3   :  { %v3995_v18 = vpop.f32.mrf.mxu0  ;;  %4812 = vmatmul.mubr.msk.bf16.vlgmr.msra.gmra.mxu0 %vm765_vm0, %v5061_v12 }
  0xe4   :  { %v4059_v19 = vpop.f32.mrf.mxu1  ;;  %1805 = vmatmul.mubr.bf16.gmra.mxu1 %v5060_v13  ;;  %4384 = vmatpush3.bf16.msra.mxu0 %v6099_v20 }
  0xe5   :  { %v3996_v21 = vpop.f32.mrf.mxu0  ;;  %4385 = vmatprep.subr.bf16.mxu0 %v6105_v22  ;;  %1812 = vmatprep.mubr.bf16.mxu1 %v5062_v14 }
  0xe6   :  { %v3997_v24 = vadd.f32 %v3996_v21, %v3995_v18  ;;  %v4060_v25 = vpop.f32.mrf.mxu1  ;;  %4815 = vmatprep.mubr.msk.bf16.mxu0 %vm765_vm0, %v5064_v16  ;;  %v6181_v16 = vld [vmem:[%s7308_s4 + $0x18] sm:$0xff]   ;;  %v6189_v21 = vld [vmem:[%s7308_s4 + $0x50] sm:$0xff]  }
  0xe7   :  { %v4061_v27 = vadd.f32 %v4060_v25, %v4059_v19  ;;  %v3998_v28 = vpop.f32.mrf.mxu0 }
  0xe8   :  { %v4062_v29 = vpop.f32.mrf.mxu1  ;;  %4386 = vmatpush3.bf16.msra.mxu0 %v6118_v30 }
  0xe9   :  { %v6121_v31 = vadd.f32 %v4061_v27, %v3997_v24  ;;  %v3999_v38 = vpop.f32.mrf.mxu0  ;;  %4387 = vmatprep.subr.bf16.mxu0 %v6126_v43 }
  0xea   :  { %v4000_v36 = vadd.f32 %v3999_v38, %v3998_v28  ;;  %v4063_v48 = vpop.f32.mrf.mxu1  ;;  %v6202_v38 = vld [vmem:[%s7308_s4 + $0x10] sm:$0xff]  }
  0xeb   :  { %v4064_v54 = vadd.f32 %v4063_v48, %v4062_v29  ;;  %v4001_v58 = vpop.f32.mrf.mxu0  ;;  %4816 = vmatmul.mubr.msk.bf16.gmra.mxu0 %vm765_vm0, %v5066_v23  ;;  %v5076_v23 = vld [vmem:[%s7310_s1 + $0x1a0] ss:$28 sps:$4 sm:$0xff]   ;;  %v6210_v48 = vld [vmem:[%s7308_s4 + $0x48] sm:$0xff]  }
  0xec   :  { %v4065_v59 = vpop.f32.mrf.mxu1  ;;  %1813 = vmatmul.mubr.bf16.gmra.mxu1 %v5065_v26  ;;  %4388 = vmatpush3.bf16.msra.mxu0 %v6139_v60  ;;  %v5075_v26 = vld [vmem:[%s7310_s1 + $0x198] ss:$28 sps:$4 sm:$0xff]  }
  0xed   :  { %v6142_v62 = vadd.f32 %v4064_v54, %v4000_v36  ;;  %v4002_v63 = vpop.f32.mrf.mxu0  ;;  %4389 = vmatprep.subr.bf16.mxu0 %v6147_v35  ;;  %1820 = vmatprep.mubr.bf16.mxu1 %v5067_v44 }
  0xee   :  { %v4003_v40 = vadd.f32 %v4002_v63, %v4001_v58  ;;  %v4066_v41 = vpop.f32.mrf.mxu1  ;;  %4819 = vmatprep.mubr.msk.bf16.mxu0 %vm765_vm0, %v5069_v53  ;;  %v5079_v53 = vld [vmem:[%s7311_s2 + $0x4] ss:$28 sps:$4 sm:$0xff]  }
  0xef   :  { %v4067_v51 = vadd.f32 %v4066_v41, %v4065_v59  ;;  %v4004_v52 = vpop.f32.mrf.mxu0  ;;  %v5082_v59 = vld [vmem:[%s7311_s2 + $0xc] ss:$28 sps:$4 sm:$0xff]  }
  0xf0   :  { %v4068_v55 = vpop.f32.mrf.mxu1  ;;  %4390 = vmatpush3.bf16.msra.mxu0 %v6160_v32  ;;  %v6223_v41 = vld [vmem:[%s7308_s4 + $0x8] sm:$0xff]  }
  0xf1   :  { %v6163_v0 = vadd.f32 %v4067_v51, %v4003_v40  ;;  %v4005_v33 = vpop.f32.mrf.mxu0  ;;  %4391 = vmatprep.subr.bf16.mxu0 %v6168_v34 }
  0xf2   :  { %v4006_v5 = vadd.f32 %v4005_v33, %v4004_v52  ;;  %v4069_v6 = vpop.f32.mrf.mxu1  ;;  %v6231_v52 = vld [vmem:[%s7308_s4 + $0x40] sm:$0xff]  }
  0xf3   :  { %v4070_v12 = vadd.f32 %v4069_v6, %v4068_v55  ;;  %v4007_v13 = vpop.f32.mrf.mxu0  ;;  %4820 = vmatmul.mubr.msk.bf16.gmra.mxu0 %vm765_vm0, %v5071_v39  ;;  %v5077_v6 = vld [vmem:[%s7311_s2] ss:$28 sps:$4 sm:$0xff]  }
  0xf4   :  { %v4071_v14 = vpop.f32.mrf.mxu1  ;;  %1821 = vmatmul.mubr.bf16.gmra.mxu1 %v5070_v50  ;;  %4392 = vmatpush3.bf16.msra.mxu0 %v6181_v16 }
  0xf5   :  { %v6184_v18 = vadd.f32 %v4070_v12, %v4006_v5  ;;  %v4008_v19 = vpop.f32.mrf.mxu0  ;;  %4393 = vmatprep.subr.bf16.mxu0 %v6189_v21  ;;  %1828 = vmatprep.mubr.bf16.mxu1 %v5072_v4  ;;  %v6240_v12 = vld [vmem:[%s7308_s4] sm:$0xff]  }
  0xf6   :  { %v4009_v24 = vadd.f32 %v4008_v19, %v4007_v13  ;;  %v4072_v25 = vpop.f32.mrf.mxu1  ;;  %4823 = vmatprep.mubr.msk.bf16.mxu0 %vm765_vm0, %v5074_v7  ;;  %v5080_v13 = vld [vmem:[%s7311_s2 + $0x8] ss:$28 sps:$4 sm:$0xff]  }
  0xf7   :  { %v4073_v27 = vadd.f32 %v4072_v25, %v4071_v14  ;;  %v4010_v28 = vpop.f32.mrf.mxu0 }
  0xf8   :  { %v4074_v29 = vpop.f32.mrf.mxu1  ;;  %4394 = vmatpush3.bf16.msra.mxu0 %v6202_v38 }
  0xf9   :  { %v6205_v44 = vadd.f32 %v4073_v27, %v4009_v24  ;;  %v4011_v36 = vpop.f32.mrf.mxu0  ;;  %4395 = vmatprep.subr.bf16.mxu0 %v6210_v48  ;;  %v5085_v24 = vld [vmem:[%s7311_s2 + $0x3c] ss:$28 sps:$4 sm:$0xff]   ;;  %v5088_v27 = vld [vmem:[%s7311_s2 + $0x44] ss:$28 sps:$4 sm:$0xff]  }
  0xfa   :  { %v4012_v54 = vadd.f32 %v4011_v36, %v4010_v28  ;;  %v4075_v58 = vpop.f32.mrf.mxu1 }
  0xfb   :  { %v4076_v63 = vadd.f32 %v4075_v58, %v4074_v29  ;;  %v4013_v39 = vpop.f32.mrf.mxu0  ;;  %4824 = vmatmul.mubr.msk.bf16.gmra.mxu0 %vm765_vm0, %v5076_v23  ;;  %v6251_v23 = vld [vmem:[%s7308_s4 + $0x178] sm:$0xff]  }
  0xfc   :  { %v4077_v40 = vpop.f32.mrf.mxu1  ;;  %1829 = vmatmul.mubr.bf16.gmra.mxu1 %v5075_v26  ;;  %4396 = vmatpush3.bf16.msra.mxu0 %v6223_v41  ;;  %7342 = vst [vmem:[#allocation4_spill] sm:$0xff] %v6251_v23 }
  0xfd   :  { %v6226_v50 = vadd.f32 %v4076_v63, %v4012_v54  ;;  %v4014_v51 = vpop.f32.mrf.mxu0  ;;  %4397 = vmatprep.subr.bf16.mxu0 %v6231_v52  ;;  %2350 = vmatprep.mubr.bf16.mxu0 %v5079_v53  ;;  %v6263_v53 = vld [vmem:[%s7308_s4 + $0x138] sm:$0xff]  }
  0xfe   :  { %v4015_v55 = vadd.f32 %v4014_v51, %v4013_v39  ;;  %v4078_v33 = vpop.f32.mrf.mxu1  ;;  %2447 = vmatprep.mubr.bf16.mxu1 %v5082_v59  ;;  %7343 = vst [vmem:[#allocation5_spill] sm:$0xff] %v6263_v53  ;;  %v6272_v39 = vld [vmem:[%s7308_s4 + $0x170] sm:$0xff]  }
  0xff   :  { %v4079_v4 = vadd.f32 %v4078_v33, %v4077_v40  ;;  %v4016_v5 = vpop.f32.mrf.mxu0  ;;  %7344 = vst [vmem:[#allocation6_spill] sm:$0xff] %v6272_v39  ;;  %v6281_v33 = vld [vmem:[%s7308_s4 + $0x180] sm:$0xff]  }
 0x100   :  { %v4080_v7 = vpop.f32.mrf.mxu1  ;;  %4398 = vmatpush3.bf16.msra.mxu0 %v6240_v12  ;;  %7345 = vst [vmem:[#allocation7_spill] sm:$0xff] %v6281_v33 }
 0x101   :  { %v6246_v14 = vadd.f32 %v4079_v4, %v4015_v55  ;;  %v4017_v19 = vpop.f32.mrf.mxu0  ;;  %4511 = vmatprep.subr.bf16.mxu0 %v6251_v23  ;;  %v5083_v55 = vld [vmem:[%s7311_s2 + $0x38] ss:$28 sps:$4 sm:$0xff]  }
 0x102   :  { %v4018_v25 = vadd.f32 %v4017_v19, %v4016_v5  ;;  %v4081_v26 = vpop.f32.mrf.mxu1  ;;  %v5086_v5 = vld [vmem:[%s7311_s2 + $0x40] ss:$28 sps:$4 sm:$0xff]  }
 0x103   :  { %v4082_v28 = vadd.f32 %v4081_v26, %v4080_v7  ;;  %v4019_v29 = vpop.f32.mrf.mxu0  ;;  %2351 = vmatmul.mubr.bf16.vlgmr.msra.gmra.mxu0 %v5077_v6  ;;  %v6290_v6 = vld [vmem:[%s7308_s4 + $0x130] sm:$0xff]  }
 0x104   :  { %v4083_v36 = vpop.f32.mrf.mxu1  ;;  %2448 = vmatmul.mubr.bf16.vlgmr.msra.gmra.mxu1 %v5080_v13  ;;  %4512 = vmatpush3.bf16.msra.mxu0 %v6263_v53  ;;  %7346 = vst [vmem:[#allocation8_spill] sm:$0xff] %v6290_v6  ;;  %v5091_v7 = vld [vmem:[%s7311_s2 + $0x74] ss:$28 sps:$4 sm:$0xff]  }
 0x105   :  { %v6266_v54 = vadd.f32 %v4082_v28, %v4018_v25  ;;  %4828 = vmatpush3.bf16.msra.mxu1 %v6092_v17  ;;  %v4020_v58 = vpop.f32.mrf.mxu0  ;;  %2358 = vmatprep.mubr.bf16.mxu0 %v5085_v24  ;;  %v5094_v24 = vld [vmem:[%s7311_s2 + $0x7c] ss:$28 sps:$4 sm:$0xff]   ;;  %v6304_v25 = vld [vmem:[%s7308_s4 + $0x168] sm:$0xff]  }
 0x106   :  { %v4021_v59 = vadd.f32 %v4020_v58, %v4019_v29  ;;  %v4084_v63 = vpop.f32.mrf.mxu1  ;;  %2455 = vmatprep.mubr.bf16.mxu1 %v5088_v27  ;;  %4513 = vmatprep.subr.bf16.mxu0 %v6272_v39  ;;  %7347 = vst [vmem:[#allocation9_spill] sm:$0xff] %v6304_v25 }
 0x107   :  { %v4085_v40 = vadd.f32 %v4084_v63, %v4083_v36  ;;  %v4022_v51 = vpop.f32.mrf.mxu0  ;;  %4829 = vmatprep.subr.bf16.mxu1 %v6281_v33  ;;  %v6314_v63 = vld [vmem:[%s7308_s4 + $0x128] sm:$0xff]  }
 0x108   :  { %v4086_v4 = vpop.f32.mrf.mxu1  ;;  %4514 = vmatpush3.bf16.msra.mxu0 %v6290_v6  ;;  %7348 = vst [vmem:[#allocation10_spill] sm:$0xff] %v6314_v63 }
 0x109   :  { %v6296_v13 = vadd.f32 %v4085_v40, %v4021_v59  ;;  %v4023_v19 = vpop.f32.mrf.mxu0  ;;  %4515 = vmatprep.subr.bf16.mxu0 %v6304_v25  ;;  %4830 = vmatpush3.bf16.msra.mxu1 %v6281_v33 }
 0x10a   :  { %v4024_v26 = vadd.f32 %v4023_v19, %v4022_v51  ;;  %v4087_v27 = vpop.f32.mrf.mxu1  ;;  %4585 = vmatprep.subr.bf16.mxu1 %v5911_v47  ;;  %v6320_v47 = vld [vmem:[%s7308_s4 + $0x160] sm:$0xff]   ;;  %v5092_v19 = vld [vmem:[%s7311_s2 + $0x78] ss:$28 sps:$4 sm:$0xff]  }
 0x10b   :  { %v4088_v28 = vadd.f32 %v4087_v27, %v4086_v4  ;;  %v4025_v29 = vpop.f32.mrf.mxu0  ;;  %2359 = vmatmul.mubr.bf16.gmra.mxu0 %v5083_v55  ;;  %7349 = vst [vmem:[#allocation11_spill] sm:$0xff] %v6320_v47 }
 0x10c   :  { %v4089_v36 = vpop.f32.mrf.mxu1  ;;  %2456 = vmatmul.mubr.bf16.gmra.mxu1 %v5086_v5  ;;  %2366 = vmatprep.mubr.bf16.mxu0 %v5091_v7  ;;  %v5089_v5 = vld [vmem:[%s7311_s2 + $0x70] ss:$28 sps:$4 sm:$0xff]  }
 0x10d   :  { %v6309_v58 = vadd.f32 %v4088_v28, %v4024_v26  ;;  %v4026_v59 = vpop.f32.mrf.mxu0  ;;  %2463 = vmatprep.mubr.bf16.mxu1 %v5094_v24  ;;  %4516 = vmatpush3.bf16.msra.mxu0 %v6314_v63  ;;  %v5097_v24 = vld [vmem:[%s7311_s2 + $0xac] ss:$28 sps:$4 sm:$0xff]   ;;  %v5100_v28 = vld [vmem:[%s7311_s2 + $0xb4] ss:$28 sps:$4 sm:$0xff]  }
 0x10e   :  { %v4027_v40 = vadd.f32 %v4026_v59, %v4025_v29  ;;  %v4090_v51 = vpop.f32.mrf.mxu1  ;;  %4517 = vmatprep.subr.bf16.mxu0 %v6320_v47  ;;  %v6340_v29 = vld [vmem:[%s7308_s4 + $0x120] sm:$0xff]  }
 0x10f   :  { %v4091_v55 = vadd.f32 %v4090_v51, %v4089_v36  ;;  %v4028_v4 = vpop.f32.mrf.mxu0  ;;  %7350 = vst [vmem:[#allocation12_spill] sm:$0xff] %v6340_v29  ;;  %v6346_v51 = vld [vmem:[%s7308_s4 + $0x158] sm:$0xff]  }
 0x110   :  { %v4092_v7 = vpop.f32.mrf.mxu1  ;;  %7351 = vst [vmem:[#allocation13_spill] sm:$0xff] %v6346_v51 }
 0x111   :  { %v6332_v26 = vadd.f32 %v4091_v55, %v4027_v40  ;;  %v4029_v27 = vpop.f32.mrf.mxu0  ;;  %4518 = vmatpush3.bf16.msra.mxu0 %v6340_v29 }
 0x112   :  { %v4030_v36 = vadd.f32 %v4029_v27, %v4028_v4  ;;  %v4093_v59 = vpop.f32.mrf.mxu1  ;;  %4519 = vmatprep.subr.bf16.mxu0 %v6346_v51  ;;  %v6354_v4 = vld [vmem:[%s7308_s4 + $0x118] sm:$0xff]  }
 0x113   :  { %v4094_v40 = vadd.f32 %v4093_v59, %v4092_v7  ;;  %v4031_v55 = vpop.f32.mrf.mxu0  ;;  %2367 = vmatmul.mubr.bf16.gmra.mxu0 %v5089_v5  ;;  %7352 = vst [vmem:[#allocation14_spill] sm:$0xff] %v6354_v4  ;;  %v6360_v5 = vld [vmem:[%s7308_s4 + $0x150] sm:$0xff]  }
 0x114   :  { %v4095_v33 = vpop.f32.mrf.mxu1  ;;  %2464 = vmatmul.mubr.bf16.gmra.mxu1 %v5092_v19  ;;  %2374 = vmatprep.mubr.bf16.mxu0 %v5097_v24  ;;  %7353 = vst [vmem:[#allocation15_spill] sm:$0xff] %v6360_v5  ;;  %v5095_v24 = vld [vmem:[%s7311_s2 + $0xa8] ss:$28 sps:$4 sm:$0xff]  }
 0x115   :  { %v6349_v47 = vadd.f32 %v4094_v40, %v4030_v36  ;;  %v4032_v63 = vpop.f32.mrf.mxu0  ;;  %2471 = vmatprep.mubr.bf16.mxu1 %v5100_v28  ;;  %4520 = vmatpush3.bf16.msra.mxu0 %v6354_v4  ;;  %v5098_v36 = vld [vmem:[%s7311_s2 + $0xb0] ss:$28 sps:$4 sm:$0xff]  }
 0x116   :  { %v4033_v27 = vadd.f32 %v4032_v63, %v4031_v55  ;;  %v4096_v29 = vpop.f32.mrf.mxu1  ;;  %4521 = vmatprep.subr.bf16.mxu0 %v6360_v5  ;;  %v5103_v63 = vld [vmem:[%s7311_s2 + $0xe4] ss:$28 sps:$4 sm:$0xff]   ;;  %v6386_v4 = vld [vmem:[%s7308_s4 + $0x148] sm:$0xff]  }
 0x117   :  { %v4097_v7 = vadd.f32 %v4096_v29, %v4095_v33  ;;  %v4034_v19 = vpop.f32.mrf.mxu0  ;;  %v5106_v33 = vld [vmem:[%s7311_s2 + $0xec] ss:$28 sps:$4 sm:$0xff]   ;;  %v6380_v29 = vld [vmem:[%s7308_s4 + $0x110] sm:$0xff]   ;;  %7355 = vst [vmem:[#allocation17_spill] sm:$0xff] %v6386_v4 }
 0x118   :  { %v4098_v28 = vpop.f32.mrf.mxu1  ;;  %7354 = vst [vmem:[#allocation16_spill] sm:$0xff] %v6380_v29 }
 0x119   :  { %v6372_v59 = vadd.f32 %v4097_v7, %v4033_v27  ;;  %v4035_v40 = vpop.f32.mrf.mxu0  ;;  %4522 = vmatpush3.bf16.msra.mxu0 %v6380_v29 }
 0x11a   :  { %v4036_v55 = vadd.f32 %v4035_v40, %v4034_v19  ;;  %v4099_v5 = vpop.f32.mrf.mxu1  ;;  %4523 = vmatprep.subr.bf16.mxu0 %v6386_v4  ;;  %v6394_v19 = vld [vmem:[%s7308_s4 + $0x108] sm:$0xff]  }
 0x11b   :  { %v4100_v27 = vadd.f32 %v4099_v5, %v4098_v28  ;;  %v4037_v7 = vpop.f32.mrf.mxu0  ;;  %2375 = vmatmul.mubr.bf16.gmra.mxu0 %v5095_v24  ;;  %7356 = vst [vmem:[#allocation18_spill] sm:$0xff] %v6394_v19  ;;  %v6400_v5 = vld [vmem:[%s7308_s4 + $0x140] sm:$0xff]  }
 0x11c   :  { %v4101_v51 = vpop.f32.mrf.mxu1  ;;  %2472 = vmatmul.mubr.bf16.gmra.mxu1 %v5098_v36  ;;  %2382 = vmatprep.mubr.bf16.mxu0 %v5103_v63  ;;  %7357 = vst [vmem:[#allocation19_spill] sm:$0xff] %v6400_v5  ;;  %v5101_v36 = vld [vmem:[%s7311_s2 + $0xe0] ss:$28 sps:$4 sm:$0xff]  }
 0x11d   :  { %v6389_v25 = vadd.f32 %v4100_v27, %v4036_v55  ;;  %v4038_v6 = vpop.f32.mrf.mxu0  ;;  %2479 = vmatprep.mubr.bf16.mxu1 %v5106_v33  ;;  %4524 = vmatpush3.bf16.msra.mxu0 %v6394_v19  ;;  %v5104_v33 = vld [vmem:[%s7311_s2 + $0xe8] ss:$28 sps:$4 sm:$0xff]  }
 0x11e   :  { %v4039_v40 = vadd.f32 %v4038_v6, %v4037_v7  ;;  %v4102_v29 = vpop.f32.mrf.mxu1  ;;  %4525 = vmatprep.subr.bf16.mxu0 %v6400_v5  ;;  %v5109_v6 = vld [vmem:[%s7311_s2 + $0x11c] ss:$28 sps:$4 sm:$0xff]  }
 0x11f   :  { %v4103_v24 = vadd.f32 %v4102_v29, %v4101_v51  ;;  %v4040_v28 = vpop.f32.mrf.mxu0  ;;  %v5112_v51 = vld [vmem:[%s7311_s2 + $0x124] ss:$28 sps:$4 sm:$0xff]  }
 0x120   :  { %v4104_v63 = vpop.f32.mrf.mxu1  ;;  %v6420_v29 = vld [vmem:[%s7308_s4 + $0x100] sm:$0xff]  }
 0x121   :  { %v6412_v55 = vadd.f32 %v4103_v24, %v4039_v40  ;;  %v4041_v27 = vpop.f32.mrf.mxu0  ;;  %7358 = vst [vmem:[#allocation20_spill] sm:$0xff] %v6420_v29  ;;  %4526 = vmatpush3.bf16.msra.mxu0 %v6420_v29 }
 0x122   :  { %v4042_v7 = vadd.f32 %v4041_v27, %v4040_v28  ;;  %v4105_v5 = vpop.f32.mrf.mxu1  ;;  %4649 = vmatprep.subr.bf16.mxu0 %v5890_v37  ;;  %v5107_v28 = vld [vmem:[%s7311_s2 + $0x118] ss:$28 sps:$4 sm:$0xff]  }
 0x123   :  { %v4106_v19 = vadd.f32 %v4105_v5, %v4104_v63  ;;  %v4123_v4 = vpop.f32.mrf.mxu0  ;;  %2383 = vmatmul.mubr.bf16.gmra.mxu0 %v5101_v36  ;;  %v5110_v5 = vld [vmem:[%s7311_s2 + $0x120] ss:$28 sps:$4 sm:$0xff]  }
 0x124   :  { %v4793_v40 = vpop.f32.mrf.mxu1  ;;  %2480 = vmatmul.mubr.bf16.gmra.mxu1 %v5104_v33  ;;  %2390 = vmatprep.mubr.bf16.mxu0 %v5109_v6 }
 0x125   :  { %v6424_v24 = vadd.f32 %v4106_v19, %v4042_v7  ;;  %v4124_v39 = vpop.f32.mrf.mxu0  ;;  %2487 = vmatprep.mubr.bf16.mxu1 %v5112_v51  ;;  %v5115_v19 = vld [vmem:[%s7311_s2 + $0x154] ss:$28 sps:$4 sm:$0xff]  }
 0x126   :  { %v4125_v53 = vadd.f32 %v4124_v39, %v4123_v4  ;;  %v1115_v17 = vpop.f32.mrf.mxu1  ;;  %v5118_v39 = vld [vmem:[%s7311_s2 + $0x15c] ss:$28 sps:$4 sm:$0xff]  }
 0x127   :  { %7359 = vst [vmem:[#allocation21_spill] sm:$0xff] %v6424_v24  ;;  %v4126_v15 = vpop.f32.mrf.mxu0 }
 0x128   :  { %v1019_v27 = vadd.f32 %v4125_v53, %v6121_v31  ;;  %v4794_v37 = vpop.f32.mrf.mxu1 }
 0x129   :  { %v4127_v36 = vpop.f32.mrf.mxu0 }
 0x12a   :  { %v6439_v4 = vadd.f32 %v1115_v17, %v1019_v27  ;;  %v4128_v63 = vadd.f32 %v4127_v36, %v4126_v15  ;;  %v1118_v33 = vpop.f32.mrf.mxu1  ;;  %v5113_v17 = vld [vmem:[%s7311_s2 + $0x150] ss:$28 sps:$4 sm:$0xff]  }
 0x12b   :  { %v4129_v6 = vpop.f32.mrf.mxu0  ;;  %2391 = vmatmul.mubr.bf16.gmra.mxu0 %v5107_v28  ;;  %v5121_v28 = vld [vmem:[%s7311_s2 + $0x18c] ss:$28 sps:$4 sm:$0xff]  }
 0x12c   :  { %7360 = vst [vmem:[#allocation22_spill] sm:$0xff] %v6439_v4  ;;  %v1022_v31 = vadd.f32 %v4128_v63, %v6142_v62  ;;  %v4797_v53 = vpop.f32.mrf.mxu1  ;;  %2488 = vmatmul.mubr.bf16.gmra.mxu1 %v5110_v5  ;;  %2398 = vmatprep.mubr.bf16.mxu0 %v5115_v19  ;;  %v5116_v62 = vld [vmem:[%s7311_s2 + $0x158] ss:$28 sps:$4 sm:$0xff]  }
 0x12d   :  { %v4130_v51 = vpop.f32.mrf.mxu0  ;;  %2495 = vmatprep.mubr.bf16.mxu1 %v5118_v39  ;;  %v5124_v19 = vld [vmem:[%s7311_s2 + $0x194] ss:$28 sps:$4 sm:$0xff]  }
 0x12e   :  { %v6442_v7 = vadd.f32 %v1118_v33, %v1022_v31  ;;  %v4131_v29 = vadd.f32 %v4130_v51, %v4129_v6  ;;  %v1131_v24 = vpop.f32.mrf.mxu1 }
 0x12f   :  { %v4132_v23 = vpop.f32.mrf.mxu0 }
 0x130   :  { %7361 = vst [vmem:[#allocation23_spill] sm:$0xff] %v6442_v7  ;;  %v1027_v15 = vadd.f32 %v4131_v29, %v6163_v0  ;;  %v6448_v27 = vpop.f32.mrf.mxu1 }
 0x131   :  { %v4133_v5 = vpop.f32.mrf.mxu0 }
 0x132   :  { %v4134_v36 = vadd.f32 %v4133_v5, %v4132_v23  ;;  %v1134_v39 = vpop.f32.mrf.mxu1  ;;  %v6459_v63 = vadd.f32 %v4793_v40, %v1027_v15  ;;  %v5119_v23 = vld [vmem:[%s7311_s2 + $0x188] ss:$28 sps:$4 sm:$0xff]   ;;  %v5127_v15 = vld [vmem:[%s7311_s2 + $0x14] ss:$28 sps:$4 sm:$0xff]  }
 0x133   :  { %v4135_v0 = vpop.f32.mrf.mxu0  ;;  %2399 = vmatmul.mubr.bf16.gmra.mxu0 %v5113_v17 }
 0x134   :  { %v1030_v29 = vadd.f32 %v4134_v36, %v6184_v18  ;;  %v6462_v33 = vpop.f32.mrf.mxu1  ;;  %2496 = vmatmul.mubr.bf16.gmra.mxu1 %v5116_v62  ;;  %2406 = vmatprep.mubr.bf16.mxu0 %v5121_v28  ;;  %v5122_v18 = vld [vmem:[%s7311_s2 + $0x190] ss:$28 sps:$4 sm:$0xff]  }
 0x135   :  { %v4136_v6 = vpop.f32.mrf.mxu0  ;;  %2503 = vmatprep.mubr.bf16.mxu1 %v5124_v19 }
 0x136   :  { %v4137_v31 = vadd.f32 %v4136_v6, %v4135_v0  ;;  %v6464_v51 = vpop.f32.mrf.mxu1  ;;  %v6466_v7 = vadd.f32 %v4794_v37, %v1030_v29  ;;  %v5128_v37 = vld [vmem:[%s7311_s2 + $0x18] ss:$28 sps:$4 sm:$0xff]  }
 0x137   :  { %v4138_v4 = vpop.f32.mrf.mxu0 }
 0x138   :  { %7362 = vst [vmem:[#allocation24_spill] sm:$0xff] %v6466_v7  ;;  %v1035_v40 = vadd.f32 %v4137_v31, %v6205_v44  ;;  %v6472_v17 = vpop.f32.mrf.mxu1 }
 0x139   :  { %v4139_v62 = vpop.f32.mrf.mxu0 }
 0x13a   :  { %v4140_v28 = vadd.f32 %v4139_v62, %v4138_v4  ;;  %v6483_v5 = vpop.f32.mrf.mxu1  ;;  %v6485_v19 = vadd.f32 %v1131_v24, %v1035_v40  ;;  %v5125_v24 = vld [vmem:[%s7311_s2 + $0x10] ss:$28 sps:$4 sm:$0xff]  }
 0x13b   :  { %v4141_v44 = vpop.f32.mrf.mxu0  ;;  %2407 = vmatmul.mubr.bf16.gmra.mxu0 %v5119_v23  ;;  %v5129_v40 = vld [vmem:[%s7311_s2 + $0x50] ss:$28 sps:$4 sm:$0xff]  }
 0x13c   :  { %v1038_v36 = vadd.f32 %v4140_v28, %v6226_v50  ;;  %v6488_v0 = vpop.f32.mrf.mxu1  ;;  %2504 = vmatmul.mubr.bf16.gmra.mxu1 %v5122_v18  ;;  %2544 = vmatprep.mubr.bf16.mxu0 %v5127_v15  ;;  %v5132_v15 = vld [vmem:[%s7311_s2 + $0x4c] ss:$28 sps:$4 sm:$0xff]  }
 0x13d   :  { %v4142_v29 = vpop.f32.mrf.mxu0  ;;  %4831 = vmatprep.mubr.msk.bf16.mxu1 %vm765_vm0, %v5128_v37  ;;  %v5133_v37 = vld [vmem:[%s7311_s2 + $0x88] ss:$28 sps:$4 sm:$0xff]  }
 0x13e   :  { %v4143_v6 = vadd.f32 %v4142_v29, %v4141_v44  ;;  %v6491_v31 = vpop.f32.mrf.mxu1  ;;  %v6493_v7 = vadd.f32 %v1134_v39, %v1038_v36 }
 0x13f   :  { %v4144_v4 = vpop.f32.mrf.mxu0 }
 0x140   :  { %v1043_v23 = vadd.f32 %v4143_v6, %v6246_v14  ;;  %v6499_v50 = vpop.f32.mrf.mxu1 }
 0x141   :  { %v4145_v18 = vpop.f32.mrf.mxu0 }
 0x142   :  { %v4146_v39 = vadd.f32 %v4145_v18, %v4144_v4  ;;  %v6507_v62 = vpop.f32.mrf.mxu1  ;;  %v6512_v28 = vadd.f32 %v4797_v53, %v1043_v23 }
 0x143   :  { %v4147_v14 = vpop.f32.mrf.mxu0  ;;  %2545 = vmatmul.mubr.bf16.vlgmr.msra.gmra.mxu0 %v5125_v24 }
 0x144   :  { %v1046_v44 = vadd.f32 %v4146_v39, %v6266_v54  ;;  %v4197_v36 = vpop.f32.mrf.mxu1  ;;  %4832 = vmatmul.mubr.msk.bf16.vlgmr.msra.gmra.mxu1 %vm765_vm0, %v5129_v40  ;;  %4650 = vmatpush3.bf16.msra.mxu0 %v5953_v46  ;;  %v5130_v46 = vld [vmem:[%s7311_s2 + $0x48] ss:$28 sps:$4 sm:$0xff]  }
 0x145   :  { %4586 = vmatpush3.bf16.msra.mxu1 %v6099_v20  ;;  %v4148_v29 = vpop.f32.mrf.mxu0  ;;  %2552 = vmatprep.mubr.bf16.mxu0 %v5132_v15 }
 0x146   :  { %v4149_v6 = vadd.f32 %v4148_v29, %v4147_v14  ;;  %v4198_v4 = vpop.f32.mrf.mxu1  ;;  %4587 = vmatprep.subr.bf16.mxu1 %v6105_v22  ;;  %4835 = vmatprep.mubr.msk.bf16.mxu1 %vm765_vm0, %v5133_v37  ;;  %v6521_v53 = vadd.f32 %v6448_v27, %v1046_v44  ;;  %v5134_v22 = vld [vmem:[%s7311_s2 + $0xc0] ss:$28 sps:$4 sm:$0xff]  }
 0x147   :  { %v6523_v24 = vadd.f32 %v4198_v4, %v4197_v36  ;;  %v4150_v54 = vpop.f32.mrf.mxu0  ;;  %4651 = vmatprep.subr.bf16.mxu0 %v5959_v49  ;;  %v5137_v27 = vld [vmem:[%s7311_s2 + $0x84] ss:$28 sps:$4 sm:$0xff]   ;;  %v5138_v49 = vld [vmem:[%s7311_s2 + $0xf8] ss:$28 sps:$4 sm:$0xff]  }
 0x148   :  { %v1051_v20 = vadd.f32 %v4149_v6, %v6296_v13  ;;  %v4200_v23 = vpop.f32.mrf.mxu1  ;;  %4652 = vmatpush3.bf16.msra.mxu0 %v5974_v1  ;;  %v5135_v36 = vld [vmem:[%s7311_s2 + $0x80] ss:$28 sps:$4 sm:$0xff]   ;;  %v5143_v6 = vld [vmem:[%s7311_s2 + $0x168] ss:$28 sps:$4 sm:$0xff]  }
 0x149   :  { %4588 = vmatpush3.bf16.msra.mxu1 %v6118_v30  ;;  %v4151_v40 = vpop.f32.mrf.mxu0  ;;  %4653 = vmatprep.subr.bf16.mxu0 %v5983_v56 }
 0x14a   :  { %v4152_v13 = vadd.f32 %v4151_v40, %v4150_v54  ;;  %v4201_v18 = vpop.f32.mrf.mxu1  ;;  %4589 = vmatprep.subr.bf16.mxu1 %v6126_v43  ;;  %v6544_v15 = vadd.f32 %v6464_v51, %v1051_v20  ;;  %v5150_v40 = vld [vmem:[%s7312_s3 + $0x4] ss:$28 sps:$4 sm:$0xff]  }
 0x14b   :  { %v6546_v1 = vadd.f32 %v4201_v18, %v4200_v23  ;;  %v4153_v39 = vpop.f32.mrf.mxu0  ;;  %2553 = vmatmul.mubr.bf16.gmra.mxu0 %v5130_v46 }
 0x14c   :  { %v1054_v30 = vadd.f32 %v4152_v13, %v6309_v58  ;;  %v4203_v37 = vpop.f32.mrf.mxu1  ;;  %4836 = vmatmul.mubr.msk.bf16.gmra.mxu1 %vm765_vm0, %v5134_v22  ;;  %2560 = vmatprep.mubr.bf16.mxu0 %v5137_v27  ;;  %v5140_v22 = vld [vmem:[%s7311_s2 + $0xb8] ss:$28 sps:$4 sm:$0xff]  }
 0x14d   :  { %4590 = vmatpush3.bf16.msra.mxu1 %v6139_v60  ;;  %v4154_v56 = vpop.f32.mrf.mxu0  ;;  %4839 = vmatprep.mubr.msk.bf16.mxu1 %vm765_vm0, %v5138_v49 }
 0x14e   :  { %v4155_v14 = vadd.f32 %v4154_v56, %v4153_v39  ;;  %v4204_v43 = vpop.f32.mrf.mxu1  ;;  %4591 = vmatprep.subr.bf16.mxu1 %v6147_v35  ;;  %4654 = vmatpush3.bf16.msra.mxu0 %v5989_v57  ;;  %v6555_v51 = vadd.f32 %v6483_v5, %v1054_v30  ;;  %v5139_v35 = vld [vmem:[%s7311_s2 + $0x130] ss:$28 sps:$4 sm:$0xff]   ;;  %v5142_v57 = vld [vmem:[%s7311_s2 + $0xbc] ss:$28 sps:$4 sm:$0xff]  }
 0x14f   :  { %v6557_v44 = vadd.f32 %v4204_v43, %v4203_v37  ;;  %v4156_v58 = vpop.f32.mrf.mxu0  ;;  %4655 = vmatprep.subr.bf16.mxu0 %v5995_v61  ;;  %v5145_v37 = vld [vmem:[%s7311_s2 + $0xf0] ss:$28 sps:$4 sm:$0xff]  }
 0x150   :  { %v1059_v60 = vadd.f32 %v4155_v14, %v6332_v26  ;;  %v4206_v29 = vpop.f32.mrf.mxu1  ;;  %v5156_v14 = vld [vmem:[%s7312_s3 + $0x3c] ss:$28 sps:$4 sm:$0xff]  }
 0x151   :  { %4592 = vmatpush3.bf16.msra.mxu1 %v6160_v32  ;;  %v4157_v5 = vpop.f32.mrf.mxu0 }
 0x152   :  { %v4158_v4 = vadd.f32 %v4157_v5, %v4156_v58  ;;  %v4207_v61 = vpop.f32.mrf.mxu1  ;;  %4593 = vmatprep.subr.bf16.mxu1 %v6168_v34  ;;  %4656 = vmatpush3.bf16.msra.mxu0 %v6013_v42  ;;  %v6577_v26 = vadd.f32 %v6462_v33, %v1059_v60  ;;  %v7363_v58 = vld [vmem:[#allocation4_spill] sm:$0xff] }
 0x153   :  { %v6579_v54 = vadd.f32 %v4207_v61, %v4206_v29  ;;  %v4159_v46 = vpop.f32.mrf.mxu0  ;;  %2561 = vmatmul.mubr.bf16.gmra.mxu0 %v5135_v36  ;;  %4657 = vmatprep.subr.bf16.mxu0 %v6019_v45  ;;  %v7364_v36 = vld [vmem:[#allocation2_spill] sm:$0xff] }
 0x154   :  { %v1062_v32 = vadd.f32 %v4158_v4, %v6349_v47  ;;  %v4209_v20 = vpop.f32.mrf.mxu1  ;;  %4840 = vmatmul.mubr.msk.bf16.gmra.mxu1 %vm765_vm0, %v5139_v35  ;;  %2568 = vmatprep.mubr.bf16.mxu0 %v5142_v57  ;;  %v7365_v35 = vld [vmem:[#allocation3_spill] sm:$0xff] }
 0x155   :  { %4594 = vmatpush3.bf16.msra.mxu1 %v6181_v16  ;;  %v4160_v34 = vpop.f32.mrf.mxu0  ;;  %4843 = vmatprep.mubr.msk.bf16.mxu1 %vm765_vm0, %v5143_v6  ;;  %v7367_v6 = vld [vmem:[#allocation5_spill] sm:$0xff] }
 0x156   :  { %v4161_v42 = vadd.f32 %v4160_v34, %v4159_v46  ;;  %v4210_v33 = vpop.f32.mrf.mxu1  ;;  %4595 = vmatprep.subr.bf16.mxu1 %v6189_v21  ;;  %4658 = vmatpush3.bf16.msra.mxu0 %v6025_v2  ;;  %v6589_v23 = vadd.f32 %v6472_v17, %v1062_v32  ;;  %v5144_v21 = vld [vmem:[%s7311_s2 + $0x1a0] ss:$28 sps:$4 sm:$0xff]   ;;  %v5147_v2 = vld [vmem:[%s7311_s2 + $0xf4] ss:$28 sps:$4 sm:$0xff]  }
 0x157   :  { %v6591_v45 = vadd.f32 %v4210_v33, %v4209_v20  ;;  %v4162_v47 = vpop.f32.mrf.mxu0  ;;  %4659 = vmatprep.subr.bf16.mxu0 %v6031_v3  ;;  %v7369_v32 = vld [vmem:[#allocation6_spill] sm:$0xff] }
 0x158   :  { %v1067_v16 = vadd.f32 %v4161_v42, %v6372_v59  ;;  %v4212_v27 = vpop.f32.mrf.mxu1  ;;  %v5151_v42 = vld [vmem:[%s7311_s2 + $0x128] ss:$28 sps:$4 sm:$0xff]  }
 0x159   :  { %4596 = vmatpush3.bf16.msra.mxu1 %v6202_v38  ;;  %v4163_v17 = vpop.f32.mrf.mxu0 }
 0x15a   :  { %v4164_v49 = vadd.f32 %v4163_v17, %v4162_v47  ;;  %v4213_v3 = vpop.f32.mrf.mxu1  ;;  %4597 = vmatprep.subr.bf16.mxu1 %v6210_v48  ;;  %4660 = vmatpush3.bf16.msra.mxu0 %v6049_v8  ;;  %v6611_v59 = vadd.f32 %v6491_v31, %v1067_v16 }
 0x15b   :  { %v6613_v13 = vadd.f32 %v4213_v3, %v4212_v27  ;;  %v4165_v18 = vpop.f32.mrf.mxu0  ;;  %2569 = vmatmul.mubr.bf16.gmra.mxu0 %v5140_v22  ;;  %4661 = vmatprep.subr.bf16.mxu0 %v6055_v9  ;;  %v5159_v22 = vld [vmem:[%s7311_s2 + $0x164] ss:$28 sps:$4 sm:$0xff]   ;;  %v7370_v27 = vld [vmem:[#allocation8_spill] sm:$0xff] }
 0x15c   :  { %v1070_v38 = vadd.f32 %v4164_v49, %v6389_v25  ;;  %v4215_v39 = vpop.f32.mrf.mxu1  ;;  %4844 = vmatmul.mubr.msk.bf16.gmra.mxu1 %vm765_vm0, %v5144_v21  ;;  %2576 = vmatprep.mubr.bf16.mxu0 %v5147_v2  ;;  %v5162_v21 = vld [vmem:[%s7312_s3 + $0x74] ss:$28 sps:$4 sm:$0xff]  }
 0x15d   :  { %4598 = vmatpush3.bf16.msra.mxu1 %v6223_v41  ;;  %v4166_v48 = vpop.f32.mrf.mxu0  ;;  %3122 = vmatprep.mubr.bf16.mxu1 %v5150_v40 }
 0x15e   :  { %v4167_v8 = vadd.f32 %v4166_v48, %v4165_v18  ;;  %v4216_v30 = vpop.f32.mrf.mxu1  ;;  %4599 = vmatprep.subr.bf16.mxu1 %v6231_v52  ;;  %4662 = vmatpush3.bf16.msra.mxu0 %v6062_v10  ;;  %v6622_v31 = vadd.f32 %v6507_v62, %v1070_v38  ;;  %v5148_v52 = vld [vmem:[%s7312_s3] ss:$28 sps:$4 sm:$0xff]   ;;  %v5153_v10 = vld [vmem:[%s7311_s2 + $0x12c] ss:$28 sps:$4 sm:$0xff]  }
 0x15f   :  { %v6624_v9 = vadd.f32 %v4216_v30, %v4215_v39  ;;  %v4168_v25 = vpop.f32.mrf.mxu0  ;;  %4663 = vmatprep.subr.bf16.mxu0 %v6068_v11  ;;  %v7372_v39 = vld [vmem:[#allocation10_spill] sm:$0xff]  ;;  %v7373_v30 = vld [vmem:[#allocation11_spill] sm:$0xff] }
 0x160   :  { %v1075_v41 = vadd.f32 %v4167_v8, %v6412_v55  ;;  %v4218_v56 = vpop.f32.mrf.mxu1 }
 0x161   :  { %4600 = vmatpush3.bf16.msra.mxu1 %v6240_v12  ;;  %v4169_v62 = vpop.f32.mrf.mxu0  ;;  %v7366_v12 = vld [vmem:[#allocation21_spill] sm:$0xff] }
 0x162   :  { %v6642_v11 = vadd.f32 %v6488_v0, %v1075_v41  ;;  %v4170_v55 = vadd.f32 %v4169_v62, %v4168_v25  ;;  %v4219_v43 = vpop.f32.mrf.mxu1  ;;  %4713 = vmatprep.subr.bf16.mxu1 %v7363_v58  ;;  %4664 = vmatpush3.bf16.msra.mxu0 %v7364_v36  ;;  %v5157_v41 = vld [vmem:[%s7311_s2 + $0x160] ss:$28 sps:$4 sm:$0xff]  }
 0x163   :  { %v6646_v60 = vadd.f32 %v4219_v43, %v4218_v56  ;;  %v4261_v29 = vpop.f32.mrf.mxu0  ;;  %2577 = vmatmul.mubr.bf16.gmra.mxu0 %v5145_v37  ;;  %4847 = vmatprep.subr.bf16.mxu0 %v7365_v35 }
 0x164   :  { %v1078_v57 = vadd.f32 %v4170_v55, %v7366_v12  ;;  %v4221_v5 = vpop.f32.mrf.mxu1  ;;  %3123 = vmatmul.mubr.bf16.vlgmr.msra.gmra.mxu1 %v5148_v52  ;;  %2584 = vmatprep.mubr.bf16.mxu0 %v5153_v10  ;;  %v5160_v52 = vld [vmem:[%s7312_s3 + $0x70] ss:$28 sps:$4 sm:$0xff]   ;;  %v5165_v10 = vld [vmem:[%s7311_s2 + $0x19c] ss:$28 sps:$4 sm:$0xff]  }
 0x165   :  { %4714 = vmatpush3.bf16.msra.mxu1 %v7367_v6  ;;  %v4262_v0 = vpop.f32.mrf.mxu0  ;;  %3130 = vmatprep.mubr.bf16.mxu1 %v5156_v14  ;;  %v5168_v14 = vld [vmem:[%s7312_s3 + $0xac] ss:$28 sps:$4 sm:$0xff]   ;;  %v7374_v55 = vld [vmem:[#allocation12_spill] sm:$0xff] }
 0x166   :  { %v6652_v4 = vadd.f32 %v6499_v50, %v1078_v57  ;;  %v4222_v61 = vpop.f32.mrf.mxu1  ;;  %v4263_v46 = vadd.f32 %v4262_v0, %v4261_v29  ;;  %4715 = vmatprep.subr.bf16.mxu1 %v7369_v32  ;;  %v5154_v50 = vld [vmem:[%s7312_s3 + $0x38] ss:$28 sps:$4 sm:$0xff]  }
 0x167   :  { %v6655_v20 = vadd.f32 %v4222_v61, %v4221_v5  ;;  %v4264_v34 = vpop.f32.mrf.mxu0  ;;  %v7376_v5 = vld [vmem:[#allocation14_spill] sm:$0xff]  ;;  %v7377_v61 = vld [vmem:[#allocation15_spill] sm:$0xff] }
 0x168   :  { %7368 = vst [vmem:[#allocation4_spill] sm:$0xff] %v6652_v4  ;;  %v6661_v33 = vadd.f32 %v4263_v46, %v6523_v24  ;;  %v4224_v47 = vpop.f32.mrf.mxu1  ;;  %v7371_v24 = vld [vmem:[#allocation9_spill] sm:$0xff] }
 0x169   :  { %v4265_v16 = vpop.f32.mrf.mxu0  ;;  %4716 = vmatpush3.bf16.msra.mxu1 %v7370_v27  ;;  %v7378_v27 = vld [vmem:[#allocation16_spill] sm:$0xff] }
 0x16a   :  { %v4225_v2 = vpop.f32.mrf.mxu1  ;;  %v4266_v17 = vadd.f32 %v4265_v16, %v4264_v34  ;;  %4717 = vmatprep.subr.bf16.mxu1 %v7371_v24  ;;  %v5163_v34 = vld [vmem:[%s7311_s2 + $0x198] ss:$28 sps:$4 sm:$0xff]   ;;  %v5171_v16 = vld [vmem:[%s7312_s3 + $0xe4] ss:$28 sps:$4 sm:$0xff]  }
 0x16b   :  { %v6674_v40 = vadd.f32 %v4225_v2, %v4224_v47  ;;  %v4267_v49 = vpop.f32.mrf.mxu0  ;;  %2585 = vmatmul.mubr.bf16.gmra.mxu0 %v5151_v42  ;;  %v5166_v47 = vld [vmem:[%s7312_s3 + $0xa8] ss:$28 sps:$4 sm:$0xff]  }
 0x16c   :  { %v6677_v3 = vadd.f32 %v4266_v17, %v6546_v1  ;;  %v4227_v18 = vpop.f32.mrf.mxu1  ;;  %3131 = vmatmul.mubr.bf16.gmra.mxu1 %v5154_v50  ;;  %2592 = vmatprep.mubr.bf16.mxu0 %v5159_v22  ;;  %v5174_v50 = vld [vmem:[%s7312_s3 + $0xc] ss:$28 sps:$4 sm:$0xff]  }
 0x16d   :  { %v4268_v38 = vpop.f32.mrf.mxu0  ;;  %3138 = vmatprep.mubr.bf16.mxu1 %v5162_v21  ;;  %4718 = vmatpush3.bf16.msra.mxu1 %v7372_v39  ;;  %v7380_v39 = vld [vmem:[#allocation18_spill] sm:$0xff] }
 0x16e   :  { %v4228_v48 = vpop.f32.mrf.mxu1  ;;  %v4269_v8 = vadd.f32 %v4268_v38, %v4267_v49  ;;  %4719 = vmatprep.subr.bf16.mxu1 %v7373_v30  ;;  %v7381_v30 = vld [vmem:[#allocation19_spill] sm:$0xff] }
 0x16f   :  { %v6681_v25 = vadd.f32 %v4228_v48, %v4227_v18  ;;  %v4270_v37 = vpop.f32.mrf.mxu0 }
 0x170   :  { %v6687_v1 = vadd.f32 %v4269_v8, %v6557_v44  ;;  %v4230_v56 = vpop.f32.mrf.mxu1  ;;  %v7375_v44 = vld [vmem:[#allocation13_spill] sm:$0xff] }
 0x171   :  { %v4271_v62 = vpop.f32.mrf.mxu0  ;;  %4720 = vmatpush3.bf16.msra.mxu1 %v7374_v55  ;;  %v5180_v55 = vld [vmem:[%s7312_s3 + $0x44] ss:$28 sps:$4 sm:$0xff]  }
 0x172   :  { %v4231_v43 = vpop.f32.mrf.mxu1  ;;  %v4272_v58 = vadd.f32 %v4271_v62, %v4270_v37  ;;  %4721 = vmatprep.subr.bf16.mxu1 %v7375_v44 }
 0x173   :  { %v6700_v36 = vadd.f32 %v4231_v43, %v4230_v56  ;;  %v4273_v29 = vpop.f32.mrf.mxu0  ;;  %2593 = vmatmul.mubr.bf16.gmra.mxu0 %v5157_v41  ;;  %v5172_v56 = vld [vmem:[%s7312_s3 + $0x8] ss:$28 sps:$4 sm:$0xff]   ;;  %v7382_v43 = vld [vmem:[#allocation20_spill] sm:$0xff] }
 0x174   :  { %v6703_v35 = vadd.f32 %v4272_v58, %v6579_v54  ;;  %v4233_v12 = vpop.f32.mrf.mxu1  ;;  %3139 = vmatmul.mubr.bf16.gmra.mxu1 %v5160_v52  ;;  %2600 = vmatprep.mubr.bf16.mxu0 %v5165_v10  ;;  %v5169_v10 = vld [vmem:[%s7312_s3 + $0xe0] ss:$28 sps:$4 sm:$0xff]  }
 0x175   :  { %v4274_v57 = vpop.f32.mrf.mxu0  ;;  %3146 = vmatprep.mubr.bf16.mxu1 %v5168_v14  ;;  %4722 = vmatpush3.bf16.msra.mxu1 %v7376_v5  ;;  %v5177_v14 = vld [vmem:[%s7312_s3 + $0x11c] ss:$28 sps:$4 sm:$0xff]   ;;  %v5287_v5 = vld [vmem:[%s7308_s4 + $0x188] sm:$0xff]  }
 0x176   :  { %v4234_v6 = vpop.f32.mrf.mxu1  ;;  %v4275_v0 = vadd.f32 %v4274_v57, %v4273_v29  ;;  %4723 = vmatprep.subr.bf16.mxu1 %v7377_v61 }
 0x177   :  { %v6707_v46 = vadd.f32 %v4234_v6, %v4233_v12  ;;  %v4276_v32 = vpop.f32.mrf.mxu0 }
 0x178   :  { %v6713_v54 = vadd.f32 %v4275_v0, %v6591_v45  ;;  %v4236_v42 = vpop.f32.mrf.mxu1  ;;  %v7379_v45 = vld [vmem:[#allocation17_spill] sm:$0xff] }
 0x179   :  { %v4277_v22 = vpop.f32.mrf.mxu0  ;;  %4724 = vmatpush3.bf16.msra.mxu1 %v7378_v27 }
 0x17a   :  { %v4237_v21 = vpop.f32.mrf.mxu1  ;;  %v4278_v2 = vadd.f32 %v4277_v22, %v4276_v32  ;;  %4725 = vmatprep.subr.bf16.mxu1 %v7379_v45  ;;  %v7383_v32 = vld [vmem:[#allocation7_spill] sm:$0xff]  ;;  %v5175_v22 = vld [vmem:[%s7312_s3 + $0x118] ss:$28 sps:$4 sm:$0xff]  }
 0x17b   :  { %v6726_v17 = vadd.f32 %v4237_v21, %v4236_v42  ;;  %v4279_v24 = vpop.f32.mrf.mxu0  ;;  %2601 = vmatmul.mubr.bf16.gmra.mxu0 %v5163_v34  ;;  %v5183_v21 = vld [vmem:[%s7312_s3 + $0x154] ss:$28 sps:$4 sm:$0xff]  }
 0x17c   :  { %v6729_v49 = vadd.f32 %v4278_v2, %v6613_v13  ;;  %v4239_v18 = vpop.f32.mrf.mxu1  ;;  %3147 = vmatmul.mubr.bf16.gmra.mxu1 %v5166_v47  ;;  %3219 = vmatprep.mubr.bf16.mxu0 %v5174_v50 }
 0x17d   :  { %v4280_v38 = vpop.f32.mrf.mxu0  ;;  %3154 = vmatprep.mubr.bf16.mxu1 %v5171_v16  ;;  %4726 = vmatpush3.bf16.msra.mxu1 %v7380_v39  ;;  %v5186_v16 = vld [vmem:[%s7312_s3 + $0x7c] ss:$28 sps:$4 sm:$0xff]  }
 0x17e   :  { %v4240_v48 = vpop.f32.mrf.mxu1  ;;  %v4281_v8 = vadd.f32 %v4280_v38, %v4279_v24  ;;  %4727 = vmatprep.subr.bf16.mxu1 %v7381_v30 }
 0x17f   :  { %v6733_v37 = vadd.f32 %v4240_v48, %v4239_v18  ;;  %v4282_v41 = vpop.f32.mrf.mxu0 }
 0x180   :  { %v6739_v13 = vadd.f32 %v4281_v8, %v6624_v9  ;;  %v4242_v52 = vpop.f32.mrf.mxu1 }
 0x181   :  { %v4283_v62 = vpop.f32.mrf.mxu0  ;;  %4728 = vmatpush3.bf16.msra.mxu1 %v7382_v43 }
 0x182   :  { %v4243_v58 = vpop.f32.mrf.mxu1  ;;  %v4284_v44 = vadd.f32 %v4283_v62, %v4282_v41  ;;  %v5181_v62 = vld [vmem:[%s7312_s3 + $0x150] ss:$28 sps:$4 sm:$0xff]  }
 0x183   :  { %v6751_v9 = vadd.f32 %v4243_v58, %v4242_v52  ;;  %v4285_v29 = vpop.f32.mrf.mxu0  ;;  %3220 = vmatmul.mubr.bf16.vlgmr.msra.gmra.mxu0 %v5172_v56  ;;  %v5184_v52 = vld [vmem:[%s7312_s3 + $0x78] ss:$28 sps:$4 sm:$0xff]  }
 0x184   :  { %v6754_v12 = vadd.f32 %v4284_v44, %v6646_v60  ;;  %v4325_v57 = vpop.f32.mrf.mxu1  ;;  %3155 = vmatmul.mubr.bf16.gmra.mxu1 %v5169_v10  ;;  %4848 = vmatpush3.bf16.msra.mxu0 %v5287_v5  ;;  %v5178_v60 = vld [vmem:[%s7312_s3 + $0x40] ss:$28 sps:$4 sm:$0xff]  }
 0x185   :  { %v4286_v6 = vpop.f32.mrf.mxu0  ;;  %3162 = vmatprep.mubr.bf16.mxu1 %v5177_v14  ;;  %3227 = vmatprep.mubr.bf16.mxu0 %v5180_v55  ;;  %v5189_v55 = vld [vmem:[%s7312_s3 + $0x18c] ss:$28 sps:$4 sm:$0xff]  }
 0x186   :  { %v4287_v0 = vadd.f32 %v4286_v6, %v4285_v29  ;;  %v4326_v61 = vpop.f32.mrf.mxu1  ;;  %4849 = vmatprep.subr.bf16.mxu0 %v7383_v32 }
 0x187   :  { %v4327_v34 = vadd.f32 %v4326_v61, %v4325_v57  ;;  %v4288_v42 = vpop.f32.mrf.mxu0 }
 0x188   :  { %v6764_v47 = vadd.f32 %v4287_v0, %v6655_v20  ;;  %v4328_v50 = vpop.f32.mrf.mxu1  ;;  %4850 = vmatpush3.bf16.msra.mxu0 %v7383_v32 }
 0x189   :  { %v4289_v27 = vpop.f32.mrf.mxu0  ;;  %v6777_v2 = vadd.f32 %v4327_v34, %v6661_v33 }
 0x18a   :  { %v4290_v20 = vadd.f32 %v4289_v27, %v4288_v42  ;;  %v4329_v45 = vpop.f32.mrf.mxu1 }
 0x18b   :  { %v4330_v24 = vadd.f32 %v4329_v45, %v4328_v50  ;;  %v4291_v18 = vpop.f32.mrf.mxu0  ;;  %3228 = vmatmul.mubr.bf16.gmra.mxu0 %v5178_v60  ;;  %v5187_v50 = vld [vmem:[%s7312_s3 + $0x188] ss:$28 sps:$4 sm:$0xff]  }
 0x18c   :  { %v6780_v38 = vadd.f32 %v4290_v20, %v6674_v40  ;;  %v4331_v39 = vpop.f32.mrf.mxu1  ;;  %3163 = vmatmul.mubr.bf16.gmra.mxu1 %v5175_v22  ;;  %3235 = vmatprep.mubr.bf16.mxu0 %v5186_v16  ;;  %v5198_v16 = vld [vmem:[%s7312_s3 + $0x14] ss:$28 sps:$4 sm:$0xff]  }
 0x18d   :  { %v4292_v48 = vpop.f32.mrf.mxu0  ;;  %3170 = vmatprep.mubr.bf16.mxu1 %v5183_v21  ;;  %v6783_v8 = vadd.f32 %v4330_v24, %v6677_v3  ;;  %v5192_v3 = vld [vmem:[%s7312_s3 + $0xb4] ss:$28 sps:$4 sm:$0xff]  }
 0x18e   :  { %v4293_v30 = vadd.f32 %v4292_v48, %v4291_v18  ;;  %v4332_v41 = vpop.f32.mrf.mxu1 }
 0x18f   :  { %v4333_v33 = vadd.f32 %v4332_v41, %v4331_v39  ;;  %v4294_v56 = vpop.f32.mrf.mxu0 }
 0x190   :  { %v6789_v10 = vadd.f32 %v4293_v30, %v6681_v25  ;;  %v4334_v40 = vpop.f32.mrf.mxu1 }
 0x191   :  { %v4295_v14 = vpop.f32.mrf.mxu0  ;;  %v1783_v43 = vadd.f32 %v4333_v33, %v6687_v1  ;;  %v5190_v1 = vld [vmem:[%s7312_s3 + $0xb0] ss:$28 sps:$4 sm:$0xff]  }
 0x192   :  { %v4296_v58 = vadd.f32 %v4295_v14, %v4294_v56  ;;  %v4335_v44 = vpop.f32.mrf.mxu1  ;;  %v5193_v56 = vld [vmem:[%s7312_s3 + $0xe8] ss:$28 sps:$4 sm:$0xff]  }
 0x193   :  { %v4336_v25 = vadd.f32 %v4335_v44, %v4334_v40  ;;  %v4297_v29 = vpop.f32.mrf.mxu0  ;;  %3236 = vmatmul.mubr.bf16.gmra.mxu0 %v5184_v52  ;;  %v5196_v40 = vld [vmem:[%s7312_s3 + $0x10] ss:$28 sps:$4 sm:$0xff]  }
 0x194   :  { %v6802_v57 = vadd.f32 %v4296_v58, %v6700_v36  ;;  %v4337_v5 = vpop.f32.mrf.mxu1  ;;  %3171 = vmatmul.mubr.bf16.gmra.mxu1 %v5181_v62  ;;  %3243 = vmatprep.mubr.bf16.mxu0 %v5192_v3  ;;  %v5204_v3 = vld [vmem:[%s7312_s3 + $0x4c] ss:$28 sps:$4 sm:$0xff]  }
 0x195   :  { %v4298_v6 = vpop.f32.mrf.mxu0  ;;  %3178 = vmatprep.mubr.bf16.mxu1 %v5189_v55  ;;  %v1786_v0 = vadd.f32 %v4336_v25, %v6703_v35  ;;  %v5195_v35 = vld [vmem:[%s7312_s3 + $0xec] ss:$28 sps:$4 sm:$0xff]  }
 0x196   :  { %v4299_v61 = vadd.f32 %v4298_v6, %v4297_v29  ;;  %v4338_v32 = vpop.f32.mrf.mxu1 }
 0x197   :  { %v4339_v34 = vadd.f32 %v4338_v32, %v4337_v5  ;;  %v4300_v42 = vpop.f32.mrf.mxu0 }
 0x198   :  { %v6809_v60 = vadd.f32 %v4299_v61, %v6707_v46  ;;  %v4340_v36 = vpop.f32.mrf.mxu1 }
 0x199   :  { %v4301_v22 = vpop.f32.mrf.mxu0  ;;  %v6821_v27 = vadd.f32 %v4339_v34, %v6713_v54 }
 0x19a   :  { %v4302_v21 = vadd.f32 %v4301_v22, %v4300_v42  ;;  %v4341_v46 = vpop.f32.mrf.mxu1 }
 0x19b   :  { %v4342_v20 = vadd.f32 %v4341_v46, %v4340_v36  ;;  %v4303_v45 = vpop.f32.mrf.mxu0  ;;  %3244 = vmatmul.mubr.bf16.gmra.mxu0 %v5190_v1  ;;  %v7385_v46 = vld [vmem:[#allocation24_spill] sm:$0xff] }
 0x19c   :  { %v6824_v24 = vadd.f32 %v4302_v21, %v6726_v17  ;;  %v4343_v18 = vpop.f32.mrf.mxu1  ;;  %3179 = vmatmul.mubr.bf16.gmra.mxu1 %v5187_v50  ;;  %3251 = vmatprep.mubr.bf16.mxu0 %v5195_v35 }
 0x19d   :  { %v4304_v39 = vpop.f32.mrf.mxu0  ;;  %3316 = vmatprep.mubr.bf16.mxu1 %v5198_v16  ;;  %v6827_v48 = vadd.f32 %v4342_v20, %v6729_v49  ;;  %v5201_v49 = vld [vmem:[%s7312_s3 + $0x124] ss:$28 sps:$4 sm:$0xff]  }
 0x19e   :  { %v4305_v30 = vadd.f32 %v4304_v39, %v4303_v45  ;;  %v4344_v41 = vpop.f32.mrf.mxu1  ;;  %v5210_v16 = vld [vmem:[%s7312_s3 + $0x84] ss:$28 sps:$4 sm:$0xff]  }
 0x19f   :  { %v4345_v54 = vadd.f32 %v4344_v41, %v4343_v18  ;;  %v4306_v33 = vpop.f32.mrf.mxu0 }
 0x1a0   :  { %v6833_v52 = vadd.f32 %v4305_v30, %v6733_v37  ;;  %v4346_v17 = vpop.f32.mrf.mxu1  ;;  %v7386_v30 = vld [vmem:[#allocation23_spill] sm:$0xff] }
 0x1a1   :  { %v4307_v62 = vpop.f32.mrf.mxu0  ;;  %v1799_v14 = vadd.f32 %v4345_v54, %v6739_v13 }
 0x1a2   :  { %v4308_v55 = vadd.f32 %v4307_v62, %v4306_v33  ;;  %v4347_v58 = vpop.f32.mrf.mxu1 }
 0x1a3   :  { %v4348_v37 = vadd.f32 %v4347_v58, %v4346_v17  ;;  %v4813_v44 = vpop.f32.mrf.mxu0  ;;  %3252 = vmatmul.mubr.bf16.gmra.mxu0 %v5193_v56 }
 0x1a4   :  { %v6846_v25 = vadd.f32 %v4308_v55, %v6751_v9  ;;  %v4349_v29 = vpop.f32.mrf.mxu1  ;;  %v6848_v5 = vadd.f32 %v4813_v44, %v1783_v43  ;;  %3317 = vmatmul.mubr.bf16.vlgmr.msra.gmra.mxu1 %v5196_v40  ;;  %3259 = vmatprep.mubr.bf16.mxu0 %v5201_v49  ;;  %v5199_v9 = vld [vmem:[%s7312_s3 + $0x120] ss:$28 sps:$4 sm:$0xff]  }
 0x1a5   :  { %v1871_v6 = vpop.f32.mrf.mxu0  ;;  %3324 = vmatprep.mubr.bf16.mxu1 %v5204_v3  ;;  %v1802_v61 = vadd.f32 %v4348_v37, %v6754_v12  ;;  %v7384_v43 = vld [vmem:[#allocation22_spill] sm:$0xff]  ;;  %v5205_v3 = vld [vmem:[%s7312_s3 + $0x158] ss:$28 sps:$4 sm:$0xff]  }
 0x1a6   :  { %v4350_v32 = vpop.f32.mrf.mxu1  ;;  %v6854_v34 = vadd.f32 %v1871_v6, %v6777_v2  ;;  %v5202_v12 = vld [vmem:[%s7312_s3 + $0x48] ss:$28 sps:$4 sm:$0xff]   ;;  %v5207_v2 = vld [vmem:[%s7312_s3 + $0x15c] ss:$28 sps:$4 sm:$0xff]  }
 0x1a7   :  { %v4351_v42 = vadd.f32 %v4350_v32, %v4349_v29  ;;  %v4814_v1 = vpop.f32.mrf.mxu0  ;;  %v5216_v29 = vld [vmem:[%s7312_s3 + $0xbc] ss:$28 sps:$4 sm:$0xff]  }
 0x1a8   :  { %v4352_v50 = vpop.f32.mrf.mxu1  ;;  %v6861_v35 = vadd.f32 %v4814_v1, %v1786_v0 }
 0x1a9   :  { %v1874_v22 = vpop.f32.mrf.mxu0  ;;  %v1807_v21 = vadd.f32 %v4351_v42, %v6764_v47 }
 0x1aa   :  { %v4353_v0 = vpop.f32.mrf.mxu1  ;;  %v6876_v45 = vadd.f32 %v1874_v22, %v6783_v8 }
 0x1ab   :  { %v4354_v18 = vadd.f32 %v4353_v0, %v4352_v50  ;;  %v4817_v39 = vpop.f32.mrf.mxu0  ;;  %3260 = vmatmul.mubr.bf16.gmra.mxu0 %v5199_v9 }
 0x1ac   :  { %v4355_v54 = vpop.f32.mrf.mxu1  ;;  %v6880_v33 = vadd.f32 %v4817_v39, %v1799_v14  ;;  %3325 = vmatmul.mubr.bf16.gmra.mxu1 %v5202_v12  ;;  %3267 = vmatprep.mubr.bf16.mxu0 %v5207_v2  ;;  %v5211_v39 = vld [vmem:[%s7312_s3 + $0x190] ss:$28 sps:$4 sm:$0xff]  }
 0x1ad   :  { %v1887_v56 = vpop.f32.mrf.mxu0  ;;  %3332 = vmatprep.mubr.bf16.mxu1 %v5210_v16  ;;  %v1810_v47 = vadd.f32 %v4354_v18, %v6780_v38  ;;  %v5208_v38 = vld [vmem:[%s7312_s3 + $0x80] ss:$28 sps:$4 sm:$0xff]  }
 0x1ae   :  { %v4356_v8 = vpop.f32.mrf.mxu1  ;;  %v6886_v40 = vadd.f32 %v1887_v56, %v6821_v27  ;;  %v5213_v27 = vld [vmem:[%s7312_s3 + $0x194] ss:$28 sps:$4 sm:$0xff]  }
 0x1af   :  { %v4357_v49 = vadd.f32 %v4356_v8, %v4355_v54  ;;  %v4818_v62 = vpop.f32.mrf.mxu0 }
 0x1b0   :  { %v4358_v55 = vpop.f32.mrf.mxu1  ;;  %v6893_v58 = vadd.f32 %v4818_v62, %v1802_v61 }
 0x1b1   :  { %v1890_v37 = vpop.f32.mrf.mxu0  ;;  %v1815_v44 = vadd.f32 %v4357_v49, %v6789_v10 }
 0x1b2   :  { %v4359_v61 = vpop.f32.mrf.mxu1  ;;  %v6908_v32 = vadd.f32 %v1890_v37, %v6827_v48 }
 0x1b3   :  { %v4360_v42 = vadd.f32 %v4359_v61, %v4358_v55  ;;  %v4821_v1 = vpop.f32.mrf.mxu0  ;;  %3268 = vmatmul.mubr.bf16.gmra.mxu0 %v5205_v3  ;;  %v5219_v3 = vld [vmem:[%s7312_s3 + $0xf4] ss:$28 sps:$4 sm:$0xff]  }
 0x1b4   :  { %v4361_v50 = vpop.f32.mrf.mxu1  ;;  %v6912_v12 = vadd.f32 %v4821_v1, %v1815_v44  ;;  %3333 = vmatmul.mubr.bf16.gmra.mxu1 %v5208_v38  ;;  %3275 = vmatprep.mubr.bf16.mxu0 %v5213_v27 }
 0x1b5   :  { %v1903_v10 = vpop.f32.mrf.mxu0  ;;  %v1818_v2 = vadd.f32 %v4360_v42, %v6802_v57  ;;  %3340 = vmatprep.mubr.bf16.mxu1 %v5216_v29  ;;  %v5214_v57 = vld [vmem:[%s7312_s3 + $0xb8] ss:$28 sps:$4 sm:$0xff]  }
 0x1b6   :  { %v4362_v48 = vpop.f32.mrf.mxu1  ;;  %v6917_v16 = vadd.f32 %v1903_v10, %v1807_v21  ;;  %v5220_v21 = vld [vmem:[%s7312_s3 + $0x18] ss:$28 sps:$4 sm:$0xff]  }
 0x1b7   :  { %v4363_v0 = vadd.f32 %v4362_v48, %v4361_v50  ;;  %v4822_v18 = vpop.f32.mrf.mxu0 }
 0x1b8   :  { %v4364_v56 = vpop.f32.mrf.mxu1  ;;  %v6924_v8 = vadd.f32 %v4822_v18, %v1818_v2  ;;  %v5221_v2 = vld [vmem:[%s7312_s3 + $0x50] ss:$28 sps:$4 sm:$0xff]  }
 0x1b9   :  { %v1906_v49 = vpop.f32.mrf.mxu0  ;;  %v1823_v62 = vadd.f32 %v4363_v0, %v6809_v60  ;;  %v5217_v18 = vld [vmem:[%s7312_s3 + $0xf0] ss:$28 sps:$4 sm:$0xff]  }
 0x1ba   :  { %v4365_v38 = vpop.f32.mrf.mxu1  ;;  %v6938_v27 = vadd.f32 %v1906_v49, %v1810_v47 }
 0x1bb   :  { %v4366_v37 = vadd.f32 %v4365_v38, %v4364_v56  ;;  %v4825_v44 = vpop.f32.mrf.mxu0  ;;  %3276 = vmatmul.mubr.bf16.gmra.mxu0 %v5211_v39 }
 0x1bc   :  { %v4367_v61 = vpop.f32.mrf.mxu1  ;;  %3341 = vmatmul.mubr.bf16.gmra.mxu1 %v5214_v57  ;;  %4851 = vmatprep.mubr.msk.bf16.mxu0 %vm765_vm0, %v5220_v21  ;;  %v5224_v57 = vld [vmem:[%s7312_s3 + $0x12c] ss:$28 sps:$4 sm:$0xff]  }
 0x1bd   :  { %v1919_v60 = vpop.f32.mrf.mxu0  ;;  %v1826_v42 = vadd.f32 %v4366_v37, %v6824_v24  ;;  %3348 = vmatprep.mubr.bf16.mxu1 %v5219_v3  ;;  %v5225_v24 = vld [vmem:[%s7312_s3 + $0x88] ss:$28 sps:$4 sm:$0xff]  }
 0x1be   :  { %v4368_v1 = vpop.f32.mrf.mxu1  ;;  %v6944_v50 = vadd.f32 %v1919_v60, %v1823_v62 }
 0x1bf   :  { %v4369_v10 = vadd.f32 %v4368_v1, %v4367_v61  ;;  %v4826_v47 = vpop.f32.mrf.mxu0 }
 0x1c0   :  { %v4370_v0 = vpop.f32.mrf.mxu1 }
 0x1c1   :  { %v1831_v39 = vadd.f32 %v4369_v10, %v6833_v52  ;;  %v1922_v56 = vpop.f32.mrf.mxu0 }
 0x1c2   :  { %v4371_v21 = vpop.f32.mrf.mxu1  ;;  %v6961_v49 = vadd.f32 %v1922_v56, %v1826_v42 }
 0x1c3   :  { %v6963_v62 = vadd.f32 %v4825_v44, %v1831_v39  ;;  %v4372_v3 = vadd.f32 %v4371_v21, %v4370_v0  ;;  %v4399_v38 = vpop.f32.mrf.mxu0  ;;  %4852 = vmatmul.mubr.msk.bf16.vlgmr.msra.gmra.mxu0 %vm765_vm0, %v5221_v2  ;;  %v5226_v39 = vld [vmem:[%s7312_s3 + $0xc0] ss:$28 sps:$4 sm:$0xff]  }
 0x1c4   :  { %v4463_v61 = vpop.f32.mrf.mxu1  ;;  %3349 = vmatmul.mubr.bf16.gmra.mxu1 %v5217_v18  ;;  %4855 = vmatprep.mubr.msk.bf16.mxu0 %vm765_vm0, %v5225_v24  ;;  %v5222_v24 = vld [vmem:[%s7312_s3 + $0x128] ss:$28 sps:$4 sm:$0xff]  }
 0x1c5   :  { %7387 = vst [vmem:[#allocation2_spill] sm:$0xff] %v6963_v62  ;;  %v1834_v60 = vadd.f32 %v4372_v3, %v6846_v25  ;;  %v4400_v42 = vpop.f32.mrf.mxu0  ;;  %3356 = vmatprep.mubr.bf16.mxu1 %v5224_v57  ;;  %v5230_v25 = vld [vmem:[%s7312_s3 + $0xf8] ss:$28 sps:$4 sm:$0xff]   ;;  %v5229_v21 = vld [vmem:[%s7312_s3 + $0x164] ss:$28 sps:$4 sm:$0xff]  }
 0x1c6   :  { %v4401_v44 = vadd.f32 %v4400_v42, %v4399_v38  ;;  %v4464_v1 = vpop.f32.mrf.mxu1 }
 0x1c7   :  { %v6972_v10 = vadd.f32 %v4826_v47, %v1834_v60  ;;  %v4465_v0 = vadd.f32 %v4464_v1, %v4463_v61  ;;  %v4402_v2 = vpop.f32.mrf.mxu0 }
 0x1c8   :  { %v4466_v18 = vpop.f32.mrf.mxu1 }
 0x1c9   :  { %7388 = vst [vmem:[#allocation3_spill] sm:$0xff] %v6972_v10  ;;  %v6985_v47 = vadd.f32 %v4465_v0, %v4401_v44  ;;  %v4403_v57 = vpop.f32.mrf.mxu0 }
 0x1ca   :  { %v4404_v3 = vadd.f32 %v4403_v57, %v4402_v2  ;;  %v4467_v38 = vpop.f32.mrf.mxu1  ;;  %v5231_v2 = vld [vmem:[%s7312_s3 + $0x130] ss:$28 sps:$4 sm:$0xff]  }
 0x1cb   :  { %v4468_v61 = vadd.f32 %v4467_v38, %v4466_v18  ;;  %v4405_v60 = vpop.f32.mrf.mxu0  ;;  %4856 = vmatmul.mubr.msk.bf16.gmra.mxu0 %vm765_vm0, %v5226_v39  ;;  %v5227_v39 = vld [vmem:[%s7312_s3 + $0x160] ss:$28 sps:$4 sm:$0xff]  }
 0x1cc   :  { %v4469_v42 = vpop.f32.mrf.mxu1  ;;  %3357 = vmatmul.mubr.bf16.gmra.mxu1 %v5222_v24  ;;  %4859 = vmatprep.mubr.msk.bf16.mxu0 %vm765_vm0, %v5230_v25  ;;  %v5235_v24 = vld [vmem:[%s7312_s3 + $0x168] ss:$28 sps:$4 sm:$0xff]  }
 0x1cd   :  { %v6992_v1 = vadd.f32 %v4468_v61, %v4404_v3  ;;  %v4406_v56 = vpop.f32.mrf.mxu0  ;;  %3364 = vmatprep.mubr.bf16.mxu1 %v5229_v21 }
 0x1ce   :  { %v4407_v44 = vadd.f32 %v4406_v56, %v4405_v60  ;;  %v4470_v0 = vpop.f32.mrf.mxu1  ;;  %v5234_v56 = vld [vmem:[%s7312_s3 + $0x19c] ss:$28 sps:$4 sm:$0xff]  }
 0x1cf   :  { %v4471_v52 = vadd.f32 %v4470_v0, %v4469_v42  ;;  %v4408_v37 = vpop.f32.mrf.mxu0 }
 0x1d0   :  { %v4472_v18 = vpop.f32.mrf.mxu1 }
 0x1d1   :  { %v7003_v25 = vadd.f32 %v4471_v52, %v4407_v44  ;;  %v4409_v57 = vpop.f32.mrf.mxu0 }
 0x1d2   :  { %v4410_v21 = vadd.f32 %v4409_v57, %v4408_v37  ;;  %v4473_v3 = vpop.f32.mrf.mxu1  ;;  %v5236_v37 = vld [vmem:[%s7312_s3 + $0x1a0] ss:$28 sps:$4 sm:$0xff]  }
 0x1d3   :  { %v4474_v38 = vadd.f32 %v4473_v3, %v4472_v18  ;;  %v4411_v61 = vpop.f32.mrf.mxu0  ;;  %4860 = vmatmul.mubr.msk.bf16.gmra.mxu0 %vm765_vm0, %v5231_v2  ;;  %v5232_v2 = vld [vmem:[%s7312_s3 + $0x198] ss:$28 sps:$4 sm:$0xff]  }
 0x1d4   :  { %v4475_v60 = vpop.f32.mrf.mxu1  ;;  %3365 = vmatmul.mubr.bf16.gmra.mxu1 %v5227_v39  ;;  %4863 = vmatprep.mubr.msk.bf16.mxu0 %vm765_vm0, %v5235_v24 }
 0x1d5   :  { %v7010_v42 = vadd.f32 %v4474_v38, %v4410_v21  ;;  %v4412_v0 = vpop.f32.mrf.mxu0  ;;  %3372 = vmatprep.mubr.bf16.mxu1 %v5234_v56 }
 0x1d6   :  { %v4413_v52 = vadd.f32 %v4412_v0, %v4411_v61  ;;  %v4476_v44 = vpop.f32.mrf.mxu1 }
 0x1d7   :  { %v4477_v48 = vadd.f32 %v4476_v44, %v4475_v60  ;;  %v4414_v55 = vpop.f32.mrf.mxu0 }
 0x1d8   :  { %v4478_v18 = vpop.f32.mrf.mxu1 }
 0x1d9   :  { %v7018_v39 = vadd.f32 %v4477_v48, %v4413_v52  ;;  %v4415_v24 = vpop.f32.mrf.mxu0 }
 0x1da   :  { %v4416_v57 = vadd.f32 %v4415_v24, %v4414_v55  ;;  %v4479_v21 = vpop.f32.mrf.mxu1 }
 0x1db   :  { %v4480_v3 = vadd.f32 %v4479_v21, %v4478_v18  ;;  %v4417_v56 = vpop.f32.mrf.mxu0  ;;  %4864 = vmatmul.mubr.msk.bf16.gmra.mxu0 %vm765_vm0, %v5236_v37 }
 0x1dc   :  { %v4481_v38 = vpop.f32.mrf.mxu1  ;;  %3373 = vmatmul.mubr.bf16.gmra.mxu1 %v5232_v2 }
 0x1dd   :  { %v7021_v61 = vadd.f32 %v4480_v3, %v4416_v57  ;;  %v4418_v60 = vpop.f32.mrf.mxu0 }
 0x1de   :  { %v4419_v0 = vadd.f32 %v4418_v60, %v4417_v56  ;;  %v4482_v44 = vpop.f32.mrf.mxu1 }
 0x1df   :  { %v4483_v22 = vadd.f32 %v4482_v44, %v4481_v38  ;;  %v4420_v29 = vpop.f32.mrf.mxu0 }
 0x1e0   :  { %v4484_v54 = vpop.f32.mrf.mxu1 }
 0x1e1   :  { %v7023_v6 = vadd.f32 %v4483_v22, %v4419_v0  ;;  %v4421_v48 = vpop.f32.mrf.mxu0 }
 0x1e2   :  { %v4422_v52 = vadd.f32 %v4421_v48, %v4420_v29  ;;  %v4485_v55 = vpop.f32.mrf.mxu1 }
 0x1e3   :  { %v4486_v24 = vadd.f32 %v4485_v55, %v4484_v54  ;;  %v4423_v18 = vpop.f32.mrf.mxu0 }
 0x1e4   :  { %v4487_v21 = vpop.f32.mrf.mxu1 }
 0x1e5   :  { %v7025_v17 = vadd.f32 %v4486_v24, %v4422_v52  ;;  %v4424_v37 = vpop.f32.mrf.mxu0 }
 0x1e6   :  { %v4425_v2 = vadd.f32 %v4424_v37, %v4423_v18  ;;  %v4488_v57 = vpop.f32.mrf.mxu1 }
 0x1e7   :  { %v4489_v3 = vadd.f32 %v4488_v57, %v4487_v21  ;;  %v4426_v9 = vpop.f32.mrf.mxu0 }
 0x1e8   :  { %v4490_v56 = vpop.f32.mrf.mxu1 }
 0x1e9   :  { %v7027_v60 = vadd.f32 %v4489_v3, %v4425_v2  ;;  %v4427_v38 = vpop.f32.mrf.mxu0 }
 0x1ea   :  { %v4428_v44 = vadd.f32 %v4427_v38, %v4426_v9  ;;  %v4491_v22 = vpop.f32.mrf.mxu1 }
 0x1eb   :  { %v4492_v0 = vadd.f32 %v4491_v22, %v4490_v56  ;;  %v4429_v14 = vpop.f32.mrf.mxu0 }
 0x1ec   :  { %v4493_v29 = vpop.f32.mrf.mxu1 }
 0x1ed   :  { %v7029_v48 = vadd.f32 %v4492_v0, %v4428_v44  ;;  %v4430_v54 = vpop.f32.mrf.mxu0 }
 0x1ee   :  { %v4431_v55 = vadd.f32 %v4430_v54, %v4429_v14  ;;  %v4494_v52 = vpop.f32.mrf.mxu1 }
 0x1ef   :  { %v4495_v24 = vadd.f32 %v4494_v52, %v4493_v29  ;;  %v4432_v20 = vpop.f32.mrf.mxu0 }
 0x1f0   :  { %v4496_v18 = vpop.f32.mrf.mxu1 }
 0x1f1   :  { %v7031_v37 = vadd.f32 %v4495_v24, %v4431_v55  ;;  %v4433_v21 = vpop.f32.mrf.mxu0 }
 0x1f2   :  { %v4434_v57 = vadd.f32 %v4433_v21, %v4432_v20  ;;  %v4497_v2 = vpop.f32.mrf.mxu1 }
 0x1f3   :  { %v4498_v3 = vadd.f32 %v4497_v2, %v4496_v18  ;;  %v4435_v13 = vpop.f32.mrf.mxu0 }
 0x1f4   :  { %v4499_v9 = vpop.f32.mrf.mxu1 }
 0x1f5   :  { %v7033_v38 = vadd.f32 %v4498_v3, %v4434_v57  ;;  %v4436_v56 = vpop.f32.mrf.mxu0 }
 0x1f6   :  { %v4437_v22 = vadd.f32 %v4436_v56, %v4435_v13  ;;  %v4500_v44 = vpop.f32.mrf.mxu1 }
 0x1f7   :  { %v4501_v0 = vadd.f32 %v4500_v44, %v4499_v9  ;;  %v4438_v41 = vpop.f32.mrf.mxu0 }
 0x1f8   :  { %v4502_v14 = vpop.f32.mrf.mxu1 }
 0x1f9   :  { %v7035_v54 = vadd.f32 %v4501_v0, %v4437_v22  ;;  %v4439_v29 = vpop.f32.mrf.mxu0 }
 0x1fa   :  { %v4440_v52 = vadd.f32 %v4439_v29, %v4438_v41  ;;  %v4503_v55 = vpop.f32.mrf.mxu1 }
 0x1fb   :  { %v4504_v24 = vadd.f32 %v4503_v55, %v4502_v14  ;;  %v4441_v36 = vpop.f32.mrf.mxu0 }
 0x1fc   :  { %v4505_v20 = vpop.f32.mrf.mxu1 }
 0x1fd   :  { %v7037_v21 = vadd.f32 %v4504_v24, %v4440_v52  ;;  %v4442_v18 = vpop.f32.mrf.mxu0 }
 0x1fe   :  { %v4443_v2 = vadd.f32 %v4442_v18, %v4441_v36  ;;  %v4506_v57 = vpop.f32.mrf.mxu1 }
 0x1ff   :  { %v4507_v3 = vadd.f32 %v4506_v57, %v4505_v20  ;;  %v4444_v10 = vpop.f32.mrf.mxu0 }
 0x200   :  { %v4508_v13 = vpop.f32.mrf.mxu1 }
 0x201   :  { %v7039_v56 = vadd.f32 %v4507_v3, %v4443_v2  ;;  %v4445_v9 = vpop.f32.mrf.mxu0 }
 0x202   :  { %v4446_v44 = vadd.f32 %v4445_v9, %v4444_v10  ;;  %v4509_v22 = vpop.f32.mrf.mxu1  ;;  %v7390_v10 = vmax.f32 %v7384_v43, %v6854_v34 }
 0x203   :  { %v4510_v0 = vadd.f32 %v4509_v22, %v4508_v13  ;;  %v4527_v4 = vpop.f32.mrf.mxu0 }
 0x204   :  { %v4833_v41 = vpop.f32.mrf.mxu1 }
 0x205   :  { %v7041_v29 = vadd.f32 %v4510_v0, %v4446_v44  ;;  %v4528_v14 = vpop.f32.mrf.mxu0 }
 0x206   :  { %v4529_v55 = vadd.f32 %v4528_v14, %v4527_v4  ;;  %v2643_v52 = vpop.f32.mrf.mxu1 }
 0x207   :  { %7389 = vst [vmem:[#allocation21_spill] sm:$0xff] %v7041_v29  ;;  %v4530_v24 = vpop.f32.mrf.mxu0 }
 0x208   :  { %v2547_v36 = vadd.f32 %v4529_v55, %v6985_v47  ;;  %v4834_v18 = vpop.f32.mrf.mxu1  ;;  %v7391_v47 = vmax.f32 %v7386_v30, %v6876_v45 }
 0x209   :  { %v4531_v20 = vpop.f32.mrf.mxu0 }
 0x20a   :  { %v2644_v57 = vadd.f32 %v2643_v52, %v2547_v36  ;;  %v4532_v62 = vadd.f32 %v4531_v20, %v4530_v24  ;;  %v2646_v2 = vpop.f32.mrf.mxu1 }
 0x20b   :  { %v4533_v3 = vpop.f32.mrf.mxu0 }
 0x20c   :  { %v7047_v13 = vmax.f32 %v7390_v10, %v2644_v57  ;;  %v2550_v9 = vadd.f32 %v4532_v62, %v6992_v1  ;;  %v4837_v44 = vpop.f32.mrf.mxu1 }
 0x20d   :  { %v4534_v22 = vpop.f32.mrf.mxu0 }
 0x20e   :  { %v2647_v4 = vadd.f32 %v2646_v2, %v2550_v9  ;;  %v4535_v0 = vadd.f32 %v4534_v22, %v4533_v3  ;;  %v2659_v14 = vpop.f32.mrf.mxu1  ;;  %v7392_v2 = vmax.f32 %v6459_v63, %v6848_v5 }
 0x20f   :  { %v4536_v29 = vpop.f32.mrf.mxu0 }
 0x210   :  { %v7053_v55 = vmax.f32 %v7391_v47, %v2647_v4  ;;  %v2555_v52 = vadd.f32 %v4535_v0, %v7003_v25  ;;  %v4838_v24 = vpop.f32.mrf.mxu1 }
 0x211   :  { %v4537_v36 = vpop.f32.mrf.mxu0 }
 0x212   :  { %v2652_v34 = vadd.f32 %v4833_v41, %v2555_v52  ;;  %v4538_v43 = vadd.f32 %v4537_v36, %v4536_v29  ;;  %v2662_v20 = vpop.f32.mrf.mxu1  ;;  %v7393_v41 = vmax.f32 %v7385_v46, %v6861_v35  ;;  %v7394_v36 = vmax.f32 %v6485_v19, %v6886_v40 }
 0x213   :  { %v4539_v57 = vpop.f32.mrf.mxu0 }
 0x214   :  { %v2558_v62 = vadd.f32 %v4538_v43, %v7010_v42  ;;  %v4841_v1 = vpop.f32.mrf.mxu1  ;;  %v7060_v3 = vmax.f32 %v7392_v2, %v2652_v34  ;;  %v7395_v2 = vmax.f32 %v6493_v7, %v6908_v32 }
 0x215   :  { %v4540_v10 = vpop.f32.mrf.mxu0 }
 0x216   :  { %v2655_v45 = vadd.f32 %v4834_v18, %v2558_v62  ;;  %v4541_v30 = vadd.f32 %v4540_v10, %v4539_v57  ;;  %v2675_v9 = vpop.f32.mrf.mxu1 }
 0x217   :  { %v4542_v22 = vpop.f32.mrf.mxu0 }
 0x218   :  { %v2563_v25 = vadd.f32 %v4541_v30, %v7018_v39  ;;  %v7063_v4 = vpop.f32.mrf.mxu1  ;;  %v7068_v29 = vmax.f32 %v7393_v41, %v2655_v45 }
 0x219   :  { %v4543_v42 = vpop.f32.mrf.mxu0 }
 0x21a   :  { %v2660_v0 = vadd.f32 %v2659_v14, %v2563_v25  ;;  %v4544_v47 = vadd.f32 %v4543_v42, %v4542_v22  ;;  %v2678_v63 = vpop.f32.mrf.mxu1  ;;  %v7397_v25 = vmax.f32 %v6512_v28, %v6880_v33 }
 0x21b   :  { %v4545_v5 = vpop.f32.mrf.mxu0 }
 0x21c   :  { %v2566_v52 = vadd.f32 %v4544_v47, %v7021_v61  ;;  %v7071_v18 = vpop.f32.mrf.mxu1  ;;  %v7076_v39 = vmax.f32 %v7394_v36, %v2660_v0 }
 0x21d   :  { %v4546_v34 = vpop.f32.mrf.mxu0 }
 0x21e   :  { %v2663_v43 = vadd.f32 %v2662_v20, %v2566_v52  ;;  %v4547_v57 = vadd.f32 %v4546_v34, %v4545_v5  ;;  %v2691_v35 = vpop.f32.mrf.mxu1  ;;  %v7398_v52 = vmax.f32 %v6521_v53, %v6893_v58 }
 0x21f   :  { %v4548_v46 = vpop.f32.mrf.mxu0 }
 0x220   :  { %v2571_v62 = vadd.f32 %v4547_v57, %v7023_v6  ;;  %v7079_v14 = vpop.f32.mrf.mxu1  ;;  %v7084_v61 = vmax.f32 %v7395_v2, %v2663_v43 }
 0x221   :  { %v4549_v10 = vpop.f32.mrf.mxu0 }
 0x222   :  { %7396 = vst [vmem:[#allocation5_spill] sm:$0xff] %v7084_v61  ;;  %v2668_v45 = vadd.f32 %v4837_v44, %v2571_v62  ;;  %v4550_v30 = vadd.f32 %v4549_v10, %v4548_v46  ;;  %v2694_v19 = vpop.f32.mrf.mxu1  ;;  %v7400_v62 = vmax.f32 %v6544_v15, %v6917_v16 }
 0x223   :  { %v4551_v40 = vpop.f32.mrf.mxu0 }
 0x224   :  { %v2574_v22 = vadd.f32 %v4550_v30, %v7025_v17  ;;  %v4601_v20 = vpop.f32.mrf.mxu1  ;;  %v7090_v41 = vmax.f32 %v7397_v25, %v2668_v45 }
 0x225   :  { %v4552_v6 = vpop.f32.mrf.mxu0 }
 0x226   :  { %v2671_v42 = vadd.f32 %v4838_v24, %v2574_v22  ;;  %v4553_v0 = vadd.f32 %v4552_v6, %v4551_v40  ;;  %v4602_v47 = vpop.f32.mrf.mxu1  ;;  %v7402_v22 = vmax.f32 %v6555_v51, %v6938_v27 }
 0x227   :  { %v7092_v7 = vadd.f32 %v4602_v47, %v4601_v20  ;;  %v4554_v32 = vpop.f32.mrf.mxu0  ;;  %v7404_v47 = vmax.f32 %v6577_v26, %v6912_v12 }
 0x228   :  { %v2579_v44 = vadd.f32 %v4553_v0, %v7027_v60  ;;  %v4604_v5 = vpop.f32.mrf.mxu1  ;;  %v7098_v17 = vmax.f32 %v7398_v52, %v2671_v42 }
 0x229   :  { %v4555_v36 = vpop.f32.mrf.mxu0 }
 0x22a   :  { %7399 = vst [vmem:[#allocation6_spill] sm:$0xff] %v7098_v17  ;;  %v2676_v34 = vadd.f32 %v2675_v9, %v2579_v44  ;;  %v4556_v28 = vadd.f32 %v4555_v36, %v4554_v32  ;;  %v4605_v33 = vpop.f32.mrf.mxu1 }
 0x22b   :  { %v7100_v43 = vadd.f32 %v4605_v33, %v4604_v5  ;;  %v4557_v24 = vpop.f32.mrf.mxu0 }
 0x22c   :  { %v2582_v57 = vadd.f32 %v4556_v28, %v7029_v48  ;;  %v4607_v46 = vpop.f32.mrf.mxu1  ;;  %v7106_v60 = vmax.f32 %v7400_v62, %v2676_v34  ;;  %v7408_v62 = vmax.f32 %v6611_v59, %v6944_v50 }
 0x22d   :  { %v4558_v2 = vpop.f32.mrf.mxu0 }
 0x22e   :  { %7401 = vst [vmem:[#allocation8_spill] sm:$0xff] %v7106_v60  ;;  %v2679_v10 = vadd.f32 %v2678_v63, %v2582_v57  ;;  %v4559_v53 = vadd.f32 %v4558_v2, %v4557_v24  ;;  %v4608_v58 = vpop.f32.mrf.mxu1 }
 0x22f   :  { %v7108_v45 = vadd.f32 %v4608_v58, %v4607_v46  ;;  %v4560_v9 = vpop.f32.mrf.mxu0 }
 0x230   :  { %v2587_v30 = vadd.f32 %v4559_v53, %v7031_v37  ;;  %v4610_v40 = vpop.f32.mrf.mxu1  ;;  %v7114_v48 = vmax.f32 %v7402_v22, %v2679_v10 }
 0x231   :  { %v4561_v20 = vpop.f32.mrf.mxu0 }
 0x232   :  { %7403 = vst [vmem:[#allocation9_spill] sm:$0xff] %v7114_v48  ;;  %v2684_v25 = vadd.f32 %v4841_v1, %v2587_v30  ;;  %v4562_v15 = vadd.f32 %v4561_v20, %v4560_v9  ;;  %v4611_v16 = vpop.f32.mrf.mxu1  ;;  %v7410_v30 = vmax.f32 %v6622_v31, %v6961_v49 }
 0x233   :  { %v7116_v6 = vadd.f32 %v4611_v16, %v4610_v40  ;;  %v4563_v63 = vpop.f32.mrf.mxu0 }
 0x234   :  { %v2590_v42 = vadd.f32 %v4562_v15, %v7033_v38  ;;  %v4613_v0 = vpop.f32.mrf.mxu1  ;;  %v7122_v37 = vmax.f32 %v7404_v47, %v2684_v25  ;;  %v7406_v38 = vmax.f32 %v6589_v23, %v6924_v8  ;;  %v7412_v25 = vld [vmem:[#allocation2_spill] sm:$0xff] }
 0x235   :  { %v4564_v32 = vpop.f32.mrf.mxu0  ;;  %v7413_v15 = vmax.f32 %v6642_v11, %v7412_v25 }
 0x236   :  { %7405 = vst [vmem:[#allocation10_spill] sm:$0xff] %v7122_v37  ;;  %v2687_v51 = vadd.f32 %v7063_v4, %v2590_v42  ;;  %v4565_v27 = vadd.f32 %v4564_v32, %v4563_v63  ;;  %v4614_v44 = vpop.f32.mrf.mxu1 }
 0x237   :  { %v7125_v5 = vadd.f32 %v4614_v44, %v4613_v0  ;;  %v4566_v1 = vpop.f32.mrf.mxu0 }
 0x238   :  { %v2595_v52 = vadd.f32 %v4565_v27, %v7035_v54  ;;  %v4616_v36 = vpop.f32.mrf.mxu1  ;;  %v7131_v34 = vmax.f32 %v7406_v38, %v2687_v51  ;;  %v7416_v51 = vld [vmem:[#allocation4_spill] sm:$0xff]  ;;  %v7417_v27 = vld [vmem:[#allocation3_spill] sm:$0xff] }
 0x239   :  { %v4567_v28 = vpop.f32.mrf.mxu0  ;;  %v7418_v44 = vmax.f32 %v7416_v51, %v7417_v27 }
 0x23a   :  { %7407 = vst [vmem:[#allocation11_spill] sm:$0xff] %v7131_v34  ;;  %v2692_v26 = vadd.f32 %v2691_v35, %v2595_v52  ;;  %v4568_v12 = vadd.f32 %v4567_v28, %v4566_v1  ;;  %v4617_v33 = vpop.f32.mrf.mxu1 }
 0x23b   :  { %v7133_v24 = vadd.f32 %v4617_v33, %v4616_v36  ;;  %v4569_v4 = vpop.f32.mrf.mxu0 }
 0x23c   :  { %v2598_v57 = vadd.f32 %v4568_v12, %v7037_v21  ;;  %v4619_v46 = vpop.f32.mrf.mxu1  ;;  %v7139_v54 = vmax.f32 %v7408_v62, %v2692_v26 }
 0x23d   :  { %v4570_v2 = vpop.f32.mrf.mxu0 }
 0x23e   :  { %7409 = vst [vmem:[#allocation12_spill] sm:$0xff] %v7139_v54  ;;  %v2695_v10 = vadd.f32 %v2694_v19, %v2598_v57  ;;  %v4571_v23 = vadd.f32 %v4570_v2, %v4569_v4  ;;  %v4620_v8 = vpop.f32.mrf.mxu1 }
 0x23f   :  { %v7141_v53 = vadd.f32 %v4620_v8, %v4619_v46  ;;  %v4572_v35 = vpop.f32.mrf.mxu0 }
 0x240   :  { %v2603_v58 = vadd.f32 %v4571_v23, %v7039_v56  ;;  %v4622_v9 = vpop.f32.mrf.mxu1  ;;  %v7147_v21 = vmax.f32 %v7410_v30, %v2695_v10  ;;  %v7415_v56 = vld [vmem:[#allocation21_spill] sm:$0xff] }
 0x241   :  { %v4573_v40 = vpop.f32.mrf.mxu0 }
 0x242   :  { %7411 = vst [vmem:[#allocation13_spill] sm:$0xff] %v7147_v21  ;;  %v2700_v59 = vadd.f32 %v7071_v18, %v2603_v58  ;;  %v4574_v50 = vadd.f32 %v4573_v40, %v4572_v35  ;;  %v4623_v22 = vpop.f32.mrf.mxu1 }
 0x243   :  { %v7150_v20 = vadd.f32 %v4623_v22, %v4622_v9  ;;  %v4665_v19 = vpop.f32.mrf.mxu0 }
 0x244   :  { %v7155_v16 = vmax.f32 %v7413_v15, %v2700_v59  ;;  %v2606_v63 = vadd.f32 %v4574_v50, %v7415_v56  ;;  %v4625_v42 = vpop.f32.mrf.mxu1 }
 0x245   :  { %v4666_v0 = vpop.f32.mrf.mxu0 }
 0x246   :  { %7414 = vst [vmem:[#allocation14_spill] sm:$0xff] %v7155_v16  ;;  %v2703_v31 = vadd.f32 %v7079_v14, %v2606_v63  ;;  %v4626_v49 = vpop.f32.mrf.mxu1  ;;  %v4667_v47 = vadd.f32 %v4666_v0, %v4665_v19 }
 0x247   :  { %v7159_v32 = vadd.f32 %v4626_v49, %v4625_v42  ;;  %v7161_v18 = vpop.f32.mrf.mxu0 }
 0x248   :  { %v7166_v1 = vmax.f32 %v7418_v44, %v2703_v31  ;;  %v7169_v11 = vadd.f32 %v4667_v47, %v7092_v7  ;;  %v4628_v52 = vpop.f32.mrf.mxu1 }
 0x249   :  { %v7171_v36 = vpop.f32.mrf.mxu0 }
 0x24a   :  { %7419 = vst [vmem:[#allocation15_spill] sm:$0xff] %v7166_v1  ;;  %v4629_v38 = vpop.f32.mrf.mxu1 }
 0x24b   :  { %v7173_v28 = vadd.f32 %v4629_v38, %v4628_v52  ;;  %v4671_v14 = vpop.f32.mrf.mxu0 }
 0x24c   :  { %v4631_v26 = vpop.f32.mrf.mxu1 }
 0x24d   :  { %7420 = vst [vmem:[#allocation16_spill] sm:$0xff] %v7173_v28  ;;  %v4672_v12 = vpop.f32.mrf.mxu0 }
 0x24e   :  { %v4632_v33 = vpop.f32.mrf.mxu1  ;;  %v4673_v34 = vadd.f32 %v4672_v12, %v4671_v14 }
 0x24f   :  { %v7175_v4 = vadd.f32 %v4632_v33, %v4631_v26  ;;  %v4674_v57 = vpop.f32.mrf.mxu0 }
 0x250   :  { %v7177_v46 = vpop.f32.mrf.mxu1 }
 0x251   :  { %v4675_v62 = vpop.f32.mrf.mxu0 }
 0x252   :  { %v7179_v2 = vpop.f32.mrf.mxu1  ;;  %v4676_v61 = vadd.f32 %v4675_v62, %v4674_v57 }
 0x253   :  { %v7181_v7 = vpop.f32.mrf.mxu0 }
 0x254   :  { %v4637_v10 = vpop.f32.mrf.mxu1  ;;  %v3233_v12 = vadd.f32 %v4676_v61, %v7116_v6 }
 0x255   :  { %v7183_v23 = vpop.f32.mrf.mxu0 }
 0x256   :  { %v4638_v8 = vpop.f32.mrf.mxu1 }
 0x257   :  { %v7185_v35 = vadd.f32 %v4638_v8, %v4637_v10  ;;  %v7187_v58 = vpop.f32.mrf.mxu0 }
 0x258   :  { %v4640_v9 = vpop.f32.mrf.mxu1 }
 0x259   :  { %7421 = vst [vmem:[#allocation17_spill] sm:$0xff] %v7185_v35  ;;  %v7189_v30 = vpop.f32.mrf.mxu0 }
 0x25a   :  { %v4641_v40 = vpop.f32.mrf.mxu1 }
 0x25b   :  { %v7191_v59 = vadd.f32 %v4641_v40, %v4640_v9  ;;  %v4683_v50 = vpop.f32.mrf.mxu0 }
 0x25c   :  { %v4643_v22 = vpop.f32.mrf.mxu1 }
 0x25d   :  { %7422 = vst [vmem:[#allocation18_spill] sm:$0xff] %v7191_v59  ;;  %v4684_v19 = vpop.f32.mrf.mxu0 }
 0x25e   :  { %v4644_v25 = vpop.f32.mrf.mxu1 }
 0x25f   :  { %v7193_v15 = vadd.f32 %v4644_v25, %v4643_v22  ;;  %v4686_v56 = vpop.f32.mrf.mxu0 }
 0x260   :  { %v7195_v63 = vpop.f32.mrf.mxu1 }
 0x261   :  { %7423 = vst [vmem:[#allocation19_spill] sm:$0xff] %v7193_v15  ;;  %7424 = vst [vmem:[#allocation20_spill] sm:$0xff] %v7195_v63  ;;  %v4687_v42 = vpop.f32.mrf.mxu0 }
 0x262   :  { %v7197_v0 = vpop.f32.mrf.mxu1  ;;  %v4688_v61 = vadd.f32 %v4687_v42, %v4686_v56 }
 0x263   :  { %7425 = vst [vmem:[#allocation7_spill] sm:$0xff] %v7197_v0  ;;  %v7199_v31 = vpop.f32.mrf.mxu0 }
 0x264   :  { %v4729_v49 = vpop.f32.mrf.mxu1  ;;  %v3249_v56 = vadd.f32 %v4688_v61, %v7150_v20 }
 0x265   :  { %v7201_v47 = vpop.f32.mrf.mxu0 }
 0x266   :  { %v4730_v51 = vpop.f32.mrf.mxu1 }
 0x267   :  { %v7203_v27 = vpop.f32.mrf.mxu0  ;;  %v4731_v17 = vadd.f32 %v4730_v51, %v4729_v49 }
 0x268   :  { %7426 = vst [vmem:[#allocation22_spill] sm:$0xff] %v7203_v27  ;;  %v4732_v44 = vpop.f32.mrf.mxu1 }
 0x269   :  { %v7205_v52 = vpop.f32.mrf.mxu0 }
 0x26a   :  { %7427 = vst [vmem:[#allocation24_spill] sm:$0xff] %v7205_v52  ;;  %v4733_v38 = vpop.f32.mrf.mxu1 }
 0x26b   :  { %v7207_v26 = vpop.f32.mrf.mxu0 }
 0x26c   :  { %v4735_v33 = vpop.f32.mrf.mxu1 }
 0x26d   :  { %v4696_v10 = vpop.f32.mrf.mxu0 }
 0x26e   :  { %v4736_v8 = vpop.f32.mrf.mxu1 }
 0x26f   :  { %v7209_v9 = vpop.f32.mrf.mxu0  ;;  %v4737_v37 = vadd.f32 %v4736_v8, %v4735_v33  ;;  %v4685_v33 = vadd.f32 %v4684_v19, %v4683_v50  ;;  %v4734_v8 = vadd.f32 %v4733_v38, %v4732_v44 }
 0x270   :  { %v4738_v40 = vpop.f32.mrf.mxu1 }
 0x271   :  { %v7211_v22 = vpop.f32.mrf.mxu0  ;;  %v3246_v19 = vadd.f32 %v4685_v33, %v7141_v53  ;;  %v4697_v53 = vadd.f32 %v4696_v10, %v7207_v26 }
 0x272   :  { %v4739_v25 = vpop.f32.mrf.mxu1 }
 0x273   :  { %v7213_v1 = vpop.f32.mrf.mxu0  ;;  %v4740_v27 = vadd.f32 %v4739_v25, %v4738_v40  ;;  %v3262_v10 = vadd.f32 %v4697_v53, %v7175_v4 }
 0x274   :  { %7428 = vst [vmem:[#allocation23_spill] sm:$0xff] %v7213_v1  ;;  %v4741_v16 = vpop.f32.mrf.mxu1 }
 0x275   :  { %v7215_v21 = vpop.f32.mrf.mxu0 }
 0x276   :  { %7429 = vst [vmem:[#allocation2_spill] sm:$0xff] %v7215_v21  ;;  %v4742_v0 = vpop.f32.mrf.mxu1  ;;  %v3230_v21 = vadd.f32 %v4673_v34, %v7108_v45  ;;  %v4679_v34 = vadd.f32 %v7183_v23, %v7181_v7 }
 0x277   :  { %v7217_v63 = vpop.f32.mrf.mxu0  ;;  %v4743_v6 = vadd.f32 %v4742_v0, %v4741_v16 }
 0x278   :  { %7430 = vst [vmem:[#allocation21_spill] sm:$0xff] %v7217_v63  ;;  %v4744_v54 = vpop.f32.mrf.mxu1  ;;  %v4670_v63 = vadd.f32 %v7171_v36, %v7161_v18  ;;  %v3327_v14 = vadd.f32 %v4737_v37, %v3230_v21  ;;  %v3330_v21 = vadd.f32 %v4740_v27, %v3233_v12 }
 0x279   :  { %v7219_v15 = vpop.f32.mrf.mxu0 }
 0x27a   :  { %7431 = vst [vmem:[#allocation4_spill] sm:$0xff] %v7219_v15  ;;  %v4745_v59 = vpop.f32.mrf.mxu1  ;;  %v3225_v45 = vadd.f32 %v4670_v63, %v7100_v43  ;;  %v3238_v63 = vadd.f32 %v4679_v34, %v7125_v5  ;;  %v7437_v34 = vld [vmem:[#allocation6_spill] sm:$0xff] }
 0x27b   :  { %v7221_v48 = vpop.f32.mrf.mxu0 }
 0x27c   :  { %7432 = vst [vmem:[#allocation3_spill] sm:$0xff] %v7221_v48  ;;  %v4747_v35 = vpop.f32.mrf.mxu1  ;;  %v3322_v43 = vadd.f32 %v4734_v8, %v3225_v45  ;;  %v3335_v0 = vadd.f32 %v4743_v6, %v3238_v63  ;;  %v7435_v45 = vld [vmem:[#allocation22_spill] sm:$0xff]  ;;  %v7438_v6 = vld [vmem:[#allocation5_spill] sm:$0xff]  ;;  %v7440_v63 = vld [vmem:[#allocation23_spill] sm:$0xff] }
 0x27d   :  { %v7223_v60 = vpop.f32.mrf.mxu0 }
 0x27e   :  { %7433 = vst [vmem:[#allocation25_spill] sm:$0xff] %v7223_v60  ;;  %v4748_v28 = vpop.f32.mrf.mxu1 }
 0x27f   :  { %v7225_v1 = vpop.f32.mrf.mxu0  ;;  %v4749_v36 = vadd.f32 %v4748_v28, %v4747_v35  ;;  %v4682_v28 = vadd.f32 %v7189_v30, %v7187_v58 }
 0x280   :  { %7434 = vst [vmem:[#allocation26_spill] sm:$0xff] %v7225_v1  ;;  %v4750_v52 = vpop.f32.mrf.mxu1  ;;  %v3319_v1 = vadd.f32 %v4731_v17, %v7169_v11 }
 0x281   :  { %v7230_v15 = vpop.f32.mrf.mxu0  ;;  %v3343_v16 = vadd.f32 %v4749_v36, %v3246_v19 }
 0x282   :  { %v4751_v48 = vpop.f32.mrf.mxu1 }
 0x283   :  { %v4853_v60 = vpop.f32.mrf.mxu0  ;;  %v4752_v7 = vadd.f32 %v4751_v48, %v4750_v52  ;;  %v3241_v48 = vadd.f32 %v4682_v28, %v7133_v24  ;;  %v7441_v28 = vld [vmem:[#allocation2_spill] sm:$0xff] }
 0x284   :  { %v4753_v57 = vpop.f32.mrf.mxu1  ;;  %v3424_v62 = vadd.f32 %v4853_v60, %v3327_v14 }
 0x285   :  { %v3415_v18 = vpop.f32.mrf.mxu0  ;;  %v3346_v40 = vadd.f32 %v4752_v7, %v3249_v56  ;;  %v4703_v7 = vadd.f32 %v7441_v28, %v7440_v63 }
 0x286   :  { %v3480_v49 = vmax.f32 %v7060_v3, %v3424_v62  ;;  %v4754_v51 = vpop.f32.mrf.mxu1  ;;  %v3416_v37 = vadd.f32 %v3415_v18, %v3319_v1  ;;  %v4636_v62 = vadd.f32 %v7179_v2, %v7177_v46 }
 0x287   :  { %v4854_v50 = vpop.f32.mrf.mxu0  ;;  %v4755_v14 = vadd.f32 %v4754_v51, %v4753_v57 }
 0x288   :  { %v3478_v60 = vmax.f32 %v7047_v13, %v3416_v37  ;;  %v4756_v17 = vpop.f32.mrf.mxu1  ;;  %v3427_v11 = vadd.f32 %v4854_v50, %v3330_v21  ;;  %v4746_v13 = vadd.f32 %v4745_v59, %v4744_v54  ;;  %v3496_v27 = vmax.f32 %v3480_v49, 0.0 }
 0x289   :  { %v3418_v3 = vpop.f32.mrf.mxu0 }
 0x28a   :  { %v3481_v1 = vmax.f32 %v7068_v29, %v3427_v11  ;;  %v4757_v23 = vpop.f32.mrf.mxu1  ;;  %v3419_v35 = vadd.f32 %v3418_v3, %v3322_v43  ;;  %v4691_v29 = vadd.f32 %v7201_v47, %v7199_v31  ;;  %v3494_v30 = vmax.f32 %v3478_v60, 0.0  ;;  %v7439_v11 = vld [vmem:[#allocation16_spill] sm:$0xff] }
 0x28b   :  { %v4857_v42 = vpop.f32.mrf.mxu0  ;;  %v4758_v37 = vadd.f32 %v4757_v23, %v4756_v17  ;;  %v7442_v17 = vld [vmem:[#allocation10_spill] sm:$0xff] }
 0x28c   :  { %v3497_v44 = vmax.f32 %v3481_v1, 0.0  ;;  %v3479_v5 = vmax.f32 %v7053_v55, %v3419_v35  ;;  %v4759_v38 = vpop.f32.mrf.mxu1  ;;  %v3440_v58 = vadd.f32 %v4857_v42, %v3343_v16  ;;  %v4700_v55 = vadd.f32 %v7211_v22, %v7209_v9  ;;  %v7436_v9 = vld [vmem:[#allocation24_spill] sm:$0xff] }
 0x28d   :  { %v3431_v52 = vpop.f32.mrf.mxu0  ;;  %v3254_v4 = vadd.f32 %v4691_v29, %v7159_v32  ;;  %v4694_v22 = vadd.f32 %v7436_v9, %v7435_v45  ;;  %v7444_v29 = vld [vmem:[#allocation21_spill] sm:$0xff]  ;;  %v7451_v45 = vld [vmem:[#allocation18_spill] sm:$0xff] }
 0x28e   :  { %v3940_v20 = vpack.c.bf16 %v3497_v44, %v3496_v27  ;;  %v3495_v25 = vmax.f32 %v3479_v5, 0.0  ;;  %v3484_v54 = vmax.f32 %v7090_v41, %v3440_v58  ;;  %v4760_v59 = vpop.f32.mrf.mxu1  ;;  %v3432_v26 = vadd.f32 %v3431_v52, %v3335_v0  ;;  %v7443_v5 = vld [vmem:[#allocation8_spill] sm:$0xff] }
 0x28f   :  { %v4761_v12 = vadd.f32 %v4760_v59, %v4759_v38  ;;  %v4858_v24 = vpop.f32.mrf.mxu0  ;;  %v3338_v41 = vadd.f32 %v4746_v13, %v3241_v48  ;;  %v3265_v51 = vadd.f32 %v4700_v55, %v4636_v62  ;;  %v3351_v46 = vadd.f32 %v4755_v14, %v3254_v4  ;;  %v7448_v55 = vld [vmem:[#allocation3_spill] sm:$0xff]  ;;  %v7449_v14 = vld [vmem:[#allocation25_spill] sm:$0xff] }
 0x290   :  { %3972 = vst [vmem:[%s7313_s5 + $0x8] sm:$0xff] %v3940_v20   ;;  %v3935_v31 = vpack.c.bf16 %v3495_v25, %v3494_v30  ;;  %v3482_v47 = vmax.f32 %v7076_v39, %v3432_v26  ;;  %v4762_v33 = vpop.f32.mrf.mxu1  ;;  %v3443_v8 = vadd.f32 %v4858_v24, %v3346_v40  ;;  %v3500_v2 = vmax.f32 %v3484_v54, 0.0  ;;  %v7445_v30 = vld [vmem:[#allocation4_spill] sm:$0xff]  ;;  %v7446_v20 = vld [vmem:[#allocation17_spill] sm:$0xff]  ;;  %v7447_v54 = vld [vmem:[#allocation11_spill] sm:$0xff] }
 0x291   :  { %v3434_v57 = vpop.f32.mrf.mxu0  ;;  %v3359_v49 = vadd.f32 %v4761_v12, %v3262_v10  ;;  %v3257_v43 = vadd.f32 %v4694_v22, %v7439_v11  ;;  %v4706_v52 = vadd.f32 %v7445_v30, %v7444_v29  ;;  %v3270_v25 = vadd.f32 %v4703_v7, %v7446_v20  ;;  %v7456_v11 = vld [vmem:[#allocation7_spill] sm:$0xff] }
 0x292   :  { %3936 = vst [vmem:[%s7313_s5] sm:$0xff] %v3935_v31   ;;  %v3485_v18 = vmax.f32 %v7437_v34, %v3443_v8  ;;  %v4763_v36 = vpop.f32.mrf.mxu1  ;;  %v3435_v39 = vadd.f32 %v3434_v57, %v3338_v41  ;;  %v3498_v3 = vmax.f32 %v3482_v47, 0.0  ;;  %v4709_v12 = vadd.f32 %v7449_v14, %v7448_v55  ;;  %v7450_v8 = vld [vmem:[#allocation9_spill] sm:$0xff] }
 0x293   :  { %v4764_v21 = vadd.f32 %v4763_v36, %v4762_v33  ;;  %v4861_v61 = vpop.f32.mrf.mxu0  ;;  %v3354_v0 = vadd.f32 %v4758_v37, %v3257_v43  ;;  %v3273_v9 = vadd.f32 %v4706_v52, %v7451_v45  ;;  %v7453_v37 = vld [vmem:[#allocation26_spill] sm:$0xff] }
 0x294   :  { %v3501_v32 = vmax.f32 %v3485_v18, 0.0  ;;  %v3483_v50 = vmax.f32 %v7438_v6, %v3435_v39  ;;  %v4765_v19 = vpop.f32.mrf.mxu1  ;;  %v3456_v60 = vadd.f32 %v4861_v61, %v3359_v49  ;;  %v7452_v49 = vld [vmem:[#allocation19_spill] sm:$0xff] }
 0x295   :  { %v3447_v1 = vpop.f32.mrf.mxu0  ;;  %v3362_v35 = vadd.f32 %v4764_v21, %v3265_v51  ;;  %v3278_v51 = vadd.f32 %v4709_v12, %v7452_v49  ;;  %v4712_v21 = vadd.f32 %v7230_v15, %v7453_v37 }
 0x296   :  { %v3950_v16 = vpack.c.bf16 %v3501_v32, %v3500_v2  ;;  %v3499_v56 = vmax.f32 %v3483_v50, 0.0  ;;  %v3488_v23 = vmax.f32 %v7442_v17, %v3456_v60  ;;  %v4766_v53 = vpop.f32.mrf.mxu1  ;;  %v3448_v13 = vadd.f32 %v3447_v1, %v3351_v46  ;;  %v7454_v32 = vld [vmem:[#allocation12_spill] sm:$0xff]  ;;  %v7458_v17 = vld [vmem:[#allocation14_spill] sm:$0xff] }
 0x297   :  { %v4862_v42 = vpop.f32.mrf.mxu0  ;;  %v4767_v44 = vadd.f32 %v4766_v53, %v4765_v19  ;;  %v7455_v60 = vld [vmem:[#allocation20_spill] sm:$0xff] }
 0x298   :  { %3974 = vst [vmem:[%s7313_s5 + $0x18] sm:$0xff] %v3950_v16   ;;  %v3945_v27 = vpack.c.bf16 %v3499_v56, %v3498_v3  ;;  %v3486_v38 = vmax.f32 %v7443_v5, %v3448_v13  ;;  %v4768_v58 = vpop.f32.mrf.mxu1  ;;  %v3459_v48 = vadd.f32 %v4862_v42, %v3362_v35  ;;  %v3504_v24 = vmax.f32 %v3488_v23, 0.0  ;;  %v7457_v16 = vld [vmem:[#allocation13_spill] sm:$0xff] }
 0x299   :  { %v3450_v40 = vpop.f32.mrf.mxu0  ;;  %v3367_v4 = vadd.f32 %v4767_v44, %v3270_v25  ;;  %v4648_v43 = vadd.f32 %v7456_v11, %v7455_v60  ;;  %v7459_v44 = vld [vmem:[#allocation15_spill] sm:$0xff] }
 0x29a   :  { %3973 = vst [vmem:[%s7313_s5 + $0x10] sm:$0xff] %v3945_v27   ;;  %v3489_v59 = vmax.f32 %v7447_v54, %v3459_v48  ;;  %v4769_v26 = vpop.f32.mrf.mxu1  ;;  %v3451_v10 = vadd.f32 %v3450_v40, %v3354_v0  ;;  %v3502_v57 = vmax.f32 %v3486_v38, 0.0 }
 0x29b   :  { %v4865_v31 = vpop.f32.mrf.mxu0  ;;  %v4770_v33 = vadd.f32 %v4769_v26, %v4768_v58  ;;  %v3281_v3 = vadd.f32 %v4712_v21, %v4648_v43 }
 0x29c   :  { %v3505_v47 = vmax.f32 %v3489_v59, 0.0  ;;  %v3487_v41 = vmax.f32 %v7450_v8, %v3451_v10  ;;  %v4771_v62 = vpop.f32.mrf.mxu1 }
 0x29d   :  { %v3463_v22 = vpop.f32.mrf.mxu0  ;;  %v3370_v19 = vadd.f32 %v4770_v33, %v3273_v9 }
 0x29e   :  { %v3960_v34 = vpack.c.bf16 %v3505_v47, %v3504_v24  ;;  %v3503_v18 = vmax.f32 %v3487_v41, 0.0  ;;  %v4772_v36 = vpop.f32.mrf.mxu1  ;;  %v3464_v39 = vadd.f32 %v3463_v22, %v3367_v4 }
 0x29f   :  { %v4773_v61 = vadd.f32 %v4772_v36, %v4771_v62  ;;  %v4866_v46 = vpop.f32.mrf.mxu0 }
 0x2a0   :  { %3976 = vst [vmem:[%s7313_s5 + $0x28] sm:$0xff] %v3960_v34   ;;  %v3955_v2 = vpack.c.bf16 %v3503_v18, %v3502_v57  ;;  %v3490_v6 = vmax.f32 %v7454_v32, %v3464_v39  ;;  %v4774_v50 = vpop.f32.mrf.mxu1 }
 0x2a1   :  { %v3375_v63 = vadd.f32 %v4773_v61, %v3278_v51  ;;  %v3466_v28 = vpop.f32.mrf.mxu0 }
 0x2a2   :  { %3975 = vst [vmem:[%s7313_s5 + $0x20] sm:$0xff] %v3955_v2   ;;  %v4775_v15 = vpop.f32.mrf.mxu1  ;;  %v3467_v7 = vadd.f32 %v3466_v28, %v3370_v19  ;;  %v3506_v13 = vmax.f32 %v3490_v6, 0.0 }
 0x2a3   :  { %v3472_v1 = vadd.f32 %v4865_v31, %v3375_v63  ;;  %v4776_v35 = vadd.f32 %v4775_v15, %v4774_v50 }
 0x2a4   :  { %v3491_v56 = vmax.f32 %v7457_v16, %v3467_v7 }
 0x2a5   :  { %v3492_v23 = vmax.f32 %v7458_v17, %v3472_v1  ;;  %v3378_v53 = vadd.f32 %v4776_v35, %v3281_v3 }
 0x2a6   :  { %v3507_v42 = vmax.f32 %v3491_v56, 0.0 }
 0x2a7   :  { %v3475_v0 = vadd.f32 %v4866_v46, %v3378_v53  ;;  %v3508_v38 = vmax.f32 %v3492_v23, 0.0 }
 0x2a8   :  { %v3965_v27 = vpack.c.bf16 %v3507_v42, %v3506_v13 }
 0x2a9   :  { %v3493_v5 = vmax.f32 %v7459_v44, %v3475_v0 }
 0x2aa   :  { %3977 = vst [vmem:[%s7313_s5 + $0x30] sm:$0xff] %v3965_v27  }
 0x2ab   :  { %v3509_v58 = vmax.f32 %v3493_v5, 0.0 }
 0x2ad   :  { %v3970_v48 = vpack.c.bf16 %v3509_v58, %v3508_v38 }
 0x2af   :  { %3978 = vst [vmem:[%s7313_s5 + $0x38] sm:$0xff] %v3970_v48  }

// kernel: _lambda_.5
= control target key start
LH: loop header
LB: loop body
LE: loop exit
PB: predicated region body
PF: predicated region fallthrough
CT: control target
= control target key end

     0   :  { %10 = vsyncpa [#allocation3], 0  ;;  %v10827_v36 = vmov 1966171168   ;;  %v1055_v38 = vlaneseq  ;;  %s14361_s0 = inlined_call_operand.vmem [shape: bf16[2,4096], index: 0, kind: input, shape index: {}]   ;;  %s14362_s1 = inlined_call_operand.vmem [shape: bf16[4096,512], index: 1, kind: input, shape index: {}]   ;;  %s14363_s2 = inlined_call_operand.vmem [shape: bf16[512,128], index: 2, kind: input, shape index: {}]   ;;  %s14364_s3 = inlined_call_operand.hbm [shape: f32[2,512], index: 3, kind: output, shape index: {0}]   ;;  %s14365_s4 = inlined_call_operand.hbm [shape: f32[2,128], index: 4, kind: output, shape index: {1}]  }
   0x1   :  { %v9211_v0 = vld [vmem:[%s14362_s1 + $0xe4] ss:$16 sps:$4 sm:$0xff]   ;;  %v9215_v2 = vld [vmem:[%s14362_s1 + $0xe0] ss:$16 sps:$4 sm:$0xff]   ;;  %v1053_v37 = vunpack.c.l.s4 %v10827_v36 }
   0x2   :  { %v9213_v1 = vld [vmem:[%s14362_s1 + $0x2e4] ss:$16 sps:$4 sm:$0xff]   ;;  %6399 = vmatprep.subr.bf16.mxu0 %v9211_v0  ;;  %v9216_v3 = vld [vmem:[%s14362_s1 + $0x2e0] ss:$16 sps:$4 sm:$0xff]   ;;  %v10973_v43 = vshrl.u32 %v1055_v38, 7 }
   0x3   :  { %6440 = vmatprep.subr.bf16.mxu1 %v9213_v1  ;;  %v9217_v4 = vld [vmem:[%s14362_s1 + $0xc4] ss:$16 sps:$4 sm:$0xff]   ;;  %6400 = vmatpush1.bf16.msra.mxu0 %v9215_v2  ;;  %v9221_v6 = vld [vmem:[%s14362_s1 + $0xc0] ss:$16 sps:$4 sm:$0xff]   ;;  %v1054_v42 = vunpack.c.0.s8 %v1053_v37 }
   0x4   :  { %6441 = vmatpush1.bf16.msra.mxu1 %v9216_v3  ;;  %v9219_v5 = vld [vmem:[%s14362_s1 + $0x2c4] ss:$16 sps:$4 sm:$0xff]   ;;  %6401 = vmatprep.subr.bf16.mxu0 %v9217_v4  ;;  %v9222_v7 = vld [vmem:[%s14362_s1 + $0x2c0] ss:$16 sps:$4 sm:$0xff]  }
   0x5   :  { %6442 = vmatprep.subr.bf16.mxu1 %v9219_v5  ;;  %v9223_v8 = vld [vmem:[%s14362_s1 + $0xa4] ss:$16 sps:$4 sm:$0xff]   ;;  %v9227_v10 = vld [vmem:[%s14362_s1 + $0xa0] ss:$16 sps:$4 sm:$0xff]   ;;  %v10991_v49 = vsub.s32 %v1054_v42, %v10973_v43 }
   0x6   :  { %v9225_v9 = vld [vmem:[%s14362_s1 + $0x2a4] ss:$16 sps:$4 sm:$0xff]   ;;  %v9228_v11 = vld [vmem:[%s14362_s1 + $0x2a0] ss:$16 sps:$4 sm:$0xff]  }
   0x7   :  { %6402 = vmatpush1.bf16.msra.mxu0 %v9221_v6  ;;  %v9229_v12 = vld [vmem:[%s14362_s1 + $0x84] ss:$16 sps:$4 sm:$0xff]   ;;  %v9233_v14 = vld [vmem:[%s14362_s1 + $0x80] ss:$16 sps:$4 sm:$0xff]  }
   0x8   :  { %6443 = vmatpush1.bf16.msra.mxu1 %v9222_v7  ;;  %6403 = vmatprep.subr.bf16.mxu0 %v9223_v8  ;;  %v9231_v13 = vld [vmem:[%s14362_s1 + $0x284] ss:$16 sps:$4 sm:$0xff]   ;;  %v9234_v15 = vld [vmem:[%s14362_s1 + $0x280] ss:$16 sps:$4 sm:$0xff]  }
   0x9   :  { %6444 = vmatprep.subr.bf16.mxu1 %v9225_v9  ;;  %v9235_v16 = vld [vmem:[%s14362_s1 + $0x64] ss:$16 sps:$4 sm:$0xff]   ;;  %v9239_v18 = vld [vmem:[%s14362_s1 + $0x60] ss:$16 sps:$4 sm:$0xff]  }
   0xa   :  { %v9237_v17 = vld [vmem:[%s14362_s1 + $0x264] ss:$16 sps:$4 sm:$0xff]   ;;  %v9240_v19 = vld [vmem:[%s14362_s1 + $0x260] ss:$16 sps:$4 sm:$0xff]  }
   0xb   :  { %6404 = vmatpush1.bf16.msra.mxu0 %v9227_v10  ;;  %v9241_v20 = vld [vmem:[%s14362_s1 + $0x44] ss:$16 sps:$4 sm:$0xff]   ;;  %v9245_v22 = vld [vmem:[%s14362_s1 + $0x40] ss:$16 sps:$4 sm:$0xff]  }
   0xc   :  { %6445 = vmatpush1.bf16.msra.mxu1 %v9228_v11  ;;  %6405 = vmatprep.subr.bf16.mxu0 %v9229_v12  ;;  %v9243_v21 = vld [vmem:[%s14362_s1 + $0x244] ss:$16 sps:$4 sm:$0xff]   ;;  %v9246_v23 = vld [vmem:[%s14362_s1 + $0x240] ss:$16 sps:$4 sm:$0xff]  }
   0xd   :  { %6446 = vmatprep.subr.bf16.mxu1 %v9231_v13  ;;  %v9247_v24 = vld [vmem:[%s14362_s1 + $0x24] ss:$16 sps:$4 sm:$0xff]   ;;  %v9251_v26 = vld [vmem:[%s14362_s1 + $0x20] ss:$16 sps:$4 sm:$0xff]  }
   0xe   :  { %v9249_v25 = vld [vmem:[%s14362_s1 + $0x224] ss:$16 sps:$4 sm:$0xff]   ;;  %v9252_v27 = vld [vmem:[%s14362_s1 + $0x220] ss:$16 sps:$4 sm:$0xff]  }
   0xf   :  { %6406 = vmatpush1.bf16.msra.mxu0 %v9233_v14  ;;  %v9253_v28 = vld [vmem:[%s14362_s1 + $0x4] ss:$16 sps:$4 sm:$0xff]   ;;  %v9257_v30 = vld [vmem:[%s14362_s1] ss:$16 sps:$4 sm:$0xff]  }
  0x10   :  { %6447 = vmatpush1.bf16.msra.mxu1 %v9234_v15  ;;  %6407 = vmatprep.subr.bf16.mxu0 %v9235_v16  ;;  %v9255_v29 = vld [vmem:[%s14362_s1 + $0x204] ss:$16 sps:$4 sm:$0xff]   ;;  %v9258_v31 = vld [vmem:[%s14362_s1 + $0x200] ss:$16 sps:$4 sm:$0xff]  }
  0x11   :  { %6448 = vmatprep.subr.bf16.mxu1 %v9237_v17  ;;  %v9259_v32 = vld [vmem:[%s14362_s1 + $0x1e4] ss:$16 sps:$4 sm:$0xff]   ;;  %v9263_v34 = vld [vmem:[%s14362_s1 + $0x1e0] ss:$16 sps:$4 sm:$0xff]  }
  0x12   :  { %v9261_v33 = vld [vmem:[%s14362_s1 + $0x3e4] ss:$16 sps:$4 sm:$0xff]   ;;  %v9264_v35 = vld [vmem:[%s14362_s1 + $0x3e0] ss:$16 sps:$4 sm:$0xff]  }
  0x13   :  { %6408 = vmatpush1.bf16.msra.mxu0 %v9239_v18  ;;  %v9265_v39 = vld [vmem:[%s14362_s1 + $0x1c4] ss:$16 sps:$4 sm:$0xff]   ;;  %v9269_v41 = vld [vmem:[%s14362_s1 + $0x1c0] ss:$16 sps:$4 sm:$0xff]  }
  0x14   :  { %6449 = vmatpush1.bf16.msra.mxu1 %v9240_v19  ;;  %6409 = vmatprep.subr.bf16.mxu0 %v9241_v20  ;;  %v9267_v40 = vld [vmem:[%s14362_s1 + $0x3c4] ss:$16 sps:$4 sm:$0xff]   ;;  %v9270_v44 = vld [vmem:[%s14362_s1 + $0x3c0] ss:$16 sps:$4 sm:$0xff]  }
  0x15   :  { %6450 = vmatprep.subr.bf16.mxu1 %v9243_v21  ;;  %v9271_v45 = vld [vmem:[%s14362_s1 + $0x1a4] ss:$16 sps:$4 sm:$0xff]   ;;  %v9275_v47 = vld [vmem:[%s14362_s1 + $0x1a0] ss:$16 sps:$4 sm:$0xff]  }
  0x16   :  { %v9273_v46 = vld [vmem:[%s14362_s1 + $0x3a4] ss:$16 sps:$4 sm:$0xff]   ;;  %v9276_v48 = vld [vmem:[%s14362_s1 + $0x3a0] ss:$16 sps:$4 sm:$0xff]  }
  0x17   :  { %6410 = vmatpush1.bf16.msra.mxu0 %v9245_v22  ;;  %v9277_v50 = vld [vmem:[%s14362_s1 + $0x184] ss:$16 sps:$4 sm:$0xff]   ;;  %v9281_v53 = vld [vmem:[%s14362_s1 + $0x180] ss:$16 sps:$4 sm:$0xff]  }
  0x18   :  { %6451 = vmatpush1.bf16.msra.mxu1 %v9246_v23  ;;  %6411 = vmatprep.subr.bf16.mxu0 %v9247_v24  ;;  %v9279_v51 = vld [vmem:[%s14362_s1 + $0x384] ss:$16 sps:$4 sm:$0xff]   ;;  %v9282_v55 = vld [vmem:[%s14362_s1 + $0x380] ss:$16 sps:$4 sm:$0xff]  }
  0x19   :  { %6452 = vmatprep.subr.bf16.mxu1 %v9249_v25  ;;  %v19_v52 = vld [vmem:[%s14361_s0] sm:$0xff] }
  0x1a   :  { %v1058_v54 = vrot.slane %v19_v52, %v10991_v49  ;;  %v9283_v56 = vld [vmem:[%s14362_s1 + $0x164] ss:$16 sps:$4 sm:$0xff]   ;;  %v9287_v59 = vld [vmem:[%s14362_s1 + $0x160] ss:$16 sps:$4 sm:$0xff]   ;;  %v1051_v1 = vcombine.high %v19_v52, %v19_v52 }
  0x1b   :  { %6412 = vmatpush1.bf16.msra.mxu0 %v9251_v26  ;;  %v9285_v57 = vld [vmem:[%s14362_s1 + $0x364] ss:$16 sps:$4 sm:$0xff]   ;;  %v9288_v61 = vld [vmem:[%s14362_s1 + $0x360] ss:$16 sps:$4 sm:$0xff]  }
  0x1c   :  { %6453 = vmatpush1.bf16.msra.mxu1 %v9252_v27  ;;  %6413 = vmatprep.subr.bf16.mxu0 %v9253_v28  ;;  %v1066_v58 = vcombine.high %v1058_v54, %v1058_v54  ;;  %v9289_v62 = vld [vmem:[%s14362_s1 + $0x144] ss:$16 sps:$4 sm:$0xff]   ;;  %v9293_v2 = vld [vmem:[%s14362_s1 + $0x140] ss:$16 sps:$4 sm:$0xff]   ;;  %v11049_v6 = vrot.slane %v1051_v1, %v10991_v49  ;;  %v11069_v13 = vrot.slane %v1058_v54, %v10991_v49 }
  0x1d   :  { %6454 = vmatprep.subr.bf16.mxu1 %v9255_v29  ;;  %v9291_v63 = vld [vmem:[%s14362_s1 + $0x344] ss:$16 sps:$4 sm:$0xff]   ;;  %v9294_v3 = vld [vmem:[%s14362_s1 + $0x340] ss:$16 sps:$4 sm:$0xff]  }
  0x1e   :  { %v11019_v60 = vrot.slane %v1066_v58, %v10991_v49  ;;  %v9295_v4 = vld [vmem:[%s14362_s1 + $0x124] ss:$16 sps:$4 sm:$0xff]   ;;  %v9299_v7 = vld [vmem:[%s14362_s1 + $0x120] ss:$16 sps:$4 sm:$0xff]   ;;  %v1067_v11 = vcombine.high %v11049_v6, %v11049_v6  ;;  %v11085_v18 = vcombine.high %v11069_v13, %v11069_v13 }
  0x1f   :  { %6414 = vmatpush1.bf16.msra.mxu0 %v9257_v30  ;;  %v9297_v5 = vld [vmem:[%s14362_s1 + $0x324] ss:$16 sps:$4 sm:$0xff]   ;;  %v9300_v8 = vld [vmem:[%s14362_s1 + $0x320] ss:$16 sps:$4 sm:$0xff]  }
  0x20   :  { %6455 = vmatpush1.bf16.msra.mxu1 %v9258_v31  ;;  %6415 = vmatprep.subr.bf16.mxu0 %v9259_v32  ;;  %v11032_v0 = vcombine.high %v11019_v60, %v11019_v60  ;;  %v9301_v9 = vld [vmem:[%s14362_s1 + $0x104] ss:$16 sps:$4 sm:$0xff]   ;;  %v9305_v12 = vld [vmem:[%s14362_s1 + $0x100] ss:$16 sps:$4 sm:$0xff]   ;;  %v11081_v17 = vrot.slane %v1067_v11, %v10991_v49 }
  0x21   :  { %6456 = vmatprep.subr.bf16.mxu1 %v9261_v33  ;;  %6431 = vmatprep.mubr.bf16.mxu0 %v11019_v60  ;;  %v9303_v10 = vld [vmem:[%s14362_s1 + $0x304] ss:$16 sps:$4 sm:$0xff]   ;;  %v9306_v14 = vld [vmem:[%s14362_s1 + $0x300] ss:$16 sps:$4 sm:$0xff]  }
  0x22   :  { %6472 = vmatprep.mubr.bf16.mxu1 %v11032_v0  ;;  %v9309_v15 = vld [vmem:[%s14362_s1 + $0x4e4] ss:$16 sps:$4 sm:$0xff]   ;;  %v9307_v19 = vld [vmem:[%s14362_s1 + $0x4e0] ss:$16 sps:$4 sm:$0xff]   ;;  %v11101_v23 = vcombine.high %v11081_v17, %v11081_v17 }
  0x23   :  { %6416 = vmatpush2.bf16.msra.mxu0 %v9263_v34  ;;  %v9312_v16 = vld [vmem:[%s14362_s1 + $0x6e4] ss:$16 sps:$4 sm:$0xff]   ;;  %v9310_v20 = vld [vmem:[%s14362_s1 + $0x6e0] ss:$16 sps:$4 sm:$0xff]  }
  0x24   :  { %6457 = vmatpush2.bf16.msra.mxu1 %v9264_v35  ;;  %6417 = vmatprep.subr.bf16.mxu0 %v9265_v39  ;;  %v9315_v21 = vld [vmem:[%s14362_s1 + $0x4c4] ss:$16 sps:$4 sm:$0xff]   ;;  %v9313_v24 = vld [vmem:[%s14362_s1 + $0x4c0] ss:$16 sps:$4 sm:$0xff]  }
  0x25   :  { %6458 = vmatprep.subr.bf16.mxu1 %v9267_v40  ;;  %v9318_v22 = vld [vmem:[%s14362_s1 + $0x6c4] ss:$16 sps:$4 sm:$0xff]   ;;  %v9316_v25 = vld [vmem:[%s14362_s1 + $0x6c0] ss:$16 sps:$4 sm:$0xff]  }
  0x26   :  { %v9321_v26 = vld [vmem:[%s14362_s1 + $0x4a4] ss:$16 sps:$4 sm:$0xff]   ;;  %v9319_v28 = vld [vmem:[%s14362_s1 + $0x4a0] ss:$16 sps:$4 sm:$0xff]  }
  0x27   :  { %6418 = vmatpush2.bf16.msra.mxu0 %v9269_v41  ;;  %v9324_v27 = vld [vmem:[%s14362_s1 + $0x6a4] ss:$16 sps:$4 sm:$0xff]   ;;  %v9322_v29 = vld [vmem:[%s14362_s1 + $0x6a0] ss:$16 sps:$4 sm:$0xff]  }
  0x28   :  { %6459 = vmatpush2.bf16.msra.mxu1 %v9270_v44  ;;  %6419 = vmatprep.subr.bf16.mxu0 %v9271_v45  ;;  %v9327_v30 = vld [vmem:[%s14362_s1 + $0x484] ss:$16 sps:$4 sm:$0xff]   ;;  %v9325_v32 = vld [vmem:[%s14362_s1 + $0x480] ss:$16 sps:$4 sm:$0xff]  }
  0x29   :  { %6460 = vmatprep.subr.bf16.mxu1 %v9273_v46  ;;  %v9330_v31 = vld [vmem:[%s14362_s1 + $0x684] ss:$16 sps:$4 sm:$0xff]   ;;  %v9328_v33 = vld [vmem:[%s14362_s1 + $0x680] ss:$16 sps:$4 sm:$0xff]  }
  0x2a   :  { %v9333_v34 = vld [vmem:[%s14362_s1 + $0x464] ss:$16 sps:$4 sm:$0xff]   ;;  %v9331_v36 = vld [vmem:[%s14362_s1 + $0x460] ss:$16 sps:$4 sm:$0xff]  }
  0x2b   :  { %6420 = vmatpush2.bf16.msra.mxu0 %v9275_v47  ;;  %v9336_v35 = vld [vmem:[%s14362_s1 + $0x664] ss:$16 sps:$4 sm:$0xff]   ;;  %v9334_v37 = vld [vmem:[%s14362_s1 + $0x660] ss:$16 sps:$4 sm:$0xff]  }
  0x2c   :  { %6461 = vmatpush2.bf16.msra.mxu1 %v9276_v48  ;;  %6421 = vmatprep.subr.bf16.mxu0 %v9277_v50  ;;  %v9339_v38 = vld [vmem:[%s14362_s1 + $0x444] ss:$16 sps:$4 sm:$0xff]   ;;  %v9337_v40 = vld [vmem:[%s14362_s1 + $0x440] ss:$16 sps:$4 sm:$0xff]  }
  0x2d   :  { %6462 = vmatprep.subr.bf16.mxu1 %v9279_v51  ;;  %v9342_v39 = vld [vmem:[%s14362_s1 + $0x644] ss:$16 sps:$4 sm:$0xff]   ;;  %v9340_v41 = vld [vmem:[%s14362_s1 + $0x640] ss:$16 sps:$4 sm:$0xff]  }
  0x2e   :  { %v9345_v42 = vld [vmem:[%s14362_s1 + $0x424] ss:$16 sps:$4 sm:$0xff]   ;;  %v9343_v45 = vld [vmem:[%s14362_s1 + $0x420] ss:$16 sps:$4 sm:$0xff]  }
  0x2f   :  { %6422 = vmatpush2.bf16.msra.mxu0 %v9281_v53  ;;  %v9348_v44 = vld [vmem:[%s14362_s1 + $0x624] ss:$16 sps:$4 sm:$0xff]   ;;  %v9346_v46 = vld [vmem:[%s14362_s1 + $0x620] ss:$16 sps:$4 sm:$0xff]  }
  0x30   :  { %6463 = vmatpush2.bf16.msra.mxu1 %v9282_v55  ;;  %6423 = vmatprep.subr.bf16.mxu0 %v9283_v56  ;;  %v9351_v47 = vld [vmem:[%s14362_s1 + $0x404] ss:$16 sps:$4 sm:$0xff]   ;;  %v9349_v50 = vld [vmem:[%s14362_s1 + $0x400] ss:$16 sps:$4 sm:$0xff]  }
  0x31   :  { %6464 = vmatprep.subr.bf16.mxu1 %v9285_v57  ;;  %v9354_v48 = vld [vmem:[%s14362_s1 + $0x604] ss:$16 sps:$4 sm:$0xff]   ;;  %v9352_v51 = vld [vmem:[%s14362_s1 + $0x600] ss:$16 sps:$4 sm:$0xff]  }
  0x32   :  { %v9357_v52 = vld [vmem:[%s14362_s1 + $0x5e4] ss:$16 sps:$4 sm:$0xff]   ;;  %v9355_v54 = vld [vmem:[%s14362_s1 + $0x5e0] ss:$16 sps:$4 sm:$0xff]  }
  0x33   :  { %6424 = vmatpush2.bf16.msra.mxu0 %v9287_v59  ;;  %v9360_v53 = vld [vmem:[%s14362_s1 + $0x7e4] ss:$16 sps:$4 sm:$0xff]   ;;  %v9358_v55 = vld [vmem:[%s14362_s1 + $0x7e0] ss:$16 sps:$4 sm:$0xff]  }
  0x34   :  { %6465 = vmatpush2.bf16.msra.mxu1 %v9288_v61  ;;  %6425 = vmatprep.subr.bf16.mxu0 %v9289_v62  ;;  %v9363_v56 = vld [vmem:[%s14362_s1 + $0x5c4] ss:$16 sps:$4 sm:$0xff]   ;;  %v9361_v58 = vld [vmem:[%s14362_s1 + $0x5c0] ss:$16 sps:$4 sm:$0xff]  }
  0x35   :  { %6466 = vmatprep.subr.bf16.mxu1 %v9291_v63  ;;  %v9366_v57 = vld [vmem:[%s14362_s1 + $0x7c4] ss:$16 sps:$4 sm:$0xff]   ;;  %v9364_v59 = vld [vmem:[%s14362_s1 + $0x7c0] ss:$16 sps:$4 sm:$0xff]  }
  0x36   :  { %v9369_v61 = vld [vmem:[%s14362_s1 + $0x5a4] ss:$16 sps:$4 sm:$0xff]   ;;  %v9367_v63 = vld [vmem:[%s14362_s1 + $0x5a0] ss:$16 sps:$4 sm:$0xff]  }
  0x37   :  { %6426 = vmatpush2.bf16.msra.mxu0 %v9293_v2  ;;  %v9372_v62 = vld [vmem:[%s14362_s1 + $0x7a4] ss:$16 sps:$4 sm:$0xff]   ;;  %v9370_v1 = vld [vmem:[%s14362_s1 + $0x7a0] ss:$16 sps:$4 sm:$0xff]  }
  0x38   :  { %6467 = vmatpush2.bf16.msra.mxu1 %v9294_v3  ;;  %6427 = vmatprep.subr.bf16.mxu0 %v9295_v4  ;;  %v9375_v2 = vld [vmem:[%s14362_s1 + $0x584] ss:$16 sps:$4 sm:$0xff]   ;;  %v9373_v4 = vld [vmem:[%s14362_s1 + $0x580] ss:$16 sps:$4 sm:$0xff]  }
  0x39   :  { %6468 = vmatprep.subr.bf16.mxu1 %v9297_v5  ;;  %v9378_v3 = vld [vmem:[%s14362_s1 + $0x784] ss:$16 sps:$4 sm:$0xff]   ;;  %v9376_v5 = vld [vmem:[%s14362_s1 + $0x780] ss:$16 sps:$4 sm:$0xff]  }
  0x3a   :  { %v9387_v11 = vld [vmem:[%s14362_s1 + $0x544] ss:$16 sps:$4 sm:$0xff]  }
  0x3b   :  { %6428 = vmatpush2.bf16.msra.mxu0 %v9299_v7  ;;  %v9381_v7 = vld [vmem:[%s14362_s1 + $0x564] ss:$16 sps:$4 sm:$0xff]  }
  0x3c   :  { %6469 = vmatpush2.bf16.msra.mxu1 %v9300_v8  ;;  %6429 = vmatprep.subr.bf16.mxu0 %v9301_v9  ;;  %v9384_v8 = vld [vmem:[%s14362_s1 + $0x764] ss:$16 sps:$4 sm:$0xff]   ;;  %v9379_v9 = vld [vmem:[%s14362_s1 + $0x560] ss:$16 sps:$4 sm:$0xff]  }
  0x3d   :  { %6470 = vmatprep.subr.bf16.mxu1 %v9303_v10  ;;  %v9382_v10 = vld [vmem:[%s14362_s1 + $0x760] ss:$16 sps:$4 sm:$0xff]  }
  0x3f   :  { %6430 = vmatpush2.bf16.msra.mxu0 %v9305_v12  ;;  %v9390_v12 = vld [vmem:[%s14362_s1 + $0x744] ss:$16 sps:$4 sm:$0xff]  }
  0x40   :  { %6471 = vmatpush2.bf16.msra.mxu1 %v9306_v14  ;;  %6481 = vmatprep.subr.bf16.mxu0 %v9309_v15  ;;  %v9385_v14 = vld [vmem:[%s14362_s1 + $0x540] ss:$16 sps:$4 sm:$0xff]  }
  0x41   :  { %6522 = vmatprep.subr.bf16.mxu1 %v9312_v16  ;;  %v9388_v15 = vld [vmem:[%s14362_s1 + $0x740] ss:$16 sps:$4 sm:$0xff]   ;;  %v9393_v16 = vld [vmem:[%s14362_s1 + $0x524] ss:$16 sps:$4 sm:$0xff]  }
  0x42   :  { %6432 = vmatmul.mubr.bf16.vlgmr.msra.gmra.mxu0 %v11069_v13 }
  0x43   :  { %6473 = vmatmul.mubr.bf16.vlgmr.msra.gmra.mxu1 %v11085_v18  ;;  %6482 = vmatpush1.bf16.msra.mxu0 %v9307_v19  ;;  %v9396_v19 = vld [vmem:[%s14362_s1 + $0x724] ss:$16 sps:$4 sm:$0xff]  }
  0x44   :  { %6523 = vmatpush1.bf16.msra.mxu1 %v9310_v20  ;;  %6483 = vmatprep.subr.bf16.mxu0 %v9315_v21  ;;  %v9391_v20 = vld [vmem:[%s14362_s1 + $0x520] ss:$16 sps:$4 sm:$0xff]  }
  0x45   :  { %6524 = vmatprep.subr.bf16.mxu1 %v9318_v22  ;;  %6513 = vmatprep.mubr.bf16.mxu0 %v11081_v17  ;;  %v9394_v21 = vld [vmem:[%s14362_s1 + $0x720] ss:$16 sps:$4 sm:$0xff]   ;;  %v9399_v22 = vld [vmem:[%s14362_s1 + $0x504] ss:$16 sps:$4 sm:$0xff]  }
  0x46   :  { %6554 = vmatprep.mubr.bf16.mxu1 %v11101_v23 }
  0x47   :  { %6484 = vmatpush1.bf16.msra.mxu0 %v9313_v24  ;;  %v9402_v24 = vld [vmem:[%s14362_s1 + $0x704] ss:$16 sps:$4 sm:$0xff]  }
  0x48   :  { %6525 = vmatpush1.bf16.msra.mxu1 %v9316_v25  ;;  %6485 = vmatprep.subr.bf16.mxu0 %v9321_v26  ;;  %v9397_v25 = vld [vmem:[%s14362_s1 + $0x500] ss:$16 sps:$4 sm:$0xff]   ;;  %v11280_v26 = vrot.slane %v11049_v6, %v10991_v49 }
  0x49   :  { %6526 = vmatprep.subr.bf16.mxu1 %v9324_v27  ;;  %v9400_v27 = vld [vmem:[%s14362_s1 + $0x700] ss:$16 sps:$4 sm:$0xff]  }
  0x4a   :  { %v11293_v6 = vcombine.high %v11280_v26, %v11280_v26 }
  0x4b   :  { %6486 = vmatpush1.bf16.msra.mxu0 %v9319_v28  ;;  %v9406_v28 = vld [vmem:[%s14362_s1 + $0x8e4] ss:$16 sps:$4 sm:$0xff]  }
  0x4c   :  { %6527 = vmatpush1.bf16.msra.mxu1 %v9322_v29  ;;  %6487 = vmatprep.subr.bf16.mxu0 %v9327_v30  ;;  %v9409_v29 = vld [vmem:[%s14362_s1 + $0xae4] ss:$16 sps:$4 sm:$0xff]   ;;  %v9404_v30 = vld [vmem:[%s14362_s1 + $0x8e0] ss:$16 sps:$4 sm:$0xff]  }
  0x4d   :  { %6528 = vmatprep.subr.bf16.mxu1 %v9330_v31  ;;  %v9407_v31 = vld [vmem:[%s14362_s1 + $0xae0] ss:$16 sps:$4 sm:$0xff]  }
  0x4f   :  { %6488 = vmatpush1.bf16.msra.mxu0 %v9325_v32  ;;  %v11304_v32 = vld [vmem:[%s14361_s0 + $0x8] sm:$0xff] }
  0x50   :  { %6529 = vmatpush1.bf16.msra.mxu1 %v9328_v33  ;;  %6489 = vmatprep.subr.bf16.mxu0 %v9333_v34  ;;  %v9412_v33 = vld [vmem:[%s14362_s1 + $0x8c4] ss:$16 sps:$4 sm:$0xff]  }
  0x51   :  { %6530 = vmatprep.subr.bf16.mxu1 %v9336_v35  ;;  %v9415_v34 = vld [vmem:[%s14362_s1 + $0xac4] ss:$16 sps:$4 sm:$0xff]   ;;  %v11314_v35 = vrot.slane %v11304_v32, %v10991_v49 }
  0x53   :  { %6490 = vmatpush1.bf16.msra.mxu0 %v9331_v36  ;;  %v1115_v36 = vcombine.high %v11314_v35, %v11314_v35 }
  0x54   :  { %6531 = vmatpush1.bf16.msra.mxu1 %v9334_v37  ;;  %6491 = vmatprep.subr.bf16.mxu0 %v9339_v38  ;;  %v9410_v37 = vld [vmem:[%s14362_s1 + $0x8c0] ss:$16 sps:$4 sm:$0xff]  }
  0x55   :  { %6532 = vmatprep.subr.bf16.mxu1 %v9342_v39  ;;  %v9413_v38 = vld [vmem:[%s14362_s1 + $0xac0] ss:$16 sps:$4 sm:$0xff]   ;;  %v9418_v39 = vld [vmem:[%s14362_s1 + $0x8a4] ss:$16 sps:$4 sm:$0xff]  }
  0x57   :  { %6492 = vmatpush1.bf16.msra.mxu0 %v9337_v40  ;;  %v9421_v40 = vld [vmem:[%s14362_s1 + $0xaa4] ss:$16 sps:$4 sm:$0xff]  }
  0x58   :  { %6533 = vmatpush1.bf16.msra.mxu1 %v9340_v41  ;;  %6493 = vmatprep.subr.bf16.mxu0 %v9345_v42  ;;  %v11333_v41 = vrot.slane %v1115_v36, %v10991_v49  ;;  %v9482_v36 = vld [vmem:[%s14362_s1 + $0x940] ss:$16 sps:$4 sm:$0xff]  }
  0x59   :  { %6534 = vmatprep.subr.bf16.mxu1 %v9348_v44  ;;  %v9416_v44 = vld [vmem:[%s14362_s1 + $0x8a0] ss:$16 sps:$4 sm:$0xff]  }
  0x5a   :  { %v11338_v42 = vcombine.high %v11333_v41, %v11333_v41 }
  0x5b   :  { %6494 = vmatpush1.bf16.msra.mxu0 %v9343_v45  ;;  %v9419_v45 = vld [vmem:[%s14362_s1 + $0xaa0] ss:$16 sps:$4 sm:$0xff]  }
  0x5c   :  { %6535 = vmatpush1.bf16.msra.mxu1 %v9346_v46  ;;  %6495 = vmatprep.subr.bf16.mxu0 %v9351_v47  ;;  %v9424_v46 = vld [vmem:[%s14362_s1 + $0x884] ss:$16 sps:$4 sm:$0xff]  }
  0x5d   :  { %6536 = vmatprep.subr.bf16.mxu1 %v9354_v48  ;;  %v9427_v47 = vld [vmem:[%s14362_s1 + $0xa84] ss:$16 sps:$4 sm:$0xff]   ;;  %v9422_v48 = vld [vmem:[%s14362_s1 + $0x880] ss:$16 sps:$4 sm:$0xff]  }
  0x5f   :  { %6496 = vmatpush1.bf16.msra.mxu0 %v9349_v50  ;;  %v9425_v50 = vld [vmem:[%s14362_s1 + $0xa80] ss:$16 sps:$4 sm:$0xff]  }
  0x60   :  { %6537 = vmatpush1.bf16.msra.mxu1 %v9352_v51  ;;  %6497 = vmatprep.subr.bf16.mxu0 %v9357_v52  ;;  %v9430_v51 = vld [vmem:[%s14362_s1 + $0x864] ss:$16 sps:$4 sm:$0xff]  }
  0x61   :  { %6538 = vmatprep.subr.bf16.mxu1 %v9360_v53  ;;  %v9433_v52 = vld [vmem:[%s14362_s1 + $0xa64] ss:$16 sps:$4 sm:$0xff]   ;;  %v9428_v53 = vld [vmem:[%s14362_s1 + $0x860] ss:$16 sps:$4 sm:$0xff]  }
  0x63   :  { %6498 = vmatpush2.bf16.msra.mxu0 %v9355_v54  ;;  %v9431_v54 = vld [vmem:[%s14362_s1 + $0xa60] ss:$16 sps:$4 sm:$0xff]  }
  0x64   :  { %6539 = vmatpush2.bf16.msra.mxu1 %v9358_v55  ;;  %6499 = vmatprep.subr.bf16.mxu0 %v9363_v56  ;;  %v9436_v55 = vld [vmem:[%s14362_s1 + $0x844] ss:$16 sps:$4 sm:$0xff]  }
  0x65   :  { %6540 = vmatprep.subr.bf16.mxu1 %v9366_v57  ;;  %v9439_v56 = vld [vmem:[%s14362_s1 + $0xa44] ss:$16 sps:$4 sm:$0xff]   ;;  %v9434_v57 = vld [vmem:[%s14362_s1 + $0x840] ss:$16 sps:$4 sm:$0xff]  }
  0x67   :  { %6500 = vmatpush2.bf16.msra.mxu0 %v9361_v58  ;;  %v9437_v58 = vld [vmem:[%s14362_s1 + $0xa40] ss:$16 sps:$4 sm:$0xff]  }
  0x68   :  { %6541 = vmatpush2.bf16.msra.mxu1 %v9364_v59  ;;  %6501 = vmatprep.subr.bf16.mxu0 %v9369_v61  ;;  %v9442_v59 = vld [vmem:[%s14362_s1 + $0x824] ss:$16 sps:$4 sm:$0xff]  }
  0x69   :  { %6542 = vmatprep.subr.bf16.mxu1 %v9372_v62  ;;  %v9445_v61 = vld [vmem:[%s14362_s1 + $0xa24] ss:$16 sps:$4 sm:$0xff]   ;;  %v9440_v62 = vld [vmem:[%s14362_s1 + $0x820] ss:$16 sps:$4 sm:$0xff]  }
  0x6b   :  { %6502 = vmatpush2.bf16.msra.mxu0 %v9367_v63  ;;  %v9443_v63 = vld [vmem:[%s14362_s1 + $0xa20] ss:$16 sps:$4 sm:$0xff]  }
  0x6c   :  { %6543 = vmatpush2.bf16.msra.mxu1 %v9370_v1  ;;  %6503 = vmatprep.subr.bf16.mxu0 %v9375_v2  ;;  %v9448_v1 = vld [vmem:[%s14362_s1 + $0x804] ss:$16 sps:$4 sm:$0xff]  }
  0x6d   :  { %6544 = vmatprep.subr.bf16.mxu1 %v9378_v3  ;;  %v9451_v2 = vld [vmem:[%s14362_s1 + $0xa04] ss:$16 sps:$4 sm:$0xff]   ;;  %v9446_v3 = vld [vmem:[%s14362_s1 + $0x800] ss:$16 sps:$4 sm:$0xff]  }
  0x6f   :  { %6504 = vmatpush2.bf16.msra.mxu0 %v9373_v4  ;;  %v9449_v4 = vld [vmem:[%s14362_s1 + $0xa00] ss:$16 sps:$4 sm:$0xff]  }
  0x70   :  { %6545 = vmatpush2.bf16.msra.mxu1 %v9376_v5  ;;  %6505 = vmatprep.subr.bf16.mxu0 %v9381_v7  ;;  %v9454_v5 = vld [vmem:[%s14362_s1 + $0x9e4] ss:$16 sps:$4 sm:$0xff]  }
  0x71   :  { %6546 = vmatprep.subr.bf16.mxu1 %v9384_v8  ;;  %v9457_v7 = vld [vmem:[%s14362_s1 + $0xbe4] ss:$16 sps:$4 sm:$0xff]   ;;  %v9452_v8 = vld [vmem:[%s14362_s1 + $0x9e0] ss:$16 sps:$4 sm:$0xff]  }
  0x73   :  { %6506 = vmatpush2.bf16.msra.mxu0 %v9379_v9  ;;  %v9455_v9 = vld [vmem:[%s14362_s1 + $0xbe0] ss:$16 sps:$4 sm:$0xff]  }
  0x74   :  { %6547 = vmatpush2.bf16.msra.mxu1 %v9382_v10  ;;  %6507 = vmatprep.subr.bf16.mxu0 %v9387_v11  ;;  %v9460_v10 = vld [vmem:[%s14362_s1 + $0x9c4] ss:$16 sps:$4 sm:$0xff]  }
  0x75   :  { %6548 = vmatprep.subr.bf16.mxu1 %v9390_v12  ;;  %v9463_v11 = vld [vmem:[%s14362_s1 + $0xbc4] ss:$16 sps:$4 sm:$0xff]   ;;  %v9458_v12 = vld [vmem:[%s14362_s1 + $0x9c0] ss:$16 sps:$4 sm:$0xff]  }
  0x77   :  { %6508 = vmatpush2.bf16.msra.mxu0 %v9385_v14  ;;  %v9461_v14 = vld [vmem:[%s14362_s1 + $0xbc0] ss:$16 sps:$4 sm:$0xff]  }
  0x78   :  { %6549 = vmatpush2.bf16.msra.mxu1 %v9388_v15  ;;  %6509 = vmatprep.subr.bf16.mxu0 %v9393_v16  ;;  %v9466_v15 = vld [vmem:[%s14362_s1 + $0x9a4] ss:$16 sps:$4 sm:$0xff]  }
  0x79   :  { %6550 = vmatprep.subr.bf16.mxu1 %v9396_v19  ;;  %v9469_v16 = vld [vmem:[%s14362_s1 + $0xba4] ss:$16 sps:$4 sm:$0xff]   ;;  %v9464_v19 = vld [vmem:[%s14362_s1 + $0x9a0] ss:$16 sps:$4 sm:$0xff]  }
  0x7b   :  { %6510 = vmatpush2.bf16.msra.mxu0 %v9391_v20  ;;  %v9467_v20 = vld [vmem:[%s14362_s1 + $0xba0] ss:$16 sps:$4 sm:$0xff]  }
  0x7c   :  { %6551 = vmatpush2.bf16.msra.mxu1 %v9394_v21  ;;  %6511 = vmatprep.subr.bf16.mxu0 %v9399_v22  ;;  %v9472_v21 = vld [vmem:[%s14362_s1 + $0x984] ss:$16 sps:$4 sm:$0xff]  }
  0x7d   :  { %6552 = vmatprep.subr.bf16.mxu1 %v9402_v24  ;;  %v9475_v22 = vld [vmem:[%s14362_s1 + $0xb84] ss:$16 sps:$4 sm:$0xff]   ;;  %v9470_v24 = vld [vmem:[%s14362_s1 + $0x980] ss:$16 sps:$4 sm:$0xff]  }
  0x7f   :  { %6512 = vmatpush2.bf16.msra.mxu0 %v9397_v25  ;;  %v9473_v25 = vld [vmem:[%s14362_s1 + $0xb80] ss:$16 sps:$4 sm:$0xff]  }
  0x80   :  { %6553 = vmatpush2.bf16.msra.mxu1 %v9400_v27  ;;  %6563 = vmatprep.subr.bf16.mxu0 %v9406_v28  ;;  %v9478_v27 = vld [vmem:[%s14362_s1 + $0x964] ss:$16 sps:$4 sm:$0xff]  }
  0x81   :  { %6604 = vmatprep.subr.bf16.mxu1 %v9409_v29  ;;  %v9481_v28 = vld [vmem:[%s14362_s1 + $0xb64] ss:$16 sps:$4 sm:$0xff]   ;;  %v9476_v29 = vld [vmem:[%s14362_s1 + $0x960] ss:$16 sps:$4 sm:$0xff]  }
  0x82   :  { %6514 = vmatmul.mubr.bf16.vlgmr.msra.gmra.mxu0 %v11280_v26 }
  0x83   :  { %6555 = vmatmul.mubr.bf16.vlgmr.msra.gmra.mxu1 %v11293_v6  ;;  %6564 = vmatpush1.bf16.msra.mxu0 %v9404_v30  ;;  %v9479_v30 = vld [vmem:[%s14362_s1 + $0xb60] ss:$16 sps:$4 sm:$0xff]  }
  0x84   :  { %6605 = vmatpush1.bf16.msra.mxu1 %v9407_v31  ;;  %6565 = vmatprep.subr.bf16.mxu0 %v9412_v33  ;;  %v9484_v31 = vld [vmem:[%s14362_s1 + $0x944] ss:$16 sps:$4 sm:$0xff]  }
  0x85   :  { %6606 = vmatprep.subr.bf16.mxu1 %v9415_v34  ;;  %6595 = vmatprep.mubr.bf16.mxu0 %v11333_v41  ;;  %v9487_v33 = vld [vmem:[%s14362_s1 + $0xb44] ss:$16 sps:$4 sm:$0xff]   ;;  %v1100_v34 = vcombine.high %v11304_v32, %v11304_v32 }
  0x86   :  { %6636 = vmatprep.mubr.bf16.mxu1 %v11338_v42  ;;  %v9493_v32 = vld [vmem:[%s14362_s1 + $0xb24] ss:$16 sps:$4 sm:$0xff]  }
  0x87   :  { %6566 = vmatpush1.bf16.msra.mxu0 %v9410_v37  ;;  %v9485_v37 = vld [vmem:[%s14362_s1 + $0xb40] ss:$16 sps:$4 sm:$0xff]  }
  0x88   :  { %6607 = vmatpush1.bf16.msra.mxu1 %v9413_v38  ;;  %6567 = vmatprep.subr.bf16.mxu0 %v9418_v39  ;;  %v9490_v38 = vld [vmem:[%s14362_s1 + $0x924] ss:$16 sps:$4 sm:$0xff]   ;;  %v11488_v39 = vrot.slane %v1100_v34, %v10991_v49  ;;  %v9551_v34 = vld [vmem:[%s14362_s1 + $0xfe0] ss:$16 sps:$4 sm:$0xff]  }
  0x89   :  { %6608 = vmatprep.subr.bf16.mxu1 %v9421_v40  ;;  %v9488_v40 = vld [vmem:[%s14362_s1 + $0x920] ss:$16 sps:$4 sm:$0xff]  }
  0x8b   :  { %6568 = vmatpush1.bf16.msra.mxu0 %v9416_v44  ;;  %v9491_v44 = vld [vmem:[%s14362_s1 + $0xb20] ss:$16 sps:$4 sm:$0xff]  }
  0x8c   :  { %6609 = vmatpush1.bf16.msra.mxu1 %v9419_v45  ;;  %6569 = vmatprep.subr.bf16.mxu0 %v9424_v46  ;;  %v9496_v45 = vld [vmem:[%s14362_s1 + $0x904] ss:$16 sps:$4 sm:$0xff]  }
  0x8d   :  { %6610 = vmatprep.subr.bf16.mxu1 %v9427_v47  ;;  %v9499_v46 = vld [vmem:[%s14362_s1 + $0xb04] ss:$16 sps:$4 sm:$0xff]   ;;  %v1116_v47 = vcombine.high %v11488_v39, %v11488_v39 }
  0x8f   :  { %6570 = vmatpush1.bf16.msra.mxu0 %v9422_v48  ;;  %v11506_v48 = vrot.slane %v11314_v35, %v10991_v49  ;;  %v9505_v35 = vld [vmem:[%s14362_s1 + $0xee4] ss:$16 sps:$4 sm:$0xff]  }
  0x90   :  { %6611 = vmatpush1.bf16.msra.mxu1 %v9425_v50  ;;  %6571 = vmatprep.subr.bf16.mxu0 %v9430_v51  ;;  %v9494_v50 = vld [vmem:[%s14362_s1 + $0x900] ss:$16 sps:$4 sm:$0xff]  }
  0x91   :  { %6612 = vmatprep.subr.bf16.mxu1 %v9433_v52  ;;  %v9497_v51 = vld [vmem:[%s14362_s1 + $0xb00] ss:$16 sps:$4 sm:$0xff]   ;;  %v9502_v52 = vld [vmem:[%s14362_s1 + $0xce4] ss:$16 sps:$4 sm:$0xff]  }
  0x93   :  { %6572 = vmatpush1.bf16.msra.mxu0 %v9428_v53  ;;  %v11521_v53 = vrot.slane %v1116_v47, %v10991_v49  ;;  %v9568_v47 = vld [vmem:[%s14362_s1 + $0xd84] ss:$16 sps:$4 sm:$0xff]  }
  0x94   :  { %6613 = vmatpush1.bf16.msra.mxu1 %v9431_v54  ;;  %6573 = vmatprep.subr.bf16.mxu0 %v9436_v55  ;;  %v11525_v54 = vcombine.high %v11506_v48, %v11506_v48  ;;  %v9500_v55 = vld [vmem:[%s14362_s1 + $0xce0] ss:$16 sps:$4 sm:$0xff]  }
  0x95   :  { %6614 = vmatprep.subr.bf16.mxu1 %v9439_v56  ;;  %v9503_v56 = vld [vmem:[%s14362_s1 + $0xee0] ss:$16 sps:$4 sm:$0xff]  }
  0x97   :  { %6574 = vmatpush1.bf16.msra.mxu0 %v9434_v57  ;;  %v9508_v57 = vld [vmem:[%s14362_s1 + $0xcc4] ss:$16 sps:$4 sm:$0xff]  }
  0x98   :  { %6615 = vmatpush1.bf16.msra.mxu1 %v9437_v58  ;;  %6575 = vmatprep.subr.bf16.mxu0 %v9442_v59  ;;  %v9511_v58 = vld [vmem:[%s14362_s1 + $0xec4] ss:$16 sps:$4 sm:$0xff]   ;;  %v11541_v59 = vcombine.high %v11521_v53, %v11521_v53 }
  0x99   :  { %6616 = vmatprep.subr.bf16.mxu1 %v9445_v61  ;;  %v9506_v61 = vld [vmem:[%s14362_s1 + $0xcc0] ss:$16 sps:$4 sm:$0xff]  }
  0x9b   :  { %6576 = vmatpush1.bf16.msra.mxu0 %v9440_v62  ;;  %v9509_v62 = vld [vmem:[%s14362_s1 + $0xec0] ss:$16 sps:$4 sm:$0xff]  }
  0x9c   :  { %6617 = vmatpush1.bf16.msra.mxu1 %v9443_v63  ;;  %6577 = vmatprep.subr.bf16.mxu0 %v9448_v1  ;;  %v9514_v63 = vld [vmem:[%s14362_s1 + $0xca4] ss:$16 sps:$4 sm:$0xff]  }
  0x9d   :  { %6618 = vmatprep.subr.bf16.mxu1 %v9451_v2  ;;  %v9517_v1 = vld [vmem:[%s14362_s1 + $0xea4] ss:$16 sps:$4 sm:$0xff]   ;;  %v9512_v2 = vld [vmem:[%s14362_s1 + $0xca0] ss:$16 sps:$4 sm:$0xff]  }
  0x9f   :  { %6578 = vmatpush1.bf16.msra.mxu0 %v9446_v3  ;;  %v9515_v3 = vld [vmem:[%s14362_s1 + $0xea0] ss:$16 sps:$4 sm:$0xff]  }
  0xa0   :  { %6619 = vmatpush1.bf16.msra.mxu1 %v9449_v4  ;;  %6579 = vmatprep.subr.bf16.mxu0 %v9454_v5  ;;  %v9520_v4 = vld [vmem:[%s14362_s1 + $0xc84] ss:$16 sps:$4 sm:$0xff]  }
  0xa1   :  { %6620 = vmatprep.subr.bf16.mxu1 %v9457_v7  ;;  %v9523_v5 = vld [vmem:[%s14362_s1 + $0xe84] ss:$16 sps:$4 sm:$0xff]   ;;  %v9518_v7 = vld [vmem:[%s14362_s1 + $0xc80] ss:$16 sps:$4 sm:$0xff]  }
  0xa3   :  { %6580 = vmatpush2.bf16.msra.mxu0 %v9452_v8  ;;  %v9521_v8 = vld [vmem:[%s14362_s1 + $0xe80] ss:$16 sps:$4 sm:$0xff]  }
  0xa4   :  { %6621 = vmatpush2.bf16.msra.mxu1 %v9455_v9  ;;  %6581 = vmatprep.subr.bf16.mxu0 %v9460_v10  ;;  %v9526_v9 = vld [vmem:[%s14362_s1 + $0xc64] ss:$16 sps:$4 sm:$0xff]  }
  0xa5   :  { %6622 = vmatprep.subr.bf16.mxu1 %v9463_v11  ;;  %v9529_v10 = vld [vmem:[%s14362_s1 + $0xe64] ss:$16 sps:$4 sm:$0xff]   ;;  %v9524_v11 = vld [vmem:[%s14362_s1 + $0xc60] ss:$16 sps:$4 sm:$0xff]  }
  0xa7   :  { %6582 = vmatpush2.bf16.msra.mxu0 %v9458_v12  ;;  %v9527_v12 = vld [vmem:[%s14362_s1 + $0xe60] ss:$16 sps:$4 sm:$0xff]  }
  0xa8   :  { %6623 = vmatpush2.bf16.msra.mxu1 %v9461_v14  ;;  %6583 = vmatprep.subr.bf16.mxu0 %v9466_v15  ;;  %v9532_v14 = vld [vmem:[%s14362_s1 + $0xc44] ss:$16 sps:$4 sm:$0xff]  }
  0xa9   :  { %6624 = vmatprep.subr.bf16.mxu1 %v9469_v16  ;;  %v9535_v15 = vld [vmem:[%s14362_s1 + $0xe44] ss:$16 sps:$4 sm:$0xff]   ;;  %v9530_v16 = vld [vmem:[%s14362_s1 + $0xc40] ss:$16 sps:$4 sm:$0xff]  }
  0xab   :  { %6584 = vmatpush2.bf16.msra.mxu0 %v9464_v19  ;;  %v9533_v19 = vld [vmem:[%s14362_s1 + $0xe40] ss:$16 sps:$4 sm:$0xff]  }
  0xac   :  { %6625 = vmatpush2.bf16.msra.mxu1 %v9467_v20  ;;  %6585 = vmatprep.subr.bf16.mxu0 %v9472_v21  ;;  %v9538_v20 = vld [vmem:[%s14362_s1 + $0xc24] ss:$16 sps:$4 sm:$0xff]  }
  0xad   :  { %6626 = vmatprep.subr.bf16.mxu1 %v9475_v22  ;;  %v9541_v21 = vld [vmem:[%s14362_s1 + $0xe24] ss:$16 sps:$4 sm:$0xff]   ;;  %v9536_v22 = vld [vmem:[%s14362_s1 + $0xc20] ss:$16 sps:$4 sm:$0xff]  }
  0xaf   :  { %6586 = vmatpush2.bf16.msra.mxu0 %v9470_v24  ;;  %v9539_v24 = vld [vmem:[%s14362_s1 + $0xe20] ss:$16 sps:$4 sm:$0xff]  }
  0xb0   :  { %6627 = vmatpush2.bf16.msra.mxu1 %v9473_v25  ;;  %6587 = vmatprep.subr.bf16.mxu0 %v9478_v27  ;;  %v9544_v25 = vld [vmem:[%s14362_s1 + $0xc04] ss:$16 sps:$4 sm:$0xff]  }
  0xb1   :  { %6628 = vmatprep.subr.bf16.mxu1 %v9481_v28  ;;  %v9547_v27 = vld [vmem:[%s14362_s1 + $0xe04] ss:$16 sps:$4 sm:$0xff]   ;;  %v9542_v28 = vld [vmem:[%s14362_s1 + $0xc00] ss:$16 sps:$4 sm:$0xff]  }
  0xb3   :  { %6588 = vmatpush2.bf16.msra.mxu0 %v9476_v29  ;;  %v9545_v29 = vld [vmem:[%s14362_s1 + $0xe00] ss:$16 sps:$4 sm:$0xff]  }
  0xb4   :  { %6629 = vmatpush2.bf16.msra.mxu1 %v9479_v30  ;;  %6589 = vmatprep.subr.bf16.mxu0 %v9484_v31  ;;  %v9550_v30 = vld [vmem:[%s14362_s1 + $0xde4] ss:$16 sps:$4 sm:$0xff]  }
  0xb5   :  { %6630 = vmatprep.subr.bf16.mxu1 %v9487_v33  ;;  %v9553_v31 = vld [vmem:[%s14362_s1 + $0xfe4] ss:$16 sps:$4 sm:$0xff]   ;;  %v9548_v33 = vld [vmem:[%s14362_s1 + $0xde0] ss:$16 sps:$4 sm:$0xff]  }
  0xb7   :  { %6590 = vmatpush2.bf16.msra.mxu0 %v9482_v36  ;;  %v9556_v36 = vld [vmem:[%s14362_s1 + $0xdc4] ss:$16 sps:$4 sm:$0xff]  }
  0xb8   :  { %6631 = vmatpush2.bf16.msra.mxu1 %v9485_v37  ;;  %6591 = vmatprep.subr.bf16.mxu0 %v9490_v38  ;;  %v9559_v37 = vld [vmem:[%s14362_s1 + $0xfc4] ss:$16 sps:$4 sm:$0xff]   ;;  %v9554_v38 = vld [vmem:[%s14362_s1 + $0xdc0] ss:$16 sps:$4 sm:$0xff]  }
  0xb9   :  { %6632 = vmatprep.subr.bf16.mxu1 %v9493_v32  ;;  %v9557_v32 = vld [vmem:[%s14362_s1 + $0xfc0] ss:$16 sps:$4 sm:$0xff]  }
  0xbb   :  { %6592 = vmatpush2.bf16.msra.mxu0 %v9488_v40  ;;  %v9562_v40 = vld [vmem:[%s14362_s1 + $0xda4] ss:$16 sps:$4 sm:$0xff]  }
  0xbc   :  { %6633 = vmatpush2.bf16.msra.mxu1 %v9491_v44  ;;  %6593 = vmatprep.subr.bf16.mxu0 %v9496_v45  ;;  %v9565_v44 = vld [vmem:[%s14362_s1 + $0xfa4] ss:$16 sps:$4 sm:$0xff]   ;;  %v9560_v45 = vld [vmem:[%s14362_s1 + $0xda0] ss:$16 sps:$4 sm:$0xff]  }
  0xbd   :  { %6634 = vmatprep.subr.bf16.mxu1 %v9499_v46  ;;  %v9563_v46 = vld [vmem:[%s14362_s1 + $0xfa0] ss:$16 sps:$4 sm:$0xff]  }
  0xbf   :  { %6594 = vmatpush2.bf16.msra.mxu0 %v9494_v50  ;;  %v9571_v50 = vld [vmem:[%s14362_s1 + $0xf84] ss:$16 sps:$4 sm:$0xff]  }
  0xc0   :  { %6635 = vmatpush2.bf16.msra.mxu1 %v9497_v51  ;;  %6645 = vmatprep.subr.bf16.mxu0 %v9502_v52  ;;  %v9566_v51 = vld [vmem:[%s14362_s1 + $0xd80] ss:$16 sps:$4 sm:$0xff]  }
  0xc1   :  { %6686 = vmatprep.subr.bf16.mxu1 %v9505_v35  ;;  %v9569_v52 = vld [vmem:[%s14362_s1 + $0xf80] ss:$16 sps:$4 sm:$0xff]   ;;  %v9574_v35 = vld [vmem:[%s14362_s1 + $0xd64] ss:$16 sps:$4 sm:$0xff]  }
  0xc2   :  { %6596 = vmatmul.mubr.bf16.vlgmr.msra.gmra.mxu0 %v11506_v48 }
  0xc3   :  { %6637 = vmatmul.mubr.bf16.vlgmr.msra.gmra.mxu1 %v11525_v54  ;;  %6646 = vmatpush1.bf16.msra.mxu0 %v9500_v55  ;;  %v9577_v55 = vld [vmem:[%s14362_s1 + $0xf64] ss:$16 sps:$4 sm:$0xff]  }
  0xc4   :  { %6687 = vmatpush1.bf16.msra.mxu1 %v9503_v56  ;;  %6647 = vmatprep.subr.bf16.mxu0 %v9508_v57  ;;  %v9572_v56 = vld [vmem:[%s14362_s1 + $0xd60] ss:$16 sps:$4 sm:$0xff]  }
  0xc5   :  { %6688 = vmatprep.subr.bf16.mxu1 %v9511_v58  ;;  %6677 = vmatprep.mubr.bf16.mxu0 %v11521_v53  ;;  %v9575_v57 = vld [vmem:[%s14362_s1 + $0xf60] ss:$16 sps:$4 sm:$0xff]   ;;  %v9580_v58 = vld [vmem:[%s14362_s1 + $0xd44] ss:$16 sps:$4 sm:$0xff]  }
  0xc6   :  { %6718 = vmatprep.mubr.bf16.mxu1 %v11541_v59 }
  0xc7   :  { %6648 = vmatpush1.bf16.msra.mxu0 %v9506_v61  ;;  %v9583_v61 = vld [vmem:[%s14362_s1 + $0xf44] ss:$16 sps:$4 sm:$0xff]  }
  0xc8   :  { %6689 = vmatpush1.bf16.msra.mxu1 %v9509_v62  ;;  %6649 = vmatprep.subr.bf16.mxu0 %v9514_v63  ;;  %v9578_v62 = vld [vmem:[%s14362_s1 + $0xd40] ss:$16 sps:$4 sm:$0xff]  }
  0xc9   :  { %6690 = vmatprep.subr.bf16.mxu1 %v9517_v1  ;;  %v11697_v63 = vld [vmem:[%s14361_s0 + $0x10] sm:$0xff] }
  0xca   :  { %v9581_v1 = vld [vmem:[%s14362_s1 + $0xf40] ss:$16 sps:$4 sm:$0xff]  }
  0xcb   :  { %6650 = vmatpush1.bf16.msra.mxu0 %v9512_v2  ;;  %v9586_v2 = vld [vmem:[%s14362_s1 + $0xd24] ss:$16 sps:$4 sm:$0xff]  }
  0xcc   :  { %6691 = vmatpush1.bf16.msra.mxu1 %v9515_v3  ;;  %6651 = vmatprep.subr.bf16.mxu0 %v9520_v4  ;;  %v9589_v3 = vld [vmem:[%s14362_s1 + $0xf24] ss:$16 sps:$4 sm:$0xff]   ;;  %v11710_v4 = vrot.slane %v11697_v63, %v10991_v49 }
  0xcd   :  { %6692 = vmatprep.subr.bf16.mxu1 %v9523_v5  ;;  %v9584_v5 = vld [vmem:[%s14362_s1 + $0xd20] ss:$16 sps:$4 sm:$0xff]  }
  0xcf   :  { %6652 = vmatpush1.bf16.msra.mxu0 %v9518_v7  ;;  %v9587_v7 = vld [vmem:[%s14362_s1 + $0xf20] ss:$16 sps:$4 sm:$0xff]  }
  0xd0   :  { %6693 = vmatpush1.bf16.msra.mxu1 %v9521_v8  ;;  %6653 = vmatprep.subr.bf16.mxu0 %v9526_v9  ;;  %v9592_v8 = vld [vmem:[%s14362_s1 + $0xd04] ss:$16 sps:$4 sm:$0xff]  }
  0xd1   :  { %6694 = vmatprep.subr.bf16.mxu1 %v9529_v10  ;;  %v9595_v9 = vld [vmem:[%s14362_s1 + $0xf04] ss:$16 sps:$4 sm:$0xff]   ;;  %v1164_v10 = vcombine.high %v11710_v4, %v11710_v4 }
  0xd3   :  { %6654 = vmatpush1.bf16.msra.mxu0 %v9524_v11  ;;  %v9590_v11 = vld [vmem:[%s14362_s1 + $0xd00] ss:$16 sps:$4 sm:$0xff]  }
  0xd4   :  { %6695 = vmatpush1.bf16.msra.mxu1 %v9527_v12  ;;  %6655 = vmatprep.subr.bf16.mxu0 %v9532_v14  ;;  %v11731_v12 = vrot.slane %v11488_v39, %v10991_v49  ;;  %v9593_v14 = vld [vmem:[%s14362_s1 + $0xf00] ss:$16 sps:$4 sm:$0xff]  }
  0xd5   :  { %6696 = vmatprep.subr.bf16.mxu1 %v9535_v15  ;;  %v9599_v15 = vld [vmem:[%s14362_s1 + $0x10e4] ss:$16 sps:$4 sm:$0xff]  }
  0xd6   :  { %v11747_v39 = vcombine.high %v11731_v12, %v11731_v12 }
  0xd7   :  { %6656 = vmatpush1.bf16.msra.mxu0 %v9530_v16  ;;  %v9602_v16 = vld [vmem:[%s14362_s1 + $0x12e4] ss:$16 sps:$4 sm:$0xff]  }
  0xd8   :  { %6697 = vmatpush1.bf16.msra.mxu1 %v9533_v19  ;;  %6657 = vmatprep.subr.bf16.mxu0 %v9538_v20  ;;  %v11743_v19 = vrot.slane %v1164_v10, %v10991_v49  ;;  %v9597_v20 = vld [vmem:[%s14362_s1 + $0x10e0] ss:$16 sps:$4 sm:$0xff]   ;;  %v9644_v10 = vld [vmem:[%s14362_s1 + $0x1204] ss:$16 sps:$4 sm:$0xff]  }
  0xd9   :  { %6698 = vmatprep.subr.bf16.mxu1 %v9541_v21  ;;  %v9600_v21 = vld [vmem:[%s14362_s1 + $0x12e0] ss:$16 sps:$4 sm:$0xff]  }
  0xdb   :  { %6658 = vmatpush1.bf16.msra.mxu0 %v9536_v22  ;;  %v9605_v22 = vld [vmem:[%s14362_s1 + $0x10c4] ss:$16 sps:$4 sm:$0xff]  }
  0xdc   :  { %6699 = vmatpush1.bf16.msra.mxu1 %v9539_v24  ;;  %6659 = vmatprep.subr.bf16.mxu0 %v9544_v25  ;;  %v9608_v24 = vld [vmem:[%s14362_s1 + $0x12c4] ss:$16 sps:$4 sm:$0xff]   ;;  %v11763_v25 = vcombine.high %v11743_v19, %v11743_v19 }
  0xdd   :  { %6700 = vmatprep.subr.bf16.mxu1 %v9547_v27 }
  0xdf   :  { %6660 = vmatpush1.bf16.msra.mxu0 %v9542_v28 }
  0xe0   :  { %6701 = vmatpush1.bf16.msra.mxu1 %v9545_v29  ;;  %6661 = vmatprep.subr.bf16.mxu0 %v9550_v30  ;;  %v9603_v29 = vld [vmem:[%s14362_s1 + $0x10c0] ss:$16 sps:$4 sm:$0xff]  }
  0xe1   :  { %6702 = vmatprep.subr.bf16.mxu1 %v9553_v31  ;;  %v9606_v30 = vld [vmem:[%s14362_s1 + $0x12c0] ss:$16 sps:$4 sm:$0xff]  }
  0xe3   :  { %6662 = vmatpush2.bf16.msra.mxu0 %v9548_v33 }
  0xe4   :  { %6703 = vmatpush2.bf16.msra.mxu1 %v9551_v34  ;;  %6663 = vmatprep.subr.bf16.mxu0 %v9556_v36  ;;  %v9611_v36 = vld [vmem:[%s14362_s1 + $0x10a4] ss:$16 sps:$4 sm:$0xff]  }
  0xe5   :  { %6704 = vmatprep.subr.bf16.mxu1 %v9559_v37  ;;  %v9614_v37 = vld [vmem:[%s14362_s1 + $0x12a4] ss:$16 sps:$4 sm:$0xff]  }
  0xe7   :  { %6664 = vmatpush2.bf16.msra.mxu0 %v9554_v38 }
  0xe8   :  { %6705 = vmatpush2.bf16.msra.mxu1 %v9557_v32  ;;  %6665 = vmatprep.subr.bf16.mxu0 %v9562_v40  ;;  %v9609_v32 = vld [vmem:[%s14362_s1 + $0x10a0] ss:$16 sps:$4 sm:$0xff]  }
  0xe9   :  { %6706 = vmatprep.subr.bf16.mxu1 %v9565_v44  ;;  %v9612_v40 = vld [vmem:[%s14362_s1 + $0x12a0] ss:$16 sps:$4 sm:$0xff]  }
  0xeb   :  { %6666 = vmatpush2.bf16.msra.mxu0 %v9560_v45 }
  0xec   :  { %6707 = vmatpush2.bf16.msra.mxu1 %v9563_v46  ;;  %6667 = vmatprep.subr.bf16.mxu0 %v9568_v47 }
  0xed   :  { %6708 = vmatprep.subr.bf16.mxu1 %v9571_v50  ;;  %v9617_v50 = vld [vmem:[%s14362_s1 + $0x1084] ss:$16 sps:$4 sm:$0xff]  }
  0xef   :  { %6668 = vmatpush2.bf16.msra.mxu0 %v9566_v51  ;;  %v9620_v51 = vld [vmem:[%s14362_s1 + $0x1284] ss:$16 sps:$4 sm:$0xff]  }
  0xf0   :  { %6709 = vmatpush2.bf16.msra.mxu1 %v9569_v52  ;;  %6669 = vmatprep.subr.bf16.mxu0 %v9574_v35  ;;  %v9615_v52 = vld [vmem:[%s14362_s1 + $0x1080] ss:$16 sps:$4 sm:$0xff]  }
  0xf1   :  { %6710 = vmatprep.subr.bf16.mxu1 %v9577_v55  ;;  %v9618_v35 = vld [vmem:[%s14362_s1 + $0x1280] ss:$16 sps:$4 sm:$0xff]   ;;  %v9623_v55 = vld [vmem:[%s14362_s1 + $0x1064] ss:$16 sps:$4 sm:$0xff]  }
  0xf3   :  { %6670 = vmatpush2.bf16.msra.mxu0 %v9572_v56  ;;  %v9626_v56 = vld [vmem:[%s14362_s1 + $0x1264] ss:$16 sps:$4 sm:$0xff]  }
  0xf4   :  { %6711 = vmatpush2.bf16.msra.mxu1 %v9575_v57  ;;  %6671 = vmatprep.subr.bf16.mxu0 %v9580_v58  ;;  %v9621_v57 = vld [vmem:[%s14362_s1 + $0x1060] ss:$16 sps:$4 sm:$0xff]  }
  0xf5   :  { %6712 = vmatprep.subr.bf16.mxu1 %v9583_v61  ;;  %v9624_v58 = vld [vmem:[%s14362_s1 + $0x1260] ss:$16 sps:$4 sm:$0xff]   ;;  %v9629_v61 = vld [vmem:[%s14362_s1 + $0x1044] ss:$16 sps:$4 sm:$0xff]  }
  0xf7   :  { %6672 = vmatpush2.bf16.msra.mxu0 %v9578_v62  ;;  %v9632_v62 = vld [vmem:[%s14362_s1 + $0x1244] ss:$16 sps:$4 sm:$0xff]  }
  0xf8   :  { %6713 = vmatpush2.bf16.msra.mxu1 %v9581_v1  ;;  %6673 = vmatprep.subr.bf16.mxu0 %v9586_v2  ;;  %v9627_v1 = vld [vmem:[%s14362_s1 + $0x1040] ss:$16 sps:$4 sm:$0xff]  }
  0xf9   :  { %6714 = vmatprep.subr.bf16.mxu1 %v9589_v3  ;;  %v9630_v2 = vld [vmem:[%s14362_s1 + $0x1240] ss:$16 sps:$4 sm:$0xff]   ;;  %v9635_v3 = vld [vmem:[%s14362_s1 + $0x1024] ss:$16 sps:$4 sm:$0xff]  }
  0xfb   :  { %6674 = vmatpush2.bf16.msra.mxu0 %v9584_v5  ;;  %v9638_v5 = vld [vmem:[%s14362_s1 + $0x1224] ss:$16 sps:$4 sm:$0xff]  }
  0xfc   :  { %6715 = vmatpush2.bf16.msra.mxu1 %v9587_v7  ;;  %6675 = vmatprep.subr.bf16.mxu0 %v9592_v8  ;;  %v9633_v7 = vld [vmem:[%s14362_s1 + $0x1020] ss:$16 sps:$4 sm:$0xff]  }
  0xfd   :  { %6716 = vmatprep.subr.bf16.mxu1 %v9595_v9  ;;  %v9636_v8 = vld [vmem:[%s14362_s1 + $0x1220] ss:$16 sps:$4 sm:$0xff]   ;;  %v9641_v9 = vld [vmem:[%s14362_s1 + $0x1004] ss:$16 sps:$4 sm:$0xff]  }
  0xff   :  { %6676 = vmatpush2.bf16.msra.mxu0 %v9590_v11  ;;  %v9639_v11 = vld [vmem:[%s14362_s1 + $0x1000] ss:$16 sps:$4 sm:$0xff]  }
 0x100   :  { %6717 = vmatpush2.bf16.msra.mxu1 %v9593_v14  ;;  %6727 = vmatprep.subr.bf16.mxu0 %v9599_v15  ;;  %v9642_v14 = vld [vmem:[%s14362_s1 + $0x1200] ss:$16 sps:$4 sm:$0xff]   ;;  %v9647_v15 = vld [vmem:[%s14362_s1 + $0x11e4] ss:$16 sps:$4 sm:$0xff]  }
 0x101   :  { %6768 = vmatprep.subr.bf16.mxu1 %v9602_v16  ;;  %v9650_v16 = vld [vmem:[%s14362_s1 + $0x13e4] ss:$16 sps:$4 sm:$0xff]  }
 0x102   :  { %v6433_v27 = vpop.f32.mrf.mxu0  ;;  %6678 = vmatmul.mubr.bf16.vlgmr.msra.gmra.mxu0 %v11731_v12 }
 0x103   :  { %v6474_v28 = vpop.f32.mrf.mxu1  ;;  %6719 = vmatmul.mubr.bf16.vlgmr.msra.gmra.mxu1 %v11747_v39  ;;  %6728 = vmatpush1.bf16.msra.mxu0 %v9597_v20  ;;  %v9645_v20 = vld [vmem:[%s14362_s1 + $0x11e0] ss:$16 sps:$4 sm:$0xff]  }
 0x104   :  { %v11773_v31 = vadd.f32 %v6474_v28, %v6433_v27  ;;  %6769 = vmatpush1.bf16.msra.mxu1 %v9600_v21  ;;  %v6435_v33 = vpop.f32.mrf.mxu0  ;;  %6729 = vmatprep.subr.bf16.mxu0 %v9605_v22  ;;  %v9648_v21 = vld [vmem:[%s14362_s1 + $0x13e0] ss:$16 sps:$4 sm:$0xff]   ;;  %v9653_v22 = vld [vmem:[%s14362_s1 + $0x11c4] ss:$16 sps:$4 sm:$0xff]  }
 0x105   :  { %v6476_v34 = vpop.f32.mrf.mxu1  ;;  %6770 = vmatprep.subr.bf16.mxu1 %v9608_v24  ;;  %6759 = vmatprep.mubr.bf16.mxu0 %v11743_v19  ;;  %v9656_v24 = vld [vmem:[%s14362_s1 + $0x13c4] ss:$16 sps:$4 sm:$0xff]   ;;  %v9651_v27 = vld [vmem:[%s14362_s1 + $0x11c0] ss:$16 sps:$4 sm:$0xff]  }
 0x106   :  { %v11781_v38 = vadd.f32 %v6476_v34, %v6435_v33  ;;  %6800 = vmatprep.mubr.bf16.mxu1 %v11763_v25  ;;  %v6437_v44 = vpop.f32.mrf.mxu0  ;;  %v9654_v28 = vld [vmem:[%s14362_s1 + $0x13c0] ss:$16 sps:$4 sm:$0xff]  }
 0x107   :  { %v6478_v45 = vpop.f32.mrf.mxu1  ;;  %6730 = vmatpush1.bf16.msra.mxu0 %v9603_v29  ;;  %v9659_v29 = vld [vmem:[%s14362_s1 + $0x11a4] ss:$16 sps:$4 sm:$0xff]   ;;  %v9657_v33 = vld [vmem:[%s14362_s1 + $0x11a0] ss:$16 sps:$4 sm:$0xff]  }
 0x108   :  { %6771 = vmatpush1.bf16.msra.mxu1 %v9606_v30  ;;  %v6438_v46 = vpop.f32.mrf.mxu0  ;;  %6731 = vmatprep.subr.bf16.mxu0 %v9611_v36  ;;  %v9662_v30 = vld [vmem:[%s14362_s1 + $0x13a4] ss:$16 sps:$4 sm:$0xff]   ;;  %v9660_v34 = vld [vmem:[%s14362_s1 + $0x13a0] ss:$16 sps:$4 sm:$0xff]  }
 0x109   :  { %v6479_v47 = vpop.f32.mrf.mxu1  ;;  %6772 = vmatprep.subr.bf16.mxu1 %v9614_v37  ;;  %v9665_v36 = vld [vmem:[%s14362_s1 + $0x1184] ss:$16 sps:$4 sm:$0xff]   ;;  %v9669_v46 = vld [vmem:[%s14362_s1 + $0x1160] ss:$16 sps:$4 sm:$0xff]  }
 0x10a   :  { %v9668_v37 = vld [vmem:[%s14362_s1 + $0x1384] ss:$16 sps:$4 sm:$0xff]   ;;  %v9672_v47 = vld [vmem:[%s14362_s1 + $0x1360] ss:$16 sps:$4 sm:$0xff]  }
 0x10b   :  { %6732 = vmatpush1.bf16.msra.mxu0 %v9609_v32  ;;  %v9663_v32 = vld [vmem:[%s14362_s1 + $0x1180] ss:$16 sps:$4 sm:$0xff]   ;;  %v9671_v44 = vld [vmem:[%s14362_s1 + $0x1164] ss:$16 sps:$4 sm:$0xff]  }
 0x10c   :  { %6773 = vmatpush1.bf16.msra.mxu1 %v9612_v40  ;;  %6733 = vmatprep.subr.bf16.mxu0 %v9617_v50  ;;  %v9666_v40 = vld [vmem:[%s14362_s1 + $0x1380] ss:$16 sps:$4 sm:$0xff]   ;;  %v9674_v45 = vld [vmem:[%s14362_s1 + $0x1364] ss:$16 sps:$4 sm:$0xff]  }
 0x10d   :  { %6774 = vmatprep.subr.bf16.mxu1 %v9620_v51  ;;  %v9677_v50 = vld [vmem:[%s14362_s1 + $0x1144] ss:$16 sps:$4 sm:$0xff]  }
 0x10e   :  { %v9680_v51 = vld [vmem:[%s14362_s1 + $0x1344] ss:$16 sps:$4 sm:$0xff]  }
 0x10f   :  { %6734 = vmatpush1.bf16.msra.mxu0 %v9615_v52  ;;  %v1149_v52 = vcombine.high %v11697_v63, %v11697_v63  ;;  %v9686_v63 = vld [vmem:[%s14362_s1 + $0x1324] ss:$16 sps:$4 sm:$0xff]  }
 0x110   :  { %6775 = vmatpush1.bf16.msra.mxu1 %v9618_v35  ;;  %6735 = vmatprep.subr.bf16.mxu0 %v9623_v55  ;;  %v9675_v35 = vld [vmem:[%s14362_s1 + $0x1140] ss:$16 sps:$4 sm:$0xff]  }
 0x111   :  { %6776 = vmatprep.subr.bf16.mxu1 %v9626_v56  ;;  %v9678_v55 = vld [vmem:[%s14362_s1 + $0x1340] ss:$16 sps:$4 sm:$0xff]   ;;  %v9683_v56 = vld [vmem:[%s14362_s1 + $0x1124] ss:$16 sps:$4 sm:$0xff]  }
 0x113   :  { %6736 = vmatpush1.bf16.msra.mxu0 %v9621_v57  ;;  %v11932_v57 = vrot.slane %v1149_v52, %v10991_v49  ;;  %v9714_v52 = vld [vmem:[%s14362_s1 + $0x1680] ss:$16 sps:$4 sm:$0xff]  }
 0x114   :  { %6777 = vmatpush1.bf16.msra.mxu1 %v9624_v58  ;;  %6737 = vmatprep.subr.bf16.mxu0 %v9629_v61  ;;  %v9681_v58 = vld [vmem:[%s14362_s1 + $0x1120] ss:$16 sps:$4 sm:$0xff]  }
 0x115   :  { %6778 = vmatprep.subr.bf16.mxu1 %v9632_v62  ;;  %v9684_v61 = vld [vmem:[%s14362_s1 + $0x1320] ss:$16 sps:$4 sm:$0xff]   ;;  %v9689_v62 = vld [vmem:[%s14362_s1 + $0x1104] ss:$16 sps:$4 sm:$0xff]  }
 0x117   :  { %6738 = vmatpush1.bf16.msra.mxu0 %v9627_v1  ;;  %v9692_v1 = vld [vmem:[%s14362_s1 + $0x1304] ss:$16 sps:$4 sm:$0xff]  }
 0x118   :  { %6779 = vmatpush1.bf16.msra.mxu1 %v9630_v2  ;;  %6739 = vmatprep.subr.bf16.mxu0 %v9635_v3  ;;  %v1165_v2 = vcombine.high %v11932_v57, %v11932_v57  ;;  %v11950_v3 = vrot.slane %v11710_v4, %v10991_v49  ;;  %v9698_v4 = vld [vmem:[%s14362_s1 + $0x16e4] ss:$16 sps:$4 sm:$0xff]  }
 0x119   :  { %6780 = vmatprep.subr.bf16.mxu1 %v9638_v5  ;;  %v9687_v5 = vld [vmem:[%s14362_s1 + $0x1100] ss:$16 sps:$4 sm:$0xff]  }
 0x11b   :  { %6740 = vmatpush1.bf16.msra.mxu0 %v9633_v7  ;;  %v9690_v7 = vld [vmem:[%s14362_s1 + $0x1300] ss:$16 sps:$4 sm:$0xff]  }
 0x11c   :  { %6781 = vmatpush1.bf16.msra.mxu1 %v9636_v8  ;;  %6741 = vmatprep.subr.bf16.mxu0 %v9641_v9  ;;  %v9695_v8 = vld [vmem:[%s14362_s1 + $0x14e4] ss:$16 sps:$4 sm:$0xff]   ;;  %v9693_v9 = vld [vmem:[%s14362_s1 + $0x14e0] ss:$16 sps:$4 sm:$0xff]  }
 0x11d   :  { %6782 = vmatprep.subr.bf16.mxu1 %v9644_v10  ;;  %v9696_v10 = vld [vmem:[%s14362_s1 + $0x16e0] ss:$16 sps:$4 sm:$0xff]  }
 0x11f   :  { %6742 = vmatpush1.bf16.msra.mxu0 %v9639_v11  ;;  %v11971_v11 = vrot.slane %v1165_v2, %v10991_v49  ;;  %v9731_v2 = vld [vmem:[%s14362_s1 + $0x1424] ss:$16 sps:$4 sm:$0xff]  }
 0x120   :  { %6783 = vmatpush1.bf16.msra.mxu1 %v9642_v14  ;;  %6743 = vmatprep.subr.bf16.mxu0 %v9647_v15  ;;  %v11975_v14 = vcombine.high %v11950_v3, %v11950_v3  ;;  %v9701_v15 = vld [vmem:[%s14362_s1 + $0x14c4] ss:$16 sps:$4 sm:$0xff]  }
 0x121   :  { %6784 = vmatprep.subr.bf16.mxu1 %v9650_v16  ;;  %v9704_v16 = vld [vmem:[%s14362_s1 + $0x16c4] ss:$16 sps:$4 sm:$0xff]  }
 0x123   :  { %6744 = vmatpush2.bf16.msra.mxu0 %v9645_v20  ;;  %v9699_v20 = vld [vmem:[%s14362_s1 + $0x14c0] ss:$16 sps:$4 sm:$0xff]  }
 0x124   :  { %6785 = vmatpush2.bf16.msra.mxu1 %v9648_v21  ;;  %6745 = vmatprep.subr.bf16.mxu0 %v9653_v22  ;;  %v9702_v21 = vld [vmem:[%s14362_s1 + $0x16c0] ss:$16 sps:$4 sm:$0xff]   ;;  %v11991_v22 = vcombine.high %v11971_v11, %v11971_v11 }
 0x125   :  { %6786 = vmatprep.subr.bf16.mxu1 %v9656_v24 }
 0x127   :  { %6746 = vmatpush2.bf16.msra.mxu0 %v9651_v27 }
 0x128   :  { %6787 = vmatpush2.bf16.msra.mxu1 %v9654_v28  ;;  %6747 = vmatprep.subr.bf16.mxu0 %v9659_v29 }
 0x129   :  { %6788 = vmatprep.subr.bf16.mxu1 %v9662_v30 }
 0x12b   :  { %6748 = vmatpush2.bf16.msra.mxu0 %v9657_v33  ;;  %v9707_v33 = vld [vmem:[%s14362_s1 + $0x14a4] ss:$16 sps:$4 sm:$0xff]  }
 0x12c   :  { %6789 = vmatpush2.bf16.msra.mxu1 %v9660_v34  ;;  %6749 = vmatprep.subr.bf16.mxu0 %v9665_v36  ;;  %v9710_v34 = vld [vmem:[%s14362_s1 + $0x16a4] ss:$16 sps:$4 sm:$0xff]  }
 0x12d   :  { %6790 = vmatprep.subr.bf16.mxu1 %v9668_v37 }
 0x12f   :  { %6750 = vmatpush2.bf16.msra.mxu0 %v9663_v32  ;;  %v9708_v32 = vld [vmem:[%s14362_s1 + $0x16a0] ss:$16 sps:$4 sm:$0xff]  }
 0x130   :  { %6791 = vmatpush2.bf16.msra.mxu1 %v9666_v40  ;;  %6751 = vmatprep.subr.bf16.mxu0 %v9671_v44 }
 0x131   :  { %6792 = vmatprep.subr.bf16.mxu1 %v9674_v45 }
 0x133   :  { %6752 = vmatpush2.bf16.msra.mxu0 %v9669_v46 }
 0x134   :  { %6793 = vmatpush2.bf16.msra.mxu1 %v9672_v47  ;;  %6753 = vmatprep.subr.bf16.mxu0 %v9677_v50  ;;  %v9713_v47 = vld [vmem:[%s14362_s1 + $0x1484] ss:$16 sps:$4 sm:$0xff]  }
 0x135   :  { %6794 = vmatprep.subr.bf16.mxu1 %v9680_v51  ;;  %v9716_v50 = vld [vmem:[%s14362_s1 + $0x1684] ss:$16 sps:$4 sm:$0xff]   ;;  %v9711_v51 = vld [vmem:[%s14362_s1 + $0x1480] ss:$16 sps:$4 sm:$0xff]  }
 0x137   :  { %6754 = vmatpush2.bf16.msra.mxu0 %v9675_v35  ;;  %v9719_v35 = vld [vmem:[%s14362_s1 + $0x1464] ss:$16 sps:$4 sm:$0xff]  }
 0x138   :  { %6795 = vmatpush2.bf16.msra.mxu1 %v9678_v55  ;;  %6755 = vmatprep.subr.bf16.mxu0 %v9683_v56  ;;  %v9722_v55 = vld [vmem:[%s14362_s1 + $0x1664] ss:$16 sps:$4 sm:$0xff]   ;;  %v9717_v56 = vld [vmem:[%s14362_s1 + $0x1460] ss:$16 sps:$4 sm:$0xff]  }
 0x139   :  { %6796 = vmatprep.subr.bf16.mxu1 %v9686_v63  ;;  %v9720_v63 = vld [vmem:[%s14362_s1 + $0x1660] ss:$16 sps:$4 sm:$0xff]  }
 0x13b   :  { %6756 = vmatpush2.bf16.msra.mxu0 %v9681_v58  ;;  %v9725_v58 = vld [vmem:[%s14362_s1 + $0x1444] ss:$16 sps:$4 sm:$0xff]  }
 0x13c   :  { %6797 = vmatpush2.bf16.msra.mxu1 %v9684_v61  ;;  %6757 = vmatprep.subr.bf16.mxu0 %v9689_v62  ;;  %v9728_v61 = vld [vmem:[%s14362_s1 + $0x1644] ss:$16 sps:$4 sm:$0xff]   ;;  %v9723_v62 = vld [vmem:[%s14362_s1 + $0x1440] ss:$16 sps:$4 sm:$0xff]  }
 0x13d   :  { %6798 = vmatprep.subr.bf16.mxu1 %v9692_v1  ;;  %v9726_v1 = vld [vmem:[%s14362_s1 + $0x1640] ss:$16 sps:$4 sm:$0xff]  }
 0x13f   :  { %6758 = vmatpush2.bf16.msra.mxu0 %v9687_v5  ;;  %v9734_v5 = vld [vmem:[%s14362_s1 + $0x1624] ss:$16 sps:$4 sm:$0xff]  }
 0x140   :  { %6799 = vmatpush2.bf16.msra.mxu1 %v9690_v7  ;;  %6809 = vmatprep.subr.bf16.mxu0 %v9695_v8  ;;  %v9729_v7 = vld [vmem:[%s14362_s1 + $0x1420] ss:$16 sps:$4 sm:$0xff]  }
 0x141   :  { %6850 = vmatprep.subr.bf16.mxu1 %v9698_v4  ;;  %v9732_v8 = vld [vmem:[%s14362_s1 + $0x1620] ss:$16 sps:$4 sm:$0xff]   ;;  %v9737_v4 = vld [vmem:[%s14362_s1 + $0x1404] ss:$16 sps:$4 sm:$0xff]  }
 0x142   :  { %v6515_v24 = vpop.f32.mrf.mxu0  ;;  %6760 = vmatmul.mubr.bf16.vlgmr.msra.gmra.mxu0 %v11950_v3 }
 0x143   :  { %v6556_v27 = vpop.f32.mrf.mxu1  ;;  %6801 = vmatmul.mubr.bf16.vlgmr.msra.gmra.mxu1 %v11975_v14  ;;  %v6516_v28 = vadd.f32 %v6515_v24, %v11773_v31  ;;  %6810 = vmatpush1.bf16.msra.mxu0 %v9693_v9  ;;  %v9705_v31 = vld [vmem:[%s14362_s1 + $0x14a0] ss:$16 sps:$4 sm:$0xff]   ;;  %v9740_v9 = vld [vmem:[%s14362_s1 + $0x1604] ss:$16 sps:$4 sm:$0xff]  }
 0x144   :  { %6851 = vmatpush1.bf16.msra.mxu1 %v9696_v10  ;;  %v6517_v29 = vpop.f32.mrf.mxu0  ;;  %6811 = vmatprep.subr.bf16.mxu0 %v9701_v15  ;;  %v9735_v10 = vld [vmem:[%s14362_s1 + $0x1400] ss:$16 sps:$4 sm:$0xff]  }
 0x145   :  { %v6558_v30 = vpop.f32.mrf.mxu1  ;;  %6852 = vmatprep.subr.bf16.mxu1 %v9704_v16  ;;  %v12002_v36 = vadd.f32 %v6556_v27, %v6516_v28  ;;  %v6518_v37 = vadd.f32 %v6517_v29, %v11781_v38  ;;  %6841 = vmatprep.mubr.bf16.mxu0 %v11971_v11  ;;  %v9738_v15 = vld [vmem:[%s14362_s1 + $0x1600] ss:$16 sps:$4 sm:$0xff]   ;;  %v9743_v16 = vld [vmem:[%s14362_s1 + $0x15e4] ss:$16 sps:$4 sm:$0xff]  }
 0x146   :  { %6882 = vmatprep.mubr.bf16.mxu1 %v11991_v22  ;;  %v6519_v40 = vpop.f32.mrf.mxu0  ;;  %v9744_v24 = vld [vmem:[%s14362_s1 + $0x17e0] ss:$16 sps:$4 sm:$0xff]   ;;  %v9749_v27 = vld [vmem:[%s14362_s1 + $0x15c4] ss:$16 sps:$4 sm:$0xff]  }
 0x147   :  { %v6560_v44 = vpop.f32.mrf.mxu1  ;;  %v12013_v45 = vadd.f32 %v6558_v30, %v6518_v37  ;;  %6812 = vmatpush1.bf16.msra.mxu0 %v9699_v20  ;;  %v9746_v20 = vld [vmem:[%s14362_s1 + $0x17e4] ss:$16 sps:$4 sm:$0xff]   ;;  %v9747_v29 = vld [vmem:[%s14362_s1 + $0x15c0] ss:$16 sps:$4 sm:$0xff]  }
 0x148   :  { %6853 = vmatpush1.bf16.msra.mxu1 %v9702_v21  ;;  %v6520_v46 = vpop.f32.mrf.mxu0  ;;  %6813 = vmatprep.subr.bf16.mxu0 %v9707_v33  ;;  %v9741_v21 = vld [vmem:[%s14362_s1 + $0x15e0] ss:$16 sps:$4 sm:$0xff]   ;;  %v9752_v28 = vld [vmem:[%s14362_s1 + $0x17c4] ss:$16 sps:$4 sm:$0xff]  }
 0x149   :  { %v6561_v38 = vpop.f32.mrf.mxu1  ;;  %6854 = vmatprep.subr.bf16.mxu1 %v9710_v34  ;;  %v9750_v30 = vld [vmem:[%s14362_s1 + $0x17c0] ss:$16 sps:$4 sm:$0xff]   ;;  %v9755_v33 = vld [vmem:[%s14362_s1 + $0x15a4] ss:$16 sps:$4 sm:$0xff]  }
 0x14a   :  { %v9758_v34 = vld [vmem:[%s14362_s1 + $0x17a4] ss:$16 sps:$4 sm:$0xff]   ;;  %v9753_v37 = vld [vmem:[%s14362_s1 + $0x15a0] ss:$16 sps:$4 sm:$0xff]  }
 0x14b   :  { %6814 = vmatpush1.bf16.msra.mxu0 %v9705_v31  ;;  %v9756_v31 = vld [vmem:[%s14362_s1 + $0x17a0] ss:$16 sps:$4 sm:$0xff]   ;;  %v9764_v40 = vld [vmem:[%s14362_s1 + $0x1784] ss:$16 sps:$4 sm:$0xff]  }
 0x14c   :  { %6855 = vmatpush1.bf16.msra.mxu1 %v9708_v32  ;;  %6815 = vmatprep.subr.bf16.mxu0 %v9713_v47  ;;  %v9761_v32 = vld [vmem:[%s14362_s1 + $0x1584] ss:$16 sps:$4 sm:$0xff]   ;;  %v9759_v44 = vld [vmem:[%s14362_s1 + $0x1580] ss:$16 sps:$4 sm:$0xff]  }
 0x14d   :  { %6856 = vmatprep.subr.bf16.mxu1 %v9716_v50  ;;  %v9762_v46 = vld [vmem:[%s14362_s1 + $0x1780] ss:$16 sps:$4 sm:$0xff]   ;;  %v9767_v38 = vld [vmem:[%s14362_s1 + $0x1564] ss:$16 sps:$4 sm:$0xff]  }
 0x14e   :  { %v9770_v47 = vld [vmem:[%s14362_s1 + $0x1764] ss:$16 sps:$4 sm:$0xff]   ;;  %v9765_v50 = vld [vmem:[%s14362_s1 + $0x1560] ss:$16 sps:$4 sm:$0xff]  }
 0x14f   :  { %6816 = vmatpush1.bf16.msra.mxu0 %v9711_v51  ;;  %v9768_v51 = vld [vmem:[%s14362_s1 + $0x1760] ss:$16 sps:$4 sm:$0xff]  }
 0x150   :  { %6857 = vmatpush1.bf16.msra.mxu1 %v9714_v52  ;;  %6817 = vmatprep.subr.bf16.mxu0 %v9719_v35  ;;  %v9773_v52 = vld [vmem:[%s14362_s1 + $0x1544] ss:$16 sps:$4 sm:$0xff]  }
 0x151   :  { %6858 = vmatprep.subr.bf16.mxu1 %v9722_v55  ;;  %v9776_v35 = vld [vmem:[%s14362_s1 + $0x1744] ss:$16 sps:$4 sm:$0xff]   ;;  %v12144_v55 = vld [vmem:[%s14361_s0 + $0x18] sm:$0xff] }
 0x153   :  { %6818 = vmatpush1.bf16.msra.mxu0 %v9717_v56  ;;  %v9771_v56 = vld [vmem:[%s14362_s1 + $0x1540] ss:$16 sps:$4 sm:$0xff]  }
 0x154   :  { %6859 = vmatpush1.bf16.msra.mxu1 %v9720_v63  ;;  %6819 = vmatprep.subr.bf16.mxu0 %v9725_v58  ;;  %v9774_v63 = vld [vmem:[%s14362_s1 + $0x1740] ss:$16 sps:$4 sm:$0xff]   ;;  %v9779_v58 = vld [vmem:[%s14362_s1 + $0x1524] ss:$16 sps:$4 sm:$0xff]  }
 0x155   :  { %6860 = vmatprep.subr.bf16.mxu1 %v9728_v61  ;;  %v9782_v61 = vld [vmem:[%s14362_s1 + $0x1724] ss:$16 sps:$4 sm:$0xff]  }
 0x157   :  { %6820 = vmatpush1.bf16.msra.mxu0 %v9723_v62  ;;  %v12160_v62 = vrot.slane %v12144_v55, %v10991_v49 }
 0x158   :  { %6861 = vmatpush1.bf16.msra.mxu1 %v9726_v1  ;;  %6821 = vmatprep.subr.bf16.mxu0 %v9731_v2  ;;  %v9777_v1 = vld [vmem:[%s14362_s1 + $0x1520] ss:$16 sps:$4 sm:$0xff]  }
 0x159   :  { %6862 = vmatprep.subr.bf16.mxu1 %v9734_v5  ;;  %v9780_v2 = vld [vmem:[%s14362_s1 + $0x1720] ss:$16 sps:$4 sm:$0xff]   ;;  %v9785_v5 = vld [vmem:[%s14362_s1 + $0x1504] ss:$16 sps:$4 sm:$0xff]  }
 0x15b   :  { %6822 = vmatpush1.bf16.msra.mxu0 %v9729_v7  ;;  %v9788_v7 = vld [vmem:[%s14362_s1 + $0x1704] ss:$16 sps:$4 sm:$0xff]  }
 0x15c   :  { %6863 = vmatpush1.bf16.msra.mxu1 %v9732_v8  ;;  %6823 = vmatprep.subr.bf16.mxu0 %v9737_v4  ;;  %v1213_v8 = vcombine.high %v12160_v62, %v12160_v62  ;;  %v12178_v4 = vrot.slane %v11932_v57, %v10991_v49  ;;  %v9795_v57 = vld [vmem:[%s14362_s1 + $0x1ae4] ss:$16 sps:$4 sm:$0xff]  }
 0x15d   :  { %6864 = vmatprep.subr.bf16.mxu1 %v9740_v9  ;;  %v9783_v9 = vld [vmem:[%s14362_s1 + $0x1500] ss:$16 sps:$4 sm:$0xff]  }
 0x15f   :  { %6824 = vmatpush1.bf16.msra.mxu0 %v9735_v10  ;;  %v9786_v10 = vld [vmem:[%s14362_s1 + $0x1700] ss:$16 sps:$4 sm:$0xff]  }
 0x160   :  { %6865 = vmatpush1.bf16.msra.mxu1 %v9738_v15  ;;  %6825 = vmatprep.subr.bf16.mxu0 %v9743_v16  ;;  %v9792_v15 = vld [vmem:[%s14362_s1 + $0x18e4] ss:$16 sps:$4 sm:$0xff]   ;;  %v9790_v16 = vld [vmem:[%s14362_s1 + $0x18e0] ss:$16 sps:$4 sm:$0xff]  }
 0x161   :  { %6866 = vmatprep.subr.bf16.mxu1 %v9746_v20  ;;  %v9793_v20 = vld [vmem:[%s14362_s1 + $0x1ae0] ss:$16 sps:$4 sm:$0xff]  }
 0x163   :  { %6826 = vmatpush2.bf16.msra.mxu0 %v9741_v21  ;;  %v12199_v21 = vrot.slane %v1213_v8, %v10991_v49  ;;  %v9817_v8 = vld [vmem:[%s14362_s1 + $0x1a60] ss:$16 sps:$4 sm:$0xff]  }
 0x164   :  { %6867 = vmatpush2.bf16.msra.mxu1 %v9744_v24  ;;  %6827 = vmatprep.subr.bf16.mxu0 %v9749_v27  ;;  %v12203_v24 = vcombine.high %v12178_v4, %v12178_v4  ;;  %v9798_v27 = vld [vmem:[%s14362_s1 + $0x18c4] ss:$16 sps:$4 sm:$0xff]  }
 0x165   :  { %6868 = vmatprep.subr.bf16.mxu1 %v9752_v28  ;;  %v9801_v28 = vld [vmem:[%s14362_s1 + $0x1ac4] ss:$16 sps:$4 sm:$0xff]  }
 0x167   :  { %6828 = vmatpush2.bf16.msra.mxu0 %v9747_v29  ;;  %v9796_v29 = vld [vmem:[%s14362_s1 + $0x18c0] ss:$16 sps:$4 sm:$0xff]  }
 0x168   :  { %6869 = vmatpush2.bf16.msra.mxu1 %v9750_v30  ;;  %6829 = vmatprep.subr.bf16.mxu0 %v9755_v33  ;;  %v9799_v30 = vld [vmem:[%s14362_s1 + $0x1ac0] ss:$16 sps:$4 sm:$0xff]   ;;  %v12219_v33 = vcombine.high %v12199_v21, %v12199_v21 }
 0x169   :  { %6870 = vmatprep.subr.bf16.mxu1 %v9758_v34 }
 0x16b   :  { %6830 = vmatpush2.bf16.msra.mxu0 %v9753_v37 }
 0x16c   :  { %6871 = vmatpush2.bf16.msra.mxu1 %v9756_v31  ;;  %6831 = vmatprep.subr.bf16.mxu0 %v9761_v32 }
 0x16d   :  { %6872 = vmatprep.subr.bf16.mxu1 %v9764_v40 }
 0x16f   :  { %6832 = vmatpush2.bf16.msra.mxu0 %v9759_v44  ;;  %v9804_v44 = vld [vmem:[%s14362_s1 + $0x18a4] ss:$16 sps:$4 sm:$0xff]  }
 0x170   :  { %6873 = vmatpush2.bf16.msra.mxu1 %v9762_v46  ;;  %6833 = vmatprep.subr.bf16.mxu0 %v9767_v38  ;;  %v9807_v46 = vld [vmem:[%s14362_s1 + $0x1aa4] ss:$16 sps:$4 sm:$0xff]  }
 0x171   :  { %6874 = vmatprep.subr.bf16.mxu1 %v9770_v47 }
 0x173   :  { %6834 = vmatpush2.bf16.msra.mxu0 %v9765_v50  ;;  %v9805_v50 = vld [vmem:[%s14362_s1 + $0x1aa0] ss:$16 sps:$4 sm:$0xff]  }
 0x174   :  { %6875 = vmatpush2.bf16.msra.mxu1 %v9768_v51  ;;  %6835 = vmatprep.subr.bf16.mxu0 %v9773_v52 }
 0x175   :  { %6876 = vmatprep.subr.bf16.mxu1 %v9776_v35 }
 0x177   :  { %6836 = vmatpush2.bf16.msra.mxu0 %v9771_v56 }
 0x178   :  { %6877 = vmatpush2.bf16.msra.mxu1 %v9774_v63  ;;  %6837 = vmatprep.subr.bf16.mxu0 %v9779_v58  ;;  %v9810_v63 = vld [vmem:[%s14362_s1 + $0x1884] ss:$16 sps:$4 sm:$0xff]  }
 0x179   :  { %6878 = vmatprep.subr.bf16.mxu1 %v9782_v61  ;;  %v9813_v58 = vld [vmem:[%s14362_s1 + $0x1a84] ss:$16 sps:$4 sm:$0xff]   ;;  %v9808_v61 = vld [vmem:[%s14362_s1 + $0x1880] ss:$16 sps:$4 sm:$0xff]  }
 0x17b   :  { %6838 = vmatpush2.bf16.msra.mxu0 %v9777_v1  ;;  %v9811_v1 = vld [vmem:[%s14362_s1 + $0x1a80] ss:$16 sps:$4 sm:$0xff]  }
 0x17c   :  { %6879 = vmatpush2.bf16.msra.mxu1 %v9780_v2  ;;  %6839 = vmatprep.subr.bf16.mxu0 %v9785_v5  ;;  %v9816_v2 = vld [vmem:[%s14362_s1 + $0x1864] ss:$16 sps:$4 sm:$0xff]  }
 0x17d   :  { %6880 = vmatprep.subr.bf16.mxu1 %v9788_v7  ;;  %v9819_v5 = vld [vmem:[%s14362_s1 + $0x1a64] ss:$16 sps:$4 sm:$0xff]   ;;  %v9814_v7 = vld [vmem:[%s14362_s1 + $0x1860] ss:$16 sps:$4 sm:$0xff]  }
 0x17f   :  { %6840 = vmatpush2.bf16.msra.mxu0 %v9783_v9  ;;  %v9822_v9 = vld [vmem:[%s14362_s1 + $0x1844] ss:$16 sps:$4 sm:$0xff]  }
 0x180   :  { %6881 = vmatpush2.bf16.msra.mxu1 %v9786_v10  ;;  %6891 = vmatprep.subr.bf16.mxu0 %v9792_v15  ;;  %v9825_v10 = vld [vmem:[%s14362_s1 + $0x1a44] ss:$16 sps:$4 sm:$0xff]   ;;  %v9820_v15 = vld [vmem:[%s14362_s1 + $0x1840] ss:$16 sps:$4 sm:$0xff]  }
 0x181   :  { %6932 = vmatprep.subr.bf16.mxu1 %v9795_v57  ;;  %v9823_v57 = vld [vmem:[%s14362_s1 + $0x1a40] ss:$16 sps:$4 sm:$0xff]  }
 0x182   :  { %v6597_v34 = vpop.f32.mrf.mxu0  ;;  %6842 = vmatmul.mubr.bf16.vlgmr.msra.gmra.mxu0 %v12178_v4 }
 0x183   :  { %v6638_v37 = vpop.f32.mrf.mxu1  ;;  %6883 = vmatmul.mubr.bf16.vlgmr.msra.gmra.mxu1 %v12203_v24  ;;  %v6598_v31 = vadd.f32 %v6597_v34, %v12002_v36  ;;  %6892 = vmatpush1.bf16.msra.mxu0 %v9790_v16  ;;  %v9802_v36 = vld [vmem:[%s14362_s1 + $0x18a0] ss:$16 sps:$4 sm:$0xff]   ;;  %v9828_v16 = vld [vmem:[%s14362_s1 + $0x1824] ss:$16 sps:$4 sm:$0xff]  }
 0x184   :  { %6933 = vmatpush1.bf16.msra.mxu1 %v9793_v20  ;;  %v6599_v32 = vpop.f32.mrf.mxu0  ;;  %6893 = vmatprep.subr.bf16.mxu0 %v9798_v27  ;;  %v9831_v20 = vld [vmem:[%s14362_s1 + $0x1a24] ss:$16 sps:$4 sm:$0xff]   ;;  %v9826_v27 = vld [vmem:[%s14362_s1 + $0x1820] ss:$16 sps:$4 sm:$0xff]  }
 0x185   :  { %v6640_v40 = vpop.f32.mrf.mxu1  ;;  %6934 = vmatprep.subr.bf16.mxu1 %v9801_v28  ;;  %v12230_v38 = vadd.f32 %v6638_v37, %v6598_v31  ;;  %v6600_v47 = vadd.f32 %v6599_v32, %v12013_v45  ;;  %6923 = vmatprep.mubr.bf16.mxu0 %v12199_v21  ;;  %v9829_v28 = vld [vmem:[%s14362_s1 + $0x1a20] ss:$16 sps:$4 sm:$0xff]   ;;  %v9840_v31 = vld [vmem:[%s14362_s1 + $0x19e4] ss:$16 sps:$4 sm:$0xff]  }
 0x186   :  { %6964 = vmatprep.mubr.bf16.mxu1 %v12219_v33  ;;  %v6601_v51 = vpop.f32.mrf.mxu0  ;;  %v9832_v34 = vld [vmem:[%s14362_s1 + $0x1800] ss:$16 sps:$4 sm:$0xff]   ;;  %v9843_v32 = vld [vmem:[%s14362_s1 + $0x1be4] ss:$16 sps:$4 sm:$0xff]  }
 0x187   :  { %v6642_v52 = vpop.f32.mrf.mxu1  ;;  %v12241_v35 = vadd.f32 %v6640_v40, %v6600_v47  ;;  %6894 = vmatpush1.bf16.msra.mxu0 %v9796_v29  ;;  %v9834_v29 = vld [vmem:[%s14362_s1 + $0x1804] ss:$16 sps:$4 sm:$0xff]   ;;  %v9835_v37 = vld [vmem:[%s14362_s1 + $0x1a00] ss:$16 sps:$4 sm:$0xff]  }
 0x188   :  { %6935 = vmatpush1.bf16.msra.mxu1 %v9799_v30  ;;  %v6602_v56 = vpop.f32.mrf.mxu0  ;;  %6895 = vmatprep.subr.bf16.mxu0 %v9804_v44  ;;  %v9837_v30 = vld [vmem:[%s14362_s1 + $0x1a04] ss:$16 sps:$4 sm:$0xff]   ;;  %v9838_v40 = vld [vmem:[%s14362_s1 + $0x19e0] ss:$16 sps:$4 sm:$0xff]  }
 0x189   :  { %v6643_v45 = vpop.f32.mrf.mxu1  ;;  %6936 = vmatprep.subr.bf16.mxu1 %v9807_v46  ;;  %v9841_v44 = vld [vmem:[%s14362_s1 + $0x1be0] ss:$16 sps:$4 sm:$0xff]   ;;  %v9846_v46 = vld [vmem:[%s14362_s1 + $0x19c4] ss:$16 sps:$4 sm:$0xff]  }
 0x18a   :  { %v9849_v47 = vld [vmem:[%s14362_s1 + $0x1bc4] ss:$16 sps:$4 sm:$0xff]   ;;  %v9850_v56 = vld [vmem:[%s14362_s1 + $0x19a0] ss:$16 sps:$4 sm:$0xff]  }
 0x18b   :  { %6896 = vmatpush1.bf16.msra.mxu0 %v9802_v36  ;;  %v9844_v36 = vld [vmem:[%s14362_s1 + $0x19c0] ss:$16 sps:$4 sm:$0xff]   ;;  %v9852_v51 = vld [vmem:[%s14362_s1 + $0x19a4] ss:$16 sps:$4 sm:$0xff]  }
 0x18c   :  { %6937 = vmatpush1.bf16.msra.mxu1 %v9805_v50  ;;  %6897 = vmatprep.subr.bf16.mxu0 %v9810_v63  ;;  %v9847_v50 = vld [vmem:[%s14362_s1 + $0x1bc0] ss:$16 sps:$4 sm:$0xff]   ;;  %v9855_v52 = vld [vmem:[%s14362_s1 + $0x1ba4] ss:$16 sps:$4 sm:$0xff]  }
 0x18d   :  { %6938 = vmatprep.subr.bf16.mxu1 %v9813_v58  ;;  %v9853_v45 = vld [vmem:[%s14362_s1 + $0x1ba0] ss:$16 sps:$4 sm:$0xff]   ;;  %v9858_v63 = vld [vmem:[%s14362_s1 + $0x1984] ss:$16 sps:$4 sm:$0xff]  }
 0x18e   :  { %v9861_v58 = vld [vmem:[%s14362_s1 + $0x1b84] ss:$16 sps:$4 sm:$0xff]  }
 0x18f   :  { %6898 = vmatpush1.bf16.msra.mxu0 %v9808_v61  ;;  %v9856_v61 = vld [vmem:[%s14362_s1 + $0x1980] ss:$16 sps:$4 sm:$0xff]  }
 0x190   :  { %6939 = vmatpush1.bf16.msra.mxu1 %v9811_v1  ;;  %6899 = vmatprep.subr.bf16.mxu0 %v9816_v2  ;;  %v9859_v1 = vld [vmem:[%s14362_s1 + $0x1b80] ss:$16 sps:$4 sm:$0xff]   ;;  %v9864_v2 = vld [vmem:[%s14362_s1 + $0x1964] ss:$16 sps:$4 sm:$0xff]  }
 0x191   :  { %6940 = vmatprep.subr.bf16.mxu1 %v9819_v5  ;;  %v9867_v5 = vld [vmem:[%s14362_s1 + $0x1b64] ss:$16 sps:$4 sm:$0xff]  }
 0x193   :  { %6900 = vmatpush1.bf16.msra.mxu0 %v9814_v7  ;;  %v9862_v7 = vld [vmem:[%s14362_s1 + $0x1960] ss:$16 sps:$4 sm:$0xff]  }
 0x194   :  { %6941 = vmatpush1.bf16.msra.mxu1 %v9817_v8  ;;  %6901 = vmatprep.subr.bf16.mxu0 %v9822_v9  ;;  %v9865_v8 = vld [vmem:[%s14362_s1 + $0x1b60] ss:$16 sps:$4 sm:$0xff]   ;;  %v9870_v9 = vld [vmem:[%s14362_s1 + $0x1944] ss:$16 sps:$4 sm:$0xff]  }
 0x195   :  { %6942 = vmatprep.subr.bf16.mxu1 %v9825_v10  ;;  %v9873_v10 = vld [vmem:[%s14362_s1 + $0x1b44] ss:$16 sps:$4 sm:$0xff]  }
 0x197   :  { %6902 = vmatpush1.bf16.msra.mxu0 %v9820_v15  ;;  %v1198_v15 = vcombine.high %v12144_v55, %v12144_v55  ;;  %v9879_v55 = vld [vmem:[%s14362_s1 + $0x1b24] ss:$16 sps:$4 sm:$0xff]  }
 0x198   :  { %6943 = vmatpush1.bf16.msra.mxu1 %v9823_v57  ;;  %6903 = vmatprep.subr.bf16.mxu0 %v9828_v16  ;;  %v9868_v57 = vld [vmem:[%s14362_s1 + $0x1940] ss:$16 sps:$4 sm:$0xff]  }
 0x199   :  { %6944 = vmatprep.subr.bf16.mxu1 %v9831_v20  ;;  %v9871_v16 = vld [vmem:[%s14362_s1 + $0x1b40] ss:$16 sps:$4 sm:$0xff]   ;;  %v9876_v20 = vld [vmem:[%s14362_s1 + $0x1924] ss:$16 sps:$4 sm:$0xff]  }
 0x19b   :  { %6904 = vmatpush1.bf16.msra.mxu0 %v9826_v27  ;;  %v12384_v27 = vrot.slane %v1198_v15, %v10991_v49  ;;  %v9901_v15 = vld [vmem:[%s14362_s1 + $0x1ea0] ss:$16 sps:$4 sm:$0xff]  }
 0x19c   :  { %6945 = vmatpush1.bf16.msra.mxu1 %v9829_v28  ;;  %6905 = vmatprep.subr.bf16.mxu0 %v9834_v29  ;;  %v9874_v28 = vld [vmem:[%s14362_s1 + $0x1920] ss:$16 sps:$4 sm:$0xff]  }
 0x19d   :  { %6946 = vmatprep.subr.bf16.mxu1 %v9837_v30  ;;  %v9877_v29 = vld [vmem:[%s14362_s1 + $0x1b20] ss:$16 sps:$4 sm:$0xff]   ;;  %v9882_v30 = vld [vmem:[%s14362_s1 + $0x1904] ss:$16 sps:$4 sm:$0xff]  }
 0x19f   :  { %6906 = vmatpush1.bf16.msra.mxu0 %v9832_v34  ;;  %v9885_v34 = vld [vmem:[%s14362_s1 + $0x1b04] ss:$16 sps:$4 sm:$0xff]  }
 0x1a0   :  { %6947 = vmatpush1.bf16.msra.mxu1 %v9835_v37  ;;  %6907 = vmatprep.subr.bf16.mxu0 %v9840_v31  ;;  %v1214_v37 = vcombine.high %v12384_v27, %v12384_v27  ;;  %v12402_v31 = vrot.slane %v12160_v62, %v10991_v49  ;;  %v9891_v62 = vld [vmem:[%s14362_s1 + $0x1ee4] ss:$16 sps:$4 sm:$0xff]  }
 0x1a1   :  { %6948 = vmatprep.subr.bf16.mxu1 %v9843_v32  ;;  %v9880_v32 = vld [vmem:[%s14362_s1 + $0x1900] ss:$16 sps:$4 sm:$0xff]  }
 0x1a3   :  { %6908 = vmatpush2.bf16.msra.mxu0 %v9838_v40  ;;  %v9883_v40 = vld [vmem:[%s14362_s1 + $0x1b00] ss:$16 sps:$4 sm:$0xff]  }
 0x1a4   :  { %6949 = vmatpush2.bf16.msra.mxu1 %v9841_v44  ;;  %6909 = vmatprep.subr.bf16.mxu0 %v9846_v46  ;;  %v9888_v44 = vld [vmem:[%s14362_s1 + $0x1ce4] ss:$16 sps:$4 sm:$0xff]   ;;  %v9886_v46 = vld [vmem:[%s14362_s1 + $0x1ce0] ss:$16 sps:$4 sm:$0xff]  }
 0x1a5   :  { %6950 = vmatprep.subr.bf16.mxu1 %v9849_v47  ;;  %v9889_v47 = vld [vmem:[%s14362_s1 + $0x1ee0] ss:$16 sps:$4 sm:$0xff]  }
 0x1a7   :  { %6910 = vmatpush2.bf16.msra.mxu0 %v9844_v36  ;;  %v12423_v36 = vrot.slane %v1214_v37, %v10991_v49  ;;  %v9912_v37 = vld [vmem:[%s14362_s1 + $0x1c64] ss:$16 sps:$4 sm:$0xff]  }
 0x1a8   :  { %6951 = vmatpush2.bf16.msra.mxu1 %v9847_v50  ;;  %6911 = vmatprep.subr.bf16.mxu0 %v9852_v51  ;;  %v12427_v50 = vcombine.high %v12402_v31, %v12402_v31  ;;  %v9894_v51 = vld [vmem:[%s14362_s1 + $0x1cc4] ss:$16 sps:$4 sm:$0xff]  }
 0x1a9   :  { %6952 = vmatprep.subr.bf16.mxu1 %v9855_v52  ;;  %v9897_v52 = vld [vmem:[%s14362_s1 + $0x1ec4] ss:$16 sps:$4 sm:$0xff]  }
 0x1ab   :  { %6912 = vmatpush2.bf16.msra.mxu0 %v9850_v56  ;;  %v9892_v56 = vld [vmem:[%s14362_s1 + $0x1cc0] ss:$16 sps:$4 sm:$0xff]  }
 0x1ac   :  { %6953 = vmatpush2.bf16.msra.mxu1 %v9853_v45  ;;  %6913 = vmatprep.subr.bf16.mxu0 %v9858_v63  ;;  %v9895_v45 = vld [vmem:[%s14362_s1 + $0x1ec0] ss:$16 sps:$4 sm:$0xff]   ;;  %v12443_v63 = vcombine.high %v12423_v36, %v12423_v36 }
 0x1ad   :  { %6954 = vmatprep.subr.bf16.mxu1 %v9861_v58 }
 0x1af   :  { %6914 = vmatpush2.bf16.msra.mxu0 %v9856_v61 }
 0x1b0   :  { %6955 = vmatpush2.bf16.msra.mxu1 %v9859_v1  ;;  %6915 = vmatprep.subr.bf16.mxu0 %v9864_v2 }
 0x1b1   :  { %6956 = vmatprep.subr.bf16.mxu1 %v9867_v5 }
 0x1b3   :  { %6916 = vmatpush2.bf16.msra.mxu0 %v9862_v7  ;;  %v9900_v7 = vld [vmem:[%s14362_s1 + $0x1ca4] ss:$16 sps:$4 sm:$0xff]  }
 0x1b4   :  { %6957 = vmatpush2.bf16.msra.mxu1 %v9865_v8  ;;  %6917 = vmatprep.subr.bf16.mxu0 %v9870_v9  ;;  %v9903_v8 = vld [vmem:[%s14362_s1 + $0x1ea4] ss:$16 sps:$4 sm:$0xff]  }
 0x1b5   :  { %6958 = vmatprep.subr.bf16.mxu1 %v9873_v10 }
 0x1b7   :  { %6918 = vmatpush2.bf16.msra.mxu0 %v9868_v57 }
 0x1b8   :  { %6959 = vmatpush2.bf16.msra.mxu1 %v9871_v16  ;;  %6919 = vmatprep.subr.bf16.mxu0 %v9876_v20 }
 0x1b9   :  { %6960 = vmatprep.subr.bf16.mxu1 %v9879_v55 }
 0x1bb   :  { %6920 = vmatpush2.bf16.msra.mxu0 %v9874_v28  ;;  %v9906_v28 = vld [vmem:[%s14362_s1 + $0x1c84] ss:$16 sps:$4 sm:$0xff]  }
 0x1bc   :  { %6961 = vmatpush2.bf16.msra.mxu1 %v9877_v29  ;;  %6921 = vmatprep.subr.bf16.mxu0 %v9882_v30  ;;  %v9909_v29 = vld [vmem:[%s14362_s1 + $0x1e84] ss:$16 sps:$4 sm:$0xff]   ;;  %v9904_v30 = vld [vmem:[%s14362_s1 + $0x1c80] ss:$16 sps:$4 sm:$0xff]  }
 0x1bd   :  { %6962 = vmatprep.subr.bf16.mxu1 %v9885_v34  ;;  %v9907_v34 = vld [vmem:[%s14362_s1 + $0x1e80] ss:$16 sps:$4 sm:$0xff]  }
 0x1bf   :  { %6922 = vmatpush2.bf16.msra.mxu0 %v9880_v32  ;;  %v9915_v32 = vld [vmem:[%s14362_s1 + $0x1e64] ss:$16 sps:$4 sm:$0xff]  }
 0x1c0   :  { %6963 = vmatpush2.bf16.msra.mxu1 %v9883_v40  ;;  %6973 = vmatprep.subr.bf16.mxu0 %v9888_v44  ;;  %v9910_v40 = vld [vmem:[%s14362_s1 + $0x1c60] ss:$16 sps:$4 sm:$0xff]  }
 0x1c1   :  { %7014 = vmatprep.subr.bf16.mxu1 %v9891_v62  ;;  %v9913_v44 = vld [vmem:[%s14362_s1 + $0x1e60] ss:$16 sps:$4 sm:$0xff]   ;;  %v9918_v62 = vld [vmem:[%s14362_s1 + $0x1c44] ss:$16 sps:$4 sm:$0xff]  }
 0x1c2   :  { %v6679_v58 = vpop.f32.mrf.mxu0  ;;  %6924 = vmatmul.mubr.bf16.vlgmr.msra.gmra.mxu0 %v12402_v31 }
 0x1c3   :  { %v6720_v61 = vpop.f32.mrf.mxu1  ;;  %6965 = vmatmul.mubr.bf16.vlgmr.msra.gmra.mxu1 %v12427_v50  ;;  %v6680_v1 = vadd.f32 %v6679_v58, %v12230_v38  ;;  %6974 = vmatpush1.bf16.msra.mxu0 %v9886_v46  ;;  %v9898_v38 = vld [vmem:[%s14362_s1 + $0x1ca0] ss:$16 sps:$4 sm:$0xff]   ;;  %v9921_v46 = vld [vmem:[%s14362_s1 + $0x1e44] ss:$16 sps:$4 sm:$0xff]  }
 0x1c4   :  { %7015 = vmatpush1.bf16.msra.mxu1 %v9889_v47  ;;  %v6681_v2 = vpop.f32.mrf.mxu0  ;;  %6975 = vmatprep.subr.bf16.mxu0 %v9894_v51  ;;  %v9916_v47 = vld [vmem:[%s14362_s1 + $0x1c40] ss:$16 sps:$4 sm:$0xff]  }
 0x1c5   :  { %v6722_v5 = vpop.f32.mrf.mxu1  ;;  %7016 = vmatprep.subr.bf16.mxu1 %v9897_v52  ;;  %v12454_v9 = vadd.f32 %v6720_v61, %v6680_v1  ;;  %v6682_v10 = vadd.f32 %v6681_v2, %v12241_v35  ;;  %7005 = vmatprep.mubr.bf16.mxu0 %v12423_v36  ;;  %v9919_v51 = vld [vmem:[%s14362_s1 + $0x1e40] ss:$16 sps:$4 sm:$0xff]   ;;  %v9924_v52 = vld [vmem:[%s14362_s1 + $0x1c24] ss:$16 sps:$4 sm:$0xff]  }
 0x1c6   :  { %7046 = vmatprep.mubr.bf16.mxu1 %v12443_v63  ;;  %v6683_v57 = vpop.f32.mrf.mxu0  ;;  %v9925_v58 = vld [vmem:[%s14362_s1 + $0x1e20] ss:$16 sps:$4 sm:$0xff]   ;;  %v9930_v61 = vld [vmem:[%s14362_s1 + $0x1c04] ss:$16 sps:$4 sm:$0xff]  }
 0x1c7   :  { %v6724_v16 = vpop.f32.mrf.mxu1  ;;  %v12465_v20 = vadd.f32 %v6722_v5, %v6682_v10  ;;  %6976 = vmatpush1.bf16.msra.mxu0 %v9892_v56  ;;  %v9927_v56 = vld [vmem:[%s14362_s1 + $0x1e24] ss:$16 sps:$4 sm:$0xff]   ;;  %v9928_v2 = vld [vmem:[%s14362_s1 + $0x1c00] ss:$16 sps:$4 sm:$0xff]  }
 0x1c8   :  { %7017 = vmatpush1.bf16.msra.mxu1 %v9895_v45  ;;  %v6684_v55 = vpop.f32.mrf.mxu0  ;;  %6977 = vmatprep.subr.bf16.mxu0 %v9900_v7  ;;  %v9922_v45 = vld [vmem:[%s14362_s1 + $0x1c20] ss:$16 sps:$4 sm:$0xff]   ;;  %v9933_v1 = vld [vmem:[%s14362_s1 + $0x1e04] ss:$16 sps:$4 sm:$0xff]  }
 0x1c9   :  { %v6725_v35 = vpop.f32.mrf.mxu1  ;;  %7018 = vmatprep.subr.bf16.mxu1 %v9903_v8  ;;  %v9931_v5 = vld [vmem:[%s14362_s1 + $0x1e00] ss:$16 sps:$4 sm:$0xff]   ;;  %v9936_v7 = vld [vmem:[%s14362_s1 + $0x1de4] ss:$16 sps:$4 sm:$0xff]  }
 0x1ca   :  { %v9939_v8 = vld [vmem:[%s14362_s1 + $0x1fe4] ss:$16 sps:$4 sm:$0xff]   ;;  %v9934_v10 = vld [vmem:[%s14362_s1 + $0x1de0] ss:$16 sps:$4 sm:$0xff]  }
 0x1cb   :  { %6978 = vmatpush1.bf16.msra.mxu0 %v9898_v38  ;;  %v9937_v38 = vld [vmem:[%s14362_s1 + $0x1fe0] ss:$16 sps:$4 sm:$0xff]   ;;  %v9945_v57 = vld [vmem:[%s14362_s1 + $0x1fc4] ss:$16 sps:$4 sm:$0xff]  }
 0x1cc   :  { %7019 = vmatpush1.bf16.msra.mxu1 %v9901_v15  ;;  %6979 = vmatprep.subr.bf16.mxu0 %v9906_v28  ;;  %v9942_v15 = vld [vmem:[%s14362_s1 + $0x1dc4] ss:$16 sps:$4 sm:$0xff]   ;;  %v9940_v16 = vld [vmem:[%s14362_s1 + $0x1dc0] ss:$16 sps:$4 sm:$0xff]  }
 0x1cd   :  { %7020 = vmatprep.subr.bf16.mxu1 %v9909_v29  ;;  %v9943_v55 = vld [vmem:[%s14362_s1 + $0x1fc0] ss:$16 sps:$4 sm:$0xff]   ;;  %v9948_v35 = vld [vmem:[%s14362_s1 + $0x1da4] ss:$16 sps:$4 sm:$0xff]  }
 0x1ce   :  { %v9951_v28 = vld [vmem:[%s14362_s1 + $0x1fa4] ss:$16 sps:$4 sm:$0xff]   ;;  %v9946_v29 = vld [vmem:[%s14362_s1 + $0x1da0] ss:$16 sps:$4 sm:$0xff]  }
 0x1cf   :  { %6980 = vmatpush1.bf16.msra.mxu0 %v9904_v30  ;;  %v9949_v30 = vld [vmem:[%s14362_s1 + $0x1fa0] ss:$16 sps:$4 sm:$0xff]  }
 0x1d0   :  { %7021 = vmatpush1.bf16.msra.mxu1 %v9907_v34  ;;  %6981 = vmatprep.subr.bf16.mxu0 %v9912_v37  ;;  %v9954_v34 = vld [vmem:[%s14362_s1 + $0x1d84] ss:$16 sps:$4 sm:$0xff]  }
 0x1d1   :  { %7022 = vmatprep.subr.bf16.mxu1 %v9915_v32  ;;  %v9957_v37 = vld [vmem:[%s14362_s1 + $0x1f84] ss:$16 sps:$4 sm:$0xff]   ;;  %v9952_v32 = vld [vmem:[%s14362_s1 + $0x1d80] ss:$16 sps:$4 sm:$0xff]  }
 0x1d3   :  { %6982 = vmatpush1.bf16.msra.mxu0 %v9910_v40  ;;  %v9955_v40 = vld [vmem:[%s14362_s1 + $0x1f80] ss:$16 sps:$4 sm:$0xff]  }
 0x1d4   :  { %7023 = vmatpush1.bf16.msra.mxu1 %v9913_v44  ;;  %6983 = vmatprep.subr.bf16.mxu0 %v9918_v62  ;;  %v9960_v44 = vld [vmem:[%s14362_s1 + $0x1d64] ss:$16 sps:$4 sm:$0xff]  }
 0x1d5   :  { %7024 = vmatprep.subr.bf16.mxu1 %v9921_v46  ;;  %v9963_v62 = vld [vmem:[%s14362_s1 + $0x1f64] ss:$16 sps:$4 sm:$0xff]   ;;  %v9958_v46 = vld [vmem:[%s14362_s1 + $0x1d60] ss:$16 sps:$4 sm:$0xff]  }
 0x1d7   :  { %6984 = vmatpush1.bf16.msra.mxu0 %v9916_v47  ;;  %v9961_v47 = vld [vmem:[%s14362_s1 + $0x1f60] ss:$16 sps:$4 sm:$0xff]  }
 0x1d8   :  { %7025 = vmatpush1.bf16.msra.mxu1 %v9919_v51  ;;  %6985 = vmatprep.subr.bf16.mxu0 %v9924_v52  ;;  %v9966_v51 = vld [vmem:[%s14362_s1 + $0x1d44] ss:$16 sps:$4 sm:$0xff]  }
 0x1d9   :  { %7026 = vmatprep.subr.bf16.mxu1 %v9927_v56  ;;  %v9969_v52 = vld [vmem:[%s14362_s1 + $0x1f44] ss:$16 sps:$4 sm:$0xff]   ;;  %v9964_v56 = vld [vmem:[%s14362_s1 + $0x1d40] ss:$16 sps:$4 sm:$0xff]  }
 0x1db   :  { %6986 = vmatpush1.bf16.msra.mxu0 %v9922_v45  ;;  %v9967_v45 = vld [vmem:[%s14362_s1 + $0x1f40] ss:$16 sps:$4 sm:$0xff]  }
 0x1dc   :  { %7027 = vmatpush1.bf16.msra.mxu1 %v9925_v58  ;;  %6987 = vmatprep.subr.bf16.mxu0 %v9930_v61  ;;  %v9972_v58 = vld [vmem:[%s14362_s1 + $0x1d24] ss:$16 sps:$4 sm:$0xff]  }
 0x1dd   :  { %7028 = vmatprep.subr.bf16.mxu1 %v9933_v1  ;;  %v9975_v61 = vld [vmem:[%s14362_s1 + $0x1f24] ss:$16 sps:$4 sm:$0xff]   ;;  %v9970_v1 = vld [vmem:[%s14362_s1 + $0x1d20] ss:$16 sps:$4 sm:$0xff]  }
 0x1df   :  { %6988 = vmatpush1.bf16.msra.mxu0 %v9928_v2  ;;  %v9973_v2 = vld [vmem:[%s14362_s1 + $0x1f20] ss:$16 sps:$4 sm:$0xff]  }
 0x1e0   :  { %7029 = vmatpush1.bf16.msra.mxu1 %v9931_v5  ;;  %6989 = vmatprep.subr.bf16.mxu0 %v9936_v7  ;;  %v9978_v5 = vld [vmem:[%s14362_s1 + $0x1d04] ss:$16 sps:$4 sm:$0xff]  }
 0x1e1   :  { %7030 = vmatprep.subr.bf16.mxu1 %v9939_v8  ;;  %v9981_v7 = vld [vmem:[%s14362_s1 + $0x1f04] ss:$16 sps:$4 sm:$0xff]   ;;  %v12619_v8 = vrot.slane %v12384_v27, %v10991_v49  ;;  %v9988_v49 = vld [vmem:[%s14362_s1 + $0x2ec] ss:$16 sps:$4 sm:$0xff]   ;;  %v9983_v27 = vld [vmem:[%s14362_s1 + $0xe8] ss:$16 sps:$4 sm:$0xff]  }
 0x1e3   :  { %6990 = vmatpush2.bf16.msra.mxu0 %v9934_v10  ;;  %v9976_v10 = vld [vmem:[%s14362_s1 + $0x1d00] ss:$16 sps:$4 sm:$0xff]  }
 0x1e4   :  { %7031 = vmatpush2.bf16.msra.mxu1 %v9937_v38  ;;  %6991 = vmatprep.subr.bf16.mxu0 %v9942_v15  ;;  %v9979_v38 = vld [vmem:[%s14362_s1 + $0x1f00] ss:$16 sps:$4 sm:$0xff]   ;;  %v9985_v15 = vld [vmem:[%s14362_s1 + $0xec] ss:$16 sps:$4 sm:$0xff]  }
 0x1e5   :  { %7032 = vmatprep.subr.bf16.mxu1 %v9945_v57  ;;  %v9986_v57 = vld [vmem:[%s14362_s1 + $0x2e8] ss:$16 sps:$4 sm:$0xff]  }
 0x1e7   :  { %6992 = vmatpush2.bf16.msra.mxu0 %v9940_v16  ;;  %v12641_v16 = vcombine.high %v12619_v8, %v12619_v8 }
 0x1e8   :  { %7033 = vmatpush2.bf16.msra.mxu1 %v9943_v55  ;;  %6993 = vmatprep.subr.bf16.mxu0 %v9948_v35  ;;  %v9991_v55 = vld [vmem:[%s14362_s1 + $0xcc] ss:$16 sps:$4 sm:$0xff]  }
 0x1e9   :  { %7034 = vmatprep.subr.bf16.mxu1 %v9951_v28  ;;  %v9994_v35 = vld [vmem:[%s14362_s1 + $0x2cc] ss:$16 sps:$4 sm:$0xff]   ;;  %v9989_v28 = vld [vmem:[%s14362_s1 + $0xc8] ss:$16 sps:$4 sm:$0xff]  }
 0x1eb   :  { %6994 = vmatpush2.bf16.msra.mxu0 %v9946_v29  ;;  %v9992_v29 = vld [vmem:[%s14362_s1 + $0x2c8] ss:$16 sps:$4 sm:$0xff]  }
 0x1ec   :  { %7035 = vmatpush2.bf16.msra.mxu1 %v9949_v30  ;;  %6995 = vmatprep.subr.bf16.mxu0 %v9954_v34 }
 0x1ed   :  { %7036 = vmatprep.subr.bf16.mxu1 %v9957_v37 }
 0x1ef   :  { %6996 = vmatpush2.bf16.msra.mxu0 %v9952_v32 }
 0x1f0   :  { %7037 = vmatpush2.bf16.msra.mxu1 %v9955_v40  ;;  %6997 = vmatprep.subr.bf16.mxu0 %v9960_v44  ;;  %v9997_v44 = vld [vmem:[%s14362_s1 + $0xac] ss:$16 sps:$4 sm:$0xff]  }
 0x1f1   :  { %7038 = vmatprep.subr.bf16.mxu1 %v9963_v62  ;;  %v10000_v62 = vld [vmem:[%s14362_s1 + $0x2ac] ss:$16 sps:$4 sm:$0xff]  }
 0x1f3   :  { %6998 = vmatpush2.bf16.msra.mxu0 %v9958_v46 }
 0x1f4   :  { %7039 = vmatpush2.bf16.msra.mxu1 %v9961_v47  ;;  %6999 = vmatprep.subr.bf16.mxu0 %v9966_v51  ;;  %v9998_v51 = vld [vmem:[%s14362_s1 + $0x2a8] ss:$16 sps:$4 sm:$0xff]  }
 0x1f5   :  { %7040 = vmatprep.subr.bf16.mxu1 %v9969_v52 }
 0x1f7   :  { %7000 = vmatpush2.bf16.msra.mxu0 %v9964_v56 }
 0x1f8   :  { %7041 = vmatpush2.bf16.msra.mxu1 %v9967_v45  ;;  %7001 = vmatprep.subr.bf16.mxu0 %v9972_v58 }
 0x1f9   :  { %7042 = vmatprep.subr.bf16.mxu1 %v9975_v61  ;;  %v10003_v61 = vld [vmem:[%s14362_s1 + $0x8c] ss:$16 sps:$4 sm:$0xff]  }
 0x1fb   :  { %7002 = vmatpush2.bf16.msra.mxu0 %v9970_v1  ;;  %v10004_v1 = vld [vmem:[%s14362_s1 + $0x288] ss:$16 sps:$4 sm:$0xff]  }
 0x1fc   :  { %7043 = vmatpush2.bf16.msra.mxu1 %v9973_v2  ;;  %7003 = vmatprep.subr.bf16.mxu0 %v9978_v5  ;;  %v10009_v2 = vld [vmem:[%s14362_s1 + $0x6c] ss:$16 sps:$4 sm:$0xff]  }
 0x1fd   :  { %7044 = vmatprep.subr.bf16.mxu1 %v9981_v7  ;;  %v10012_v5 = vld [vmem:[%s14362_s1 + $0x26c] ss:$16 sps:$4 sm:$0xff]   ;;  %v10007_v7 = vld [vmem:[%s14362_s1 + $0x68] ss:$16 sps:$4 sm:$0xff]  }
 0x1ff   :  { %7004 = vmatpush2.bf16.msra.mxu0 %v9976_v10  ;;  %v10010_v10 = vld [vmem:[%s14362_s1 + $0x268] ss:$16 sps:$4 sm:$0xff]  }
 0x200   :  { %7045 = vmatpush2.bf16.msra.mxu1 %v9979_v38  ;;  %7055 = vmatprep.subr.bf16.mxu0 %v9985_v15  ;;  %v10015_v38 = vld [vmem:[%s14362_s1 + $0x4c] ss:$16 sps:$4 sm:$0xff]  }
 0x201   :  { %7096 = vmatprep.subr.bf16.mxu1 %v9988_v49  ;;  %v10018_v15 = vld [vmem:[%s14362_s1 + $0x24c] ss:$16 sps:$4 sm:$0xff]   ;;  %v10013_v49 = vld [vmem:[%s14362_s1 + $0x48] ss:$16 sps:$4 sm:$0xff]  }
 0x202   :  { %v6761_v30 = vpop.f32.mrf.mxu0  ;;  %7006 = vmatmul.mubr.bf16.vlgmr.msra.gmra.mxu0 %v12619_v8 }
 0x203   :  { %v6802_v34 = vpop.f32.mrf.mxu1  ;;  %7047 = vmatmul.mubr.bf16.vlgmr.msra.gmra.mxu1 %v12641_v16  ;;  %v6762_v37 = vadd.f32 %v6761_v30, %v12454_v9  ;;  %7056 = vmatpush1.bf16.msra.mxu0 %v9983_v27  ;;  %v9995_v9 = vld [vmem:[%s14362_s1 + $0xa8] ss:$16 sps:$4 sm:$0xff]   ;;  %v10030_v30 = vld [vmem:[%s14362_s1 + $0x20c] ss:$16 sps:$4 sm:$0xff]  }
 0x204   :  { %7097 = vmatpush1.bf16.msra.mxu1 %v9986_v57  ;;  %v6763_v32 = vpop.f32.mrf.mxu0  ;;  %7057 = vmatprep.subr.bf16.mxu0 %v9991_v55  ;;  %v10016_v27 = vld [vmem:[%s14362_s1 + $0x248] ss:$16 sps:$4 sm:$0xff]   ;;  %v10021_v57 = vld [vmem:[%s14362_s1 + $0x2c] ss:$16 sps:$4 sm:$0xff]  }
 0x205   :  { %v6804_v40 = vpop.f32.mrf.mxu1  ;;  %7098 = vmatprep.subr.bf16.mxu1 %v9994_v35  ;;  %v12664_v46 = vadd.f32 %v6802_v34, %v6762_v37  ;;  %v6764_v47 = vadd.f32 %v6763_v32, %v12465_v20  ;;  %7087 = vmatprep.mubr.bf16.mxu0 %v11019_v60  ;;  %v10006_v60 = vld [vmem:[%s14362_s1 + $0x28c] ss:$16 sps:$4 sm:$0xff]   ;;  %v10019_v35 = vld [vmem:[%s14362_s1 + $0x28] ss:$16 sps:$4 sm:$0xff]  }
 0x206   :  { %7128 = vmatprep.mubr.bf16.mxu1 %v11032_v0  ;;  %v6765_v52 = vpop.f32.mrf.mxu0  ;;  %v10001_v0 = vld [vmem:[%s14362_s1 + $0x88] ss:$16 sps:$4 sm:$0xff]   ;;  %v10024_v55 = vld [vmem:[%s14362_s1 + $0x22c] ss:$16 sps:$4 sm:$0xff]  }
 0x207   :  { %v6806_v56 = vpop.f32.mrf.mxu1  ;;  %v12675_v45 = vadd.f32 %v6804_v40, %v6764_v47  ;;  %7058 = vmatpush1.bf16.msra.mxu0 %v9989_v28  ;;  %v10022_v28 = vld [vmem:[%s14362_s1 + $0x228] ss:$16 sps:$4 sm:$0xff]   ;;  %v10033_v32 = vld [vmem:[%s14362_s1 + $0x1ec] ss:$16 sps:$4 sm:$0xff]  }
 0x208   :  { %7099 = vmatpush1.bf16.msra.mxu1 %v9992_v29  ;;  %v6766_v58 = vpop.f32.mrf.mxu0  ;;  %7059 = vmatprep.subr.bf16.mxu0 %v9997_v44  ;;  %v10027_v29 = vld [vmem:[%s14362_s1 + $0xc] ss:$16 sps:$4 sm:$0xff]   ;;  %v10025_v34 = vld [vmem:[%s14362_s1 + $0x8] ss:$16 sps:$4 sm:$0xff]  }
 0x209   :  { %v6807_v20 = vpop.f32.mrf.mxu1  ;;  %7100 = vmatprep.subr.bf16.mxu1 %v10000_v62  ;;  %v10028_v37 = vld [vmem:[%s14362_s1 + $0x208] ss:$16 sps:$4 sm:$0xff]   ;;  %v10036_v40 = vld [vmem:[%s14362_s1 + $0x3ec] ss:$16 sps:$4 sm:$0xff]  }
 0x20a   :  { %v10031_v44 = vld [vmem:[%s14362_s1 + $0x1e8] ss:$16 sps:$4 sm:$0xff]   ;;  %v10039_v47 = vld [vmem:[%s14362_s1 + $0x1cc] ss:$16 sps:$4 sm:$0xff]  }
 0x20b   :  { %7060 = vmatpush1.bf16.msra.mxu0 %v9995_v9  ;;  %v10034_v62 = vld [vmem:[%s14362_s1 + $0x3e8] ss:$16 sps:$4 sm:$0xff]   ;;  %v10042_v9 = vld [vmem:[%s14362_s1 + $0x3cc] ss:$16 sps:$4 sm:$0xff]  }
 0x20c   :  { %7101 = vmatpush1.bf16.msra.mxu1 %v9998_v51  ;;  %7061 = vmatprep.subr.bf16.mxu0 %v10003_v61  ;;  %v10037_v51 = vld [vmem:[%s14362_s1 + $0x1c8] ss:$16 sps:$4 sm:$0xff]   ;;  %v10045_v56 = vld [vmem:[%s14362_s1 + $0x1ac] ss:$16 sps:$4 sm:$0xff]  }
 0x20d   :  { %7102 = vmatprep.subr.bf16.mxu1 %v10006_v60  ;;  %v10040_v52 = vld [vmem:[%s14362_s1 + $0x3c8] ss:$16 sps:$4 sm:$0xff]   ;;  %v10048_v58 = vld [vmem:[%s14362_s1 + $0x3ac] ss:$16 sps:$4 sm:$0xff]  }
 0x20e   :  { %v10043_v20 = vld [vmem:[%s14362_s1 + $0x1a8] ss:$16 sps:$4 sm:$0xff]   ;;  %v10051_v60 = vld [vmem:[%s14362_s1 + $0x18c] ss:$16 sps:$4 sm:$0xff]  }
 0x20f   :  { %7062 = vmatpush1.bf16.msra.mxu0 %v10001_v0  ;;  %v10046_v61 = vld [vmem:[%s14362_s1 + $0x3a8] ss:$16 sps:$4 sm:$0xff]   ;;  %v10054_v0 = vld [vmem:[%s14362_s1 + $0x38c] ss:$16 sps:$4 sm:$0xff]  }
 0x210   :  { %7103 = vmatpush1.bf16.msra.mxu1 %v10004_v1  ;;  %7063 = vmatprep.subr.bf16.mxu0 %v10009_v2  ;;  %v10049_v1 = vld [vmem:[%s14362_s1 + $0x188] ss:$16 sps:$4 sm:$0xff]  }
 0x211   :  { %7104 = vmatprep.subr.bf16.mxu1 %v10012_v5  ;;  %v10052_v2 = vld [vmem:[%s14362_s1 + $0x388] ss:$16 sps:$4 sm:$0xff]   ;;  %v10057_v5 = vld [vmem:[%s14362_s1 + $0x16c] ss:$16 sps:$4 sm:$0xff]  }
 0x213   :  { %7064 = vmatpush1.bf16.msra.mxu0 %v10007_v7  ;;  %v10060_v7 = vld [vmem:[%s14362_s1 + $0x36c] ss:$16 sps:$4 sm:$0xff]  }
 0x214   :  { %7105 = vmatpush1.bf16.msra.mxu1 %v10010_v10  ;;  %7065 = vmatprep.subr.bf16.mxu0 %v10015_v38  ;;  %v10055_v10 = vld [vmem:[%s14362_s1 + $0x168] ss:$16 sps:$4 sm:$0xff]  }
 0x215   :  { %7106 = vmatprep.subr.bf16.mxu1 %v10018_v15  ;;  %v10058_v38 = vld [vmem:[%s14362_s1 + $0x368] ss:$16 sps:$4 sm:$0xff]   ;;  %v10063_v15 = vld [vmem:[%s14362_s1 + $0x14c] ss:$16 sps:$4 sm:$0xff]  }
 0x217   :  { %7066 = vmatpush1.bf16.msra.mxu0 %v10013_v49  ;;  %v10066_v49 = vld [vmem:[%s14362_s1 + $0x34c] ss:$16 sps:$4 sm:$0xff]  }
 0x218   :  { %7107 = vmatpush1.bf16.msra.mxu1 %v10016_v27  ;;  %7067 = vmatprep.subr.bf16.mxu0 %v10021_v57  ;;  %v10061_v27 = vld [vmem:[%s14362_s1 + $0x148] ss:$16 sps:$4 sm:$0xff]  }
 0x219   :  { %7108 = vmatprep.subr.bf16.mxu1 %v10024_v55  ;;  %v10064_v57 = vld [vmem:[%s14362_s1 + $0x348] ss:$16 sps:$4 sm:$0xff]   ;;  %v10069_v55 = vld [vmem:[%s14362_s1 + $0x12c] ss:$16 sps:$4 sm:$0xff]  }
 0x21b   :  { %7068 = vmatpush1.bf16.msra.mxu0 %v10019_v35  ;;  %v10072_v35 = vld [vmem:[%s14362_s1 + $0x32c] ss:$16 sps:$4 sm:$0xff]  }
 0x21c   :  { %7109 = vmatpush1.bf16.msra.mxu1 %v10022_v28  ;;  %7069 = vmatprep.subr.bf16.mxu0 %v10027_v29  ;;  %v10067_v28 = vld [vmem:[%s14362_s1 + $0x128] ss:$16 sps:$4 sm:$0xff]  }
 0x21d   :  { %7110 = vmatprep.subr.bf16.mxu1 %v10030_v30  ;;  %v10070_v29 = vld [vmem:[%s14362_s1 + $0x328] ss:$16 sps:$4 sm:$0xff]   ;;  %v10075_v30 = vld [vmem:[%s14362_s1 + $0x10c] ss:$16 sps:$4 sm:$0xff]  }
 0x21f   :  { %7070 = vmatpush1.bf16.msra.mxu0 %v10025_v34  ;;  %v10078_v34 = vld [vmem:[%s14362_s1 + $0x30c] ss:$16 sps:$4 sm:$0xff]  }
 0x220   :  { %7111 = vmatpush1.bf16.msra.mxu1 %v10028_v37  ;;  %7071 = vmatprep.subr.bf16.mxu0 %v10033_v32  ;;  %v10073_v37 = vld [vmem:[%s14362_s1 + $0x108] ss:$16 sps:$4 sm:$0xff]  }
 0x221   :  { %7112 = vmatprep.subr.bf16.mxu1 %v10036_v40  ;;  %v10076_v32 = vld [vmem:[%s14362_s1 + $0x308] ss:$16 sps:$4 sm:$0xff]   ;;  %v10081_v40 = vld [vmem:[%s14362_s1 + $0x4ec] ss:$16 sps:$4 sm:$0xff]  }
 0x223   :  { %7072 = vmatpush2.bf16.msra.mxu0 %v10031_v44  ;;  %v10084_v44 = vld [vmem:[%s14362_s1 + $0x6ec] ss:$16 sps:$4 sm:$0xff]  }
 0x224   :  { %7113 = vmatpush2.bf16.msra.mxu1 %v10034_v62  ;;  %7073 = vmatprep.subr.bf16.mxu0 %v10039_v47  ;;  %v10079_v62 = vld [vmem:[%s14362_s1 + $0x4e8] ss:$16 sps:$4 sm:$0xff]  }
 0x225   :  { %7114 = vmatprep.subr.bf16.mxu1 %v10042_v9  ;;  %v10082_v47 = vld [vmem:[%s14362_s1 + $0x6e8] ss:$16 sps:$4 sm:$0xff]   ;;  %v10087_v9 = vld [vmem:[%s14362_s1 + $0x4cc] ss:$16 sps:$4 sm:$0xff]  }
 0x227   :  { %7074 = vmatpush2.bf16.msra.mxu0 %v10037_v51  ;;  %v10090_v51 = vld [vmem:[%s14362_s1 + $0x6cc] ss:$16 sps:$4 sm:$0xff]  }
 0x228   :  { %7115 = vmatpush2.bf16.msra.mxu1 %v10040_v52  ;;  %7075 = vmatprep.subr.bf16.mxu0 %v10045_v56  ;;  %v10085_v52 = vld [vmem:[%s14362_s1 + $0x4c8] ss:$16 sps:$4 sm:$0xff]  }
 0x229   :  { %7116 = vmatprep.subr.bf16.mxu1 %v10048_v58  ;;  %v10088_v56 = vld [vmem:[%s14362_s1 + $0x6c8] ss:$16 sps:$4 sm:$0xff]  }
 0x22b   :  { %7076 = vmatpush2.bf16.msra.mxu0 %v10043_v20 }
 0x22c   :  { %7117 = vmatpush2.bf16.msra.mxu1 %v10046_v61  ;;  %7077 = vmatprep.subr.bf16.mxu0 %v10051_v60 }
 0x22d   :  { %7118 = vmatprep.subr.bf16.mxu1 %v10054_v0 }
 0x22f   :  { %7078 = vmatpush2.bf16.msra.mxu0 %v10049_v1  ;;  %v10093_v1 = vld [vmem:[%s14362_s1 + $0x4ac] ss:$16 sps:$4 sm:$0xff]  }
 0x230   :  { %7119 = vmatpush2.bf16.msra.mxu1 %v10052_v2  ;;  %7079 = vmatprep.subr.bf16.mxu0 %v10057_v5  ;;  %v10096_v2 = vld [vmem:[%s14362_s1 + $0x6ac] ss:$16 sps:$4 sm:$0xff]  }
 0x231   :  { %7120 = vmatprep.subr.bf16.mxu1 %v10060_v7 }
 0x233   :  { %7080 = vmatpush2.bf16.msra.mxu0 %v10055_v10 }
 0x234   :  { %7121 = vmatpush2.bf16.msra.mxu1 %v10058_v38  ;;  %7081 = vmatprep.subr.bf16.mxu0 %v10063_v15 }
 0x235   :  { %7122 = vmatprep.subr.bf16.mxu1 %v10066_v49  ;;  %v10099_v49 = vld [vmem:[%s14362_s1 + $0x48c] ss:$16 sps:$4 sm:$0xff]  }
 0x237   :  { %7082 = vmatpush2.bf16.msra.mxu0 %v10061_v27  ;;  %v10100_v27 = vld [vmem:[%s14362_s1 + $0x688] ss:$16 sps:$4 sm:$0xff]  }
 0x238   :  { %7123 = vmatpush2.bf16.msra.mxu1 %v10064_v57  ;;  %7083 = vmatprep.subr.bf16.mxu0 %v10069_v55  ;;  %v10105_v57 = vld [vmem:[%s14362_s1 + $0x46c] ss:$16 sps:$4 sm:$0xff]  }
 0x239   :  { %7124 = vmatprep.subr.bf16.mxu1 %v10072_v35  ;;  %v10108_v55 = vld [vmem:[%s14362_s1 + $0x66c] ss:$16 sps:$4 sm:$0xff]   ;;  %v10103_v35 = vld [vmem:[%s14362_s1 + $0x468] ss:$16 sps:$4 sm:$0xff]  }
 0x23b   :  { %7084 = vmatpush2.bf16.msra.mxu0 %v10067_v28  ;;  %v10106_v28 = vld [vmem:[%s14362_s1 + $0x668] ss:$16 sps:$4 sm:$0xff]  }
 0x23c   :  { %7125 = vmatpush2.bf16.msra.mxu1 %v10070_v29  ;;  %7085 = vmatprep.subr.bf16.mxu0 %v10075_v30  ;;  %v10111_v29 = vld [vmem:[%s14362_s1 + $0x44c] ss:$16 sps:$4 sm:$0xff]  }
 0x23d   :  { %7126 = vmatprep.subr.bf16.mxu1 %v10078_v34  ;;  %v10114_v30 = vld [vmem:[%s14362_s1 + $0x64c] ss:$16 sps:$4 sm:$0xff]   ;;  %v10109_v34 = vld [vmem:[%s14362_s1 + $0x448] ss:$16 sps:$4 sm:$0xff]  }
 0x23f   :  { %7086 = vmatpush2.bf16.msra.mxu0 %v10073_v37  ;;  %v10112_v37 = vld [vmem:[%s14362_s1 + $0x648] ss:$16 sps:$4 sm:$0xff]  }
 0x240   :  { %7127 = vmatpush2.bf16.msra.mxu1 %v10076_v32  ;;  %7137 = vmatprep.subr.bf16.mxu0 %v10081_v40  ;;  %v10117_v32 = vld [vmem:[%s14362_s1 + $0x42c] ss:$16 sps:$4 sm:$0xff]  }
 0x241   :  { %7178 = vmatprep.subr.bf16.mxu1 %v10084_v44  ;;  %v10120_v40 = vld [vmem:[%s14362_s1 + $0x62c] ss:$16 sps:$4 sm:$0xff]   ;;  %v10115_v44 = vld [vmem:[%s14362_s1 + $0x428] ss:$16 sps:$4 sm:$0xff]  }
 0x242   :  { %v6843_v58 = vpop.f32.mrf.mxu0  ;;  %7088 = vmatmul.mubr.bf16.vlgmr.msra.gmra.mxu0 %v11069_v13 }
 0x243   :  { %v6884_v20 = vpop.f32.mrf.mxu1  ;;  %7129 = vmatmul.mubr.bf16.vlgmr.msra.gmra.mxu1 %v11085_v18  ;;  %v6844_v61 = vadd.f32 %v6843_v58, %v12664_v46  ;;  %7138 = vmatpush1.bf16.msra.mxu0 %v10079_v62  ;;  %v10091_v18 = vld [vmem:[%s14362_s1 + $0x4a8] ss:$16 sps:$4 sm:$0xff]   ;;  %v10132_v58 = vld [vmem:[%s14362_s1 + $0x7ec] ss:$16 sps:$4 sm:$0xff]  }
 0x244   :  { %7179 = vmatpush1.bf16.msra.mxu1 %v10082_v47  ;;  %v6845_v60 = vpop.f32.mrf.mxu0  ;;  %7139 = vmatprep.subr.bf16.mxu0 %v10087_v9  ;;  %v10094_v46 = vld [vmem:[%s14362_s1 + $0x6a8] ss:$16 sps:$4 sm:$0xff]   ;;  %v10123_v47 = vld [vmem:[%s14362_s1 + $0x40c] ss:$16 sps:$4 sm:$0xff]  }
 0x245   :  { %v6886_v0 = vpop.f32.mrf.mxu1  ;;  %7180 = vmatprep.subr.bf16.mxu1 %v10090_v51  ;;  %v12866_v5 = vadd.f32 %v6884_v20, %v6844_v61  ;;  %v6846_v13 = vadd.f32 %v6845_v60, %v12675_v45  ;;  %7169 = vmatprep.mubr.bf16.mxu0 %v11081_v17  ;;  %v10102_v17 = vld [vmem:[%s14362_s1 + $0x68c] ss:$16 sps:$4 sm:$0xff]   ;;  %v10118_v62 = vld [vmem:[%s14362_s1 + $0x628] ss:$16 sps:$4 sm:$0xff]  }
 0x246   :  { %7210 = vmatprep.mubr.bf16.mxu1 %v11101_v23  ;;  %v6847_v7 = vpop.f32.mrf.mxu0  ;;  %v10097_v23 = vld [vmem:[%s14362_s1 + $0x488] ss:$16 sps:$4 sm:$0xff]   ;;  %v10126_v9 = vld [vmem:[%s14362_s1 + $0x60c] ss:$16 sps:$4 sm:$0xff]  }
 0x247   :  { %v6888_v10 = vpop.f32.mrf.mxu1  ;;  %v12877_v38 = vadd.f32 %v6886_v0, %v6846_v13  ;;  %7140 = vmatpush1.bf16.msra.mxu0 %v10085_v52  ;;  %v10121_v51 = vld [vmem:[%s14362_s1 + $0x408] ss:$16 sps:$4 sm:$0xff]   ;;  %v10135_v60 = vld [vmem:[%s14362_s1 + $0x5cc] ss:$16 sps:$4 sm:$0xff]  }
 0x248   :  { %7181 = vmatpush1.bf16.msra.mxu1 %v10088_v56  ;;  %v6848_v15 = vpop.f32.mrf.mxu0  ;;  %7141 = vmatprep.subr.bf16.mxu0 %v10093_v1  ;;  %v10124_v52 = vld [vmem:[%s14362_s1 + $0x608] ss:$16 sps:$4 sm:$0xff]   ;;  %v10129_v56 = vld [vmem:[%s14362_s1 + $0x5ec] ss:$16 sps:$4 sm:$0xff]  }
 0x249   :  { %v6889_v45 = vpop.f32.mrf.mxu1  ;;  %7182 = vmatprep.subr.bf16.mxu1 %v10096_v2  ;;  %v10127_v20 = vld [vmem:[%s14362_s1 + $0x5e8] ss:$16 sps:$4 sm:$0xff]   ;;  %v10138_v0 = vld [vmem:[%s14362_s1 + $0x7cc] ss:$16 sps:$4 sm:$0xff]  }
 0x24a   :  { %v10130_v61 = vld [vmem:[%s14362_s1 + $0x7e8] ss:$16 sps:$4 sm:$0xff]  }
 0x24b   :  { %7142 = vmatpush1.bf16.msra.mxu0 %v10091_v18 }
 0x24c   :  { %7183 = vmatpush1.bf16.msra.mxu1 %v10094_v46  ;;  %7143 = vmatprep.subr.bf16.mxu0 %v10099_v49 }
 0x24d   :  { %7184 = vmatprep.subr.bf16.mxu1 %v10102_v17 }
 0x24f   :  { %7144 = vmatpush1.bf16.msra.mxu0 %v10097_v23 }
 0x250   :  { %7185 = vmatpush1.bf16.msra.mxu1 %v10100_v27  ;;  %7145 = vmatprep.subr.bf16.mxu0 %v10105_v57 }
 0x251   :  { %7186 = vmatprep.subr.bf16.mxu1 %v10108_v55 }
 0x253   :  { %7146 = vmatpush1.bf16.msra.mxu0 %v10103_v35 }
 0x254   :  { %7187 = vmatpush1.bf16.msra.mxu1 %v10106_v28  ;;  %7147 = vmatprep.subr.bf16.mxu0 %v10111_v29 }
 0x255   :  { %7188 = vmatprep.subr.bf16.mxu1 %v10114_v30 }
 0x257   :  { %7148 = vmatpush1.bf16.msra.mxu0 %v10109_v34 }
 0x258   :  { %7189 = vmatpush1.bf16.msra.mxu1 %v10112_v37  ;;  %7149 = vmatprep.subr.bf16.mxu0 %v10117_v32 }
 0x259   :  { %7190 = vmatprep.subr.bf16.mxu1 %v10120_v40 }
 0x25b   :  { %7150 = vmatpush1.bf16.msra.mxu0 %v10115_v44 }
 0x25c   :  { %7191 = vmatpush1.bf16.msra.mxu1 %v10118_v62  ;;  %7151 = vmatprep.subr.bf16.mxu0 %v10123_v47 }
 0x25d   :  { %7192 = vmatprep.subr.bf16.mxu1 %v10126_v9 }
 0x25f   :  { %7152 = vmatpush1.bf16.msra.mxu0 %v10121_v51 }
 0x260   :  { %7193 = vmatpush1.bf16.msra.mxu1 %v10124_v52  ;;  %7153 = vmatprep.subr.bf16.mxu0 %v10129_v56 }
 0x261   :  { %7194 = vmatprep.subr.bf16.mxu1 %v10132_v58 }
 0x262   :  { %11 = vsyncpa [#allocation5], 0  ;;  %v10133_v1 = vld [vmem:[%s14362_s1 + $0x5c8] ss:$16 sps:$4 sm:$0xff]   ;;  %v10141_v13 = vld [vmem:[%s14362_s1 + $0x5ac] ss:$16 sps:$4 sm:$0xff]  }
 0x263   :  { %7154 = vmatpush2.bf16.msra.mxu0 %v10127_v20  ;;  %v10136_v2 = vld [vmem:[%s14362_s1 + $0x7c8] ss:$16 sps:$4 sm:$0xff]   ;;  %v10144_v18 = vld [vmem:[%s14362_s1 + $0x7ac] ss:$16 sps:$4 sm:$0xff]  }
 0x264   :  { %7195 = vmatpush2.bf16.msra.mxu1 %v10130_v61  ;;  %7155 = vmatprep.subr.bf16.mxu0 %v10135_v60  ;;  %v10139_v46 = vld [vmem:[%s14362_s1 + $0x5a8] ss:$16 sps:$4 sm:$0xff]   ;;  %v10147_v10 = vld [vmem:[%s14362_s1 + $0x58c] ss:$16 sps:$4 sm:$0xff]  }
 0x265   :  { %7196 = vmatprep.subr.bf16.mxu1 %v10138_v0  ;;  %v10142_v7 = vld [vmem:[%s14362_s1 + $0x7a8] ss:$16 sps:$4 sm:$0xff]   ;;  %v10150_v15 = vld [vmem:[%s14362_s1 + $0x78c] ss:$16 sps:$4 sm:$0xff]  }
 0x266   :  { %v10145_v45 = vld [vmem:[%s14362_s1 + $0x588] ss:$16 sps:$4 sm:$0xff]   ;;  %v10153_v17 = vld [vmem:[%s14362_s1 + $0x56c] ss:$16 sps:$4 sm:$0xff]  }
 0x267   :  { %7156 = vmatpush2.bf16.msra.mxu0 %v10133_v1  ;;  %v10148_v49 = vld [vmem:[%s14362_s1 + $0x788] ss:$16 sps:$4 sm:$0xff]   ;;  %v10156_v23 = vld [vmem:[%s14362_s1 + $0x76c] ss:$16 sps:$4 sm:$0xff]  }
 0x268   :  { %7197 = vmatpush2.bf16.msra.mxu1 %v10136_v2  ;;  %7157 = vmatprep.subr.bf16.mxu0 %v10141_v13  ;;  %v10151_v27 = vld [vmem:[%s14362_s1 + $0x568] ss:$16 sps:$4 sm:$0xff]   ;;  %v10159_v55 = vld [vmem:[%s14362_s1 + $0x54c] ss:$16 sps:$4 sm:$0xff]  }
 0x269   :  { %7198 = vmatprep.subr.bf16.mxu1 %v10144_v18  ;;  %v10154_v57 = vld [vmem:[%s14362_s1 + $0x768] ss:$16 sps:$4 sm:$0xff]   ;;  %v10162_v35 = vld [vmem:[%s14362_s1 + $0x74c] ss:$16 sps:$4 sm:$0xff]  }
 0x26a   :  { %v10157_v28 = vld [vmem:[%s14362_s1 + $0x548] ss:$16 sps:$4 sm:$0xff]   ;;  %v10165_v30 = vld [vmem:[%s14362_s1 + $0x52c] ss:$16 sps:$4 sm:$0xff]  }
 0x26b   :  { %7158 = vmatpush2.bf16.msra.mxu0 %v10139_v46  ;;  %v10160_v29 = vld [vmem:[%s14362_s1 + $0x748] ss:$16 sps:$4 sm:$0xff]   ;;  %v10168_v34 = vld [vmem:[%s14362_s1 + $0x72c] ss:$16 sps:$4 sm:$0xff]  }
 0x26c   :  { %7199 = vmatpush2.bf16.msra.mxu1 %v10142_v7  ;;  %7159 = vmatprep.subr.bf16.mxu0 %v10147_v10  ;;  %v10163_v37 = vld [vmem:[%s14362_s1 + $0x528] ss:$16 sps:$4 sm:$0xff]   ;;  %v10171_v40 = vld [vmem:[%s14362_s1 + $0x50c] ss:$16 sps:$4 sm:$0xff]  }
 0x26d   :  { %7200 = vmatprep.subr.bf16.mxu1 %v10150_v15  ;;  %v10166_v32 = vld [vmem:[%s14362_s1 + $0x728] ss:$16 sps:$4 sm:$0xff]   ;;  %v10174_v44 = vld [vmem:[%s14362_s1 + $0x70c] ss:$16 sps:$4 sm:$0xff]  }
 0x26e   :  { %v10169_v62 = vld [vmem:[%s14362_s1 + $0x508] ss:$16 sps:$4 sm:$0xff]   ;;  %v10177_v9 = vld [vmem:[%s14362_s1 + $0x8ec] ss:$16 sps:$4 sm:$0xff]  }
 0x26f   :  { %7160 = vmatpush2.bf16.msra.mxu0 %v10145_v45  ;;  %v10172_v47 = vld [vmem:[%s14362_s1 + $0x708] ss:$16 sps:$4 sm:$0xff]   ;;  %v10180_v51 = vld [vmem:[%s14362_s1 + $0xaec] ss:$16 sps:$4 sm:$0xff]  }
 0x270   :  { %7201 = vmatpush2.bf16.msra.mxu1 %v10148_v49  ;;  %7161 = vmatprep.subr.bf16.mxu0 %v10153_v17  ;;  %v10175_v52 = vld [vmem:[%s14362_s1 + $0x8e8] ss:$16 sps:$4 sm:$0xff]   ;;  %v10183_v58 = vld [vmem:[%s14362_s1 + $0x8cc] ss:$16 sps:$4 sm:$0xff]  }
 0x271   :  { %7202 = vmatprep.subr.bf16.mxu1 %v10156_v23  ;;  %v10178_v56 = vld [vmem:[%s14362_s1 + $0xae8] ss:$16 sps:$4 sm:$0xff]   ;;  %v10186_v20 = vld [vmem:[%s14362_s1 + $0xacc] ss:$16 sps:$4 sm:$0xff]  }
 0x272   :  { %v10181_v1 = vld [vmem:[%s14362_s1 + $0x8c8] ss:$16 sps:$4 sm:$0xff]  }
 0x273   :  { %7162 = vmatpush2.bf16.msra.mxu0 %v10151_v27  ;;  %v10184_v2 = vld [vmem:[%s14362_s1 + $0xac8] ss:$16 sps:$4 sm:$0xff]  }
 0x274   :  { %7203 = vmatpush2.bf16.msra.mxu1 %v10154_v57  ;;  %7163 = vmatprep.subr.bf16.mxu0 %v10159_v55  ;;  %v10187_v45 = vld [vmem:[%s14362_s1 + $0x8a8] ss:$16 sps:$4 sm:$0xff]   ;;  %v10201_v57 = vld [vmem:[%s14362_s1 + $0x86c] ss:$16 sps:$4 sm:$0xff]  }
 0x275   :  { %7204 = vmatprep.subr.bf16.mxu1 %v10162_v35  ;;  %v10190_v49 = vld [vmem:[%s14362_s1 + $0xaa8] ss:$16 sps:$4 sm:$0xff]   ;;  %v10204_v55 = vld [vmem:[%s14362_s1 + $0xa6c] ss:$16 sps:$4 sm:$0xff]  }
 0x276   :  { %v10193_v23 = vld [vmem:[%s14362_s1 + $0x888] ss:$16 sps:$4 sm:$0xff]  }
 0x277   :  { %7164 = vmatpush2.bf16.msra.mxu0 %v10157_v28  ;;  %v10196_v27 = vld [vmem:[%s14362_s1 + $0xa88] ss:$16 sps:$4 sm:$0xff]  }
 0x278   :  { %7205 = vmatpush2.bf16.msra.mxu1 %v10160_v29  ;;  %7165 = vmatprep.subr.bf16.mxu0 %v10165_v30  ;;  %v10199_v35 = vld [vmem:[%s14362_s1 + $0x868] ss:$16 sps:$4 sm:$0xff]   ;;  %v10207_v29 = vld [vmem:[%s14362_s1 + $0x84c] ss:$16 sps:$4 sm:$0xff]  }
 0x279   :  { %7206 = vmatprep.subr.bf16.mxu1 %v10168_v34  ;;  %v10202_v28 = vld [vmem:[%s14362_s1 + $0xa68] ss:$16 sps:$4 sm:$0xff]   ;;  %v10210_v30 = vld [vmem:[%s14362_s1 + $0xa4c] ss:$16 sps:$4 sm:$0xff]  }
 0x27a   :  { %v10205_v34 = vld [vmem:[%s14362_s1 + $0x848] ss:$16 sps:$4 sm:$0xff]  }
 0x27b   :  { %7166 = vmatpush2.bf16.msra.mxu0 %v10163_v37  ;;  %v10208_v37 = vld [vmem:[%s14362_s1 + $0xa48] ss:$16 sps:$4 sm:$0xff]  }
 0x27c   :  { %7207 = vmatpush2.bf16.msra.mxu1 %v10166_v32  ;;  %7167 = vmatprep.subr.bf16.mxu0 %v10171_v40  ;;  %v10213_v32 = vld [vmem:[%s14362_s1 + $0x82c] ss:$16 sps:$4 sm:$0xff]  }
 0x27d   :  { %7208 = vmatprep.subr.bf16.mxu1 %v10174_v44  ;;  %v10216_v40 = vld [vmem:[%s14362_s1 + $0xa2c] ss:$16 sps:$4 sm:$0xff]   ;;  %v10211_v44 = vld [vmem:[%s14362_s1 + $0x828] ss:$16 sps:$4 sm:$0xff]  }
 0x27f   :  { %7168 = vmatpush2.bf16.msra.mxu0 %v10169_v62  ;;  %v10214_v62 = vld [vmem:[%s14362_s1 + $0xa28] ss:$16 sps:$4 sm:$0xff]  }
 0x280   :  { %7209 = vmatpush2.bf16.msra.mxu1 %v10172_v47  ;;  %7219 = vmatprep.subr.bf16.mxu0 %v10177_v9  ;;  %v10219_v47 = vld [vmem:[%s14362_s1 + $0x80c] ss:$16 sps:$4 sm:$0xff]  }
 0x281   :  { %7260 = vmatprep.subr.bf16.mxu1 %v10180_v51  ;;  %v10222_v9 = vld [vmem:[%s14362_s1 + $0xa0c] ss:$16 sps:$4 sm:$0xff]   ;;  %v10217_v51 = vld [vmem:[%s14362_s1 + $0x808] ss:$16 sps:$4 sm:$0xff]  }
 0x282   :  { %v6925_v61 = vpop.f32.mrf.mxu0  ;;  %7170 = vmatmul.mubr.bf16.vlgmr.msra.gmra.mxu0 %v11280_v26  ;;  %v10189_v26 = vld [vmem:[%s14362_s1 + $0x8ac] ss:$16 sps:$4 sm:$0xff]  }
 0x283   :  { %v6966_v60 = vpop.f32.mrf.mxu1  ;;  %7211 = vmatmul.mubr.bf16.vlgmr.msra.gmra.mxu1 %v11293_v6  ;;  %v6926_v0 = vadd.f32 %v6925_v61, %v12866_v5  ;;  %7220 = vmatpush1.bf16.msra.mxu0 %v10175_v52  ;;  %v10192_v6 = vld [vmem:[%s14362_s1 + $0xaac] ss:$16 sps:$4 sm:$0xff]   ;;  %v10220_v52 = vld [vmem:[%s14362_s1 + $0xa08] ss:$16 sps:$4 sm:$0xff]  }
 0x284   :  { %7261 = vmatpush1.bf16.msra.mxu1 %v10178_v56  ;;  %v6927_v13 = vpop.f32.mrf.mxu0  ;;  %7221 = vmatprep.subr.bf16.mxu0 %v10183_v58  ;;  %v10225_v56 = vld [vmem:[%s14362_s1 + $0x9ec] ss:$16 sps:$4 sm:$0xff]   ;;  %v10226_v61 = vld [vmem:[%s14362_s1 + $0xbe8] ss:$16 sps:$4 sm:$0xff]  }
 0x285   :  { %v6968_v18 = vpop.f32.mrf.mxu1  ;;  %7262 = vmatprep.subr.bf16.mxu1 %v10186_v20  ;;  %v13068_v5 = vadd.f32 %v6966_v60, %v6926_v0  ;;  %v6928_v46 = vadd.f32 %v6927_v13, %v12877_v38  ;;  %7251 = vmatprep.mubr.bf16.mxu0 %v11333_v41  ;;  %v10195_v41 = vld [vmem:[%s14362_s1 + $0x88c] ss:$16 sps:$4 sm:$0xff]   ;;  %v10223_v20 = vld [vmem:[%s14362_s1 + $0x9e8] ss:$16 sps:$4 sm:$0xff]  }
 0x286   :  { %7292 = vmatprep.mubr.bf16.mxu1 %v11338_v42  ;;  %v6929_v7 = vpop.f32.mrf.mxu0  ;;  %v10198_v42 = vld [vmem:[%s14362_s1 + $0xa8c] ss:$16 sps:$4 sm:$0xff]  }
 0x287   :  { %v6970_v10 = vpop.f32.mrf.mxu1  ;;  %v13073_v15 = vadd.f32 %v6968_v18, %v6928_v46  ;;  %7222 = vmatpush1.bf16.msra.mxu0 %v10181_v1  ;;  %v10228_v58 = vld [vmem:[%s14362_s1 + $0xbec] ss:$16 sps:$4 sm:$0xff]   ;;  %v10229_v1 = vld [vmem:[%s14362_s1 + $0x9c8] ss:$16 sps:$4 sm:$0xff]  }
 0x288   :  { %7263 = vmatpush1.bf16.msra.mxu1 %v10184_v2  ;;  %v6930_v17 = vpop.f32.mrf.mxu0  ;;  %7223 = vmatprep.subr.bf16.mxu0 %v10189_v26  ;;  %v10231_v60 = vld [vmem:[%s14362_s1 + $0x9cc] ss:$16 sps:$4 sm:$0xff]   ;;  %v10232_v2 = vld [vmem:[%s14362_s1 + $0xbc8] ss:$16 sps:$4 sm:$0xff]  }
 0x289   :  { %v6971_v38 = vpop.f32.mrf.mxu1  ;;  %7264 = vmatprep.subr.bf16.mxu1 %v10192_v6  ;;  %v10234_v0 = vld [vmem:[%s14362_s1 + $0xbcc] ss:$16 sps:$4 sm:$0xff]   ;;  %v10235_v26 = vld [vmem:[%s14362_s1 + $0x9a8] ss:$16 sps:$4 sm:$0xff]  }
 0x28a   :  { %v10237_v13 = vld [vmem:[%s14362_s1 + $0x9ac] ss:$16 sps:$4 sm:$0xff]   ;;  %v10238_v6 = vld [vmem:[%s14362_s1 + $0xba8] ss:$16 sps:$4 sm:$0xff]  }
 0x28b   :  { %7224 = vmatpush1.bf16.msra.mxu0 %v10187_v45  ;;  %v10240_v18 = vld [vmem:[%s14362_s1 + $0xbac] ss:$16 sps:$4 sm:$0xff]   ;;  %v10241_v10 = vld [vmem:[%s14362_s1 + $0x988] ss:$16 sps:$4 sm:$0xff]  }
 0x28c   :  { %7265 = vmatpush1.bf16.msra.mxu1 %v10190_v49  ;;  %7225 = vmatprep.subr.bf16.mxu0 %v10195_v41  ;;  %v10243_v46 = vld [vmem:[%s14362_s1 + $0x98c] ss:$16 sps:$4 sm:$0xff]   ;;  %v10244_v45 = vld [vmem:[%s14362_s1 + $0xb88] ss:$16 sps:$4 sm:$0xff]  }
 0x28d   :  { %7266 = vmatprep.subr.bf16.mxu1 %v10198_v42  ;;  %v10246_v7 = vld [vmem:[%s14362_s1 + $0xb8c] ss:$16 sps:$4 sm:$0xff]   ;;  %v10247_v38 = vld [vmem:[%s14362_s1 + $0x968] ss:$16 sps:$4 sm:$0xff]  }
 0x28e   :  { %v10249_v49 = vld [vmem:[%s14362_s1 + $0x96c] ss:$16 sps:$4 sm:$0xff]   ;;  %v10250_v41 = vld [vmem:[%s14362_s1 + $0xb68] ss:$16 sps:$4 sm:$0xff]  }
 0x28f   :  { %7226 = vmatpush1.bf16.msra.mxu0 %v10193_v23  ;;  %v10252_v17 = vld [vmem:[%s14362_s1 + $0xb6c] ss:$16 sps:$4 sm:$0xff]  }
 0x290   :  { %7267 = vmatpush1.bf16.msra.mxu1 %v10196_v27  ;;  %7227 = vmatprep.subr.bf16.mxu0 %v10201_v57  ;;  %v10255_v42 = vld [vmem:[%s14362_s1 + $0x94c] ss:$16 sps:$4 sm:$0xff]   ;;  %v10253_v27 = vld [vmem:[%s14362_s1 + $0x948] ss:$16 sps:$4 sm:$0xff]  }
 0x291   :  { %7268 = vmatprep.subr.bf16.mxu1 %v10204_v55  ;;  %v10258_v23 = vld [vmem:[%s14362_s1 + $0xb4c] ss:$16 sps:$4 sm:$0xff]   ;;  %v10256_v57 = vld [vmem:[%s14362_s1 + $0xb48] ss:$16 sps:$4 sm:$0xff]  }
 0x292   :  { %v10261_v55 = vld [vmem:[%s14362_s1 + $0x92c] ss:$16 sps:$4 sm:$0xff]  }
 0x293   :  { %7228 = vmatpush1.bf16.msra.mxu0 %v10199_v35  ;;  %v10264_v35 = vld [vmem:[%s14362_s1 + $0xb2c] ss:$16 sps:$4 sm:$0xff]  }
 0x294   :  { %7269 = vmatpush1.bf16.msra.mxu1 %v10202_v28  ;;  %7229 = vmatprep.subr.bf16.mxu0 %v10207_v29  ;;  %v10259_v28 = vld [vmem:[%s14362_s1 + $0x928] ss:$16 sps:$4 sm:$0xff]  }
 0x295   :  { %7270 = vmatprep.subr.bf16.mxu1 %v10210_v30  ;;  %v10262_v29 = vld [vmem:[%s14362_s1 + $0xb28] ss:$16 sps:$4 sm:$0xff]   ;;  %v10267_v30 = vld [vmem:[%s14362_s1 + $0x90c] ss:$16 sps:$4 sm:$0xff]  }
 0x297   :  { %7230 = vmatpush1.bf16.msra.mxu0 %v10205_v34  ;;  %v10270_v34 = vld [vmem:[%s14362_s1 + $0xb0c] ss:$16 sps:$4 sm:$0xff]  }
 0x298   :  { %7271 = vmatpush1.bf16.msra.mxu1 %v10208_v37  ;;  %7231 = vmatprep.subr.bf16.mxu0 %v10213_v32  ;;  %v10265_v37 = vld [vmem:[%s14362_s1 + $0x908] ss:$16 sps:$4 sm:$0xff]  }
 0x299   :  { %7272 = vmatprep.subr.bf16.mxu1 %v10216_v40  ;;  %v10268_v32 = vld [vmem:[%s14362_s1 + $0xb08] ss:$16 sps:$4 sm:$0xff]   ;;  %v10273_v40 = vld [vmem:[%s14362_s1 + $0xcec] ss:$16 sps:$4 sm:$0xff]  }
 0x29b   :  { %7232 = vmatpush1.bf16.msra.mxu0 %v10211_v44  ;;  %v10276_v44 = vld [vmem:[%s14362_s1 + $0xeec] ss:$16 sps:$4 sm:$0xff]  }
 0x29c   :  { %7273 = vmatpush1.bf16.msra.mxu1 %v10214_v62  ;;  %7233 = vmatprep.subr.bf16.mxu0 %v10219_v47  ;;  %v10271_v62 = vld [vmem:[%s14362_s1 + $0xce8] ss:$16 sps:$4 sm:$0xff]  }
 0x29d   :  { %7274 = vmatprep.subr.bf16.mxu1 %v10222_v9  ;;  %v10274_v47 = vld [vmem:[%s14362_s1 + $0xee8] ss:$16 sps:$4 sm:$0xff]   ;;  %v10279_v9 = vld [vmem:[%s14362_s1 + $0xccc] ss:$16 sps:$4 sm:$0xff]  }
 0x29f   :  { %7234 = vmatpush1.bf16.msra.mxu0 %v10217_v51  ;;  %v10282_v51 = vld [vmem:[%s14362_s1 + $0xecc] ss:$16 sps:$4 sm:$0xff]  }
 0x2a0   :  { %7275 = vmatpush1.bf16.msra.mxu1 %v10220_v52  ;;  %7235 = vmatprep.subr.bf16.mxu0 %v10225_v56 }
 0x2a1   :  { %7276 = vmatprep.subr.bf16.mxu1 %v10228_v58 }
 0x2a3   :  { %7236 = vmatpush2.bf16.msra.mxu0 %v10223_v20  ;;  %v10277_v20 = vld [vmem:[%s14362_s1 + $0xcc8] ss:$16 sps:$4 sm:$0xff]  }
 0x2a4   :  { %7277 = vmatpush2.bf16.msra.mxu1 %v10226_v61  ;;  %7237 = vmatprep.subr.bf16.mxu0 %v10231_v60  ;;  %v10280_v61 = vld [vmem:[%s14362_s1 + $0xec8] ss:$16 sps:$4 sm:$0xff]  }
 0x2a5   :  { %7278 = vmatprep.subr.bf16.mxu1 %v10234_v0 }
 0x2a7   :  { %7238 = vmatpush2.bf16.msra.mxu0 %v10229_v1 }
 0x2a8   :  { %7279 = vmatpush2.bf16.msra.mxu1 %v10232_v2  ;;  %7239 = vmatprep.subr.bf16.mxu0 %v10237_v13 }
 0x2a9   :  { %7280 = vmatprep.subr.bf16.mxu1 %v10240_v18 }
 0x2ab   :  { %7240 = vmatpush2.bf16.msra.mxu0 %v10235_v26  ;;  %v10283_v26 = vld [vmem:[%s14362_s1 + $0xca8] ss:$16 sps:$4 sm:$0xff]  }
 0x2ac   :  { %7281 = vmatpush2.bf16.msra.mxu1 %v10238_v6  ;;  %7241 = vmatprep.subr.bf16.mxu0 %v10243_v46  ;;  %v10286_v6 = vld [vmem:[%s14362_s1 + $0xea8] ss:$16 sps:$4 sm:$0xff]  }
 0x2ad   :  { %7282 = vmatprep.subr.bf16.mxu1 %v10246_v7 }
 0x2af   :  { %7242 = vmatpush2.bf16.msra.mxu0 %v10241_v10 }
 0x2b0   :  { %7283 = vmatpush2.bf16.msra.mxu1 %v10244_v45  ;;  %7243 = vmatprep.subr.bf16.mxu0 %v10249_v49  ;;  %v10289_v49 = vld [vmem:[%s14362_s1 + $0xc88] ss:$16 sps:$4 sm:$0xff]  }
 0x2b1   :  { %7284 = vmatprep.subr.bf16.mxu1 %v10252_v17  ;;  %v10292_v17 = vld [vmem:[%s14362_s1 + $0xe88] ss:$16 sps:$4 sm:$0xff]  }
 0x2b3   :  { %7244 = vmatpush2.bf16.msra.mxu0 %v10247_v38  ;;  %v10297_v38 = vld [vmem:[%s14362_s1 + $0xc6c] ss:$16 sps:$4 sm:$0xff]  }
 0x2b4   :  { %7285 = vmatpush2.bf16.msra.mxu1 %v10250_v41  ;;  %7245 = vmatprep.subr.bf16.mxu0 %v10255_v42  ;;  %v10300_v41 = vld [vmem:[%s14362_s1 + $0xe6c] ss:$16 sps:$4 sm:$0xff]   ;;  %v10295_v42 = vld [vmem:[%s14362_s1 + $0xc68] ss:$16 sps:$4 sm:$0xff]  }
 0x2b5   :  { %7286 = vmatprep.subr.bf16.mxu1 %v10258_v23  ;;  %v10298_v23 = vld [vmem:[%s14362_s1 + $0xe68] ss:$16 sps:$4 sm:$0xff]  }
 0x2b7   :  { %7246 = vmatpush2.bf16.msra.mxu0 %v10253_v27  ;;  %v10303_v27 = vld [vmem:[%s14362_s1 + $0xc4c] ss:$16 sps:$4 sm:$0xff]  }
 0x2b8   :  { %7287 = vmatpush2.bf16.msra.mxu1 %v10256_v57  ;;  %7247 = vmatprep.subr.bf16.mxu0 %v10261_v55  ;;  %v10306_v57 = vld [vmem:[%s14362_s1 + $0xe4c] ss:$16 sps:$4 sm:$0xff]   ;;  %v10301_v55 = vld [vmem:[%s14362_s1 + $0xc48] ss:$16 sps:$4 sm:$0xff]  }
 0x2b9   :  { %7288 = vmatprep.subr.bf16.mxu1 %v10264_v35  ;;  %v10304_v35 = vld [vmem:[%s14362_s1 + $0xe48] ss:$16 sps:$4 sm:$0xff]  }
 0x2bb   :  { %7248 = vmatpush2.bf16.msra.mxu0 %v10259_v28  ;;  %v10309_v28 = vld [vmem:[%s14362_s1 + $0xc2c] ss:$16 sps:$4 sm:$0xff]  }
 0x2bc   :  { %7289 = vmatpush2.bf16.msra.mxu1 %v10262_v29  ;;  %7249 = vmatprep.subr.bf16.mxu0 %v10267_v30  ;;  %v10312_v29 = vld [vmem:[%s14362_s1 + $0xe2c] ss:$16 sps:$4 sm:$0xff]   ;;  %v10307_v30 = vld [vmem:[%s14362_s1 + $0xc28] ss:$16 sps:$4 sm:$0xff]  }
 0x2bd   :  { %7290 = vmatprep.subr.bf16.mxu1 %v10270_v34  ;;  %v10310_v34 = vld [vmem:[%s14362_s1 + $0xe28] ss:$16 sps:$4 sm:$0xff]  }
 0x2bf   :  { %7250 = vmatpush2.bf16.msra.mxu0 %v10265_v37  ;;  %v10315_v37 = vld [vmem:[%s14362_s1 + $0xc0c] ss:$16 sps:$4 sm:$0xff]  }
 0x2c0   :  { %7291 = vmatpush2.bf16.msra.mxu1 %v10268_v32  ;;  %7301 = vmatprep.subr.bf16.mxu0 %v10273_v40  ;;  %v10318_v32 = vld [vmem:[%s14362_s1 + $0xe0c] ss:$16 sps:$4 sm:$0xff]   ;;  %v10313_v40 = vld [vmem:[%s14362_s1 + $0xc08] ss:$16 sps:$4 sm:$0xff]  }
 0x2c1   :  { %7342 = vmatprep.subr.bf16.mxu1 %v10276_v44  ;;  %v10316_v44 = vld [vmem:[%s14362_s1 + $0xe08] ss:$16 sps:$4 sm:$0xff]  }
 0x2c2   :  { %v7007_v52 = vpop.f32.mrf.mxu0  ;;  %7252 = vmatmul.mubr.bf16.vlgmr.msra.gmra.mxu0 %v11506_v48  ;;  %v10285_v48 = vld [vmem:[%s14362_s1 + $0xcac] ss:$16 sps:$4 sm:$0xff]  }
 0x2c3   :  { %v7048_v56 = vpop.f32.mrf.mxu1  ;;  %7293 = vmatmul.mubr.bf16.vlgmr.msra.gmra.mxu1 %v11525_v54  ;;  %v7008_v58 = vadd.f32 %v7007_v52, %v13068_v5  ;;  %7302 = vmatpush1.bf16.msra.mxu0 %v10271_v62  ;;  %v10288_v54 = vld [vmem:[%s14362_s1 + $0xeac] ss:$16 sps:$4 sm:$0xff]  }
 0x2c4   :  { %7343 = vmatpush1.bf16.msra.mxu1 %v10274_v47  ;;  %v7009_v60 = vpop.f32.mrf.mxu0  ;;  %7303 = vmatprep.subr.bf16.mxu0 %v10279_v9  ;;  %v10321_v62 = vld [vmem:[%s14362_s1 + $0xdec] ss:$16 sps:$4 sm:$0xff]   ;;  %v10319_v9 = vld [vmem:[%s14362_s1 + $0xde8] ss:$16 sps:$4 sm:$0xff]  }
 0x2c5   :  { %v7050_v0 = vpop.f32.mrf.mxu1  ;;  %7344 = vmatprep.subr.bf16.mxu1 %v10282_v51  ;;  %v7049_v5 = vadd.f32 %v7048_v56, %v7008_v58  ;;  %v7010_v1 = vadd.f32 %v7009_v60, %v13073_v15  ;;  %7333 = vmatprep.mubr.bf16.mxu0 %v11521_v53  ;;  %v10291_v53 = vld [vmem:[%s14362_s1 + $0xc8c] ss:$16 sps:$4 sm:$0xff]   ;;  %v10322_v51 = vld [vmem:[%s14362_s1 + $0xfe8] ss:$16 sps:$4 sm:$0xff]  }
 0x2c6   :  { %7374 = vmatprep.mubr.bf16.mxu1 %v11541_v59  ;;  %v7011_v2 = vpop.f32.mrf.mxu0  ;;  %v10294_v59 = vld [vmem:[%s14362_s1 + $0xe8c] ss:$16 sps:$4 sm:$0xff]   ;;  %v10325_v58 = vld [vmem:[%s14362_s1 + $0xdc8] ss:$16 sps:$4 sm:$0xff]  }
 0x2c7   :  { %v7052_v13 = vpop.f32.mrf.mxu1  ;;  %v7051_v18 = vadd.f32 %v7050_v0, %v7010_v1  ;;  %7304 = vmatpush1.bf16.msra.mxu0 %v10277_v20  ;;  %v13285_v15 = vmax.f32 %v7049_v5, 0.0  ;;  %v10324_v47 = vld [vmem:[%s14362_s1 + $0xfec] ss:$16 sps:$4 sm:$0xff]   ;;  %v10328_v20 = vld [vmem:[%s14362_s1 + $0xfc8] ss:$16 sps:$4 sm:$0xff]  }
 0x2c8   :  { %7345 = vmatpush1.bf16.msra.mxu1 %v10280_v61  ;;  %v7012_v46 = vpop.f32.mrf.mxu0  ;;  %7305 = vmatprep.subr.bf16.mxu0 %v10285_v48  ;;  %v10327_v52 = vld [vmem:[%s14362_s1 + $0xdcc] ss:$16 sps:$4 sm:$0xff]   ;;  %v10331_v0 = vld [vmem:[%s14362_s1 + $0xda8] ss:$16 sps:$4 sm:$0xff]  }
 0x2c9   :  { %v7053_v7 = vpop.f32.mrf.mxu1  ;;  %7346 = vmatprep.subr.bf16.mxu1 %v10288_v54  ;;  %v13287_v10 = vmax.f32 %v7051_v18, 0.0  ;;  %v10330_v56 = vld [vmem:[%s14362_s1 + $0xfcc] ss:$16 sps:$4 sm:$0xff]   ;;  %v10334_v48 = vld [vmem:[%s14362_s1 + $0xfa8] ss:$16 sps:$4 sm:$0xff]  }
 0x2ca   :  { %v10333_v61 = vld [vmem:[%s14362_s1 + $0xdac] ss:$16 sps:$4 sm:$0xff]   ;;  %v10337_v1 = vld [vmem:[%s14362_s1 + $0xd88] ss:$16 sps:$4 sm:$0xff]  }
 0x2cb   :  { %v7719_v45 = vcombine.low %v13285_v15, %v13287_v10  ;;  %7306 = vmatpush1.bf16.msra.mxu0 %v10283_v26  ;;  %v10336_v60 = vld [vmem:[%s14362_s1 + $0xfac] ss:$16 sps:$4 sm:$0xff]   ;;  %v10340_v2 = vld [vmem:[%s14362_s1 + $0xf88] ss:$16 sps:$4 sm:$0xff]  }
 0x2cc   :  { %7347 = vmatpush1.bf16.msra.mxu1 %v10286_v6  ;;  %7307 = vmatprep.subr.bf16.mxu0 %v10291_v53  ;;  %v10339_v54 = vld [vmem:[%s14362_s1 + $0xd8c] ss:$16 sps:$4 sm:$0xff]   ;;  %v10343_v26 = vld [vmem:[%s14362_s1 + $0xd68] ss:$16 sps:$4 sm:$0xff]  }
 0x2cd   :  { %7348 = vmatprep.subr.bf16.mxu1 %v10294_v59  ;;  %v10342_v5 = vld [vmem:[%s14362_s1 + $0xf8c] ss:$16 sps:$4 sm:$0xff]   ;;  %v10346_v6 = vld [vmem:[%s14362_s1 + $0xf68] ss:$16 sps:$4 sm:$0xff]  }
 0x2ce   :  { %v10345_v13 = vld [vmem:[%s14362_s1 + $0xd6c] ss:$16 sps:$4 sm:$0xff]   ;;  %v10349_v53 = vld [vmem:[%s14362_s1 + $0xd48] ss:$16 sps:$4 sm:$0xff]  }
 0x2cf   :  { %7308 = vmatpush1.bf16.msra.mxu0 %v10289_v49  ;;  %v10348_v18 = vld [vmem:[%s14362_s1 + $0xf6c] ss:$16 sps:$4 sm:$0xff]   ;;  %v10352_v59 = vld [vmem:[%s14362_s1 + $0xf48] ss:$16 sps:$4 sm:$0xff]  }
 0x2d0   :  { %7349 = vmatpush1.bf16.msra.mxu1 %v10292_v17  ;;  %7309 = vmatprep.subr.bf16.mxu0 %v10297_v38  ;;  %v10351_v46 = vld [vmem:[%s14362_s1 + $0xd4c] ss:$16 sps:$4 sm:$0xff]   ;;  %v10355_v38 = vld [vmem:[%s14362_s1 + $0xd28] ss:$16 sps:$4 sm:$0xff]  }
 0x2d1   :  { %7350 = vmatprep.subr.bf16.mxu1 %v10300_v41  ;;  %v10354_v7 = vld [vmem:[%s14362_s1 + $0xf4c] ss:$16 sps:$4 sm:$0xff]   ;;  %v10358_v41 = vld [vmem:[%s14362_s1 + $0xf28] ss:$16 sps:$4 sm:$0xff]  }
 0x2d2   :  { %v10357_v49 = vld [vmem:[%s14362_s1 + $0xd2c] ss:$16 sps:$4 sm:$0xff]  }
 0x2d3   :  { %7310 = vmatpush1.bf16.msra.mxu0 %v10295_v42  ;;  %v10360_v17 = vld [vmem:[%s14362_s1 + $0xf2c] ss:$16 sps:$4 sm:$0xff]  }
 0x2d4   :  { %7351 = vmatpush1.bf16.msra.mxu1 %v10298_v23  ;;  %7311 = vmatprep.subr.bf16.mxu0 %v10303_v27  ;;  %v10363_v42 = vld [vmem:[%s14362_s1 + $0xd0c] ss:$16 sps:$4 sm:$0xff]   ;;  %v10361_v27 = vld [vmem:[%s14362_s1 + $0xd08] ss:$16 sps:$4 sm:$0xff]  }
 0x2d5   :  { %7352 = vmatprep.subr.bf16.mxu1 %v10306_v57  ;;  %v10366_v23 = vld [vmem:[%s14362_s1 + $0xf0c] ss:$16 sps:$4 sm:$0xff]   ;;  %v10364_v57 = vld [vmem:[%s14362_s1 + $0xf08] ss:$16 sps:$4 sm:$0xff]  }
 0x2d7   :  { %7312 = vmatpush1.bf16.msra.mxu0 %v10301_v55  ;;  %v10369_v55 = vld [vmem:[%s14362_s1 + $0x10ec] ss:$16 sps:$4 sm:$0xff]  }
 0x2d8   :  { %7353 = vmatpush1.bf16.msra.mxu1 %v10304_v35  ;;  %7313 = vmatprep.subr.bf16.mxu0 %v10309_v28  ;;  %v10372_v35 = vld [vmem:[%s14362_s1 + $0x12ec] ss:$16 sps:$4 sm:$0xff]   ;;  %v10367_v28 = vld [vmem:[%s14362_s1 + $0x10e8] ss:$16 sps:$4 sm:$0xff]  }
 0x2d9   :  { %7354 = vmatprep.subr.bf16.mxu1 %v10312_v29  ;;  %v10370_v29 = vld [vmem:[%s14362_s1 + $0x12e8] ss:$16 sps:$4 sm:$0xff]  }
 0x2db   :  { %7314 = vmatpush1.bf16.msra.mxu0 %v10307_v30  ;;  %v10375_v30 = vld [vmem:[%s14362_s1 + $0x10cc] ss:$16 sps:$4 sm:$0xff]  }
 0x2dc   :  { %7355 = vmatpush1.bf16.msra.mxu1 %v10310_v34  ;;  %7315 = vmatprep.subr.bf16.mxu0 %v10315_v37  ;;  %v10378_v34 = vld [vmem:[%s14362_s1 + $0x12cc] ss:$16 sps:$4 sm:$0xff]  }
 0x2dd   :  { %7356 = vmatprep.subr.bf16.mxu1 %v10318_v32 }
 0x2df   :  { %7316 = vmatpush1.bf16.msra.mxu0 %v10313_v40 }
 0x2e0   :  { %7357 = vmatpush1.bf16.msra.mxu1 %v10316_v44  ;;  %7317 = vmatprep.subr.bf16.mxu0 %v10321_v62  ;;  %v10373_v44 = vld [vmem:[%s14362_s1 + $0x10c8] ss:$16 sps:$4 sm:$0xff]  }
 0x2e1   :  { %7358 = vmatprep.subr.bf16.mxu1 %v10324_v47  ;;  %v10376_v62 = vld [vmem:[%s14362_s1 + $0x12c8] ss:$16 sps:$4 sm:$0xff]  }
 0x2e3   :  { %7318 = vmatpush2.bf16.msra.mxu0 %v10319_v9 }
 0x2e4   :  { %7359 = vmatpush2.bf16.msra.mxu1 %v10322_v51  ;;  %7319 = vmatprep.subr.bf16.mxu0 %v10327_v52 }
 0x2e5   :  { %7360 = vmatprep.subr.bf16.mxu1 %v10330_v56 }
 0x2e7   :  { %7320 = vmatpush2.bf16.msra.mxu0 %v10325_v58  ;;  %v10379_v58 = vld [vmem:[%s14362_s1 + $0x10a8] ss:$16 sps:$4 sm:$0xff]  }
 0x2e8   :  { %7361 = vmatpush2.bf16.msra.mxu1 %v10328_v20  ;;  %7321 = vmatprep.subr.bf16.mxu0 %v10333_v61  ;;  %v10382_v20 = vld [vmem:[%s14362_s1 + $0x12a8] ss:$16 sps:$4 sm:$0xff]  }
 0x2e9   :  { %7362 = vmatprep.subr.bf16.mxu1 %v10336_v60 }
 0x2eb   :  { %7322 = vmatpush2.bf16.msra.mxu0 %v10331_v0  ;;  %v10385_v0 = vld [vmem:[%s14362_s1 + $0x1088] ss:$16 sps:$4 sm:$0xff]  }
 0x2ec   :  { %7363 = vmatpush2.bf16.msra.mxu1 %v10334_v48  ;;  %7323 = vmatprep.subr.bf16.mxu0 %v10339_v54  ;;  %v10388_v48 = vld [vmem:[%s14362_s1 + $0x1288] ss:$16 sps:$4 sm:$0xff]   ;;  %v10393_v54 = vld [vmem:[%s14362_s1 + $0x106c] ss:$16 sps:$4 sm:$0xff]  }
 0x2ed   :  { %7364 = vmatprep.subr.bf16.mxu1 %v10342_v5  ;;  %v10396_v5 = vld [vmem:[%s14362_s1 + $0x126c] ss:$16 sps:$4 sm:$0xff]  }
 0x2ef   :  { %7324 = vmatpush2.bf16.msra.mxu0 %v10337_v1  ;;  %v10391_v1 = vld [vmem:[%s14362_s1 + $0x1068] ss:$16 sps:$4 sm:$0xff]  }
 0x2f0   :  { %7365 = vmatpush2.bf16.msra.mxu1 %v10340_v2  ;;  %7325 = vmatprep.subr.bf16.mxu0 %v10345_v13  ;;  %v10394_v2 = vld [vmem:[%s14362_s1 + $0x1268] ss:$16 sps:$4 sm:$0xff]   ;;  %v10399_v13 = vld [vmem:[%s14362_s1 + $0x104c] ss:$16 sps:$4 sm:$0xff]  }
 0x2f1   :  { %7366 = vmatprep.subr.bf16.mxu1 %v10348_v18  ;;  %v10402_v18 = vld [vmem:[%s14362_s1 + $0x124c] ss:$16 sps:$4 sm:$0xff]  }
 0x2f3   :  { %7326 = vmatpush2.bf16.msra.mxu0 %v10343_v26  ;;  %v10397_v26 = vld [vmem:[%s14362_s1 + $0x1048] ss:$16 sps:$4 sm:$0xff]  }
 0x2f4   :  { %7367 = vmatpush2.bf16.msra.mxu1 %v10346_v6  ;;  %7327 = vmatprep.subr.bf16.mxu0 %v10351_v46  ;;  %v10400_v6 = vld [vmem:[%s14362_s1 + $0x1248] ss:$16 sps:$4 sm:$0xff]   ;;  %v10405_v46 = vld [vmem:[%s14362_s1 + $0x102c] ss:$16 sps:$4 sm:$0xff]  }
 0x2f5   :  { %7368 = vmatprep.subr.bf16.mxu1 %v10354_v7  ;;  %v10408_v7 = vld [vmem:[%s14362_s1 + $0x122c] ss:$16 sps:$4 sm:$0xff]  }
 0x2f7   :  { %7328 = vmatpush2.bf16.msra.mxu0 %v10349_v53  ;;  %v10403_v53 = vld [vmem:[%s14362_s1 + $0x1028] ss:$16 sps:$4 sm:$0xff]  }
 0x2f8   :  { %7369 = vmatpush2.bf16.msra.mxu1 %v10352_v59  ;;  %7329 = vmatprep.subr.bf16.mxu0 %v10357_v49  ;;  %v10406_v59 = vld [vmem:[%s14362_s1 + $0x1228] ss:$16 sps:$4 sm:$0xff]   ;;  %v10411_v49 = vld [vmem:[%s14362_s1 + $0x100c] ss:$16 sps:$4 sm:$0xff]  }
 0x2f9   :  { %7370 = vmatprep.subr.bf16.mxu1 %v10360_v17  ;;  %v10414_v17 = vld [vmem:[%s14362_s1 + $0x120c] ss:$16 sps:$4 sm:$0xff]  }
 0x2fb   :  { %7330 = vmatpush2.bf16.msra.mxu0 %v10355_v38  ;;  %v10409_v38 = vld [vmem:[%s14362_s1 + $0x1008] ss:$16 sps:$4 sm:$0xff]  }
 0x2fc   :  { %7371 = vmatpush2.bf16.msra.mxu1 %v10358_v41  ;;  %7331 = vmatprep.subr.bf16.mxu0 %v10363_v42  ;;  %v10412_v41 = vld [vmem:[%s14362_s1 + $0x1208] ss:$16 sps:$4 sm:$0xff]   ;;  %v10417_v42 = vld [vmem:[%s14362_s1 + $0x11ec] ss:$16 sps:$4 sm:$0xff]  }
 0x2fd   :  { %7372 = vmatprep.subr.bf16.mxu1 %v10366_v23  ;;  %v10420_v23 = vld [vmem:[%s14362_s1 + $0x13ec] ss:$16 sps:$4 sm:$0xff]  }
 0x2ff   :  { %7332 = vmatpush2.bf16.msra.mxu0 %v10361_v27  ;;  %v10415_v27 = vld [vmem:[%s14362_s1 + $0x11e8] ss:$16 sps:$4 sm:$0xff]  }
 0x300   :  { %7373 = vmatpush2.bf16.msra.mxu1 %v10364_v57  ;;  %7383 = vmatprep.subr.bf16.mxu0 %v10369_v55  ;;  %v10418_v57 = vld [vmem:[%s14362_s1 + $0x13e8] ss:$16 sps:$4 sm:$0xff]   ;;  %v10423_v55 = vld [vmem:[%s14362_s1 + $0x11cc] ss:$16 sps:$4 sm:$0xff]  }
 0x301   :  { %7424 = vmatprep.subr.bf16.mxu1 %v10372_v35  ;;  %v10426_v35 = vld [vmem:[%s14362_s1 + $0x13cc] ss:$16 sps:$4 sm:$0xff]  }
 0x302   :  { %v7089_v37 = vpop.f32.mrf.mxu0  ;;  %7334 = vmatmul.mubr.bf16.vlgmr.msra.gmra.mxu0 %v11731_v12  ;;  %v10381_v12 = vld [vmem:[%s14362_s1 + $0x10ac] ss:$16 sps:$4 sm:$0xff]  }
 0x303   :  { %v7130_v32 = vpop.f32.mrf.mxu1  ;;  %7375 = vmatmul.mubr.bf16.vlgmr.msra.gmra.mxu1 %v11747_v39  ;;  %7384 = vmatpush1.bf16.msra.mxu0 %v10367_v28  ;;  %v10384_v39 = vld [vmem:[%s14362_s1 + $0x12ac] ss:$16 sps:$4 sm:$0xff]   ;;  %v10421_v28 = vld [vmem:[%s14362_s1 + $0x11c8] ss:$16 sps:$4 sm:$0xff]  }
 0x304   :  { %v13461_v40 = vadd.f32 %v7130_v32, %v7089_v37  ;;  %7425 = vmatpush1.bf16.msra.mxu1 %v10370_v29  ;;  %v7091_v47 = vpop.f32.mrf.mxu0  ;;  %7385 = vmatprep.subr.bf16.mxu0 %v10375_v30  ;;  %v10424_v29 = vld [vmem:[%s14362_s1 + $0x13c8] ss:$16 sps:$4 sm:$0xff]   ;;  %v10429_v30 = vld [vmem:[%s14362_s1 + $0x11ac] ss:$16 sps:$4 sm:$0xff]  }
 0x305   :  { %v7132_v9 = vpop.f32.mrf.mxu1  ;;  %7426 = vmatprep.subr.bf16.mxu1 %v10378_v34  ;;  %7415 = vmatprep.mubr.bf16.mxu0 %v11743_v19  ;;  %v10387_v19 = vld [vmem:[%s14362_s1 + $0x108c] ss:$16 sps:$4 sm:$0xff]   ;;  %v10427_v37 = vld [vmem:[%s14362_s1 + $0x11a8] ss:$16 sps:$4 sm:$0xff]  }
 0x306   :  { %v13475_v51 = vadd.f32 %v7132_v9, %v7091_v47  ;;  %7456 = vmatprep.mubr.bf16.mxu1 %v11763_v25  ;;  %v7093_v52 = vpop.f32.mrf.mxu0  ;;  %v10390_v25 = vld [vmem:[%s14362_s1 + $0x128c] ss:$16 sps:$4 sm:$0xff]   ;;  %v10430_v32 = vld [vmem:[%s14362_s1 + $0x13a8] ss:$16 sps:$4 sm:$0xff]  }
 0x307   :  { %v7134_v56 = vpop.f32.mrf.mxu1  ;;  %7386 = vmatpush1.bf16.msra.mxu0 %v10373_v44  ;;  %v10432_v34 = vld [vmem:[%s14362_s1 + $0x13ac] ss:$16 sps:$4 sm:$0xff]   ;;  %v10433_v47 = vld [vmem:[%s14362_s1 + $0x1188] ss:$16 sps:$4 sm:$0xff]  }
 0x308   :  { %7427 = vmatpush1.bf16.msra.mxu1 %v10376_v62  ;;  %v7094_v61 = vpop.f32.mrf.mxu0  ;;  %7387 = vmatprep.subr.bf16.mxu0 %v10381_v12  ;;  %v10435_v44 = vld [vmem:[%s14362_s1 + $0x118c] ss:$16 sps:$4 sm:$0xff]   ;;  %v10436_v9 = vld [vmem:[%s14362_s1 + $0x1388] ss:$16 sps:$4 sm:$0xff]  }
 0x309   :  { %v7135_v60 = vpop.f32.mrf.mxu1  ;;  %7428 = vmatprep.subr.bf16.mxu1 %v10384_v39  ;;  %v10438_v62 = vld [vmem:[%s14362_s1 + $0x138c] ss:$16 sps:$4 sm:$0xff]   ;;  %v10439_v52 = vld [vmem:[%s14362_s1 + $0x1168] ss:$16 sps:$4 sm:$0xff]  }
 0x30a   :  { %v10441_v12 = vld [vmem:[%s14362_s1 + $0x116c] ss:$16 sps:$4 sm:$0xff]   ;;  %v10442_v56 = vld [vmem:[%s14362_s1 + $0x1368] ss:$16 sps:$4 sm:$0xff]  }
 0x30b   :  { %7388 = vmatpush1.bf16.msra.mxu0 %v10379_v58  ;;  %v10444_v39 = vld [vmem:[%s14362_s1 + $0x136c] ss:$16 sps:$4 sm:$0xff]   ;;  %v10445_v61 = vld [vmem:[%s14362_s1 + $0x1148] ss:$16 sps:$4 sm:$0xff]  }
 0x30c   :  { %7429 = vmatpush1.bf16.msra.mxu1 %v10382_v20  ;;  %7389 = vmatprep.subr.bf16.mxu0 %v10387_v19  ;;  %v10447_v58 = vld [vmem:[%s14362_s1 + $0x114c] ss:$16 sps:$4 sm:$0xff]   ;;  %v10448_v60 = vld [vmem:[%s14362_s1 + $0x1348] ss:$16 sps:$4 sm:$0xff]  }
 0x30d   :  { %7430 = vmatprep.subr.bf16.mxu1 %v10390_v25  ;;  %v10450_v20 = vld [vmem:[%s14362_s1 + $0x134c] ss:$16 sps:$4 sm:$0xff]  }
 0x30e   :  { %v10453_v19 = vld [vmem:[%s14362_s1 + $0x112c] ss:$16 sps:$4 sm:$0xff]  }
 0x30f   :  { %7390 = vmatpush1.bf16.msra.mxu0 %v10385_v0  ;;  %v10456_v25 = vld [vmem:[%s14362_s1 + $0x132c] ss:$16 sps:$4 sm:$0xff]   ;;  %v10451_v0 = vld [vmem:[%s14362_s1 + $0x1128] ss:$16 sps:$4 sm:$0xff]  }
 0x310   :  { %7431 = vmatpush1.bf16.msra.mxu1 %v10388_v48  ;;  %7391 = vmatprep.subr.bf16.mxu0 %v10393_v54  ;;  %v10454_v48 = vld [vmem:[%s14362_s1 + $0x1328] ss:$16 sps:$4 sm:$0xff]   ;;  %v10459_v54 = vld [vmem:[%s14362_s1 + $0x110c] ss:$16 sps:$4 sm:$0xff]  }
 0x311   :  { %7432 = vmatprep.subr.bf16.mxu1 %v10396_v5  ;;  %v10462_v5 = vld [vmem:[%s14362_s1 + $0x130c] ss:$16 sps:$4 sm:$0xff]  }
 0x313   :  { %7392 = vmatpush1.bf16.msra.mxu0 %v10391_v1  ;;  %v10457_v1 = vld [vmem:[%s14362_s1 + $0x1108] ss:$16 sps:$4 sm:$0xff]  }
 0x314   :  { %7433 = vmatpush1.bf16.msra.mxu1 %v10394_v2  ;;  %7393 = vmatprep.subr.bf16.mxu0 %v10399_v13  ;;  %v10460_v2 = vld [vmem:[%s14362_s1 + $0x1308] ss:$16 sps:$4 sm:$0xff]   ;;  %v10465_v13 = vld [vmem:[%s14362_s1 + $0x14ec] ss:$16 sps:$4 sm:$0xff]  }
 0x315   :  { %7434 = vmatprep.subr.bf16.mxu1 %v10402_v18  ;;  %v10468_v18 = vld [vmem:[%s14362_s1 + $0x16ec] ss:$16 sps:$4 sm:$0xff]  }
 0x317   :  { %7394 = vmatpush1.bf16.msra.mxu0 %v10397_v26  ;;  %v10463_v26 = vld [vmem:[%s14362_s1 + $0x14e8] ss:$16 sps:$4 sm:$0xff]  }
 0x318   :  { %7435 = vmatpush1.bf16.msra.mxu1 %v10400_v6  ;;  %7395 = vmatprep.subr.bf16.mxu0 %v10405_v46  ;;  %v10466_v6 = vld [vmem:[%s14362_s1 + $0x16e8] ss:$16 sps:$4 sm:$0xff]   ;;  %v10471_v46 = vld [vmem:[%s14362_s1 + $0x14cc] ss:$16 sps:$4 sm:$0xff]  }
 0x319   :  { %7436 = vmatprep.subr.bf16.mxu1 %v10408_v7  ;;  %v10474_v7 = vld [vmem:[%s14362_s1 + $0x16cc] ss:$16 sps:$4 sm:$0xff]  }
 0x31b   :  { %7396 = vmatpush1.bf16.msra.mxu0 %v10403_v53 }
 0x31c   :  { %7437 = vmatpush1.bf16.msra.mxu1 %v10406_v59  ;;  %7397 = vmatprep.subr.bf16.mxu0 %v10411_v49 }
 0x31d   :  { %7438 = vmatprep.subr.bf16.mxu1 %v10414_v17  ;;  %v10469_v17 = vld [vmem:[%s14362_s1 + $0x14c8] ss:$16 sps:$4 sm:$0xff]  }
 0x31f   :  { %7398 = vmatpush1.bf16.msra.mxu0 %v10409_v38  ;;  %v10472_v38 = vld [vmem:[%s14362_s1 + $0x16c8] ss:$16 sps:$4 sm:$0xff]  }
 0x320   :  { %7439 = vmatpush1.bf16.msra.mxu1 %v10412_v41  ;;  %7399 = vmatprep.subr.bf16.mxu0 %v10417_v42 }
 0x321   :  { %7440 = vmatprep.subr.bf16.mxu1 %v10420_v23 }
 0x323   :  { %7400 = vmatpush2.bf16.msra.mxu0 %v10415_v27 }
 0x324   :  { %7441 = vmatpush2.bf16.msra.mxu1 %v10418_v57  ;;  %7401 = vmatprep.subr.bf16.mxu0 %v10423_v55 }
 0x325   :  { %7442 = vmatprep.subr.bf16.mxu1 %v10426_v35  ;;  %v10475_v35 = vld [vmem:[%s14362_s1 + $0x14a8] ss:$16 sps:$4 sm:$0xff]  }
 0x327   :  { %7402 = vmatpush2.bf16.msra.mxu0 %v10421_v28  ;;  %v10478_v28 = vld [vmem:[%s14362_s1 + $0x16a8] ss:$16 sps:$4 sm:$0xff]  }
 0x328   :  { %7443 = vmatpush2.bf16.msra.mxu1 %v10424_v29  ;;  %7403 = vmatprep.subr.bf16.mxu0 %v10429_v30  ;;  %v10481_v30 = vld [vmem:[%s14362_s1 + $0x1488] ss:$16 sps:$4 sm:$0xff]  }
 0x329   :  { %7444 = vmatprep.subr.bf16.mxu1 %v10432_v34  ;;  %v10484_v34 = vld [vmem:[%s14362_s1 + $0x1688] ss:$16 sps:$4 sm:$0xff]  }
 0x32b   :  { %7404 = vmatpush2.bf16.msra.mxu0 %v10427_v37  ;;  %v10489_v37 = vld [vmem:[%s14362_s1 + $0x146c] ss:$16 sps:$4 sm:$0xff]  }
 0x32c   :  { %7445 = vmatpush2.bf16.msra.mxu1 %v10430_v32  ;;  %7405 = vmatprep.subr.bf16.mxu0 %v10435_v44  ;;  %v10492_v32 = vld [vmem:[%s14362_s1 + $0x166c] ss:$16 sps:$4 sm:$0xff]   ;;  %v10487_v44 = vld [vmem:[%s14362_s1 + $0x1468] ss:$16 sps:$4 sm:$0xff]  }
 0x32d   :  { %7446 = vmatprep.subr.bf16.mxu1 %v10438_v62  ;;  %v10490_v62 = vld [vmem:[%s14362_s1 + $0x1668] ss:$16 sps:$4 sm:$0xff]  }
 0x32f   :  { %7406 = vmatpush2.bf16.msra.mxu0 %v10433_v47  ;;  %v10495_v47 = vld [vmem:[%s14362_s1 + $0x144c] ss:$16 sps:$4 sm:$0xff]  }
 0x330   :  { %7447 = vmatpush2.bf16.msra.mxu1 %v10436_v9  ;;  %7407 = vmatprep.subr.bf16.mxu0 %v10441_v12  ;;  %v10498_v9 = vld [vmem:[%s14362_s1 + $0x164c] ss:$16 sps:$4 sm:$0xff]   ;;  %v10493_v12 = vld [vmem:[%s14362_s1 + $0x1448] ss:$16 sps:$4 sm:$0xff]  }
 0x331   :  { %7448 = vmatprep.subr.bf16.mxu1 %v10444_v39  ;;  %v10496_v39 = vld [vmem:[%s14362_s1 + $0x1648] ss:$16 sps:$4 sm:$0xff]  }
 0x333   :  { %7408 = vmatpush2.bf16.msra.mxu0 %v10439_v52  ;;  %v10501_v52 = vld [vmem:[%s14362_s1 + $0x142c] ss:$16 sps:$4 sm:$0xff]  }
 0x334   :  { %7449 = vmatpush2.bf16.msra.mxu1 %v10442_v56  ;;  %7409 = vmatprep.subr.bf16.mxu0 %v10447_v58  ;;  %v10504_v56 = vld [vmem:[%s14362_s1 + $0x162c] ss:$16 sps:$4 sm:$0xff]   ;;  %v10499_v58 = vld [vmem:[%s14362_s1 + $0x1428] ss:$16 sps:$4 sm:$0xff]  }
 0x335   :  { %7450 = vmatprep.subr.bf16.mxu1 %v10450_v20  ;;  %v10502_v20 = vld [vmem:[%s14362_s1 + $0x1628] ss:$16 sps:$4 sm:$0xff]  }
 0x337   :  { %7410 = vmatpush2.bf16.msra.mxu0 %v10445_v61  ;;  %v10507_v61 = vld [vmem:[%s14362_s1 + $0x140c] ss:$16 sps:$4 sm:$0xff]  }
 0x338   :  { %7451 = vmatpush2.bf16.msra.mxu1 %v10448_v60  ;;  %7411 = vmatprep.subr.bf16.mxu0 %v10453_v19  ;;  %v10510_v60 = vld [vmem:[%s14362_s1 + $0x160c] ss:$16 sps:$4 sm:$0xff]   ;;  %v10505_v19 = vld [vmem:[%s14362_s1 + $0x1408] ss:$16 sps:$4 sm:$0xff]  }
 0x339   :  { %7452 = vmatprep.subr.bf16.mxu1 %v10456_v25  ;;  %v10508_v25 = vld [vmem:[%s14362_s1 + $0x1608] ss:$16 sps:$4 sm:$0xff]  }
 0x33b   :  { %7412 = vmatpush2.bf16.msra.mxu0 %v10451_v0  ;;  %v10513_v0 = vld [vmem:[%s14362_s1 + $0x15ec] ss:$16 sps:$4 sm:$0xff]  }
 0x33c   :  { %7453 = vmatpush2.bf16.msra.mxu1 %v10454_v48  ;;  %7413 = vmatprep.subr.bf16.mxu0 %v10459_v54  ;;  %v10516_v48 = vld [vmem:[%s14362_s1 + $0x17ec] ss:$16 sps:$4 sm:$0xff]   ;;  %v10511_v54 = vld [vmem:[%s14362_s1 + $0x15e8] ss:$16 sps:$4 sm:$0xff]  }
 0x33d   :  { %7454 = vmatprep.subr.bf16.mxu1 %v10462_v5  ;;  %v10514_v5 = vld [vmem:[%s14362_s1 + $0x17e8] ss:$16 sps:$4 sm:$0xff]  }
 0x33f   :  { %7414 = vmatpush2.bf16.msra.mxu0 %v10457_v1  ;;  %v10519_v1 = vld [vmem:[%s14362_s1 + $0x15cc] ss:$16 sps:$4 sm:$0xff]  }
 0x340   :  { %7455 = vmatpush2.bf16.msra.mxu1 %v10460_v2  ;;  %7465 = vmatprep.subr.bf16.mxu0 %v10465_v13  ;;  %v10522_v2 = vld [vmem:[%s14362_s1 + $0x17cc] ss:$16 sps:$4 sm:$0xff]   ;;  %v10517_v13 = vld [vmem:[%s14362_s1 + $0x15c8] ss:$16 sps:$4 sm:$0xff]  }
 0x341   :  { %7506 = vmatprep.subr.bf16.mxu1 %v10468_v18  ;;  %v10520_v18 = vld [vmem:[%s14362_s1 + $0x17c8] ss:$16 sps:$4 sm:$0xff]  }
 0x342   :  { %v7171_v53 = vpop.f32.mrf.mxu0  ;;  %7416 = vmatmul.mubr.bf16.vlgmr.msra.gmra.mxu0 %v11950_v3  ;;  %v10477_v3 = vld [vmem:[%s14362_s1 + $0x14ac] ss:$16 sps:$4 sm:$0xff]  }
 0x343   :  { %v7212_v59 = vpop.f32.mrf.mxu1  ;;  %7457 = vmatmul.mubr.bf16.vlgmr.msra.gmra.mxu1 %v11975_v14  ;;  %v7172_v49 = vadd.f32 %v7171_v53, %v13461_v40  ;;  %7466 = vmatpush1.bf16.msra.mxu0 %v10463_v26  ;;  %v10480_v14 = vld [vmem:[%s14362_s1 + $0x16ac] ss:$16 sps:$4 sm:$0xff]  }
 0x344   :  { %7507 = vmatpush1.bf16.msra.mxu1 %v10466_v6  ;;  %v7173_v41 = vpop.f32.mrf.mxu0  ;;  %7467 = vmatprep.subr.bf16.mxu0 %v10471_v46  ;;  %v10525_v26 = vld [vmem:[%s14362_s1 + $0x15ac] ss:$16 sps:$4 sm:$0xff]   ;;  %v10523_v46 = vld [vmem:[%s14362_s1 + $0x15a8] ss:$16 sps:$4 sm:$0xff]  }
 0x345   :  { %v7214_v42 = vpop.f32.mrf.mxu1  ;;  %7508 = vmatprep.subr.bf16.mxu1 %v10474_v7  ;;  %v13674_v40 = vadd.f32 %v7212_v59, %v7172_v49  ;;  %v7174_v23 = vadd.f32 %v7173_v41, %v13475_v51  ;;  %7497 = vmatprep.mubr.bf16.mxu0 %v11971_v11  ;;  %v10483_v11 = vld [vmem:[%s14362_s1 + $0x148c] ss:$16 sps:$4 sm:$0xff]   ;;  %v10526_v7 = vld [vmem:[%s14362_s1 + $0x17a8] ss:$16 sps:$4 sm:$0xff]  }
 0x346   :  { %7538 = vmatprep.mubr.bf16.mxu1 %v11991_v22  ;;  %v7175_v27 = vpop.f32.mrf.mxu0  ;;  %v10486_v22 = vld [vmem:[%s14362_s1 + $0x168c] ss:$16 sps:$4 sm:$0xff]   ;;  %v10529_v49 = vld [vmem:[%s14362_s1 + $0x1588] ss:$16 sps:$4 sm:$0xff]  }
 0x347   :  { %v7216_v57 = vpop.f32.mrf.mxu1  ;;  %v13679_v55 = vadd.f32 %v7214_v42, %v7174_v23  ;;  %7468 = vmatpush1.bf16.msra.mxu0 %v10469_v17  ;;  %v10528_v6 = vld [vmem:[%s14362_s1 + $0x17ac] ss:$16 sps:$4 sm:$0xff]   ;;  %v10532_v17 = vld [vmem:[%s14362_s1 + $0x1788] ss:$16 sps:$4 sm:$0xff]  }
 0x348   :  { %7509 = vmatpush1.bf16.msra.mxu1 %v10472_v38  ;;  %v7176_v29 = vpop.f32.mrf.mxu0  ;;  %7469 = vmatprep.subr.bf16.mxu0 %v10477_v3  ;;  %v10531_v53 = vld [vmem:[%s14362_s1 + $0x158c] ss:$16 sps:$4 sm:$0xff]   ;;  %v10535_v42 = vld [vmem:[%s14362_s1 + $0x1568] ss:$16 sps:$4 sm:$0xff]  }
 0x349   :  { %v7217_v51 = vpop.f32.mrf.mxu1  ;;  %7510 = vmatprep.subr.bf16.mxu1 %v10480_v14  ;;  %v10534_v59 = vld [vmem:[%s14362_s1 + $0x178c] ss:$16 sps:$4 sm:$0xff]   ;;  %v10538_v3 = vld [vmem:[%s14362_s1 + $0x1768] ss:$16 sps:$4 sm:$0xff]  }
 0x34a   :  { %v10537_v38 = vld [vmem:[%s14362_s1 + $0x156c] ss:$16 sps:$4 sm:$0xff]   ;;  %v10541_v27 = vld [vmem:[%s14362_s1 + $0x1548] ss:$16 sps:$4 sm:$0xff]  }
 0x34b   :  { %7470 = vmatpush1.bf16.msra.mxu0 %v10475_v35  ;;  %v10540_v41 = vld [vmem:[%s14362_s1 + $0x176c] ss:$16 sps:$4 sm:$0xff]   ;;  %v10544_v57 = vld [vmem:[%s14362_s1 + $0x1748] ss:$16 sps:$4 sm:$0xff]  }
 0x34c   :  { %7511 = vmatpush1.bf16.msra.mxu1 %v10478_v28  ;;  %7471 = vmatprep.subr.bf16.mxu0 %v10483_v11  ;;  %v10543_v14 = vld [vmem:[%s14362_s1 + $0x154c] ss:$16 sps:$4 sm:$0xff]   ;;  %v10547_v29 = vld [vmem:[%s14362_s1 + $0x1528] ss:$16 sps:$4 sm:$0xff]  }
 0x34d   :  { %7512 = vmatprep.subr.bf16.mxu1 %v10486_v22  ;;  %v10546_v23 = vld [vmem:[%s14362_s1 + $0x174c] ss:$16 sps:$4 sm:$0xff]   ;;  %v10550_v51 = vld [vmem:[%s14362_s1 + $0x1728] ss:$16 sps:$4 sm:$0xff]  }
 0x34e   :  { %v10549_v35 = vld [vmem:[%s14362_s1 + $0x152c] ss:$16 sps:$4 sm:$0xff]  }
 0x34f   :  { %7472 = vmatpush1.bf16.msra.mxu0 %v10481_v30  ;;  %v10552_v28 = vld [vmem:[%s14362_s1 + $0x172c] ss:$16 sps:$4 sm:$0xff]   ;;  %v10553_v30 = vld [vmem:[%s14362_s1 + $0x1508] ss:$16 sps:$4 sm:$0xff]  }
 0x350   :  { %7513 = vmatpush1.bf16.msra.mxu1 %v10484_v34  ;;  %7473 = vmatprep.subr.bf16.mxu0 %v10489_v37  ;;  %v10555_v11 = vld [vmem:[%s14362_s1 + $0x150c] ss:$16 sps:$4 sm:$0xff]   ;;  %v10556_v34 = vld [vmem:[%s14362_s1 + $0x1708] ss:$16 sps:$4 sm:$0xff]  }
 0x351   :  { %7514 = vmatprep.subr.bf16.mxu1 %v10492_v32  ;;  %v10558_v22 = vld [vmem:[%s14362_s1 + $0x170c] ss:$16 sps:$4 sm:$0xff]  }
 0x352   :  { %v10561_v37 = vld [vmem:[%s14362_s1 + $0x18ec] ss:$16 sps:$4 sm:$0xff]  }
 0x353   :  { %7474 = vmatpush1.bf16.msra.mxu0 %v10487_v44  ;;  %v10564_v32 = vld [vmem:[%s14362_s1 + $0x1aec] ss:$16 sps:$4 sm:$0xff]   ;;  %v10559_v44 = vld [vmem:[%s14362_s1 + $0x18e8] ss:$16 sps:$4 sm:$0xff]  }
 0x354   :  { %7515 = vmatpush1.bf16.msra.mxu1 %v10490_v62  ;;  %7475 = vmatprep.subr.bf16.mxu0 %v10495_v47  ;;  %v10562_v62 = vld [vmem:[%s14362_s1 + $0x1ae8] ss:$16 sps:$4 sm:$0xff]   ;;  %v10567_v47 = vld [vmem:[%s14362_s1 + $0x18cc] ss:$16 sps:$4 sm:$0xff]  }
 0x355   :  { %7516 = vmatprep.subr.bf16.mxu1 %v10498_v9  ;;  %v10570_v9 = vld [vmem:[%s14362_s1 + $0x1acc] ss:$16 sps:$4 sm:$0xff]  }
 0x357   :  { %7476 = vmatpush1.bf16.msra.mxu0 %v10493_v12 }
 0x358   :  { %7517 = vmatpush1.bf16.msra.mxu1 %v10496_v39  ;;  %7477 = vmatprep.subr.bf16.mxu0 %v10501_v52 }
 0x359   :  { %7518 = vmatprep.subr.bf16.mxu1 %v10504_v56  ;;  %v10565_v56 = vld [vmem:[%s14362_s1 + $0x18c8] ss:$16 sps:$4 sm:$0xff]  }
 0x35b   :  { %7478 = vmatpush1.bf16.msra.mxu0 %v10499_v58  ;;  %v10568_v58 = vld [vmem:[%s14362_s1 + $0x1ac8] ss:$16 sps:$4 sm:$0xff]  }
 0x35c   :  { %7519 = vmatpush1.bf16.msra.mxu1 %v10502_v20  ;;  %7479 = vmatprep.subr.bf16.mxu0 %v10507_v61 }
 0x35d   :  { %7520 = vmatprep.subr.bf16.mxu1 %v10510_v60 }
 0x35f   :  { %7480 = vmatpush1.bf16.msra.mxu0 %v10505_v19 }
 0x360   :  { %7521 = vmatpush1.bf16.msra.mxu1 %v10508_v25  ;;  %7481 = vmatprep.subr.bf16.mxu0 %v10513_v0 }
 0x361   :  { %7522 = vmatprep.subr.bf16.mxu1 %v10516_v48  ;;  %v10571_v48 = vld [vmem:[%s14362_s1 + $0x18a8] ss:$16 sps:$4 sm:$0xff]  }
 0x363   :  { %7482 = vmatpush2.bf16.msra.mxu0 %v10511_v54  ;;  %v10574_v54 = vld [vmem:[%s14362_s1 + $0x1aa8] ss:$16 sps:$4 sm:$0xff]  }
 0x364   :  { %7523 = vmatpush2.bf16.msra.mxu1 %v10514_v5  ;;  %7483 = vmatprep.subr.bf16.mxu0 %v10519_v1  ;;  %v10577_v1 = vld [vmem:[%s14362_s1 + $0x1888] ss:$16 sps:$4 sm:$0xff]  }
 0x365   :  { %7524 = vmatprep.subr.bf16.mxu1 %v10522_v2  ;;  %v10580_v2 = vld [vmem:[%s14362_s1 + $0x1a88] ss:$16 sps:$4 sm:$0xff]  }
 0x367   :  { %7484 = vmatpush2.bf16.msra.mxu0 %v10517_v13  ;;  %v10585_v13 = vld [vmem:[%s14362_s1 + $0x186c] ss:$16 sps:$4 sm:$0xff]  }
 0x368   :  { %7525 = vmatpush2.bf16.msra.mxu1 %v10520_v18  ;;  %7485 = vmatprep.subr.bf16.mxu0 %v10525_v26  ;;  %v10588_v18 = vld [vmem:[%s14362_s1 + $0x1a6c] ss:$16 sps:$4 sm:$0xff]   ;;  %v10583_v26 = vld [vmem:[%s14362_s1 + $0x1868] ss:$16 sps:$4 sm:$0xff]  }
 0x369   :  { %7526 = vmatprep.subr.bf16.mxu1 %v10528_v6  ;;  %v10586_v6 = vld [vmem:[%s14362_s1 + $0x1a68] ss:$16 sps:$4 sm:$0xff]  }
 0x36b   :  { %7486 = vmatpush2.bf16.msra.mxu0 %v10523_v46  ;;  %v10591_v46 = vld [vmem:[%s14362_s1 + $0x184c] ss:$16 sps:$4 sm:$0xff]  }
 0x36c   :  { %7527 = vmatpush2.bf16.msra.mxu1 %v10526_v7  ;;  %7487 = vmatprep.subr.bf16.mxu0 %v10531_v53  ;;  %v10594_v7 = vld [vmem:[%s14362_s1 + $0x1a4c] ss:$16 sps:$4 sm:$0xff]   ;;  %v10589_v53 = vld [vmem:[%s14362_s1 + $0x1848] ss:$16 sps:$4 sm:$0xff]  }
 0x36d   :  { %7528 = vmatprep.subr.bf16.mxu1 %v10534_v59  ;;  %v10592_v59 = vld [vmem:[%s14362_s1 + $0x1a48] ss:$16 sps:$4 sm:$0xff]  }
 0x36f   :  { %7488 = vmatpush2.bf16.msra.mxu0 %v10529_v49  ;;  %v10597_v49 = vld [vmem:[%s14362_s1 + $0x182c] ss:$16 sps:$4 sm:$0xff]  }
 0x370   :  { %7529 = vmatpush2.bf16.msra.mxu1 %v10532_v17  ;;  %7489 = vmatprep.subr.bf16.mxu0 %v10537_v38  ;;  %v10600_v17 = vld [vmem:[%s14362_s1 + $0x1a2c] ss:$16 sps:$4 sm:$0xff]   ;;  %v10595_v38 = vld [vmem:[%s14362_s1 + $0x1828] ss:$16 sps:$4 sm:$0xff]  }
 0x371   :  { %7530 = vmatprep.subr.bf16.mxu1 %v10540_v41  ;;  %v10598_v41 = vld [vmem:[%s14362_s1 + $0x1a28] ss:$16 sps:$4 sm:$0xff]  }
 0x373   :  { %7490 = vmatpush2.bf16.msra.mxu0 %v10535_v42  ;;  %v10603_v42 = vld [vmem:[%s14362_s1 + $0x180c] ss:$16 sps:$4 sm:$0xff]  }
 0x374   :  { %7531 = vmatpush2.bf16.msra.mxu1 %v10538_v3  ;;  %7491 = vmatprep.subr.bf16.mxu0 %v10543_v14  ;;  %v10606_v3 = vld [vmem:[%s14362_s1 + $0x1a0c] ss:$16 sps:$4 sm:$0xff]   ;;  %v10601_v14 = vld [vmem:[%s14362_s1 + $0x1808] ss:$16 sps:$4 sm:$0xff]  }
 0x375   :  { %7532 = vmatprep.subr.bf16.mxu1 %v10546_v23  ;;  %v10604_v23 = vld [vmem:[%s14362_s1 + $0x1a08] ss:$16 sps:$4 sm:$0xff]  }
 0x377   :  { %7492 = vmatpush2.bf16.msra.mxu0 %v10541_v27  ;;  %v10609_v27 = vld [vmem:[%s14362_s1 + $0x19ec] ss:$16 sps:$4 sm:$0xff]  }
 0x378   :  { %7533 = vmatpush2.bf16.msra.mxu1 %v10544_v57  ;;  %7493 = vmatprep.subr.bf16.mxu0 %v10549_v35  ;;  %v10612_v57 = vld [vmem:[%s14362_s1 + $0x1bec] ss:$16 sps:$4 sm:$0xff]   ;;  %v10607_v35 = vld [vmem:[%s14362_s1 + $0x19e8] ss:$16 sps:$4 sm:$0xff]  }
 0x379   :  { %7534 = vmatprep.subr.bf16.mxu1 %v10552_v28  ;;  %v10610_v28 = vld [vmem:[%s14362_s1 + $0x1be8] ss:$16 sps:$4 sm:$0xff]  }
 0x37b   :  { %7494 = vmatpush2.bf16.msra.mxu0 %v10547_v29  ;;  %v10615_v29 = vld [vmem:[%s14362_s1 + $0x19cc] ss:$16 sps:$4 sm:$0xff]  }
 0x37c   :  { %7535 = vmatpush2.bf16.msra.mxu1 %v10550_v51  ;;  %7495 = vmatprep.subr.bf16.mxu0 %v10555_v11  ;;  %v10618_v51 = vld [vmem:[%s14362_s1 + $0x1bcc] ss:$16 sps:$4 sm:$0xff]   ;;  %v10613_v11 = vld [vmem:[%s14362_s1 + $0x19c8] ss:$16 sps:$4 sm:$0xff]  }
 0x37d   :  { %7536 = vmatprep.subr.bf16.mxu1 %v10558_v22  ;;  %v10616_v22 = vld [vmem:[%s14362_s1 + $0x1bc8] ss:$16 sps:$4 sm:$0xff]  }
 0x37f   :  { %7496 = vmatpush2.bf16.msra.mxu0 %v10553_v30  ;;  %v10621_v30 = vld [vmem:[%s14362_s1 + $0x19ac] ss:$16 sps:$4 sm:$0xff]  }
 0x380   :  { %7537 = vmatpush2.bf16.msra.mxu1 %v10556_v34  ;;  %7547 = vmatprep.subr.bf16.mxu0 %v10561_v37  ;;  %v10624_v34 = vld [vmem:[%s14362_s1 + $0x1bac] ss:$16 sps:$4 sm:$0xff]   ;;  %v10619_v37 = vld [vmem:[%s14362_s1 + $0x19a8] ss:$16 sps:$4 sm:$0xff]  }
 0x381   :  { %7588 = vmatprep.subr.bf16.mxu1 %v10564_v32  ;;  %v10622_v32 = vld [vmem:[%s14362_s1 + $0x1ba8] ss:$16 sps:$4 sm:$0xff]  }
 0x382   :  { %v7253_v12 = vpop.f32.mrf.mxu0  ;;  %7498 = vmatmul.mubr.bf16.vlgmr.msra.gmra.mxu0 %v12178_v4  ;;  %v10573_v4 = vld [vmem:[%s14362_s1 + $0x18ac] ss:$16 sps:$4 sm:$0xff]  }
 0x383   :  { %v7294_v39 = vpop.f32.mrf.mxu1  ;;  %7539 = vmatmul.mubr.bf16.vlgmr.msra.gmra.mxu1 %v12203_v24  ;;  %v7254_v52 = vadd.f32 %v7253_v12, %v13674_v40  ;;  %7548 = vmatpush1.bf16.msra.mxu0 %v10559_v44  ;;  %v10576_v24 = vld [vmem:[%s14362_s1 + $0x1aac] ss:$16 sps:$4 sm:$0xff]  }
 0x384   :  { %7589 = vmatpush1.bf16.msra.mxu1 %v10562_v62  ;;  %v7255_v20 = vpop.f32.mrf.mxu0  ;;  %7549 = vmatprep.subr.bf16.mxu0 %v10567_v47  ;;  %v10627_v44 = vld [vmem:[%s14362_s1 + $0x198c] ss:$16 sps:$4 sm:$0xff]   ;;  %v10625_v47 = vld [vmem:[%s14362_s1 + $0x1988] ss:$16 sps:$4 sm:$0xff]  }
 0x385   :  { %v7296_v61 = vpop.f32.mrf.mxu1  ;;  %7590 = vmatprep.subr.bf16.mxu1 %v10570_v9  ;;  %v13876_v40 = vadd.f32 %v7294_v39, %v7254_v52  ;;  %v7256_v60 = vadd.f32 %v7255_v20, %v13679_v55  ;;  %7579 = vmatprep.mubr.bf16.mxu0 %v12199_v21  ;;  %v10579_v21 = vld [vmem:[%s14362_s1 + $0x188c] ss:$16 sps:$4 sm:$0xff]   ;;  %v10628_v9 = vld [vmem:[%s14362_s1 + $0x1b88] ss:$16 sps:$4 sm:$0xff]  }
 0x386   :  { %7620 = vmatprep.mubr.bf16.mxu1 %v12219_v33  ;;  %v7257_v19 = vpop.f32.mrf.mxu0  ;;  %v10582_v33 = vld [vmem:[%s14362_s1 + $0x1a8c] ss:$16 sps:$4 sm:$0xff]   ;;  %v10631_v52 = vld [vmem:[%s14362_s1 + $0x1968] ss:$16 sps:$4 sm:$0xff]  }
 0x387   :  { %v7298_v25 = vpop.f32.mrf.mxu1  ;;  %v13881_v0 = vadd.f32 %v7296_v61, %v7256_v60  ;;  %7550 = vmatpush1.bf16.msra.mxu0 %v10565_v56  ;;  %v10630_v62 = vld [vmem:[%s14362_s1 + $0x1b8c] ss:$16 sps:$4 sm:$0xff]   ;;  %v10634_v56 = vld [vmem:[%s14362_s1 + $0x1b68] ss:$16 sps:$4 sm:$0xff]  }
 0x388   :  { %7591 = vmatpush1.bf16.msra.mxu1 %v10568_v58  ;;  %v7258_v5 = vpop.f32.mrf.mxu0  ;;  %7551 = vmatprep.subr.bf16.mxu0 %v10573_v4  ;;  %v10633_v12 = vld [vmem:[%s14362_s1 + $0x196c] ss:$16 sps:$4 sm:$0xff]   ;;  %v10637_v61 = vld [vmem:[%s14362_s1 + $0x1948] ss:$16 sps:$4 sm:$0xff]  }
 0x389   :  { %v7299_v55 = vpop.f32.mrf.mxu1  ;;  %7592 = vmatprep.subr.bf16.mxu1 %v10576_v24  ;;  %v10636_v39 = vld [vmem:[%s14362_s1 + $0x1b6c] ss:$16 sps:$4 sm:$0xff]   ;;  %v10640_v4 = vld [vmem:[%s14362_s1 + $0x1b48] ss:$16 sps:$4 sm:$0xff]  }
 0x38a   :  { %v10639_v58 = vld [vmem:[%s14362_s1 + $0x194c] ss:$16 sps:$4 sm:$0xff]   ;;  %v10643_v19 = vld [vmem:[%s14362_s1 + $0x1928] ss:$16 sps:$4 sm:$0xff]  }
 0x38b   :  { %7552 = vmatpush1.bf16.msra.mxu0 %v10571_v48  ;;  %v10642_v20 = vld [vmem:[%s14362_s1 + $0x1b4c] ss:$16 sps:$4 sm:$0xff]   ;;  %v10646_v25 = vld [vmem:[%s14362_s1 + $0x1b28] ss:$16 sps:$4 sm:$0xff]  }
 0x38c   :  { %7593 = vmatpush1.bf16.msra.mxu1 %v10574_v54  ;;  %7553 = vmatprep.subr.bf16.mxu0 %v10579_v21  ;;  %v10645_v24 = vld [vmem:[%s14362_s1 + $0x192c] ss:$16 sps:$4 sm:$0xff]   ;;  %v10649_v5 = vld [vmem:[%s14362_s1 + $0x1908] ss:$16 sps:$4 sm:$0xff]  }
 0x38d   :  { %7594 = vmatprep.subr.bf16.mxu1 %v10582_v33  ;;  %v10648_v60 = vld [vmem:[%s14362_s1 + $0x1b2c] ss:$16 sps:$4 sm:$0xff]   ;;  %v10652_v55 = vld [vmem:[%s14362_s1 + $0x1b08] ss:$16 sps:$4 sm:$0xff]  }
 0x38e   :  { %v10651_v48 = vld [vmem:[%s14362_s1 + $0x190c] ss:$16 sps:$4 sm:$0xff]  }
 0x38f   :  { %7554 = vmatpush1.bf16.msra.mxu0 %v10577_v1  ;;  %v10654_v54 = vld [vmem:[%s14362_s1 + $0x1b0c] ss:$16 sps:$4 sm:$0xff]   ;;  %v10655_v1 = vld [vmem:[%s14362_s1 + $0x1ce8] ss:$16 sps:$4 sm:$0xff]  }
 0x390   :  { %7595 = vmatpush1.bf16.msra.mxu1 %v10580_v2  ;;  %7555 = vmatprep.subr.bf16.mxu0 %v10585_v13  ;;  %v10657_v21 = vld [vmem:[%s14362_s1 + $0x1cec] ss:$16 sps:$4 sm:$0xff]   ;;  %v10658_v2 = vld [vmem:[%s14362_s1 + $0x1ee8] ss:$16 sps:$4 sm:$0xff]  }
 0x391   :  { %7596 = vmatprep.subr.bf16.mxu1 %v10588_v18  ;;  %v10660_v33 = vld [vmem:[%s14362_s1 + $0x1eec] ss:$16 sps:$4 sm:$0xff]  }
 0x392   :  { %v10663_v13 = vld [vmem:[%s14362_s1 + $0x1ccc] ss:$16 sps:$4 sm:$0xff]  }
 0x393   :  { %7556 = vmatpush1.bf16.msra.mxu0 %v10583_v26  ;;  %v10666_v18 = vld [vmem:[%s14362_s1 + $0x1ecc] ss:$16 sps:$4 sm:$0xff]  }
 0x394   :  { %7597 = vmatpush1.bf16.msra.mxu1 %v10586_v6  ;;  %7557 = vmatprep.subr.bf16.mxu0 %v10591_v46 }
 0x395   :  { %7598 = vmatprep.subr.bf16.mxu1 %v10594_v7  ;;  %v10661_v7 = vld [vmem:[%s14362_s1 + $0x1cc8] ss:$16 sps:$4 sm:$0xff]  }
 0x397   :  { %7558 = vmatpush1.bf16.msra.mxu0 %v10589_v53  ;;  %v10664_v53 = vld [vmem:[%s14362_s1 + $0x1ec8] ss:$16 sps:$4 sm:$0xff]  }
 0x398   :  { %7599 = vmatpush1.bf16.msra.mxu1 %v10592_v59  ;;  %7559 = vmatprep.subr.bf16.mxu0 %v10597_v49 }
 0x399   :  { %7600 = vmatprep.subr.bf16.mxu1 %v10600_v17 }
 0x39b   :  { %7560 = vmatpush1.bf16.msra.mxu0 %v10595_v38 }
 0x39c   :  { %7601 = vmatpush1.bf16.msra.mxu1 %v10598_v41  ;;  %7561 = vmatprep.subr.bf16.mxu0 %v10603_v42 }
 0x39d   :  { %7602 = vmatprep.subr.bf16.mxu1 %v10606_v3  ;;  %v10667_v3 = vld [vmem:[%s14362_s1 + $0x1ca8] ss:$16 sps:$4 sm:$0xff]  }
 0x39f   :  { %7562 = vmatpush1.bf16.msra.mxu0 %v10601_v14  ;;  %v10670_v14 = vld [vmem:[%s14362_s1 + $0x1ea8] ss:$16 sps:$4 sm:$0xff]  }
 0x3a0   :  { %7603 = vmatpush1.bf16.msra.mxu1 %v10604_v23  ;;  %7563 = vmatprep.subr.bf16.mxu0 %v10609_v27  ;;  %v10673_v27 = vld [vmem:[%s14362_s1 + $0x1c88] ss:$16 sps:$4 sm:$0xff]  }
 0x3a1   :  { %7604 = vmatprep.subr.bf16.mxu1 %v10612_v57  ;;  %v10676_v57 = vld [vmem:[%s14362_s1 + $0x1e88] ss:$16 sps:$4 sm:$0xff]  }
 0x3a3   :  { %7564 = vmatpush2.bf16.msra.mxu0 %v10607_v35  ;;  %v10681_v35 = vld [vmem:[%s14362_s1 + $0x1c6c] ss:$16 sps:$4 sm:$0xff]  }
 0x3a4   :  { %7605 = vmatpush2.bf16.msra.mxu1 %v10610_v28  ;;  %7565 = vmatprep.subr.bf16.mxu0 %v10615_v29  ;;  %v10684_v28 = vld [vmem:[%s14362_s1 + $0x1e6c] ss:$16 sps:$4 sm:$0xff]   ;;  %v10679_v29 = vld [vmem:[%s14362_s1 + $0x1c68] ss:$16 sps:$4 sm:$0xff]  }
 0x3a5   :  { %7606 = vmatprep.subr.bf16.mxu1 %v10618_v51  ;;  %v10682_v51 = vld [vmem:[%s14362_s1 + $0x1e68] ss:$16 sps:$4 sm:$0xff]  }
 0x3a7   :  { %7566 = vmatpush2.bf16.msra.mxu0 %v10613_v11  ;;  %v10687_v11 = vld [vmem:[%s14362_s1 + $0x1c4c] ss:$16 sps:$4 sm:$0xff]  }
 0x3a8   :  { %7607 = vmatpush2.bf16.msra.mxu1 %v10616_v22  ;;  %7567 = vmatprep.subr.bf16.mxu0 %v10621_v30  ;;  %v10690_v22 = vld [vmem:[%s14362_s1 + $0x1e4c] ss:$16 sps:$4 sm:$0xff]   ;;  %v10685_v30 = vld [vmem:[%s14362_s1 + $0x1c48] ss:$16 sps:$4 sm:$0xff]  }
 0x3a9   :  { %7608 = vmatprep.subr.bf16.mxu1 %v10624_v34  ;;  %v10688_v34 = vld [vmem:[%s14362_s1 + $0x1e48] ss:$16 sps:$4 sm:$0xff]  }
 0x3ab   :  { %7568 = vmatpush2.bf16.msra.mxu0 %v10619_v37  ;;  %v10693_v37 = vld [vmem:[%s14362_s1 + $0x1c2c] ss:$16 sps:$4 sm:$0xff]  }
 0x3ac   :  { %7609 = vmatpush2.bf16.msra.mxu1 %v10622_v32  ;;  %7569 = vmatprep.subr.bf16.mxu0 %v10627_v44  ;;  %v10696_v32 = vld [vmem:[%s14362_s1 + $0x1e2c] ss:$16 sps:$4 sm:$0xff]   ;;  %v10691_v44 = vld [vmem:[%s14362_s1 + $0x1c28] ss:$16 sps:$4 sm:$0xff]  }
 0x3ad   :  { %7610 = vmatprep.subr.bf16.mxu1 %v10630_v62  ;;  %v10694_v62 = vld [vmem:[%s14362_s1 + $0x1e28] ss:$16 sps:$4 sm:$0xff]  }
 0x3af   :  { %7570 = vmatpush2.bf16.msra.mxu0 %v10625_v47  ;;  %v10699_v47 = vld [vmem:[%s14362_s1 + $0x1c0c] ss:$16 sps:$4 sm:$0xff]  }
 0x3b0   :  { %7611 = vmatpush2.bf16.msra.mxu1 %v10628_v9  ;;  %7571 = vmatprep.subr.bf16.mxu0 %v10633_v12  ;;  %v10702_v9 = vld [vmem:[%s14362_s1 + $0x1e0c] ss:$16 sps:$4 sm:$0xff]   ;;  %v10697_v12 = vld [vmem:[%s14362_s1 + $0x1c08] ss:$16 sps:$4 sm:$0xff]  }
 0x3b1   :  { %7612 = vmatprep.subr.bf16.mxu1 %v10636_v39  ;;  %v10700_v39 = vld [vmem:[%s14362_s1 + $0x1e08] ss:$16 sps:$4 sm:$0xff]  }
 0x3b3   :  { %7572 = vmatpush2.bf16.msra.mxu0 %v10631_v52  ;;  %v10705_v52 = vld [vmem:[%s14362_s1 + $0x1dec] ss:$16 sps:$4 sm:$0xff]  }
 0x3b4   :  { %7613 = vmatpush2.bf16.msra.mxu1 %v10634_v56  ;;  %7573 = vmatprep.subr.bf16.mxu0 %v10639_v58  ;;  %v10708_v56 = vld [vmem:[%s14362_s1 + $0x1fec] ss:$16 sps:$4 sm:$0xff]   ;;  %v10703_v58 = vld [vmem:[%s14362_s1 + $0x1de8] ss:$16 sps:$4 sm:$0xff]  }
 0x3b5   :  { %7614 = vmatprep.subr.bf16.mxu1 %v10642_v20  ;;  %v10706_v20 = vld [vmem:[%s14362_s1 + $0x1fe8] ss:$16 sps:$4 sm:$0xff]  }
 0x3b7   :  { %7574 = vmatpush2.bf16.msra.mxu0 %v10637_v61  ;;  %v10711_v61 = vld [vmem:[%s14362_s1 + $0x1dcc] ss:$16 sps:$4 sm:$0xff]  }
 0x3b8   :  { %7615 = vmatpush2.bf16.msra.mxu1 %v10640_v4  ;;  %7575 = vmatprep.subr.bf16.mxu0 %v10645_v24  ;;  %v10714_v4 = vld [vmem:[%s14362_s1 + $0x1fcc] ss:$16 sps:$4 sm:$0xff]   ;;  %v10709_v24 = vld [vmem:[%s14362_s1 + $0x1dc8] ss:$16 sps:$4 sm:$0xff]  }
 0x3b9   :  { %7616 = vmatprep.subr.bf16.mxu1 %v10648_v60  ;;  %v10712_v60 = vld [vmem:[%s14362_s1 + $0x1fc8] ss:$16 sps:$4 sm:$0xff]  }
 0x3bb   :  { %7576 = vmatpush2.bf16.msra.mxu0 %v10643_v19  ;;  %v10717_v19 = vld [vmem:[%s14362_s1 + $0x1dac] ss:$16 sps:$4 sm:$0xff]  }
 0x3bc   :  { %7617 = vmatpush2.bf16.msra.mxu1 %v10646_v25  ;;  %7577 = vmatprep.subr.bf16.mxu0 %v10651_v48  ;;  %v10720_v25 = vld [vmem:[%s14362_s1 + $0x1fac] ss:$16 sps:$4 sm:$0xff]   ;;  %v10715_v48 = vld [vmem:[%s14362_s1 + $0x1da8] ss:$16 sps:$4 sm:$0xff]  }
 0x3bd   :  { %7618 = vmatprep.subr.bf16.mxu1 %v10654_v54  ;;  %v10718_v54 = vld [vmem:[%s14362_s1 + $0x1fa8] ss:$16 sps:$4 sm:$0xff]  }
 0x3bf   :  { %7578 = vmatpush2.bf16.msra.mxu0 %v10649_v5  ;;  %v10723_v5 = vld [vmem:[%s14362_s1 + $0x1d8c] ss:$16 sps:$4 sm:$0xff]  }
 0x3c0   :  { %7619 = vmatpush2.bf16.msra.mxu1 %v10652_v55  ;;  %7629 = vmatprep.subr.bf16.mxu0 %v10657_v21  ;;  %v10726_v55 = vld [vmem:[%s14362_s1 + $0x1f8c] ss:$16 sps:$4 sm:$0xff]   ;;  %v10721_v21 = vld [vmem:[%s14362_s1 + $0x1d88] ss:$16 sps:$4 sm:$0xff]  }
 0x3c1   :  { %7670 = vmatprep.subr.bf16.mxu1 %v10660_v33  ;;  %v10724_v33 = vld [vmem:[%s14362_s1 + $0x1f88] ss:$16 sps:$4 sm:$0xff]  }
 0x3c2   :  { %v7335_v26 = vpop.f32.mrf.mxu0  ;;  %7580 = vmatmul.mubr.bf16.vlgmr.msra.gmra.mxu0 %v12402_v31  ;;  %v10669_v31 = vld [vmem:[%s14362_s1 + $0x1cac] ss:$16 sps:$4 sm:$0xff]  }
 0x3c3   :  { %v7376_v6 = vpop.f32.mrf.mxu1  ;;  %7621 = vmatmul.mubr.bf16.vlgmr.msra.gmra.mxu1 %v12427_v50  ;;  %v7336_v46 = vadd.f32 %v7335_v26, %v13876_v40  ;;  %7630 = vmatpush1.bf16.msra.mxu0 %v10655_v1  ;;  %v10672_v50 = vld [vmem:[%s14362_s1 + $0x1eac] ss:$16 sps:$4 sm:$0xff]  }
 0x3c4   :  { %7671 = vmatpush1.bf16.msra.mxu1 %v10658_v2  ;;  %v7337_v59 = vpop.f32.mrf.mxu0  ;;  %7631 = vmatprep.subr.bf16.mxu0 %v10663_v13  ;;  %v10729_v1 = vld [vmem:[%s14362_s1 + $0x1d6c] ss:$16 sps:$4 sm:$0xff]   ;;  %v10727_v13 = vld [vmem:[%s14362_s1 + $0x1d68] ss:$16 sps:$4 sm:$0xff]  }
 0x3c5   :  { %v7378_v49 = vpop.f32.mrf.mxu1  ;;  %7672 = vmatprep.subr.bf16.mxu1 %v10666_v18  ;;  %v14078_v40 = vadd.f32 %v7376_v6, %v7336_v46  ;;  %v7338_v17 = vadd.f32 %v7337_v59, %v13881_v0  ;;  %7661 = vmatprep.mubr.bf16.mxu0 %v12423_v36  ;;  %v10675_v36 = vld [vmem:[%s14362_s1 + $0x1c8c] ss:$16 sps:$4 sm:$0xff]   ;;  %v10730_v18 = vld [vmem:[%s14362_s1 + $0x1f68] ss:$16 sps:$4 sm:$0xff]  }
 0x3c6   :  { %7702 = vmatprep.mubr.bf16.mxu1 %v12443_v63  ;;  %v7339_v38 = vpop.f32.mrf.mxu0  ;;  %v10678_v63 = vld [vmem:[%s14362_s1 + $0x1e8c] ss:$16 sps:$4 sm:$0xff]   ;;  %v10733_v46 = vld [vmem:[%s14362_s1 + $0x1d48] ss:$16 sps:$4 sm:$0xff]  }
 0x3c7   :  { %v7380_v41 = vpop.f32.mrf.mxu1  ;;  %v14083_v42 = vadd.f32 %v7378_v49, %v7338_v17  ;;  %7632 = vmatpush1.bf16.msra.mxu0 %v10661_v7  ;;  %v10732_v2 = vld [vmem:[%s14362_s1 + $0x1f6c] ss:$16 sps:$4 sm:$0xff]   ;;  %v10736_v7 = vld [vmem:[%s14362_s1 + $0x1f48] ss:$16 sps:$4 sm:$0xff]  }
 0x3c8   :  { %7673 = vmatpush1.bf16.msra.mxu1 %v10664_v53  ;;  %v7340_v23 = vpop.f32.mrf.mxu0  ;;  %7633 = vmatprep.subr.bf16.mxu0 %v10669_v31  ;;  %v10735_v26 = vld [vmem:[%s14362_s1 + $0x1d4c] ss:$16 sps:$4 sm:$0xff]   ;;  %v10739_v49 = vld [vmem:[%s14362_s1 + $0x1d28] ss:$16 sps:$4 sm:$0xff]  }
 0x3c9   :  { %v7381_v0 = vpop.f32.mrf.mxu1  ;;  %7674 = vmatprep.subr.bf16.mxu1 %v10672_v50  ;;  %v10738_v6 = vld [vmem:[%s14362_s1 + $0x1f4c] ss:$16 sps:$4 sm:$0xff]   ;;  %v10742_v31 = vld [vmem:[%s14362_s1 + $0x1f28] ss:$16 sps:$4 sm:$0xff]   ;;  %v10753_v23 = vld [vmem:[%s14363_s2 + $0x70] sm:$0xff]  }
 0x3ca   :  { %v10741_v53 = vld [vmem:[%s14362_s1 + $0x1d2c] ss:$16 sps:$4 sm:$0xff]   ;;  %v10745_v38 = vld [vmem:[%s14362_s1 + $0x1d08] ss:$16 sps:$4 sm:$0xff]   ;;  %v7739_v0 = vpack.c.bf16 %v13287_v10, %v13287_v10 }
 0x3cb   :  { %7634 = vmatpush1.bf16.msra.mxu0 %v10667_v3  ;;  %v10744_v59 = vld [vmem:[%s14362_s1 + $0x1f2c] ss:$16 sps:$4 sm:$0xff]   ;;  %v10748_v41 = vld [vmem:[%s14362_s1 + $0x1f08] ss:$16 sps:$4 sm:$0xff]  }
 0x3cc   :  { %7675 = vmatpush1.bf16.msra.mxu1 %v10670_v14  ;;  %7635 = vmatprep.subr.bf16.mxu0 %v10675_v36  ;;  %v10747_v50 = vld [vmem:[%s14362_s1 + $0x1d0c] ss:$16 sps:$4 sm:$0xff]  }
 0x3cd   :  { %7676 = vmatprep.subr.bf16.mxu1 %v10678_v63  ;;  %v10750_v17 = vld [vmem:[%s14362_s1 + $0x1f0c] ss:$16 sps:$4 sm:$0xff]  }
 0x3ce   :  { %v10751_v3 = vld [vmem:[%s14363_s2 + $0x78] sm:$0xff]  }
 0x3cf   :  { %7636 = vmatpush1.bf16.msra.mxu0 %v10673_v27  ;;  %v10752_v14 = vld [vmem:[%s14363_s2 + $0x38] sm:$0xff]  }
 0x3d0   :  { %7677 = vmatpush1.bf16.msra.mxu1 %v10676_v57  ;;  %7637 = vmatprep.subr.bf16.mxu0 %v10681_v35  ;;  %v10754_v57 = vld [vmem:[%s14363_s2 + $0x30] sm:$0xff]  }
 0x3d1   :  { %7678 = vmatprep.subr.bf16.mxu1 %v10684_v28 }
 0x3d3   :  { %7638 = vmatpush1.bf16.msra.mxu0 %v10679_v29  ;;  %v10755_v29 = vld [vmem:[%s14363_s2 + $0x68] sm:$0xff]  }
 0x3d4   :  { %7679 = vmatpush1.bf16.msra.mxu1 %v10682_v51  ;;  %7639 = vmatprep.subr.bf16.mxu0 %v10687_v11 }
 0x3d5   :  { %7680 = vmatprep.subr.bf16.mxu1 %v10690_v22 }
 0x3d7   :  { %7640 = vmatpush1.bf16.msra.mxu0 %v10685_v30  ;;  %v10757_v30 = vld [vmem:[%s14363_s2 + $0x60] sm:$0xff]  }
 0x3d8   :  { %7681 = vmatpush1.bf16.msra.mxu1 %v10688_v34  ;;  %7641 = vmatprep.subr.bf16.mxu0 %v10693_v37 }
 0x3d9   :  { %7682 = vmatprep.subr.bf16.mxu1 %v10696_v32  ;;  %v10767_v32 = vld [vmem:[%s14363_s2 + $0xf8] sm:$0xff]  }
 0x3db   :  { %7642 = vmatpush1.bf16.msra.mxu0 %v10691_v44  ;;  %v10769_v44 = vld [vmem:[%s14363_s2 + $0xf0] sm:$0xff]  }
 0x3dc   :  { %7683 = vmatpush1.bf16.msra.mxu1 %v10694_v62  ;;  %7643 = vmatprep.subr.bf16.mxu0 %v10699_v47  ;;  %v10758_v62 = vld [vmem:[%s14363_s2 + $0x20] sm:$0xff]   ;;  %v10770_v47 = vld [vmem:[%s14363_s2 + $0xb0] sm:$0xff]  }
 0x3dd   :  { %7684 = vmatprep.subr.bf16.mxu1 %v10702_v9  ;;  %v10759_v9 = vld [vmem:[%s14363_s2 + $0x58] sm:$0xff]  }
 0x3df   :  { %7644 = vmatpush1.bf16.msra.mxu0 %v10697_v12  ;;  %v10771_v12 = vld [vmem:[%s14363_s2 + $0xe8] sm:$0xff]  }
 0x3e0   :  { %7685 = vmatpush1.bf16.msra.mxu1 %v10700_v39  ;;  %7645 = vmatprep.subr.bf16.mxu0 %v10705_v52  ;;  %v10760_v39 = vld [vmem:[%s14363_s2 + $0x18] sm:$0xff]   ;;  %v10772_v52 = vld [vmem:[%s14363_s2 + $0xa8] sm:$0xff]  }
 0x3e1   :  { %7686 = vmatprep.subr.bf16.mxu1 %v10708_v56  ;;  %v10761_v56 = vld [vmem:[%s14363_s2 + $0x50] sm:$0xff]  }
 0x3e3   :  { %7646 = vmatpush2.bf16.msra.mxu0 %v10703_v58  ;;  %v10773_v58 = vld [vmem:[%s14363_s2 + $0xe0] sm:$0xff]  }
 0x3e4   :  { %7687 = vmatpush2.bf16.msra.mxu1 %v10706_v20  ;;  %7647 = vmatprep.subr.bf16.mxu0 %v10711_v61  ;;  %v10762_v20 = vld [vmem:[%s14363_s2 + $0x10] sm:$0xff]   ;;  %v10774_v61 = vld [vmem:[%s14363_s2 + $0xa0] sm:$0xff]  }
 0x3e5   :  { %7688 = vmatprep.subr.bf16.mxu1 %v10714_v4  ;;  %v10763_v4 = vld [vmem:[%s14363_s2 + $0x48] sm:$0xff]  }
 0x3e7   :  { %7648 = vmatpush2.bf16.msra.mxu0 %v10709_v24  ;;  %v10775_v24 = vld [vmem:[%s14363_s2 + $0xd8] sm:$0xff]  }
 0x3e8   :  { %7689 = vmatpush2.bf16.msra.mxu1 %v10712_v60  ;;  %7649 = vmatprep.subr.bf16.mxu0 %v10717_v19  ;;  %v10764_v60 = vld [vmem:[%s14363_s2 + $0x8] sm:$0xff]   ;;  %v10776_v19 = vld [vmem:[%s14363_s2 + $0x98] sm:$0xff]  }
 0x3e9   :  { %7690 = vmatprep.subr.bf16.mxu1 %v10720_v25  ;;  %v10765_v25 = vld [vmem:[%s14363_s2 + $0x40] sm:$0xff]  }
 0x3eb   :  { %7650 = vmatpush2.bf16.msra.mxu0 %v10715_v48  ;;  %v10766_v48 = vld [vmem:[%s14363_s2] sm:$0xff]  }
 0x3ec   :  { %7691 = vmatpush2.bf16.msra.mxu1 %v10718_v54  ;;  %7651 = vmatprep.subr.bf16.mxu0 %v10723_v5  ;;  %v7738_v54 = vpack.c.bf16 %v13285_v15, %v13285_v15  ;;  %v10777_v5 = vld [vmem:[%s14363_s2 + $0xd0] sm:$0xff]  }
 0x3ed   :  { %7692 = vmatprep.subr.bf16.mxu1 %v10726_v55  ;;  %v10778_v55 = vld [vmem:[%s14363_s2 + $0x90] sm:$0xff]  }
 0x3ef   :  { %7652 = vmatpush2.bf16.msra.mxu0 %v10721_v21 }
 0x3f0   :  { %7693 = vmatpush2.bf16.msra.mxu1 %v10724_v33  ;;  %7653 = vmatprep.subr.bf16.mxu0 %v10729_v1 }
 0x3f1   :  { %7694 = vmatprep.subr.bf16.mxu1 %v10732_v2 }
 0x3f3   :  { %7654 = vmatpush2.bf16.msra.mxu0 %v10727_v13 }
 0x3f4   :  { %7695 = vmatpush2.bf16.msra.mxu1 %v10730_v18  ;;  %7655 = vmatprep.subr.bf16.mxu0 %v10735_v26  ;;  %v10779_v18 = vld [vmem:[%s14363_s2 + $0xc8] sm:$0xff]  }
 0x3f5   :  { %7696 = vmatprep.subr.bf16.mxu1 %v10738_v6 }
 0x3f7   :  { %7656 = vmatpush2.bf16.msra.mxu0 %v10733_v46  ;;  %v10780_v46 = vld [vmem:[%s14363_s2 + $0x88] sm:$0xff]  }
 0x3f8   :  { %7697 = vmatpush2.bf16.msra.mxu1 %v10736_v7  ;;  %7657 = vmatprep.subr.bf16.mxu0 %v10741_v53 }
 0x3f9   :  { %7698 = vmatprep.subr.bf16.mxu1 %v10744_v59 }
 0x3fb   :  { %7658 = vmatpush2.bf16.msra.mxu0 %v10739_v49 }
 0x3fc   :  { %7699 = vmatpush2.bf16.msra.mxu1 %v10742_v31  ;;  %7659 = vmatprep.subr.bf16.mxu0 %v10747_v50  ;;  %v10781_v50 = vld [vmem:[%s14363_s2 + $0xc0] sm:$0xff]  }
 0x3fd   :  { %7700 = vmatprep.subr.bf16.mxu1 %v10750_v17  ;;  %v10782_v17 = vld [vmem:[%s14363_s2 + $0x80] sm:$0xff]  }
 0x3ff   :  { %7660 = vmatpush2.bf16.msra.mxu0 %v10745_v38 }
 0x400   :  { %7701 = vmatpush2.bf16.msra.mxu1 %v10748_v41  ;;  %9163 = vmatprep.subr.bf16.mxu0 %v10751_v3 }
 0x401   :  { %9185 = vmatprep.subr.bf16.mxu1 %v10767_v32 }
 0x402   :  { %v7417_v36 = vpop.f32.mrf.mxu0  ;;  %7662 = vmatmul.mubr.bf16.vlgmr.msra.gmra.mxu0 %v12619_v8 }
 0x403   :  { %v7458_v63 = vpop.f32.mrf.mxu1  ;;  %7703 = vmatmul.mubr.bf16.vlgmr.msra.gmra.mxu1 %v12641_v16  ;;  %v7418_v27 = vadd.f32 %v7417_v36, %v14078_v40  ;;  %9164 = vmatpush3.bf16.msra.mxu0 %v10752_v14  ;;  %v10756_v40 = vld [vmem:[%s14363_s2 + $0x28] sm:$0xff]  }
 0x404   :  { %8030 = vmatprep.mubr.bf16.mxu0 %v7739_v0  ;;  %v7419_v35 = vpop.f32.mrf.mxu0  ;;  %9165 = vmatprep.subr.bf16.mxu0 %v10753_v23 }
 0x405   :  { %v7460_v28 = vpop.f32.mrf.mxu1  ;;  %v7459_v51 = vadd.f32 %v7458_v63, %v7418_v27  ;;  %v7420_v8 = vadd.f32 %v7419_v35, %v14083_v42  ;;  %v10768_v42 = vld [vmem:[%s14363_s2 + $0xb8] sm:$0xff]   ;;  %s10829_s2 = smov [#allocation2]  }
 0x406   :  { %v7421_v11 = vpop.f32.mrf.mxu0  ;;  %9186 = vmatpush3.bf16.msra.mxu1 %v10768_v42  ;;  %s8085_s27 = sshll.u32 %s10829_s2, 4  ;;  %s8086_s27 = int_to_ptr.vmem [resolvable:$true] %s8085_s27 }
 0x407   :  { %v7462_v16 = vpop.f32.mrf.mxu1  ;;  %v7461_v22 = vadd.f32 %v7460_v28, %v7420_v8  ;;  %9166 = vmatpush3.bf16.msra.mxu0 %v10754_v57  ;;  %9187 = vmatprep.subr.bf16.mxu1 %v10769_v44  ;;  %v10828_v28 = vmov 1983009808   ;;  %s10783_s28 = scalar_lea.vmem %s8086_s27, 128  ;;  %p10788_p1 = scmp.lt.s32.totalorder %s8086_s27, %s8086_s27 }
 0x408   :  { %v7422_v34 = vpop.f32.mrf.mxu0  ;;  %9167 = vmatprep.subr.bf16.mxu0 %v10755_v29  ;;  %v7722_v29 = vunpack.c.l.s4 %v10828_v28  ;;  %p10784_p0 = scmp.ne.s32.totalorder %s8086_s27, %s10783_s28  ;;  %p10789_p2 = scmp.lt.s32.totalorder %s10783_s28, %s10783_s28 }
 0x409   :  { %v7463_v37 = vpop.f32.mrf.mxu1 }
 0x40a   :  { %9188 = vmatpush3.bf16.msra.mxu1 %v10770_v47  ;;  %v7723_v37 = vunpack.c.0.s8 %v7722_v29  ;;  %p10790_p3 = por %p10789_p2, %p10788_p1 }
 0x40b   :  { %9168 = vmatpush3.bf16.msra.mxu0 %v10756_v40  ;;  %9189 = vmatprep.subr.bf16.mxu1 %v10771_v12 }
 0x40c   :  { %9169 = vmatprep.subr.bf16.mxu0 %v10757_v30  ;;  %p10791_p4 = pnand %p10790_p3, %p10784_p0 }
 0x40e   :  { %9190 = vmatpush3.bf16.msra.mxu1 %v10772_v52 }
 0x40f   :  { %9170 = vmatpush3.bf16.msra.mxu0 %v10758_v62  ;;  %9191 = vmatprep.subr.bf16.mxu1 %v10773_v58 }
 0x410   :  { %9171 = vmatprep.subr.bf16.mxu0 %v10759_v9 }
 0x412   :  { %9192 = vmatpush3.bf16.msra.mxu1 %v10774_v61 }
 0x413   :  { %9172 = vmatpush3.bf16.msra.mxu0 %v10760_v39  ;;  %9193 = vmatprep.subr.bf16.mxu1 %v10775_v24  ;;  %v7726_v39 = vsub.s32 %v7723_v37, %v10973_v43 }
 0x414   :  { %9173 = vmatprep.subr.bf16.mxu0 %v10761_v56 }
 0x416   :  { %9194 = vmatpush3.bf16.msra.mxu1 %v10776_v19 }
 0x417   :  { %9174 = vmatpush3.bf16.msra.mxu0 %v10762_v20  ;;  %9195 = vmatprep.subr.bf16.mxu1 %v10777_v5  ;;  %v7727_v20 = vrot.slane %v7719_v45, %v7726_v39 }
 0x418   :  { %9175 = vmatprep.subr.bf16.mxu0 %v10763_v4 }
 0x41a   :  { %9196 = vmatpush3.bf16.msra.mxu1 %v10778_v55 }
 0x41b   :  { %9176 = vmatpush3.bf16.msra.mxu0 %v10764_v60  ;;  %9197 = vmatprep.subr.bf16.mxu1 %v10779_v18 }
 0x41c   :  { %9177 = vmatprep.subr.bf16.mxu0 %v10765_v25 }
 0x41e   :  { %9198 = vmatpush3.bf16.msra.mxu1 %v10780_v46 }
 0x41f   :  { %9178 = vmatpush3.bf16.msra.mxu0 %v10766_v48  ;;  %9199 = vmatprep.subr.bf16.mxu1 %v10781_v50 }
 0x422   :  { %8031 = vmatmul.mubr.bf16.vlgmr.msra.gmra.mxu0 %v7738_v54  ;;  %9200 = vmatpush3.bf16.msra.mxu1 %v10782_v17 }
 0x442   :  { %v7499_v21 = vpop.f32.mrf.mxu0 }
 0x443   :  { %v7540_v33 = vpop.f32.mrf.mxu1  ;;  %v7500_v1 = vadd.f32 %v7499_v21, %v7459_v51 }
 0x444   :  { %v7501_v2 = vpop.f32.mrf.mxu0 }
 0x445   :  { %v7542_v13 = vpop.f32.mrf.mxu1  ;;  %v7541_v26 = vadd.f32 %v7540_v33, %v7500_v1  ;;  %v7502_v6 = vadd.f32 %v7501_v2, %v7461_v22 }
 0x446   :  { %v7503_v7 = vpop.f32.mrf.mxu0 }
 0x447   :  { %v7544_v53 = vpop.f32.mrf.mxu1  ;;  %v7543_v59 = vadd.f32 %v7542_v13, %v7502_v6 }
 0x448   :  { %v7504_v49 = vpop.f32.mrf.mxu0 }
 0x449   :  { %v7545_v31 = vpop.f32.mrf.mxu1 }
 0x482   :  { %v7581_v38 = vpop.f32.mrf.mxu0 }
 0x483   :  { %v7622_v41 = vpop.f32.mrf.mxu1  ;;  %v7582_v3 = vadd.f32 %v7581_v38, %v7541_v26 }
 0x484   :  { %v7583_v14 = vpop.f32.mrf.mxu0 }
 0x485   :  { %v7624_v23 = vpop.f32.mrf.mxu1  ;;  %v7623_v0 = vadd.f32 %v7622_v41, %v7582_v3  ;;  %v7584_v35 = vadd.f32 %v7583_v14, %v7543_v59 }
 0x486   :  { %v7585_v36 = vpop.f32.mrf.mxu0 }
 0x487   :  { %v7626_v63 = vpop.f32.mrf.mxu1  ;;  %v7625_v11 = vadd.f32 %v7624_v23, %v7584_v35 }
 0x488   :  { %v7586_v27 = vpop.f32.mrf.mxu0 }
 0x489   :  { %v7627_v57 = vpop.f32.mrf.mxu1 }
 0x4c2   :  { %v7663_v51 = vpop.f32.mrf.mxu0 }
 0x4c3   :  { %v7704_v8 = vpop.f32.mrf.mxu1  ;;  %v7664_v16 = vadd.f32 %v7663_v51, %v7623_v0 }
 0x4c4   :  { %v7665_v22 = vpop.f32.mrf.mxu0 }
 0x4c5   :  { %v7706_v40 = vpop.f32.mrf.mxu1  ;;  %v7705_v30 = vadd.f32 %v7704_v8, %v7664_v16  ;;  %v7666_v34 = vadd.f32 %v7665_v22, %v7625_v11 }
 0x4c6   :  { %v7667_v32 = vpop.f32.mrf.mxu0 }
 0x4c7   :  { %v7708_v42 = vpop.f32.mrf.mxu1  ;;  %v7707_v44 = vadd.f32 %v7706_v40, %v7666_v34  ;;  %v7713_v62 = vmax.f32 %v7705_v30, 0.0 }
 0x4c8   :  { %v7668_v47 = vpop.f32.mrf.mxu0 }
 0x4c9   :  { %v7709_v9 = vpop.f32.mrf.mxu1  ;;  %v7714_v12 = vmax.f32 %v7707_v44, 0.0  ;;  %v7740_v58 = vpack.c.bf16 %v7713_v62, %v7713_v62 }
 0x4cb   :  { %v7720_v52 = vcombine.low %v7713_v62, %v7714_v12  ;;  %v7741_v56 = vpack.c.bf16 %v7714_v12, %v7714_v12 }
 0x4cd   :  { %8070 = vmatprep.mubr.bf16.mxu1 %v7741_v56  ;;  %v7734_v61 = vrot.slane %v7720_v52, %v7726_v39 }
 0x4ce   :  { %8071 = vmatmul.mubr.bf16.vlgmr.msra.gmra.mxu1 %v7740_v58 }
 0x4cf   :  { %v7735_v4 = vcombine.low %v7727_v20, %v7734_v61 }
 0x4d1   :  { %7737 = vst [vmem:[#allocation2] sm:$0xff] %v7735_v4 }
 0x4e2   :  { %v9179_v24 = vpop.f32.mrf.mxu0 }
 0x4e4   :  { %v9180_v60 = vpop.f32.mrf.mxu0 }
 0x4e5   :  { %v9181_v19 = vadd.f32 %v9180_v60, %v9179_v24 }
 0x4e6   :  { %v9182_v25 = vpop.f32.mrf.mxu0 }
 0x4e8   :  { %v9183_v48 = vpop.f32.mrf.mxu0 }
 0x4e9   :  { %10794 = shalt.err (!%p10791_p4)
}
 0x4ea   :  { %8088 = dma.vmem_to_hbm [thread:$0]  %s8086_s27, 128, %s14364_s3, [#allocation3]  }
 0x4eb   :  { %s10830_s5 = smov [#allocation4]  }
 0x4ec   :  { %s8095_s6 = sshll.u32 %s10830_s5, 4  ;;  %s8096_s6 = int_to_ptr.vmem [resolvable:$true] %s8095_s6 }
 0x4ed   :  { %s10803_s7 = scalar_lea.vmem %s8096_s6, 32  ;;  %p10808_p6 = scmp.lt.s32.totalorder %s8096_s6, %s8096_s6 }
 0x4ee   :  { %p10804_p5 = scmp.ne.s32.totalorder %s8096_s6, %s10803_s7  ;;  %p10809_p7 = scmp.lt.s32.totalorder %s10803_s7, %s10803_s7 }
 0x4f0   :  { %p10810_p8 = por %p10809_p7, %p10808_p6 }
 0x4f2   :  { %p10811_p9 = pnand %p10810_p8, %p10804_p5 }
 0x58e   :  { %v9201_v43 = vpop.f32.mrf.mxu1 }
 0x590   :  { %v9202_v15 = vpop.f32.mrf.mxu1 }
 0x591   :  { %v9203_v10 = vadd.f32 %v9202_v15, %v9201_v43 }
 0x592   :  { %v9204_v45 = vpop.f32.mrf.mxu1 }
 0x593   :  { %v8073_v54 = vadd.f32 %v9203_v10, %v9181_v19 }
 0x594   :  { %v9205_v5 = vpop.f32.mrf.mxu1 }
 0x595   :  { %8078 = vst [vmem:[#allocation4] sm:$0x3] %v8073_v54 }
 0x596   :  { %10814 = shalt.err (!%p10811_p9)
}
 0x597   :  { %8098 = dma.vmem_to_hbm [thread:$0]  %s8096_s6, 32, %s14365_s4, [#allocation5]  }
 0x598   :  { %10823 = dma.done.wait [#allocation3], 128  }
 0x599   :  { %10824 = vsyncadd [#allocation3], 4294967168 }
 0x59a   :  { %10825 = dma.done.wait [#allocation5], 32  }
 0x59b   :  { %10826 = vsyncadd [#allocation5], 4294967264 }
 0x59c   :  { %8105 = vsyncpa [#allocation3], 1 }
 0x59d   :  { %8106 = vsyncpa [#allocation5], 1 }

</bundles_post_ra>
